<compile_context>
chip_gen: v6e
topology: v6e:2x2x1
jax: 0.10.0
libtpu: 0.0.40
codegen_flags: <defaults>
</compile_context>

<pallas_src>
import jax
import jax.numpy as jnp
import numpy as np
from jax import lax
from jax.experimental import pallas as pl
from jax.experimental.pallas import tpu as pltpu

# ---- model dims (fixed by the module) ----
CIN = 256
C1, C2, C3 = 70, 60, 126
COUT = C1 + C2 + C3          # 256
K = 5                        # unified tap grid (5x5, pad=2)
PAD = 2
EPS = 1e-5
NTAPS = K * K                # 25

# ---- small test dims ----
B, H, W = 2, 8, 8
HP, WP = H + 2 * PAD, W + 2 * PAD
R = B * H * W                # 128 output rows


def inception_kernel(xp_ref, w_ref, gamma_ref, beta_ref, alpha_ref, o_ref, col_ref):
    xp = xp_ref[...]                                   # (B, HP, WP, CIN) bf16, zero-padded

    # --- im2col: each shifted window is materialized exactly once into a
    #     lane-aligned slot (offsets are multiples of 256 lanes). ---
    for di in range(K):
        for dj in range(K):
            t = di * K + dj
            win = xp[:, di:di + H, dj:dj + W, :].reshape(R, CIN)     # bf16
            col_ref[:, t * CIN:(t + 1) * CIN] = win

    # --- single full-lane bf16 matmul, f32 accumulation inside the MXU ---
    acc = jnp.dot(col_ref[...], w_ref[...],
                  preferred_element_type=jnp.float32)  # (R, COUT) f32

    # --- BatchNorm2d (training-mode batch stats over N*H*W per channel),
    #     folded into a single per-channel scale/shift ---
    mean = jnp.mean(acc, axis=0, keepdims=True)                     # (1, COUT)
    var = jnp.mean((acc - mean) ** 2, axis=0, keepdims=True)        # biased variance
    scale = gamma_ref[...] * lax.rsqrt(var + EPS)                   # (1, COUT)
    shift = beta_ref[...] - mean * scale                            # (1, COUT)
    y = acc * scale + shift

    # --- PReLU (single shared parameter, scalar from SMEM) ---
    a = alpha_ref[0]
    y = jnp.where(y >= 0, y, a * y)

    o_ref[...] = y.reshape(B, H, W, COUT)


def merge_weights(w1, w2, w3):
    """Pack the three branch weights into a tap-major (NTAPS*CIN, COUT) operand."""
    wm = jnp.zeros((K, K, CIN, COUT), jnp.float32)
    wm = wm.at[2, 2, :, 0:C1].set(w1)                # 1x1 -> center tap, cols 0:70
    wm = wm.at[1:4, 1:4, :, C1:C1 + C2].set(w2)      # 3x3 -> inner 9 taps, cols 70:130
    wm = wm.at[:, :, :, C1 + C2:].set(w3)            # 5x5 -> all 25 taps, cols 130:256
    return wm.reshape(NTAPS * CIN, COUT)


def mod_inception_forward(x_nchw, params):
    """x_nchw: (B, 256, H, W) float32 -> (B, 256, H, W) float32."""
    w1, b1, w2, b2, w3, b3, gamma, beta, alpha = params
    del b1, b2, b3  # per-channel conv biases cancel under training-mode BatchNorm

    wflat = merge_weights(w1, w2, w3).astype(jnp.bfloat16)
    x_nhwc = jnp.transpose(x_nchw, (0, 2, 3, 1)).astype(jnp.bfloat16)
    xp = jnp.pad(x_nhwc, ((0, 0), (PAD, PAD), (PAD, PAD), (0, 0)))

    def full(shape):
        return pl.BlockSpec(shape, lambda i, s=shape: (0,) * len(s))

    out_nhwc = pl.pallas_call(
        inception_kernel,
        out_shape=jax.ShapeDtypeStruct((B, H, W, COUT), jnp.float32),
        grid=(1,),
        in_specs=[
            full((B, HP, WP, CIN)),                          # padded input (bf16)
            full((NTAPS * CIN, COUT)),                       # merged weights (bf16)
            full((1, COUT)),                                 # BN gamma
            full((1, COUT)),                                 # BN beta
            pl.BlockSpec(memory_space=pltpu.MemorySpace.SMEM),  # PReLU alpha scalar
        ],
        out_specs=full((B, H, W, COUT)),
        scratch_shapes=[pltpu.VMEM((R, NTAPS * CIN), jnp.bfloat16)],  # im2col buffer
        compiler_params=pltpu.CompilerParams(
            dimension_semantics=("arbitrary",)),
    )(xp, wflat, gamma, beta, alpha)

    return jnp.transpose(out_nhwc, (0, 3, 1, 2))


# ---------------- pure-JAX reference (mirrors PyTorch semantics, full f32) ----
def _conv_ref(x_nchw, w_hwio, bias, pad):
    y = lax.conv_general_dilated(
        x_nchw, w_hwio, window_strides=(1, 1),
        padding=[(pad, pad), (pad, pad)],
        dimension_numbers=('NCHW', 'HWIO', 'NCHW'),
        precision=lax.Precision.HIGHEST)
    return y + bias.reshape(1, -1, 1, 1)


def ref_forward(x_nchw, params):
    w1, b1, w2, b2, w3, b3, gamma, beta, alpha = params
    y1 = _conv_ref(x_nchw, w1.reshape(1, 1, CIN, C1), b1, 0)
    y2 = _conv_ref(x_nchw, w2, b2, 1)
    y3 = _conv_ref(x_nchw, w3, b3, 2)
    y = jnp.concatenate([y1, y2, y3], axis=1)
    mean = jnp.mean(y, axis=(0, 2, 3), keepdims=True)
    var = jnp.mean((y - mean) ** 2, axis=(0, 2, 3), keepdims=True)
    y = (y - mean) * lax.rsqrt(var + EPS)
    y = y * gamma.reshape(1, -1, 1, 1) + beta.reshape(1, -1, 1, 1)
    a = alpha.reshape(())
    return jnp.where(y >= 0, y, a * y)


def make_params(key):
    ks = jax.random.split(key, 6)
    w1 = jax.random.normal(ks[0], (CIN, C1), jnp.float32) / np.sqrt(CIN)
    b1 = jax.random.normal(ks[1], (1, C1), jnp.float32) * 0.1
    w2 = jax.random.normal(ks[2], (3, 3, CIN, C2), jnp.float32) / np.sqrt(9 * CIN)
    b2 = jax.random.normal(ks[3], (1, C2), jnp.float32) * 0.1
    w3 = jax.random.normal(ks[4], (5, 5, CIN, C3), jnp.float32) / np.sqrt(25 * CIN)
    b3 = jax.random.normal(ks[5], (1, C3), jnp.float32) * 0.1
    gamma = jnp.ones((1, COUT), jnp.float32)       # BatchNorm2d default weight
    beta = jnp.zeros((1, COUT), jnp.float32)       # BatchNorm2d default bias
    alpha = jnp.full((1,), 0.25, jnp.float32)      # nn.PReLU() default
    return (w1, b1, w2, b2, w3, b3, gamma, beta, alpha)


if __name__ == "__main__":
    key = jax.random.PRNGKey(0)
    pkey, xkey = jax.random.split(key)
    params = make_params(pkey)
    x = jax.random.normal(xkey, (B, CIN, H, W), jnp.float32)

    out = jax.jit(mod_inception_forward)(x, params)
    out = jax.block_until_ready(out)

    ref = jax.block_until_ready(ref_forward(x, params))
    # bf16 MXU inputs with f32 accumulation vs. f32-HIGHEST reference:
    # observed error is O(few e-3); 2e-2 tolerance gives comfortable margin.
    np.testing.assert_allclose(np.asarray(out), np.asarray(ref),
                               atol=2e-2, rtol=2e-2)

    assert out.shape == (B, COUT, H, W)
    print("KERNEL_OK")
</pallas_src>

<mosaic_0001>
module attributes {stable_mosaic.version = 11 : i64} {
  func.func @inception_kernel(%arg0: i32, %arg1: memref<2x12x12x256xbf16, #tpu.memory_space<vmem>>, %arg2: memref<6400x256xbf16, #tpu.memory_space<vmem>>, %arg3: memref<1x256xf32, #tpu.memory_space<vmem>>, %arg4: memref<1x256xf32, #tpu.memory_space<vmem>>, %arg5: memref<1xf32, #tpu.memory_space<smem>>, %arg6: memref<2x8x8x256xf32, #tpu.memory_space<vmem>>, %arg7: memref<128x6400xbf16, #tpu.memory_space<vmem>>) attributes {dimension_semantics = [#tpu.dimension_semantics<arbitrary>], iteration_bounds = array<i64: 1>, scalar_prefetch = 0 : i64, scratch_operands = 1 : i64, tpu.core_type = #tpu.core_type<tc>, window_params = [{pipeline_mode = #tpu.pipeline_mode<synchronous>, transform_indices = @transform_0, window_bounds = array<i64: 2, 12, 12, 256>}, {pipeline_mode = #tpu.pipeline_mode<synchronous>, transform_indices = @transform_1, window_bounds = array<i64: 6400, 256>}, {pipeline_mode = #tpu.pipeline_mode<synchronous>, transform_indices = @transform_2, window_bounds = array<i64: 1, 256>}, {pipeline_mode = #tpu.pipeline_mode<synchronous>, transform_indices = @transform_3, window_bounds = array<i64: 1, 256>}, {transform_indices = @transform_4, window_bounds = array<i64: 1>}, {pipeline_mode = #tpu.pipeline_mode<synchronous>, transform_indices = @transform_5, window_bounds = array<i64: 2, 8, 8, 256>}]} {
    %c0 = arith.constant 0 : index
    %c0_0 = arith.constant 0 : index
    %c0_1 = arith.constant 0 : index
    %c0_2 = arith.constant 0 : index
    %0 = vector.load %arg1[%c0, %c0_0, %c0_1, %c0_2] : memref<2x12x12x256xbf16, #tpu.memory_space<vmem>>, vector<2x12x12x256xbf16>
    %1 = vector.extract_strided_slice %0 {offsets = [0, 0, 0, 0], sizes = [2, 8, 8, 256], strides = [1, 1, 1, 1]} : vector<2x12x12x256xbf16> to vector<2x8x8x256xbf16>
    %2 = vector.shape_cast %1 : vector<2x8x8x256xbf16> to vector<128x256xbf16>
    %c0_3 = arith.constant 0 : index
    %c0_4 = arith.constant 0 : index
    %3 = vector.load %arg7[%c0_3, %c0_4] : memref<128x6400xbf16, #tpu.memory_space<vmem>>, vector<128x256xbf16>
    tpu.vector_store %arg7[%c0_3, %c0_4], %2 {strides = array<i32>} : memref<128x6400xbf16, #tpu.memory_space<vmem>>, vector<128x256xbf16>,
    %4 = vector.extract_strided_slice %0 {offsets = [0, 0, 1, 0], sizes = [2, 8, 8, 256], strides = [1, 1, 1, 1]} : vector<2x12x12x256xbf16> to vector<2x8x8x256xbf16>
    %5 = vector.shape_cast %4 : vector<2x8x8x256xbf16> to vector<128x256xbf16>
    %c0_5 = arith.constant 0 : index
    %c256 = arith.constant 256 : index
    %6 = vector.load %arg7[%c0_5, %c256] : memref<128x6400xbf16, #tpu.memory_space<vmem>>, vector<128x256xbf16>
    tpu.vector_store %arg7[%c0_5, %c256], %5 {strides = array<i32>} : memref<128x6400xbf16, #tpu.memory_space<vmem>>, vector<128x256xbf16>,
    %7 = vector.extract_strided_slice %0 {offsets = [0, 0, 2, 0], sizes = [2, 8, 8, 256], strides = [1, 1, 1, 1]} : vector<2x12x12x256xbf16> to vector<2x8x8x256xbf16>
    %8 = vector.shape_cast %7 : vector<2x8x8x256xbf16> to vector<128x256xbf16>
    %c0_6 = arith.constant 0 : index
    %c512 = arith.constant 512 : index
    %9 = vector.load %arg7[%c0_6, %c512] : memref<128x6400xbf16, #tpu.memory_space<vmem>>, vector<128x256xbf16>
    tpu.vector_store %arg7[%c0_6, %c512], %8 {strides = array<i32>} : memref<128x6400xbf16, #tpu.memory_space<vmem>>, vector<128x256xbf16>,
    %10 = vector.extract_strided_slice %0 {offsets = [0, 0, 3, 0], sizes = [2, 8, 8, 256], strides = [1, 1, 1, 1]} : vector<2x12x12x256xbf16> to vector<2x8x8x256xbf16>
    %11 = vector.shape_cast %10 : vector<2x8x8x256xbf16> to vector<128x256xbf16>
    %c0_7 = arith.constant 0 : index
    %c768 = arith.constant 768 : index
    %12 = vector.load %arg7[%c0_7, %c768] : memref<128x6400xbf16, #tpu.memory_space<vmem>>, vector<128x256xbf16>
    tpu.vector_store %arg7[%c0_7, %c768], %11 {strides = array<i32>} : memref<128x6400xbf16, #tpu.memory_space<vmem>>, vector<128x256xbf16>,
    %13 = vector.extract_strided_slice %0 {offsets = [0, 0, 4, 0], sizes = [2, 8, 8, 256], strides = [1, 1, 1, 1]} : vector<2x12x12x256xbf16> to vector<2x8x8x256xbf16>
    %14 = vector.shape_cast %13 : vector<2x8x8x256xbf16> to vector<128x256xbf16>
    %c0_8 = arith.constant 0 : index
    %c1024 = arith.constant 1024 : index
    %15 = vector.load %arg7[%c0_8, %c1024] : memref<128x6400xbf16, #tpu.memory_space<vmem>>, vector<128x256xbf16>
    tpu.vector_store %arg7[%c0_8, %c1024], %14 {strides = array<i32>} : memref<128x6400xbf16, #tpu.memory_space<vmem>>, vector<128x256xbf16>,
    %16 = vector.extract_strided_slice %0 {offsets = [0, 1, 0, 0], sizes = [2, 8, 8, 256], strides = [1, 1, 1, 1]} : vector<2x12x12x256xbf16> to vector<2x8x8x256xbf16>
    %17 = vector.shape_cast %16 : vector<2x8x8x256xbf16> to vector<128x256xbf16>
    %c0_9 = arith.constant 0 : index
    %c1280 = arith.constant 1280 : index
    %18 = vector.load %arg7[%c0_9, %c1280] : memref<128x6400xbf16, #tpu.memory_space<vmem>>, vector<128x256xbf16>
    tpu.vector_store %arg7[%c0_9, %c1280], %17 {strides = array<i32>} : memref<128x6400xbf16, #tpu.memory_space<vmem>>, vector<128x256xbf16>,
    %19 = vector.extract_strided_slice %0 {offsets = [0, 1, 1, 0], sizes = [2, 8, 8, 256], strides = [1, 1, 1, 1]} : vector<2x12x12x256xbf16> to vector<2x8x8x256xbf16>
    %20 = vector.shape_cast %19 : vector<2x8x8x256xbf16> to vector<128x256xbf16>
    %c0_10 = arith.constant 0 : index
    %c1536 = arith.constant 1536 : index
    %21 = vector.load %arg7[%c0_10, %c1536] : memref<128x6400xbf16, #tpu.memory_space<vmem>>, vector<128x256xbf16>
    tpu.vector_store %arg7[%c0_10, %c1536], %20 {strides = array<i32>} : memref<128x6400xbf16, #tpu.memory_space<vmem>>, vector<128x256xbf16>,
    %22 = vector.extract_strided_slice %0 {offsets = [0, 1, 2, 0], sizes = [2, 8, 8, 256], strides = [1, 1, 1, 1]} : vector<2x12x12x256xbf16> to vector<2x8x8x256xbf16>
    %23 = vector.shape_cast %22 : vector<2x8x8x256xbf16> to vector<128x256xbf16>
    %c0_11 = arith.constant 0 : index
    %c1792 = arith.constant 1792 : index
    %24 = vector.load %arg7[%c0_11, %c1792] : memref<128x6400xbf16, #tpu.memory_space<vmem>>, vector<128x256xbf16>
    tpu.vector_store %arg7[%c0_11, %c1792], %23 {strides = array<i32>} : memref<128x6400xbf16, #tpu.memory_space<vmem>>, vector<128x256xbf16>,
    %25 = vector.extract_strided_slice %0 {offsets = [0, 1, 3, 0], sizes = [2, 8, 8, 256], strides = [1, 1, 1, 1]} : vector<2x12x12x256xbf16> to vector<2x8x8x256xbf16>
    %26 = vector.shape_cast %25 : vector<2x8x8x256xbf16> to vector<128x256xbf16>
    %c0_12 = arith.constant 0 : index
    %c2048 = arith.constant 2048 : index
    %27 = vector.load %arg7[%c0_12, %c2048] : memref<128x6400xbf16, #tpu.memory_space<vmem>>, vector<128x256xbf16>
    tpu.vector_store %arg7[%c0_12, %c2048], %26 {strides = array<i32>} : memref<128x6400xbf16, #tpu.memory_space<vmem>>, vector<128x256xbf16>,
    %28 = vector.extract_strided_slice %0 {offsets = [0, 1, 4, 0], sizes = [2, 8, 8, 256], strides = [1, 1, 1, 1]} : vector<2x12x12x256xbf16> to vector<2x8x8x256xbf16>
    %29 = vector.shape_cast %28 : vector<2x8x8x256xbf16> to vector<128x256xbf16>
    %c0_13 = arith.constant 0 : index
    %c2304 = arith.constant 2304 : index
    %30 = vector.load %arg7[%c0_13, %c2304] : memref<128x6400xbf16, #tpu.memory_space<vmem>>, vector<128x256xbf16>
    tpu.vector_store %arg7[%c0_13, %c2304], %29 {strides = array<i32>} : memref<128x6400xbf16, #tpu.memory_space<vmem>>, vector<128x256xbf16>,
    %31 = vector.extract_strided_slice %0 {offsets = [0, 2, 0, 0], sizes = [2, 8, 8, 256], strides = [1, 1, 1, 1]} : vector<2x12x12x256xbf16> to vector<2x8x8x256xbf16>
    %32 = vector.shape_cast %31 : vector<2x8x8x256xbf16> to vector<128x256xbf16>
    %c0_14 = arith.constant 0 : index
    %c2560 = arith.constant 2560 : index
    %33 = vector.load %arg7[%c0_14, %c2560] : memref<128x6400xbf16, #tpu.memory_space<vmem>>, vector<128x256xbf16>
    tpu.vector_store %arg7[%c0_14, %c2560], %32 {strides = array<i32>} : memref<128x6400xbf16, #tpu.memory_space<vmem>>, vector<128x256xbf16>,
    %34 = vector.extract_strided_slice %0 {offsets = [0, 2, 1, 0], sizes = [2, 8, 8, 256], strides = [1, 1, 1, 1]} : vector<2x12x12x256xbf16> to vector<2x8x8x256xbf16>
    %35 = vector.shape_cast %34 : vector<2x8x8x256xbf16> to vector<128x256xbf16>
    %c0_15 = arith.constant 0 : index
    %c2816 = arith.constant 2816 : index
    %36 = vector.load %arg7[%c0_15, %c2816] : memref<128x6400xbf16, #tpu.memory_space<vmem>>, vector<128x256xbf16>
    tpu.vector_store %arg7[%c0_15, %c2816], %35 {strides = array<i32>} : memref<128x6400xbf16, #tpu.memory_space<vmem>>, vector<128x256xbf16>,
    %37 = vector.extract_strided_slice %0 {offsets = [0, 2, 2, 0], sizes = [2, 8, 8, 256], strides = [1, 1, 1, 1]} : vector<2x12x12x256xbf16> to vector<2x8x8x256xbf16>
    %38 = vector.shape_cast %37 : vector<2x8x8x256xbf16> to vector<128x256xbf16>
    %c0_16 = arith.constant 0 : index
    %c3072 = arith.constant 3072 : index
    %39 = vector.load %arg7[%c0_16, %c3072] : memref<128x6400xbf16, #tpu.memory_space<vmem>>, vector<128x256xbf16>
    tpu.vector_store %arg7[%c0_16, %c3072], %38 {strides = array<i32>} : memref<128x6400xbf16, #tpu.memory_space<vmem>>, vector<128x256xbf16>,
    %40 = vector.extract_strided_slice %0 {offsets = [0, 2, 3, 0], sizes = [2, 8, 8, 256], strides = [1, 1, 1, 1]} : vector<2x12x12x256xbf16> to vector<2x8x8x256xbf16>
    %41 = vector.shape_cast %40 : vector<2x8x8x256xbf16> to vector<128x256xbf16>
    %c0_17 = arith.constant 0 : index
    %c3328 = arith.constant 3328 : index
    %42 = vector.load %arg7[%c0_17, %c3328] : memref<128x6400xbf16, #tpu.memory_space<vmem>>, vector<128x256xbf16>
    tpu.vector_store %arg7[%c0_17, %c3328], %41 {strides = array<i32>} : memref<128x6400xbf16, #tpu.memory_space<vmem>>, vector<128x256xbf16>,
    %43 = vector.extract_strided_slice %0 {offsets = [0, 2, 4, 0], sizes = [2, 8, 8, 256], strides = [1, 1, 1, 1]} : vector<2x12x12x256xbf16> to vector<2x8x8x256xbf16>
    %44 = vector.shape_cast %43 : vector<2x8x8x256xbf16> to vector<128x256xbf16>
    %c0_18 = arith.constant 0 : index
    %c3584 = arith.constant 3584 : index
    %45 = vector.load %arg7[%c0_18, %c3584] : memref<128x6400xbf16, #tpu.memory_space<vmem>>, vector<128x256xbf16>
    tpu.vector_store %arg7[%c0_18, %c3584], %44 {strides = array<i32>} : memref<128x6400xbf16, #tpu.memory_space<vmem>>, vector<128x256xbf16>,
    %46 = vector.extract_strided_slice %0 {offsets = [0, 3, 0, 0], sizes = [2, 8, 8, 256], strides = [1, 1, 1, 1]} : vector<2x12x12x256xbf16> to vector<2x8x8x256xbf16>
    %47 = vector.shape_cast %46 : vector<2x8x8x256xbf16> to vector<128x256xbf16>
    %c0_19 = arith.constant 0 : index
    %c3840 = arith.constant 3840 : index
    %48 = vector.load %arg7[%c0_19, %c3840] : memref<128x6400xbf16, #tpu.memory_space<vmem>>, vector<128x256xbf16>
    tpu.vector_store %arg7[%c0_19, %c3840], %47 {strides = array<i32>} : memref<128x6400xbf16, #tpu.memory_space<vmem>>, vector<128x256xbf16>,
    %49 = vector.extract_strided_slice %0 {offsets = [0, 3, 1, 0], sizes = [2, 8, 8, 256], strides = [1, 1, 1, 1]} : vector<2x12x12x256xbf16> to vector<2x8x8x256xbf16>
    %50 = vector.shape_cast %49 : vector<2x8x8x256xbf16> to vector<128x256xbf16>
    %c0_20 = arith.constant 0 : index
    %c4096 = arith.constant 4096 : index
    %51 = vector.load %arg7[%c0_20, %c4096] : memref<128x6400xbf16, #tpu.memory_space<vmem>>, vector<128x256xbf16>
    tpu.vector_store %arg7[%c0_20, %c4096], %50 {strides = array<i32>} : memref<128x6400xbf16, #tpu.memory_space<vmem>>, vector<128x256xbf16>,
    %52 = vector.extract_strided_slice %0 {offsets = [0, 3, 2, 0], sizes = [2, 8, 8, 256], strides = [1, 1, 1, 1]} : vector<2x12x12x256xbf16> to vector<2x8x8x256xbf16>
    %53 = vector.shape_cast %52 : vector<2x8x8x256xbf16> to vector<128x256xbf16>
    %c0_21 = arith.constant 0 : index
    %c4352 = arith.constant 4352 : index
    %54 = vector.load %arg7[%c0_21, %c4352] : memref<128x6400xbf16, #tpu.memory_space<vmem>>, vector<128x256xbf16>
    tpu.vector_store %arg7[%c0_21, %c4352], %53 {strides = array<i32>} : memref<128x6400xbf16, #tpu.memory_space<vmem>>, vector<128x256xbf16>,
    %55 = vector.extract_strided_slice %0 {offsets = [0, 3, 3, 0], sizes = [2, 8, 8, 256], strides = [1, 1, 1, 1]} : vector<2x12x12x256xbf16> to vector<2x8x8x256xbf16>
    %56 = vector.shape_cast %55 : vector<2x8x8x256xbf16> to vector<128x256xbf16>
    %c0_22 = arith.constant 0 : index
    %c4608 = arith.constant 4608 : index
    %57 = vector.load %arg7[%c0_22, %c4608] : memref<128x6400xbf16, #tpu.memory_space<vmem>>, vector<128x256xbf16>
    tpu.vector_store %arg7[%c0_22, %c4608], %56 {strides = array<i32>} : memref<128x6400xbf16, #tpu.memory_space<vmem>>, vector<128x256xbf16>,
    %58 = vector.extract_strided_slice %0 {offsets = [0, 3, 4, 0], sizes = [2, 8, 8, 256], strides = [1, 1, 1, 1]} : vector<2x12x12x256xbf16> to vector<2x8x8x256xbf16>
    %59 = vector.shape_cast %58 : vector<2x8x8x256xbf16> to vector<128x256xbf16>
    %c0_23 = arith.constant 0 : index
    %c4864 = arith.constant 4864 : index
    %60 = vector.load %arg7[%c0_23, %c4864] : memref<128x6400xbf16, #tpu.memory_space<vmem>>, vector<128x256xbf16>
    tpu.vector_store %arg7[%c0_23, %c4864], %59 {strides = array<i32>} : memref<128x6400xbf16, #tpu.memory_space<vmem>>, vector<128x256xbf16>,
    %61 = vector.extract_strided_slice %0 {offsets = [0, 4, 0, 0], sizes = [2, 8, 8, 256], strides = [1, 1, 1, 1]} : vector<2x12x12x256xbf16> to vector<2x8x8x256xbf16>
    %62 = vector.shape_cast %61 : vector<2x8x8x256xbf16> to vector<128x256xbf16>
    %c0_24 = arith.constant 0 : index
    %c5120 = arith.constant 5120 : index
    %63 = vector.load %arg7[%c0_24, %c5120] : memref<128x6400xbf16, #tpu.memory_space<vmem>>, vector<128x256xbf16>
    tpu.vector_store %arg7[%c0_24, %c5120], %62 {strides = array<i32>} : memref<128x6400xbf16, #tpu.memory_space<vmem>>, vector<128x256xbf16>,
    %64 = vector.extract_strided_slice %0 {offsets = [0, 4, 1, 0], sizes = [2, 8, 8, 256], strides = [1, 1, 1, 1]} : vector<2x12x12x256xbf16> to vector<2x8x8x256xbf16>
    %65 = vector.shape_cast %64 : vector<2x8x8x256xbf16> to vector<128x256xbf16>
    %c0_25 = arith.constant 0 : index
    %c5376 = arith.constant 5376 : index
    %66 = vector.load %arg7[%c0_25, %c5376] : memref<128x6400xbf16, #tpu.memory_space<vmem>>, vector<128x256xbf16>
    tpu.vector_store %arg7[%c0_25, %c5376], %65 {strides = array<i32>} : memref<128x6400xbf16, #tpu.memory_space<vmem>>, vector<128x256xbf16>,
    %67 = vector.extract_strided_slice %0 {offsets = [0, 4, 2, 0], sizes = [2, 8, 8, 256], strides = [1, 1, 1, 1]} : vector<2x12x12x256xbf16> to vector<2x8x8x256xbf16>
    %68 = vector.shape_cast %67 : vector<2x8x8x256xbf16> to vector<128x256xbf16>
    %c0_26 = arith.constant 0 : index
    %c5632 = arith.constant 5632 : index
    %69 = vector.load %arg7[%c0_26, %c5632] : memref<128x6400xbf16, #tpu.memory_space<vmem>>, vector<128x256xbf16>
    tpu.vector_store %arg7[%c0_26, %c5632], %68 {strides = array<i32>} : memref<128x6400xbf16, #tpu.memory_space<vmem>>, vector<128x256xbf16>,
    %70 = vector.extract_strided_slice %0 {offsets = [0, 4, 3, 0], sizes = [2, 8, 8, 256], strides = [1, 1, 1, 1]} : vector<2x12x12x256xbf16> to vector<2x8x8x256xbf16>
    %71 = vector.shape_cast %70 : vector<2x8x8x256xbf16> to vector<128x256xbf16>
    %c0_27 = arith.constant 0 : index
    %c5888 = arith.constant 5888 : index
    %72 = vector.load %arg7[%c0_27, %c5888] : memref<128x6400xbf16, #tpu.memory_space<vmem>>, vector<128x256xbf16>
    tpu.vector_store %arg7[%c0_27, %c5888], %71 {strides = array<i32>} : memref<128x6400xbf16, #tpu.memory_space<vmem>>, vector<128x256xbf16>,
    %73 = vector.extract_strided_slice %0 {offsets = [0, 4, 4, 0], sizes = [2, 8, 8, 256], strides = [1, 1, 1, 1]} : vector<2x12x12x256xbf16> to vector<2x8x8x256xbf16>
    %74 = vector.shape_cast %73 : vector<2x8x8x256xbf16> to vector<128x256xbf16>
    %c0_28 = arith.constant 0 : index
    %c6144 = arith.constant 6144 : index
    %75 = vector.load %arg7[%c0_28, %c6144] : memref<128x6400xbf16, #tpu.memory_space<vmem>>, vector<128x256xbf16>
    tpu.vector_store %arg7[%c0_28, %c6144], %74 {strides = array<i32>} : memref<128x6400xbf16, #tpu.memory_space<vmem>>, vector<128x256xbf16>,
    %c0_29 = arith.constant 0 : index
    %c0_30 = arith.constant 0 : index
    %76 = vector.load %arg7[%c0_29, %c0_30] : memref<128x6400xbf16, #tpu.memory_space<vmem>>, vector<128x6400xbf16>
    %c0_31 = arith.constant 0 : index
    %c0_32 = arith.constant 0 : index
    %77 = vector.load %arg2[%c0_31, %c0_32] : memref<6400x256xbf16, #tpu.memory_space<vmem>>, vector<6400x256xbf16>
    %cst = arith.constant dense<0.000000e+00> : vector<128x256xf32>
    %78 = tpu.matmul %76, %77, %cst {dimension_numbers = #tpu.dot_dimension_numbers<[1], [0], [0], [1], [0, 0, 1, 1], [], []>} : vector<128x6400xbf16>, vector<6400x256xbf16>, vector<128x256xf32> -> vector<128x256xf32>
    %cst_33 = arith.constant dense<0.000000e+00> : vector<256xf32>
    %79 = vector.multi_reduction <add>, %78, %cst_33 [0] : vector<128x256xf32> to vector<256xf32>
    %80 = vector.shape_cast %79 : vector<256xf32> to vector<1x256xf32>
    %cst_34 = arith.constant 1.280000e+02 : f32
    %81 = vector.broadcast %cst_34 : f32 to vector<1x256xf32>
    %82 = arith.divf %80, %81 : vector<1x256xf32>
    %83 = vector.broadcast %82 : vector<1x256xf32> to vector<128x256xf32>
    %84 = arith.subf %78, %83 : vector<128x256xf32>
    %85 = arith.mulf %84, %84 : vector<128x256xf32>
    %cst_35 = arith.constant dense<0.000000e+00> : vector<256xf32>
    %86 = vector.multi_reduction <add>, %85, %cst_35 [0] : vector<128x256xf32> to vector<256xf32>
    %87 = vector.shape_cast %86 : vector<256xf32> to vector<1x256xf32>
    %cst_36 = arith.constant 1.280000e+02 : f32
    %88 = vector.broadcast %cst_36 : f32 to vector<1x256xf32>
    %89 = arith.divf %87, %88 : vector<1x256xf32>
    %c0_37 = arith.constant 0 : index
    %c0_38 = arith.constant 0 : index
    %90 = vector.load %arg3[%c0_37, %c0_38] : memref<1x256xf32, #tpu.memory_space<vmem>>, vector<1x256xf32>
    %cst_39 = arith.constant 9.99999974E-6 : f32
    %91 = vector.broadcast %cst_39 : f32 to vector<1x256xf32>
    %92 = arith.addf %89, %91 : vector<1x256xf32>
    %93 = math.rsqrt %92 : vector<1x256xf32>
    %94 = arith.mulf %90, %93 : vector<1x256xf32>
    %c0_40 = arith.constant 0 : index
    %c0_41 = arith.constant 0 : index
    %95 = vector.load %arg4[%c0_40, %c0_41] : memref<1x256xf32, #tpu.memory_space<vmem>>, vector<1x256xf32>
    %96 = arith.mulf %82, %94 : vector<1x256xf32>
    %97 = arith.subf %95, %96 : vector<1x256xf32>
    %98 = vector.broadcast %94 : vector<1x256xf32> to vector<128x256xf32>
    %99 = arith.mulf %78, %98 : vector<128x256xf32>
    %100 = vector.broadcast %97 : vector<1x256xf32> to vector<128x256xf32>
    %101 = arith.addf %99, %100 : vector<128x256xf32>
    %c0_42 = arith.constant 0 : index
    %102 = memref.load %arg5[%c0_42] : memref<1xf32, #tpu.memory_space<smem>>
    %cst_43 = arith.constant 0.000000e+00 : f32
    %103 = vector.broadcast %cst_43 : f32 to vector<128x256xf32>
    %104 = arith.cmpf oge, %101, %103 : vector<128x256xf32>
    %105 = vector.broadcast %102 : f32 to vector<128x256xf32>
    %106 = arith.mulf %105, %101 : vector<128x256xf32>
    %107 = arith.select %104, %101, %106 : vector<128x256xi1>, vector<128x256xf32>
    %108 = vector.shape_cast %107 : vector<128x256xf32> to vector<2x8x8x256xf32>
    %c0_44 = arith.constant 0 : index
    %c0_45 = arith.constant 0 : index
    %c0_46 = arith.constant 0 : index
    %c0_47 = arith.constant 0 : index
    %109 = vector.load %arg6[%c0_44, %c0_45, %c0_46, %c0_47] : memref<2x8x8x256xf32, #tpu.memory_space<vmem>>, vector<2x8x8x256xf32>
    tpu.vector_store %arg6[%c0_44, %c0_45, %c0_46, %c0_47], %108 {strides = array<i32>} : memref<2x8x8x256xf32, #tpu.memory_space<vmem>>, vector<2x8x8x256xf32>,
    return
  }
  func.func @transform_0(%arg0: i32) -> (i32, i32, i32, i32) {
    %c0_i32 = arith.constant 0 : i32
    %c0_i32_0 = arith.constant 0 : i32
    %c0_i32_1 = arith.constant 0 : i32
    %c0_i32_2 = arith.constant 0 : i32
    %c0_i32_3 = arith.constant 0 : i32
    return %c0_i32, %c0_i32_0, %c0_i32_1, %c0_i32_2 : i32, i32, i32, i32
  }
  func.func @transform_1(%arg0: i32) -> (i32, i32) {
    %c0_i32 = arith.constant 0 : i32
    %c0_i32_0 = arith.constant 0 : i32
    %c0_i32_1 = arith.constant 0 : i32
    return %c0_i32, %c0_i32_0 : i32, i32
  }
  func.func @transform_2(%arg0: i32) -> (i32, i32) {
    %c0_i32 = arith.constant 0 : i32
    %c0_i32_0 = arith.constant 0 : i32
    %c0_i32_1 = arith.constant 0 : i32
    return %c0_i32, %c0_i32_0 : i32, i32
  }
  func.func @transform_3(%arg0: i32) -> (i32, i32) {
    %c0_i32 = arith.constant 0 : i32
    %c0_i32_0 = arith.constant 0 : i32
    %c0_i32_1 = arith.constant 0 : i32
    return %c0_i32, %c0_i32_0 : i32, i32
  }
  func.func @transform_4(%arg0: i32) -> i32 {
    %c0_i32 = arith.constant 0 : i32
    %c0_i32_0 = arith.constant 0 : i32
    return %c0_i32 : i32
  }
  func.func @transform_5(%arg0: i32) -> (i32, i32, i32, i32) {
    %c0_i32 = arith.constant 0 : i32
    %c0_i32_0 = arith.constant 0 : i32
    %c0_i32_1 = arith.constant 0 : i32
    %c0_i32_2 = arith.constant 0 : i32
    %c0_i32_3 = arith.constant 0 : i32
    return %c0_i32, %c0_i32_0, %c0_i32_1, %c0_i32_2 : i32, i32, i32, i32
  }
}

</mosaic_0001>

<bundles_post_ra>
// kernel: mod_inception_forward.1
= control target key start
LH: loop header
LB: loop body
LE: loop exit
PB: predicated region body
PF: predicated region fallthrough
CT: control target
= control target key end

     0   :  { %vm86_vm0 = vsmask.f32 3328  ;;  %vm87_vm1 = vsmask.f32 7440  ;;  %vm476_vm3 = vsmask.f32 2304  ;;  %s21045_s0 = inlined_call_operand.vmem [shape: bf16[2,12,12,256], index: 0, kind: input, shape index: {}]   ;;  %s21046_s1 = inlined_call_operand.vmem [shape: bf16[6400,256], index: 1, kind: input, shape index: {}]   ;;  %s21047_s2 = inlined_call_operand.vmem [shape: f32[1,256], index: 2, kind: input, shape index: {}]   ;;  %s21048_s3 = inlined_call_operand.vmem [shape: f32[1,256], index: 3, kind: input, shape index: {}]   ;;  %s21049_s4 = inlined_call_operand.<no memory space> [shape: f32[1], index: 4, kind: input, shape index: {}]   ;;  %s21050_s5 = inlined_call_operand.hbm [shape: f32[2,8,8,256], index: 5, kind: output, shape index: {}]  }
   0x1   :  { %v13134_v0 = vld [vmem:[%s21046_s1 + $0x74] ss:$8 sps:$4 sm:$0xff]   ;;  %v13138_v2 = vld [vmem:[%s21046_s1 + $0x70] ss:$8 sps:$4 sm:$0xff]   ;;  %v13140_v4 = vld [vmem:[%s21046_s1 + $0x64] ss:$8 sps:$4 sm:$0xff]  }
   0x2   :  { %v13136_v1 = vld [vmem:[%s21046_s1 + $0x174] ss:$8 sps:$4 sm:$0xff]   ;;  %8594 = vmatprep.subr.bf16.mxu0 %v13134_v0  ;;  %v13139_v3 = vld [vmem:[%s21046_s1 + $0x170] ss:$8 sps:$4 sm:$0xff]   ;;  %v13142_v5 = vld [vmem:[%s21046_s1 + $0x164] ss:$8 sps:$4 sm:$0xff]  }
   0x3   :  { %8707 = vmatprep.subr.bf16.mxu1 %v13136_v1  ;;  %8595 = vmatpush1.bf16.msra.mxu0 %v13138_v2  ;;  %v13144_v6 = vld [vmem:[%s21046_s1 + $0x60] ss:$8 sps:$4 sm:$0xff]   ;;  %v13146_v8 = vld [vmem:[%s21046_s1 + $0x54] ss:$8 sps:$4 sm:$0xff]   ;;  %v13150_v10 = vld [vmem:[%s21046_s1 + $0x50] ss:$8 sps:$4 sm:$0xff]  }
   0x4   :  { %8708 = vmatpush1.bf16.msra.mxu1 %v13139_v3  ;;  %8596 = vmatprep.subr.bf16.mxu0 %v13140_v4  ;;  %v13145_v7 = vld [vmem:[%s21046_s1 + $0x160] ss:$8 sps:$4 sm:$0xff]   ;;  %v13148_v9 = vld [vmem:[%s21046_s1 + $0x154] ss:$8 sps:$4 sm:$0xff]   ;;  %v13151_v11 = vld [vmem:[%s21046_s1 + $0x150] ss:$8 sps:$4 sm:$0xff]  }
   0x5   :  { %8709 = vmatprep.subr.bf16.mxu1 %v13142_v5  ;;  %v13152_v12 = vld [vmem:[%s21046_s1 + $0x44] ss:$8 sps:$4 sm:$0xff]   ;;  %v13156_v14 = vld [vmem:[%s21046_s1 + $0x40] ss:$8 sps:$4 sm:$0xff]   ;;  %v13158_v16 = vld [vmem:[%s21046_s1 + $0x34] ss:$8 sps:$4 sm:$0xff]  }
   0x6   :  { %v13154_v13 = vld [vmem:[%s21046_s1 + $0x144] ss:$8 sps:$4 sm:$0xff]   ;;  %v13157_v15 = vld [vmem:[%s21046_s1 + $0x140] ss:$8 sps:$4 sm:$0xff]   ;;  %v13160_v17 = vld [vmem:[%s21046_s1 + $0x134] ss:$8 sps:$4 sm:$0xff]  }
   0x7   :  { %8597 = vmatpush1.bf16.msra.mxu0 %v13144_v6  ;;  %v13162_v18 = vld [vmem:[%s21046_s1 + $0x30] ss:$8 sps:$4 sm:$0xff]   ;;  %v13164_v20 = vld [vmem:[%s21046_s1 + $0x24] ss:$8 sps:$4 sm:$0xff]   ;;  %v13168_v22 = vld [vmem:[%s21046_s1 + $0x20] ss:$8 sps:$4 sm:$0xff]  }
   0x8   :  { %8710 = vmatpush1.bf16.msra.mxu1 %v13145_v7  ;;  %8598 = vmatprep.subr.bf16.mxu0 %v13146_v8  ;;  %v13163_v19 = vld [vmem:[%s21046_s1 + $0x130] ss:$8 sps:$4 sm:$0xff]   ;;  %v13166_v21 = vld [vmem:[%s21046_s1 + $0x124] ss:$8 sps:$4 sm:$0xff]   ;;  %v13169_v23 = vld [vmem:[%s21046_s1 + $0x120] ss:$8 sps:$4 sm:$0xff]  }
   0x9   :  { %8711 = vmatprep.subr.bf16.mxu1 %v13148_v9  ;;  %v13170_v24 = vld [vmem:[%s21046_s1 + $0x14] ss:$8 sps:$4 sm:$0xff]   ;;  %v13174_v26 = vld [vmem:[%s21046_s1 + $0x10] ss:$8 sps:$4 sm:$0xff]   ;;  %v13176_v28 = vld [vmem:[%s21046_s1 + $0x4] ss:$8 sps:$4 sm:$0xff]  }
   0xa   :  { %v13172_v25 = vld [vmem:[%s21046_s1 + $0x114] ss:$8 sps:$4 sm:$0xff]   ;;  %v13175_v27 = vld [vmem:[%s21046_s1 + $0x110] ss:$8 sps:$4 sm:$0xff]   ;;  %v13178_v29 = vld [vmem:[%s21046_s1 + $0x104] ss:$8 sps:$4 sm:$0xff]  }
   0xb   :  { %8599 = vmatpush1.bf16.msra.mxu0 %v13150_v10  ;;  %v13180_v30 = vld [vmem:[%s21046_s1] ss:$8 sps:$4 sm:$0xff]   ;;  %v13182_v32 = vld [vmem:[%s21046_s1 + $0xf4] ss:$8 sps:$4 sm:$0xff]   ;;  %v13186_v34 = vld [vmem:[%s21046_s1 + $0xf0] ss:$8 sps:$4 sm:$0xff]  }
   0xc   :  { %8712 = vmatpush1.bf16.msra.mxu1 %v13151_v11  ;;  %8600 = vmatprep.subr.bf16.mxu0 %v13152_v12  ;;  %v13181_v31 = vld [vmem:[%s21046_s1 + $0x100] ss:$8 sps:$4 sm:$0xff]   ;;  %v13184_v33 = vld [vmem:[%s21046_s1 + $0x1f4] ss:$8 sps:$4 sm:$0xff]   ;;  %v13187_v35 = vld [vmem:[%s21046_s1 + $0x1f0] ss:$8 sps:$4 sm:$0xff]  }
   0xd   :  { %8713 = vmatprep.subr.bf16.mxu1 %v13154_v13  ;;  %v13188_v36 = vld [vmem:[%s21046_s1 + $0xe4] ss:$8 sps:$4 sm:$0xff]   ;;  %v13192_v38 = vld [vmem:[%s21046_s1 + $0xe0] ss:$8 sps:$4 sm:$0xff]   ;;  %v13194_v40 = vld [vmem:[%s21046_s1 + $0xd4] ss:$8 sps:$4 sm:$0xff]  }
   0xe   :  { %v13190_v37 = vld [vmem:[%s21046_s1 + $0x1e4] ss:$8 sps:$4 sm:$0xff]   ;;  %v13193_v39 = vld [vmem:[%s21046_s1 + $0x1e0] ss:$8 sps:$4 sm:$0xff]   ;;  %v13196_v41 = vld [vmem:[%s21046_s1 + $0x1d4] ss:$8 sps:$4 sm:$0xff]  }
   0xf   :  { %8601 = vmatpush1.bf16.msra.mxu0 %v13156_v14  ;;  %v13198_v42 = vld [vmem:[%s21046_s1 + $0xd0] ss:$8 sps:$4 sm:$0xff]   ;;  %v13200_v44 = vld [vmem:[%s21046_s1 + $0xc4] ss:$8 sps:$4 sm:$0xff]   ;;  %v13204_v46 = vld [vmem:[%s21046_s1 + $0xc0] ss:$8 sps:$4 sm:$0xff]  }
  0x10   :  { %8714 = vmatpush1.bf16.msra.mxu1 %v13157_v15  ;;  %8602 = vmatprep.subr.bf16.mxu0 %v13158_v16  ;;  %v13199_v43 = vld [vmem:[%s21046_s1 + $0x1d0] ss:$8 sps:$4 sm:$0xff]   ;;  %v13202_v45 = vld [vmem:[%s21046_s1 + $0x1c4] ss:$8 sps:$4 sm:$0xff]   ;;  %v13205_v47 = vld [vmem:[%s21046_s1 + $0x1c0] ss:$8 sps:$4 sm:$0xff]  }
  0x11   :  { %8715 = vmatprep.subr.bf16.mxu1 %v13160_v17  ;;  %v14632_v48 = vld [vmem:[%s21045_s0] sm:$0xff]  ;;  %v13206_v49 = vld [vmem:[%s21046_s1 + $0xb4] ss:$8 sps:$4 sm:$0xff]   ;;  %v14645_v51 = vld [vmem:[%s21045_s0 + $0x8] sm:$0x33]  ;;  %v21391_v10 = vmov 0 }
  0x12   :  { %v14640_v50 = vld [vmem:[%s21045_s0 + $0x10] sm:$0xff]  ;;  %v14650_v52 = vld [vmem:[%s21045_s0 + $0x18] sm:$0x33]  ;;  %v90_v53 = vshrl.u32 %v14632_v48, 16  ;;  %v14661_v56 = vld [vmem:[%s21045_s0 + $0x20] sm:$0xff]  ;;  %v93_v57 = vshll.u32 %v14632_v48, 16 }
  0x13   :  { %8603 = vmatpush1.bf16.msra.mxu0 %v13162_v18  ;;  %v13208_v54 = vld [vmem:[%s21046_s1 + $0x1b4] ss:$8 sps:$4 sm:$0xff]   ;;  %v11899_v55 = vcombine.high %v14632_v48, %v14640_v50  ;;  %v99_v58 = vshll.u32 %v14645_v51, 16  ;;  %v104_v59 = vshrl.u32 %v14640_v50, 16  ;;  %v21076_v61 = vshll.u32 %v14640_v50, 16  ;;  %vm14694_vm2 = vmor %vm86_vm0, %vm87_vm1 }
  0x14   :  { %8716 = vmatpush1.bf16.msra.mxu1 %v13163_v19  ;;  %8604 = vmatprep.subr.bf16.mxu0 %v13164_v20  ;;  %v92_v60 = vrot.slane %v90_v53, 4  ;;  %v21075_v62 = vshll.u32 %v14650_v52, 16  ;;  %v13210_v63 = vld [vmem:[%s21046_s1 + $0xb0] ss:$8 sps:$4 sm:$0xff]   ;;  %v95_v0 = vrot.slane %v93_v57, 5  ;;  %v21074_v2 = vshrl.u32 %v14661_v56, 16 }
  0x15   :  { %8717 = vmatprep.subr.bf16.mxu1 %v13166_v21  ;;  %8626 = vmatprep.mubr.bf16.mxu0 %v11899_v55  ;;  %v106_v1 = vrot.slane %v104_v59, 4  ;;  %v21073_v3 = vshll.u32 %v14661_v56, 16  ;;  %v13211_v4 = vld [vmem:[%s21046_s1 + $0x1b0] ss:$8 sps:$4 sm:$0xff]   ;;  %v13212_v5 = vld [vmem:[%s21046_s1 + $0xa4] ss:$8 sps:$4 sm:$0xff]  }
  0x16   :  { %v109_v6 = vrot.slane %v21076_v61, 5  ;;  %v96_v7 = vor.u32 %v95_v0, %v92_v60  ;;  %v101_v8 = vrot.slane %v99_v58, 5  ;;  %v13214_v9 = vld [vmem:[%s21046_s1 + $0x1a4] ss:$8 sps:$4 sm:$0xff]   ;;  %v21392_v10 = vsel %vm14694_vm2, 4294967295, %v21391_v10 }
  0x17   :  { %8605 = vmatpush1.bf16.msra.mxu0 %v13168_v22  ;;  %21393 = vst [vmem:[#allocation7_spill] sm:$0xff] %v21392_v10  ;;  %v115_v12 = vrot.slane %v21075_v62, 5  ;;  %v13216_v13 = vld [vmem:[%s21046_s1 + $0xa0] ss:$8 sps:$4 sm:$0xff]   ;;  %v120_v16 = vrot.slane %v21074_v2, 4  ;;  %v123_v17 = vrot.slane %v21073_v3, 5 }
  0x18   :  { %8718 = vmatpush1.bf16.msra.mxu1 %v13169_v23  ;;  %8606 = vmatprep.subr.bf16.mxu0 %v13170_v24  ;;  %v110_v11 = vor.u32 %v109_v6, %v106_v1  ;;  %v13217_v14 = vld [vmem:[%s21046_s1 + $0x1a0] ss:$8 sps:$4 sm:$0xff]   ;;  %v97_v15 = vrot.slane %v96_v7, 4  ;;  %v13218_v18 = vld [vmem:[%s21046_s1 + $0x94] ss:$8 sps:$4 sm:$0xff]   ;;  %vm377_vm6 = vcmask 1042432  }
  0x19   :  { %8719 = vmatprep.subr.bf16.mxu1 %v13172_v25  ;;  %v14716_v19 = vld [vmem:[%s21045_s0 + $0x28] sm:$0x33]  ;;  %v14725_v22 = vld [vmem:[%s21045_s0 + $0x30] sm:$0xff]  ;;  %v14730_v23 = vld [vmem:[%s21045_s0 + $0x38] sm:$0x33]  ;;  %vm378_vm7 = vcmask 1046532  }
  0x1a   :  { %v111_v20 = vrot.slane %v110_v11, 4  ;;  %v14720_v21 = vsel %vm14694_vm2, %v97_v15, %v101_v8  ;;  %v13220_v24 = vld [vmem:[%s21046_s1 + $0x194] ss:$8 sps:$4 sm:$0xff]   ;;  %vm477_vm4 = vsmask.f32 6416  ;;  %vm15379_vm8 = vmor %vm377_vm6, %vm378_vm7  ;;  %vm671_vm9 = vcmask 1041408  }
  0x1b   :  { %8607 = vmatpush1.bf16.msra.mxu0 %v13174_v26  ;;  %v21072_v26 = vshrl.u32 %v14725_v22, 16  ;;  %v14794_v60 = vld [vmem:[%s21045_s0 + $0x58] sm:$0x33]  ;;  %vm15091_vm5 = vmor %vm476_vm3, %vm477_vm4  ;;  %vm672_vm10 = vcmask 1045508  }
  0x1c   :  { %8720 = vmatpush1.bf16.msra.mxu1 %v13175_v27  ;;  %8608 = vmatprep.subr.bf16.mxu0 %v13176_v28  ;;  %v14737_v25 = vsel %vm14694_vm2, %v111_v20, %v115_v12  ;;  %v21069_v27 = vshll.u32 %v14725_v22, 16  ;;  %v124_v28 = vor.u32 %v123_v17, %v120_v16  ;;  %v13237_v1 = vld [vmem:[%s21046_s1 + $0x374] ss:$8 sps:$4 sm:$0xff]   ;;  %v21051_v15 = vshll.u32 %v14794_v60, 16  ;;  %v13232_v16 = vld [vmem:[%s21046_s1 + $0x270] ss:$8 sps:$4 sm:$0xff]   ;;  %vm15929_vm11 = vmor %vm671_vm9, %vm672_vm10 }
  0x1d   :  { %8721 = vmatprep.subr.bf16.mxu1 %v13178_v29  ;;  %v21068_v29 = vshll.u32 %v14716_v19, 16  ;;  %v11900_v8 = vcombine.low %v14720_v21, %v14737_v25  ;;  %v13235_v17 = vld [vmem:[%s21046_s1 + $0x370] ss:$8 sps:$4 sm:$0xff]   ;;  %v13243_v20 = vld [vmem:[%s21046_s1 + $0x364] ss:$8 sps:$4 sm:$0xff]  }
  0x1f   :  { %8609 = vmatpush1.bf16.msra.mxu0 %v13180_v30  ;;  %v11901_v30 = vcombine.high %v14720_v21, %v14737_v25 }
  0x20   :  { %8722 = vmatpush1.bf16.msra.mxu1 %v13181_v31  ;;  %8610 = vmatprep.subr.bf16.mxu0 %v13182_v32  ;;  %v134_v31 = vrot.slane %v21072_v26, 4  ;;  %v137_v32 = vrot.slane %v21069_v27, 5  ;;  %v486_v27 = vrot.slane %v99_v58, 6  ;;  %v13266_v58 = vld [vmem:[%s21046_s1 + $0x220] ss:$8 sps:$4 sm:$0xff]  }
  0x21   :  { %8723 = vmatprep.subr.bf16.mxu1 %v13184_v33  ;;  %v21061_v33 = vshll.u32 %v14730_v23, 16  ;;  %8739 = vmatprep.mubr.bf16.mxu1 %v11901_v30  ;;  %v13238_v30 = vld [vmem:[%s21046_s1 + $0x260] ss:$8 sps:$4 sm:$0xff]  }
  0x23   :  { %8611 = vmatpush2.bf16.msra.mxu0 %v13186_v34  ;;  %v13222_v34 = vld [vmem:[%s21046_s1 + $0x90] ss:$8 sps:$4 sm:$0xff]  }
  0x24   :  { %8724 = vmatpush2.bf16.msra.mxu1 %v13187_v35  ;;  %8612 = vmatprep.subr.bf16.mxu0 %v13188_v36  ;;  %v13223_v35 = vld [vmem:[%s21046_s1 + $0x190] ss:$8 sps:$4 sm:$0xff]   ;;  %v13224_v36 = vld [vmem:[%s21046_s1 + $0x84] ss:$8 sps:$4 sm:$0xff]  }
  0x25   :  { %8725 = vmatprep.subr.bf16.mxu1 %v13190_v37  ;;  %v13226_v37 = vld [vmem:[%s21046_s1 + $0x184] ss:$8 sps:$4 sm:$0xff]  }
  0x27   :  { %8613 = vmatpush2.bf16.msra.mxu0 %v13192_v38  ;;  %v138_v38 = vor.u32 %v137_v32, %v134_v31  ;;  %v13241_v31 = vld [vmem:[%s21046_s1 + $0x360] ss:$8 sps:$4 sm:$0xff]   ;;  %v14850_v32 = vcombine.high %v14661_v56, %v14725_v22 }
  0x28   :  { %8726 = vmatpush2.bf16.msra.mxu1 %v13193_v39  ;;  %8614 = vmatprep.subr.bf16.mxu0 %v13194_v40  ;;  %v13228_v39 = vld [vmem:[%s21046_s1 + $0x80] ss:$8 sps:$4 sm:$0xff]  }
  0x29   :  { %8727 = vmatprep.subr.bf16.mxu1 %v13196_v41  ;;  %v13229_v40 = vld [vmem:[%s21046_s1 + $0x180] ss:$8 sps:$4 sm:$0xff]   ;;  %v125_v41 = vrot.slane %v124_v28, 4  ;;  %21395 = vst [vmem:[#allocation9_spill] sm:$0xff] %v14850_v32 }
  0x2a   :  { %v14840_v28 = vld [vmem:[%s21045_s0 + $0x60] sm:$0xff] }
  0x2b   :  { %8615 = vmatpush2.bf16.msra.mxu0 %v13198_v42  ;;  %v129_v42 = vrot.slane %v21068_v29, 5 }
  0x2c   :  { %8728 = vmatpush2.bf16.msra.mxu1 %v13199_v43  ;;  %8616 = vmatprep.subr.bf16.mxu0 %v13200_v44  ;;  %v14772_v43 = vld [vmem:[%s21045_s0 + $0x40] sm:$0xff]  ;;  %v14777_v44 = vld [vmem:[%s21045_s0 + $0x50] sm:$0xff] }
  0x2d   :  { %8729 = vmatprep.subr.bf16.mxu1 %v13202_v45  ;;  %v14782_v45 = vld [vmem:[%s21045_s0 + $0x48] sm:$0x33]  ;;  %v21062_v55 = vshll.u32 %v14772_v43, 16  ;;  %v21059_v0 = vshll.u32 %v14777_v44, 16  ;;  %v14808_v7 = vsel %vm14694_vm2, %v125_v41, %v129_v42  ;;  %v171_v42 = vrot.slane %v21051_v15, 5 }
  0x2e   :  { %v21053_v6 = vshll.u32 %v14782_v45, 16 }
  0x2f   :  { %8617 = vmatpush2.bf16.msra.mxu0 %v13204_v46  ;;  %v13234_v46 = vld [vmem:[%s21046_s1 + $0x274] ss:$8 sps:$4 sm:$0xff]  }
  0x30   :  { %8730 = vmatpush2.bf16.msra.mxu1 %v13205_v47  ;;  %8618 = vmatprep.subr.bf16.mxu0 %v13206_v49  ;;  %v139_v47 = vrot.slane %v138_v38, 4  ;;  %v143_v49 = vrot.slane %v21061_v33, 5  ;;  %v157_v21 = vrot.slane %v21053_v6, 5  ;;  %v21058_v38 = vshrl.u32 %v14840_v28, 16  ;;  %v13257_v6 = vld [vmem:[%s21046_s1 + $0x344] ss:$8 sps:$4 sm:$0xff]  }
  0x31   :  { %8731 = vmatprep.subr.bf16.mxu1 %v13208_v54  ;;  %v21067_v54 = vshrl.u32 %v14772_v43, 16 }
  0x32   :  { %v14818_v12 = vsel %vm14694_vm2, %v139_v47, %v143_v49  ;;  %v13251_v47 = vld [vmem:[%s21046_s1 + $0x354] ss:$8 sps:$4 sm:$0xff]   ;;  %v176_v49 = vrot.slane %v21058_v38, 4 }
  0x33   :  { %8619 = vmatpush2.bf16.msra.mxu0 %v13210_v63  ;;  %v21060_v63 = vshrl.u32 %v14777_v44, 16  ;;  %21394 = vst [vmem:[#allocation8_spill] sm:$0xff] %v14818_v12 }
  0x34   :  { %8732 = vmatpush2.bf16.msra.mxu1 %v13211_v4  ;;  %8620 = vmatprep.subr.bf16.mxu0 %v13212_v5  ;;  %v148_v4 = vrot.slane %v21067_v54, 4  ;;  %v151_v5 = vrot.slane %v21062_v55, 5  ;;  %v13271_v54 = vld [vmem:[%s21046_s1 + $0x324] ss:$8 sps:$4 sm:$0xff]  }
  0x35   :  { %8733 = vmatprep.subr.bf16.mxu1 %v13214_v9  ;;  %v11898_v9 = vcombine.low %v14632_v48, %v14640_v50  ;;  %v162_v11 = vrot.slane %v21060_v63, 4 }
  0x37   :  { %8621 = vmatpush2.bf16.msra.mxu0 %v13216_v13  ;;  %v152_v13 = vor.u32 %v151_v5, %v148_v4 }
  0x38   :  { %8734 = vmatpush2.bf16.msra.mxu1 %v13217_v14  ;;  %8622 = vmatprep.subr.bf16.mxu0 %v13218_v18  ;;  %v165_v14 = vrot.slane %v21059_v0, 5  ;;  %v13240_v18 = vld [vmem:[%s21046_s1 + $0x264] ss:$8 sps:$4 sm:$0xff]   ;;  %v13265_v0 = vld [vmem:[%s21046_s1 + $0x334] ss:$8 sps:$4 sm:$0xff]  }
  0x39   :  { %8735 = vmatprep.subr.bf16.mxu1 %v13220_v24 }
  0x3a   :  { %v166_v24 = vor.u32 %v165_v14, %v162_v11  ;;  %v14893_v11 = vcombine.low %v14661_v56, %v14725_v22  ;;  %v13246_v14 = vld [vmem:[%s21046_s1 + $0x250] ss:$8 sps:$4 sm:$0xff]  }
  0x3b   :  { %8623 = vmatpush2.bf16.msra.mxu0 %v13222_v34  ;;  %v14854_v34 = vcombine.high %v14808_v7, %v14818_v12 }
  0x3c   :  { %8736 = vmatpush2.bf16.msra.mxu1 %v13223_v35  ;;  %8624 = vmatprep.subr.bf16.mxu0 %v13224_v36  ;;  %v14859_v35 = vld [vmem:[%s21045_s0 + $0x70] sm:$0xff]  ;;  %v14864_v36 = vld [vmem:[%s21045_s0 + $0x68] sm:$0x33]  ;;  %v167_v41 = vrot.slane %v166_v24, 4  ;;  %21397 = vst [vmem:[#allocation11_spill] sm:$0xff] %v14893_v11 }
  0x3d   :  { %8737 = vmatprep.subr.bf16.mxu1 %v13226_v37  ;;  %21396 = vst [vmem:[#allocation10_spill] sm:$0xff] %v14854_v34  ;;  %v14869_v37 = vld [vmem:[%s21045_s0 + $0x78] sm:$0x33]  ;;  %v21057_v4 = vshll.u32 %v14859_v35, 16 }
  0x3e   :  { %v14916_v24 = vsel %vm14694_vm2, %v167_v41, %v171_v42  ;;  %v13255_v42 = vld [vmem:[%s21046_s1 + $0x340] ss:$8 sps:$4 sm:$0xff]  }
  0x3f   :  { %8625 = vmatpush2.bf16.msra.mxu0 %v13228_v39  ;;  %v13248_v39 = vld [vmem:[%s21046_s1 + $0x254] ss:$8 sps:$4 sm:$0xff]   ;;  %21400 = vst [vmem:[#allocation14_spill] sm:$0xff] %v14916_v24 }
  0x40   :  { %8738 = vmatpush2.bf16.msra.mxu1 %v13229_v40  ;;  %8820 = vmatprep.subr.bf16.mxu0 %v13234_v46  ;;  %v153_v40 = vrot.slane %v152_v13, 4  ;;  %v21054_v46 = vshll.u32 %v14840_v28, 16  ;;  %v14897_v13 = vcombine.low %v14808_v7, %v14818_v12 }
  0x41   :  { %8933 = vmatprep.subr.bf16.mxu1 %v13237_v1  ;;  %v21052_v1 = vshrl.u32 %v14859_v35, 16 }
  0x42   :  { %8627 = vmatmul.mubr.bf16.vlgmr.msra.gmra.mxu0 %v11898_v9  ;;  %v179_v5 = vrot.slane %v21054_v46, 5  ;;  %v21055_v9 = vshll.u32 %v14869_v37, 16  ;;  %21398 = vst [vmem:[#allocation12_spill] sm:$0xff] %v14897_v13  ;;  %v14925_v46 = vrot.slane %v90_v53, 5  ;;  %v14943_v53 = vrot.slane %v93_v57, 6 }
  0x43   :  { %8740 = vmatmul.mubr.bf16.vlgmr.msra.gmra.mxu1 %v11900_v8  ;;  %8821 = vmatpush1.bf16.msra.mxu0 %v13232_v16  ;;  %v21056_v8 = vshll.u32 %v14864_v36, 16  ;;  %v190_v16 = vrot.slane %v21052_v1, 4  ;;  %v193_v1 = vrot.slane %v21057_v4, 5  ;;  %v14962_v57 = vld [vmem:[%s21045_s0 + $0xc8] sm:$0x33] }
  0x44   :  { %8934 = vmatpush1.bf16.msra.mxu1 %v13235_v17  ;;  %8822 = vmatprep.subr.bf16.mxu0 %v13240_v18  ;;  %v13249_v17 = vld [vmem:[%s21046_s1 + $0x350] ss:$8 sps:$4 sm:$0xff]   ;;  %v13254_v18 = vld [vmem:[%s21046_s1 + $0x244] ss:$8 sps:$4 sm:$0xff]   ;;  %v180_v15 = vor.u32 %v179_v5, %v176_v49  ;;  %v199_v41 = vrot.slane %v21055_v9, 5 }
  0x45   :  { %8935 = vmatprep.subr.bf16.mxu1 %v13243_v20  ;;  %8636 = vmatprep.mubr.bf16.mxu0 %v14850_v32  ;;  %v14912_v20 = vsel %vm14694_vm2, %v153_v40, %v157_v21  ;;  %v185_v21 = vrot.slane %v21056_v8, 5  ;;  %v194_v40 = vor.u32 %v193_v1, %v190_v16  ;;  %v14967_v1 = vld [vmem:[%s21045_s0 + $0xd8] sm:$0x33]  ;;  %v15253_v32 = vld [vmem:[%s21045_s0 + $0x128] sm:$0x33] }
  0x46   :  { %8749 = vmatprep.mubr.bf16.mxu1 %v14854_v34  ;;  %21399 = vst [vmem:[#allocation13_spill] sm:$0xff] %v14912_v20  ;;  %v14957_v49 = vcombine.high %v14912_v20, %v14916_v24  ;;  %v13262_v9 = vld [vmem:[%s21046_s1 + $0x234] ss:$8 sps:$4 sm:$0xff]   ;;  %v181_v8 = vrot.slane %v180_v15, 4  ;;  %v21071_v15 = vshll.u32 %v14962_v57, 16 }
  0x47   :  { %8823 = vmatpush1.bf16.msra.mxu0 %v13238_v30  ;;  %v14934_v30 = vld [vmem:[%s21045_s0 + $0xc0] sm:$0xff]  ;;  %v195_v4 = vrot.slane %v194_v40, 4  ;;  %v481_v40 = vor.u32 %v14943_v53, %v14925_v46  ;;  %v13260_v46 = vld [vmem:[%s21046_s1 + $0x230] ss:$8 sps:$4 sm:$0xff]  }
  0x48   :  { %8936 = vmatpush1.bf16.msra.mxu1 %v13241_v31  ;;  %8824 = vmatprep.subr.bf16.mxu0 %v13248_v39  ;;  %v14939_v31 = vld [vmem:[%s21045_s0 + $0xd0] sm:$0xff]  ;;  %v13252_v39 = vld [vmem:[%s21046_s1 + $0x240] ss:$8 sps:$4 sm:$0xff]   ;;  %21402 = vst [vmem:[#allocation16_spill] sm:$0xff] %v14957_v49  ;;  %v21063_v5 = vshrl.u32 %v14934_v30, 16  ;;  %v21064_v16 = vshll.u32 %v14934_v30, 16 }
  0x49   :  { %8937 = vmatprep.subr.bf16.mxu1 %v13251_v47  ;;  %v14953_v47 = vcombine.high %v14772_v43, %v14777_v44  ;;  %v21065_v38 = vshrl.u32 %v14939_v31, 16  ;;  %v21066_v55 = vshll.u32 %v14939_v31, 16  ;;  %v15016_v53 = vsel %vm14694_vm2, %v195_v4, %v199_v41  ;;  %v15033_v41 = vld [vmem:[%s21045_s0 + $0xe0] sm:$0xff] }
  0x4a   :  { %8637 = vmatmul.mubr.bf16.gmra.mxu0 %v14893_v11  ;;  %v204_v63 = vrot.slane %v21063_v5, 4  ;;  %v207_v33 = vrot.slane %v21064_v16, 5  ;;  %21406 = vst [vmem:[#allocation20_spill] sm:$0xff] %v15016_v53  ;;  %v213_v4 = vrot.slane %v21071_v15, 5  ;;  %v15065_v15 = vld [vmem:[%s21045_s0 + $0xf8] sm:$0x33] }
  0x4b   :  { %21401 = vst [vmem:[#allocation15_spill] sm:$0xff] %v14953_v47  ;;  %8750 = vmatmul.mubr.bf16.gmra.mxu1 %v14897_v13  ;;  %8825 = vmatpush1.bf16.msra.mxu0 %v13246_v14  ;;  %v218_v14 = vrot.slane %v21065_v38, 4  ;;  %v221_v16 = vrot.slane %v21066_v55, 5  ;;  %v15002_v38 = vcombine.low %v14912_v20, %v14916_v24  ;;  %v13268_v55 = vld [vmem:[%s21046_s1 + $0x224] ss:$8 sps:$4 sm:$0xff]   ;;  %v21078_v26 = vshll.u32 %v15033_v41, 16 }
  0x4c   :  { %8938 = vmatpush1.bf16.msra.mxu1 %v13249_v17  ;;  %8826 = vmatprep.subr.bf16.mxu0 %v13254_v18  ;;  %v21070_v17 = vshll.u32 %v14967_v1, 16  ;;  %v208_v5 = vor.u32 %v207_v33, %v204_v63  ;;  %v14998_v18 = vcombine.low %v14772_v43, %v14777_v44  ;;  %v13263_v33 = vld [vmem:[%s21046_s1 + $0x330] ss:$8 sps:$4 sm:$0xff]   ;;  %v15012_v63 = vsel %vm14694_vm2, %v181_v8, %v185_v21 }
  0x4d   :  { %8939 = vmatprep.subr.bf16.mxu1 %v13257_v6  ;;  %8646 = vmatprep.mubr.bf16.mxu0 %v14953_v47  ;;  %v483_v6 = vshrl.u32 %v14645_v51, 16  ;;  %21404 = vst [vmem:[#allocation18_spill] sm:$0xff] %v15002_v38  ;;  %21405 = vst [vmem:[#allocation19_spill] sm:$0xff] %v15012_v63  ;;  %v222_v29 = vor.u32 %v221_v16, %v218_v14  ;;  %v21077_v16 = vshrl.u32 %v15033_v41, 16  ;;  %v482_v61 = vrot.slane %v481_v40, 4 }
  0x4e   :  { %8759 = vmatprep.mubr.bf16.mxu1 %v14957_v49  ;;  %21403 = vst [vmem:[#allocation17_spill] sm:$0xff] %v14998_v18  ;;  %v209_v8 = vrot.slane %v208_v5, 4  ;;  %v227_v21 = vrot.slane %v21070_v17, 5  ;;  %v15057_v5 = vld [vmem:[%s21045_s0 + $0xe8] sm:$0x33]  ;;  %v15081_v3 = vcombine.low %v15012_v63, %v15016_v53 }
  0x4f   :  { %8827 = vmatpush1.bf16.msra.mxu0 %v13252_v39  ;;  %v15038_v39 = vld [vmem:[%s21045_s0 + $0xf0] sm:$0xff]  ;;  %v485_v14 = vrot.slane %v483_v6, 5  ;;  %v223_v17 = vrot.slane %v222_v29, 4  ;;  %v15072_v6 = vcombine.low %v14840_v28, %v14859_v35  ;;  %v232_v62 = vrot.slane %v21077_v16, 4 }
  0x50   :  { %8940 = vmatpush1.bf16.msra.mxu1 %v13255_v42  ;;  %8828 = vmatprep.subr.bf16.mxu0 %v13262_v9  ;;  %v15048_v9 = vcombine.high %v14840_v28, %v14859_v35  ;;  %v15052_v42 = vcombine.high %v15012_v63, %v15016_v53  ;;  %v13276_v29 = vld [vmem:[%s21046_s1 + $0x214] ss:$8 sps:$4 sm:$0xff]   ;;  %21410 = vst [vmem:[#allocation24_spill] sm:$0xff] %v15081_v3  ;;  %v21411_v16 = vmov 0  ;;  %v13274_v49 = vld [vmem:[%s21046_s1 + $0x210] ss:$8 sps:$4 sm:$0xff]  }
  0x51   :  { %8941 = vmatprep.subr.bf16.mxu1 %v13265_v0  ;;  %v13269_v0 = vld [vmem:[%s21046_s1 + $0x320] ss:$8 sps:$4 sm:$0xff]   ;;  %21409 = vst [vmem:[#allocation23_spill] sm:$0xff] %v15072_v6  ;;  %v21412_v16 = vsel %vm15091_vm5, 4294967295, %v21411_v16 }
  0x52   :  { %21407 = vst [vmem:[#allocation21_spill] sm:$0xff] %v15048_v9  ;;  %21408 = vst [vmem:[#allocation22_spill] sm:$0xff] %v15052_v42  ;;  %8647 = vmatmul.mubr.bf16.gmra.mxu0 %v14998_v18  ;;  %v487_v18 = vor.u32 %v486_v27, %v485_v14  ;;  %v13282_v14 = vld [vmem:[%s21046_s1 + $0x204] ss:$8 sps:$4 sm:$0xff]  }
  0x53   :  { %8760 = vmatmul.mubr.bf16.gmra.mxu1 %v15002_v38  ;;  %8829 = vmatpush1.bf16.msra.mxu0 %v13260_v46  ;;  %v13279_v46 = vld [vmem:[%s21046_s1 + $0x314] ss:$8 sps:$4 sm:$0xff]   ;;  %21413 = vst [vmem:[#allocation25_spill] sm:$0xff] %v21412_v16  ;;  %v21417_v38 = vshll.u32 %v14640_v50, 16 }
  0x54   :  { %8942 = vmatpush1.bf16.msra.mxu1 %v13263_v33  ;;  %8830 = vmatprep.subr.bf16.mxu0 %v13268_v55  ;;  %v235_v33 = vrot.slane %v21078_v26, 5  ;;  %v21414_v55 = vshrl.u32 %v15038_v39, 16  ;;  %v21415_v26 = vshll.u32 %v15038_v39, 16 }
  0x55   :  { %8943 = vmatprep.subr.bf16.mxu1 %v13271_v54  ;;  %v15097_v54 = vrot.slane %v104_v59, 5  ;;  %8656 = vmatprep.mubr.bf16.mxu0 %v15048_v9  ;;  %v13277_v59 = vld [vmem:[%s21046_s1 + $0x310] ss:$8 sps:$4 sm:$0xff]   ;;  %v15122_v27 = vrot.slane %v21417_v38, 6  ;;  %v12099_v38 = vcombine.high %v14934_v30, %v14939_v31 }
  0x56   :  { %8769 = vmatprep.mubr.bf16.mxu1 %v15052_v42  ;;  %v246_v40 = vrot.slane %v21414_v55, 4  ;;  %v249_v2 = vrot.slane %v21415_v26, 5  ;;  %v15114_v42 = vsel %vm14694_vm2, %v209_v8, %v213_v4  ;;  %v15118_v55 = vsel %vm14694_vm2, %v223_v17, %v227_v21  ;;  %v13285_v8 = vld [vmem:[%s21046_s1 + $0x304] ss:$8 sps:$4 sm:$0xff]  }
  0x57   :  { %21416 = vst [vmem:[#allocation26_spill] sm:$0xff] %v15118_v55  ;;  %v236_v26 = vor.u32 %v235_v33, %v232_v62  ;;  %8831 = vmatpush1.bf16.msra.mxu0 %v13266_v58  ;;  %v15133_v17 = vld [vmem:[%s21045_s0 + $0x100] sm:$0xff]  ;;  %v15137_v62 = vsel %vm15091_vm5, %v482_v61, %v487_v18  ;;  %v21418_v21 = vshll.u32 %v15057_v5, 16  ;;  %v15156_v61 = vld [vmem:[%s21045_s0 + $0x118] sm:$0x33]  ;;  %v491_v18 = vor.u32 %v15122_v27, %v15097_v54 }
  0x58   :  { %8944 = vmatpush1.bf16.msra.mxu1 %v13269_v0  ;;  %v250_v4 = vor.u32 %v249_v2, %v246_v40  ;;  %8832 = vmatprep.subr.bf16.mxu0 %v13276_v29  ;;  %v15146_v2 = vld [vmem:[%s21045_s0 + $0x110] sm:$0xff]  ;;  %v15151_v0 = vld [vmem:[%s21045_s0 + $0x108] sm:$0x33]  ;;  %v12101_v33 = vcombine.high %v15114_v42, %v15118_v55  ;;  %v21419_v40 = vshll.u32 %v15065_v15, 16  ;;  %v21098_v9 = vshrl.u32 %v15133_v17, 16 }
  0x59   :  { %8945 = vmatprep.subr.bf16.mxu1 %v13279_v46  ;;  %v241_v58 = vrot.slane %v21418_v21, 5  ;;  %v13280_v29 = vld [vmem:[%s21046_s1 + $0x200] ss:$8 sps:$4 sm:$0xff]   ;;  %v21099_v47 = vshll.u32 %v15133_v17, 16  ;;  %v237_v54 = vrot.slane %v236_v26, 4  ;;  %v21100_v13 = vshrl.u32 %v15146_v2, 16 }
  0x5a   :  { %v13283_v46 = vld [vmem:[%s21046_s1 + $0x300] ss:$8 sps:$4 sm:$0xff]   ;;  %v255_v21 = vrot.slane %v21419_v40, 5  ;;  %8657 = vmatmul.mubr.bf16.gmra.mxu0 %v15072_v6  ;;  %v251_v27 = vrot.slane %v250_v4, 4  ;;  %v21101_v11 = vshll.u32 %v15146_v2, 16  ;;  %v260_v34 = vrot.slane %v21098_v9, 4 }
  0x5b   :  { %8770 = vmatmul.mubr.bf16.gmra.mxu1 %v15081_v3  ;;  %8833 = vmatpush1.bf16.msra.mxu0 %v13274_v49  ;;  %v13290_v40 = vld [vmem:[%s21046_s1 + $0x2f4] ss:$8 sps:$4 sm:$0xff]   ;;  %v263_v6 = vrot.slane %v21099_v47, 5  ;;  %v493_v3 = vshrl.u32 %v14650_v52, 16  ;;  %v13288_v49 = vld [vmem:[%s21046_s1 + $0x2f0] ss:$8 sps:$4 sm:$0xff]  }
  0x5c   :  { %8946 = vmatpush1.bf16.msra.mxu1 %v13277_v59  ;;  %8834 = vmatprep.subr.bf16.mxu0 %v13282_v14  ;;  %v13293_v26 = vld [vmem:[%s21046_s1 + $0x3f4] ss:$8 sps:$4 sm:$0xff]   ;;  %v274_v59 = vrot.slane %v21100_v13, 4  ;;  %v277_v47 = vrot.slane %v21101_v11, 5  ;;  %v12098_v14 = vcombine.low %v14934_v30, %v14939_v31  ;;  %v13291_v13 = vld [vmem:[%s21046_s1 + $0x3f0] ss:$8 sps:$4 sm:$0xff]   ;;  %v15218_v11 = vcombine.high %v15033_v41, %v15038_v39 }
  0x5d   :  { %8947 = vmatprep.subr.bf16.mxu1 %v13285_v8  ;;  %8666 = vmatprep.mubr.bf16.mxu0 %v12099_v38  ;;  %v264_v9 = vor.u32 %v263_v6, %v260_v34  ;;  %v12100_v8 = vcombine.low %v15114_v42, %v15118_v55  ;;  %v15205_v34 = vsel %vm14694_vm2, %v237_v54, %v241_v58  ;;  %v21422_v38 = vshll.u32 %v14650_v52, 16  ;;  %v13296_v42 = vld [vmem:[%s21046_s1 + $0x2e4] ss:$8 sps:$4 sm:$0xff]  }
  0x5e   :  { %8779 = vmatprep.mubr.bf16.mxu1 %v12101_v33  ;;  %21420 = vst [vmem:[#allocation27_spill] sm:$0xff] %v15205_v34  ;;  %v15209_v6 = vsel %vm14694_vm2, %v251_v27, %v255_v21  ;;  %21423 = vst [vmem:[#allocation29_spill] sm:$0xff] %v15218_v11  ;;  %v278_v4 = vor.u32 %v277_v47, %v274_v59  ;;  %v15223_v58 = vld [vmem:[%s21045_s0 + $0x120] sm:$0xff]  ;;  %v15228_v21 = vld [vmem:[%s21045_s0 + $0x130] sm:$0xff]  ;;  %v21424_v54 = vshll.u32 %v15151_v0, 16  ;;  %v21425_v27 = vshll.u32 %v15156_v61, 16 }
  0x5f   :  { %21421 = vst [vmem:[#allocation28_spill] sm:$0xff] %v15209_v6  ;;  %v496_v33 = vrot.slane %v21422_v38, 6  ;;  %8835 = vmatpush1.bf16.msra.mxu0 %v13280_v29  ;;  %v495_v29 = vrot.slane %v493_v3, 5  ;;  %v13294_v3 = vld [vmem:[%s21046_s1 + $0x2e0] ss:$8 sps:$4 sm:$0xff]   ;;  %v21116_v55 = vshrl.u32 %v15228_v21, 16 }
  0x60   :  { %8948 = vmatpush1.bf16.msra.mxu1 %v13283_v46  ;;  %8836 = vmatprep.subr.bf16.mxu0 %v13290_v40  ;;  %v13299_v46 = vld [vmem:[%s21046_s1 + $0x3e4] ss:$8 sps:$4 sm:$0xff]   ;;  %v269_v47 = vrot.slane %v21424_v54, 5  ;;  %v283_v59 = vrot.slane %v21425_v27, 5  ;;  %v13297_v40 = vld [vmem:[%s21046_s1 + $0x3e0] ss:$8 sps:$4 sm:$0xff]  }
  0x61   :  { %8949 = vmatprep.subr.bf16.mxu1 %v13293_v26  ;;  %v15247_v26 = vcombine.high %v15205_v34, %v15209_v6  ;;  %v265_v54 = vrot.slane %v264_v9, 4  ;;  %v492_v27 = vrot.slane %v491_v18, 4  ;;  %v279_v38 = vrot.slane %v278_v4, 4  ;;  %v15263_v9 = vld [vmem:[%s21045_s0 + $0x138] sm:$0x33] }
  0x62   :  { %8667 = vmatmul.mubr.bf16.gmra.mxu0 %v12098_v14  ;;  %v21427_v53 = vshrl.u32 %v15223_v58, 16  ;;  %v21428_v63 = vshll.u32 %v15223_v58, 16  ;;  %v21115_v20 = vshll.u32 %v15228_v21, 16  ;;  %v302_v18 = vrot.slane %v21116_v55, 4 }
  0x63   :  { %21426 = vst [vmem:[#allocation30_spill] sm:$0xff] %v15247_v26  ;;  %8780 = vmatmul.mubr.bf16.gmra.mxu1 %v12100_v8  ;;  %8837 = vmatpush2.bf16.msra.mxu0 %v13288_v49  ;;  %v497_v4 = vor.u32 %v496_v33, %v495_v29  ;;  %v15283_v14 = vcombine.low %v15205_v34, %v15209_v6  ;;  %v21117_v33 = vshll.u32 %v15253_v32, 16  ;;  %v13302_v29 = vld [vmem:[%s21046_s1 + $0x2d0] ss:$8 sps:$4 sm:$0xff]   ;;  %v21119_v55 = vshll.u32 %v15263_v9, 16 }
  0x64   :  { %v288_v24 = vrot.slane %v21427_v53, 4  ;;  %v291_v12 = vrot.slane %v21428_v63, 5  ;;  %8950 = vmatpush2.bf16.msra.mxu1 %v13291_v13  ;;  %8838 = vmatprep.subr.bf16.mxu0 %v13296_v42  ;;  %v15269_v53 = vcombine.low %v15033_v41, %v15038_v39  ;;  %v13304_v63 = vld [vmem:[%s21046_s1 + $0x2d4] ss:$8 sps:$4 sm:$0xff]   ;;  %v305_v49 = vrot.slane %v21115_v20, 5 }
  0x65   :  { %8951 = vmatprep.subr.bf16.mxu1 %v13299_v46  ;;  %v13307_v13 = vld [vmem:[%s21046_s1 + $0x3d4] ss:$8 sps:$4 sm:$0xff]   ;;  %8676 = vmatprep.mubr.bf16.mxu0 %v15218_v11  ;;  %21430 = vst [vmem:[#allocation32_spill] sm:$0xff] %v15283_v14  ;;  %v15287_v8 = vsel %vm14694_vm2, %v265_v54, %v269_v47  ;;  %v15292_v42 = vsel %vm15091_vm5, %v492_v27, %v497_v4  ;;  %v13305_v46 = vld [vmem:[%s21046_s1 + $0x3d0] ss:$8 sps:$4 sm:$0xff]  }
  0x66   :  { %21429 = vst [vmem:[#allocation31_spill] sm:$0xff] %v15269_v53  ;;  %8789 = vmatprep.mubr.bf16.mxu1 %v15247_v26  ;;  %21431 = vst [vmem:[#allocation33_spill] sm:$0xff] %v15287_v8  ;;  %v15302_v20 = vsel %vm14694_vm2, %v279_v38, %v283_v59  ;;  %v292_v47 = vor.u32 %v291_v12, %v288_v24  ;;  %v306_v54 = vor.u32 %v305_v49, %v302_v18  ;;  %v13310_v27 = vld [vmem:[%s21046_s1 + $0x2c4] ss:$8 sps:$4 sm:$0xff]   ;;  %v13308_v59 = vld [vmem:[%s21046_s1 + $0x2c0] ss:$8 sps:$4 sm:$0xff]  }
  0x67   :  { %21432 = vst [vmem:[#allocation34_spill] sm:$0xff] %v15292_v42  ;;  %21433 = vst [vmem:[#allocation35_spill] sm:$0xff] %v15302_v20  ;;  %8839 = vmatpush2.bf16.msra.mxu0 %v13294_v3  ;;  %v13313_v4 = vld [vmem:[%s21046_s1 + $0x3c4] ss:$8 sps:$4 sm:$0xff]   ;;  %v15316_v12 = vcombine.high %v15133_v17, %v15146_v2  ;;  %v15320_v24 = vcombine.high %v15287_v8, %v15302_v20  ;;  %v297_v38 = vrot.slane %v21117_v33, 5  ;;  %v311_v18 = vrot.slane %v21119_v55, 5 }
  0x68   :  { %8952 = vmatpush2.bf16.msra.mxu1 %v13297_v40  ;;  %8840 = vmatprep.subr.bf16.mxu0 %v13304_v63  ;;  %v293_v3 = vrot.slane %v292_v47, 4  ;;  %v307_v40 = vrot.slane %v306_v54, 4  ;;  %v21436_v63 = vshrl.u32 %v14661_v56, 16  ;;  %v13311_v49 = vld [vmem:[%s21046_s1 + $0x3c0] ss:$8 sps:$4 sm:$0xff]   ;;  %v21437_v33 = vshll.u32 %v14661_v56, 16 }
  0x69   :  { %8953 = vmatprep.subr.bf16.mxu1 %v13307_v13  ;;  %21434 = vst [vmem:[#allocation36_spill] sm:$0xff] %v15316_v12  ;;  %21435 = vst [vmem:[#allocation37_spill] sm:$0xff] %v15320_v24  ;;  %v13318_v47 = vld [vmem:[%s21046_s1 + $0x2b4] ss:$8 sps:$4 sm:$0xff]   ;;  %v13322_v26 = vld [vmem:[%s21046_s1 + $0x2a0] ss:$8 sps:$4 sm:$0xff]  }
  0x6a   :  { %8677 = vmatmul.mubr.bf16.gmra.mxu0 %v15269_v53  ;;  %v15330_v13 = vrot.slane %v21436_v63, 5  ;;  %v500_v53 = vrot.slane %v21437_v33, 6  ;;  %v13321_v54 = vld [vmem:[%s21046_s1 + $0x3b4] ss:$8 sps:$4 sm:$0xff]   ;;  %v15349_v33 = vcombine.low %v15133_v17, %v15146_v2  ;;  %v21440_v63 = vshll.u32 %v14725_v22, 16 }
  0x6b   :  { %8790 = vmatmul.mubr.bf16.gmra.mxu1 %v15283_v14  ;;  %8841 = vmatpush2.bf16.msra.mxu0 %v13302_v29  ;;  %v21438_v29 = vshrl.u32 %v14725_v22, 16  ;;  %v15357_v14 = vcombine.low %v15287_v8, %v15302_v20  ;;  %v21451_v20 = vshll.u32 %v14772_v43, 16 }
  0x6c   :  { %8954 = vmatpush2.bf16.msra.mxu1 %v13305_v46  ;;  %8842 = vmatprep.subr.bf16.mxu0 %v13310_v27  ;;  %21439 = vst [vmem:[#allocation38_spill] sm:$0xff] %v15349_v33  ;;  %v11850_v27 = vrot.slane %v14632_v48, 9  ;;  %v510_v55 = vrot.slane %v21440_v63, 6  ;;  %v15368_v48 = vsel %vm14694_vm2, %v307_v40, %v311_v18  ;;  %v13324_v63 = vld [vmem:[%s21046_s1 + $0x2a4] ss:$8 sps:$4 sm:$0xff]  }
  0x6d   :  { %8955 = vmatprep.subr.bf16.mxu1 %v13313_v4  ;;  %v509_v46 = vrot.slane %v21438_v29, 5  ;;  %8686 = vmatprep.mubr.bf16.mxu0 %v15316_v12  ;;  %v501_v4 = vor.u32 %v500_v53, %v15330_v13  ;;  %21441 = vst [vmem:[#allocation39_spill] sm:$0xff] %v15357_v14  ;;  %v13316_v29 = vld [vmem:[%s21046_s1 + $0x2b0] ss:$8 sps:$4 sm:$0xff]   ;;  %21443 = vst [vmem:[#allocation41_spill] sm:$0xff] %v15368_v48  ;;  %v503_v53 = vshrl.u32 %v14716_v19, 16 }
  0x6e   :  { %8799 = vmatprep.mubr.bf16.mxu1 %v15320_v24  ;;  %v15364_v24 = vsel %vm14694_vm2, %v293_v3, %v297_v38  ;;  %v13319_v13 = vld [vmem:[%s21046_s1 + $0x3b0] ss:$8 sps:$4 sm:$0xff]   ;;  %v21444_v38 = vmov 0  ;;  %v382_v3 = vrot.slane %v14645_v51, 5  ;;  %v13327_v18 = vld [vmem:[%s21046_s1 + $0x3a4] ss:$8 sps:$4 sm:$0xff]   ;;  %v15395_v51 = vcombine.high %v15223_v58, %v15228_v21 }
  0x6f   :  { %21442 = vst [vmem:[#allocation40_spill] sm:$0xff] %v15364_v24  ;;  %8843 = vmatpush2.bf16.msra.mxu0 %v13308_v59  ;;  %v21445_v38 = vsel %vm15379_vm8, 4294967295, %v21444_v38  ;;  %v511_v40 = vor.u32 %v510_v55, %v509_v46  ;;  %v513_v59 = vshrl.u32 %v14730_v23, 16  ;;  %v386_v12 = vrot.slane %v14650_v52, 5 }
  0x70   :  { %8956 = vmatpush2.bf16.msra.mxu1 %v13311_v49  ;;  %21446 = vst [vmem:[#allocation42_spill] sm:$0xff] %v21445_v38  ;;  %8844 = vmatprep.subr.bf16.mxu0 %v13318_v47  ;;  %v11851_v49 = vrot.slane %v14640_v50, 9  ;;  %21447 = vst [vmem:[#allocation43_spill] sm:$0xff] %v15395_v51  ;;  %v15399_v55 = vcombine.high %v15364_v24, %v15368_v48  ;;  %v13325_v50 = vld [vmem:[%s21046_s1 + $0x3a0] ss:$8 sps:$4 sm:$0xff]   ;;  %v505_v52 = vrot.slane %v503_v53, 5 }
  0x71   :  { %8957 = vmatprep.subr.bf16.mxu1 %v13321_v54  ;;  %v21449_v47 = vshll.u32 %v14716_v19, 16  ;;  %v21450_v46 = vshrl.u32 %v14772_v43, 16  ;;  %v15414_v6 = vrot.slane %v21451_v20, 6  ;;  %v15421_v53 = vsel %vm15379_vm8, %v11850_v27, %v382_v3 }
  0x72   :  { %21448 = vst [vmem:[#allocation44_spill] sm:$0xff] %v15399_v55  ;;  %8687 = vmatmul.mubr.bf16.gmra.mxu0 %v15349_v33  ;;  %v515_v33 = vrot.slane %v513_v59, 5  ;;  %v15427_v20 = vcombine.low %v15223_v58, %v15228_v21  ;;  %v11852_v27 = vrot.slane %v14661_v56, 9  ;;  %v390_v3 = vrot.slane %v14716_v19, 5  ;;  %v13330_v19 = vld [vmem:[%s21046_s1 + $0x290] ss:$8 sps:$4 sm:$0xff]  }
  0x73   :  { %8800 = vmatmul.mubr.bf16.gmra.mxu1 %v15357_v14  ;;  %v506_v54 = vrot.slane %v21449_v47, 6  ;;  %v15410_v11 = vrot.slane %v21450_v46, 5  ;;  %8845 = vmatpush2.bf16.msra.mxu0 %v13316_v29  ;;  %v13332_v14 = vld [vmem:[%s21046_s1 + $0x294] ss:$8 sps:$4 sm:$0xff]   ;;  %v21452_v47 = vshll.u32 %v14730_v23, 16  ;;  %v15453_v56 = vcombine.low %v15364_v24, %v15368_v48 }
  0x74   :  { %8958 = vmatpush2.bf16.msra.mxu1 %v13319_v13  ;;  %8846 = vmatprep.subr.bf16.mxu0 %v13324_v63  ;;  %21453 = vst [vmem:[#allocation45_spill] sm:$0xff] %v15427_v20  ;;  %v13335_v29 = vld [vmem:[%s21046_s1 + $0x394] ss:$8 sps:$4 sm:$0xff]   ;;  %v15434_v13 = vsel %vm15379_vm8, %v11851_v49, %v386_v12  ;;  %v11853_v63 = vrot.slane %v14725_v22, 9  ;;  %v21455_v12 = vshll.u32 %v14777_v44, 16  ;;  %v394_v22 = vrot.slane %v14730_v23, 5 }
  0x75   :  { %v516_v8 = vrot.slane %v21452_v47, 6  ;;  %8959 = vmatprep.subr.bf16.mxu1 %v13327_v18  ;;  %8696 = vmatprep.mubr.bf16.mxu0 %v15395_v51  ;;  %v21454_v18 = vshrl.u32 %v14777_v44, 16  ;;  %21456 = vst [vmem:[#allocation46_spill] sm:$0xff] %v15453_v56  ;;  %v502_v47 = vrot.slane %v501_v4, 4  ;;  %v507_v59 = vor.u32 %v506_v54, %v505_v52  ;;  %v13338_v23 = vld [vmem:[%s21046_s1 + $0x284] ss:$8 sps:$4 sm:$0xff]  }
  0x76   :  { %8809 = vmatprep.mubr.bf16.mxu1 %v15399_v55  ;;  %v15449_v49 = vrot.slane %v21455_v12, 6  ;;  %v512_v12 = vrot.slane %v511_v40, 4  ;;  %v523_v51 = vshrl.u32 %v14782_v45, 16  ;;  %v533_v4 = vshrl.u32 %v14794_v60, 16 }
  0x77   :  { %v15445_v46 = vrot.slane %v21454_v18, 5  ;;  %8847 = vmatpush2.bf16.msra.mxu0 %v13322_v26  ;;  %v13333_v18 = vld [vmem:[%s21046_s1 + $0x390] ss:$8 sps:$4 sm:$0xff]   ;;  %v517_v55 = vor.u32 %v516_v8, %v515_v33  ;;  %v13341_v26 = vld [vmem:[%s21046_s1 + $0x384] ss:$8 sps:$4 sm:$0xff]   ;;  %v11903_v33 = vcombine.high %v15421_v53, %v15434_v13  ;;  %v15481_v40 = vsel %vm15379_vm8, %v11852_v27, %v390_v3 }
  0x78   :  { %8960 = vmatpush2.bf16.msra.mxu1 %v13325_v50  ;;  %8848 = vmatprep.subr.bf16.mxu0 %v13332_v14  ;;  %v13336_v8 = vld [vmem:[%s21046_s1 + $0x280] ss:$8 sps:$4 sm:$0xff]   ;;  %v11905_v14 = vcombine.high %v15137_v62, %v15292_v42  ;;  %v15490_v52 = vsel %vm15379_vm8, %v11853_v63, %v394_v22  ;;  %v15494_v54 = vsel %vm15091_vm5, %v502_v47, %v507_v59  ;;  %v21459_v3 = vshll.u32 %v14840_v28, 16 }
  0x79   :  { %v531_v48 = vor.u32 %v15449_v49, %v15445_v46  ;;  %8961 = vmatprep.subr.bf16.mxu1 %v13335_v29  ;;  %v13339_v50 = vld [vmem:[%s21046_s1 + $0x380] ss:$8 sps:$4 sm:$0xff]   ;;  %21457 = vst [vmem:[#allocation47_spill] sm:$0xff] %v15494_v54  ;;  %v21458_v29 = vshrl.u32 %v14840_v28, 16  ;;  %v13344_v49 = vld [vmem:[%s21046_s1 + $0x474] ss:$8 sps:$4 sm:$0xff]   ;;  %v15509_v63 = vsel %vm15091_vm5, %v512_v12, %v517_v55 }
  0x7a   :  { %8697 = vmatmul.mubr.bf16.gmra.mxu0 %v15427_v20  ;;  %v15502_v46 = vrot.slane %v21459_v3, 6  ;;  %21460 = vst [vmem:[#allocation48_spill] sm:$0xff] %v15509_v63  ;;  %v525_v59 = vrot.slane %v523_v51, 5  ;;  %v21461_v22 = vshll.u32 %v14782_v45, 16  ;;  %v21463_v3 = vshll.u32 %v14794_v60, 16 }
  0x7b   :  { %8810 = vmatmul.mubr.bf16.gmra.mxu1 %v15453_v56  ;;  %v15498_v27 = vrot.slane %v21458_v29, 5  ;;  %8849 = vmatpush2.bf16.msra.mxu0 %v13330_v19  ;;  %v21462_v29 = vshrl.u32 %v14859_v35, 16  ;;  %v13347_v19 = vld [vmem:[%s21046_s1 + $0x574] ss:$8 sps:$4 sm:$0xff]   ;;  %v21464_v55 = vshll.u32 %v14859_v35, 16  ;;  %v21469_v24 = vshll.u32 %v14934_v30, 16 }
  0x7c   :  { %8962 = vmatpush2.bf16.msra.mxu1 %v13333_v18  ;;  %v526_v47 = vrot.slane %v21461_v22, 6  ;;  %8850 = vmatprep.subr.bf16.mxu0 %v13338_v23  ;;  %v535_v18 = vrot.slane %v533_v4, 5  ;;  %v536_v20 = vrot.slane %v21463_v3, 6  ;;  %v11902_v22 = vcombine.low %v15421_v53, %v15434_v13  ;;  %v13345_v4 = vld [vmem:[%s21046_s1 + $0x570] ss:$8 sps:$4 sm:$0xff]  }
  0x7d   :  { %v15515_v56 = vrot.slane %v21462_v29, 5  ;;  %8963 = vmatprep.subr.bf16.mxu1 %v13341_v26  ;;  %v15526_v12 = vrot.slane %v21464_v55, 6  ;;  %8852 = vmatprep.mubr.bf16.mxu0 %v11903_v33  ;;  %v11904_v23 = vcombine.low %v15137_v62, %v15292_v42  ;;  %v13342_v26 = vld [vmem:[%s21046_s1 + $0x470] ss:$8 sps:$4 sm:$0xff]   ;;  %v15540_v29 = vcombine.high %v15481_v40, %v15490_v52 }
  0x7e   :  { %8965 = vmatprep.mubr.bf16.mxu1 %v11905_v14  ;;  %v11854_v3 = vrot.slane %v14772_v43, 9  ;;  %v15547_v62 = vcombine.high %v15494_v54, %v15509_v63  ;;  %v398_v33 = vrot.slane %v14782_v45, 5  ;;  %v11855_v14 = vrot.slane %v14777_v44, 9  ;;  %v13350_v43 = vld [vmem:[%s21046_s1 + $0x464] ss:$8 sps:$4 sm:$0xff]  }
  0x7f   :  { %21465 = vst [vmem:[#allocation49_spill] sm:$0xff] %v15540_v29  ;;  %8851 = vmatpush2.bf16.msra.mxu0 %v13336_v8  ;;  %v402_v55 = vrot.slane %v14794_v60, 5  ;;  %v13353_v8 = vld [vmem:[%s21046_s1 + $0x564] ss:$8 sps:$4 sm:$0xff]   ;;  %v527_v51 = vor.u32 %v526_v47, %v525_v59  ;;  %v532_v45 = vrot.slane %v531_v48, 4  ;;  %v537_v42 = vor.u32 %v536_v20, %v535_v18 }
  0x80   :  { %8964 = vmatpush2.bf16.msra.mxu1 %v13339_v50  ;;  %21466 = vst [vmem:[#allocation50_spill] sm:$0xff] %v15547_v62  ;;  %9046 = vmatprep.subr.bf16.mxu0 %v13344_v49  ;;  %v21467_v50 = vor.u32 %v15414_v6, %v15410_v11  ;;  %v543_v44 = vshrl.u32 %v14864_v36, 16  ;;  %v553_v60 = vshrl.u32 %v14869_v37, 16  ;;  %v21468_v49 = vshrl.u32 %v14934_v30, 16  ;;  %v13348_v11 = vld [vmem:[%s21046_s1 + $0x460] ss:$8 sps:$4 sm:$0xff]  }
  0x81   :  { %9159 = vmatprep.subr.bf16.mxu1 %v13347_v19  ;;  %v15569_v34 = vrot.slane %v21469_v24, 6  ;;  %v13351_v6 = vld [vmem:[%s21046_s1 + $0x560] ss:$8 sps:$4 sm:$0xff]   ;;  %v15579_v48 = vsel %vm15379_vm8, %v11854_v3, %v398_v33  ;;  %v21470_v20 = vshrl.u32 %v14939_v31, 16  ;;  %v21471_v47 = vshll.u32 %v14939_v31, 16 }
  0x82   :  { %v522_v53 = vrot.slane %v21467_v50, 4  ;;  %v15565_v19 = vrot.slane %v21468_v49, 5  ;;  %8853 = vmatmul.mubr.bf16.vlgmr.msra.gmra.mxu0 %v11902_v22  ;;  %v13356_v22 = vld [vmem:[%s21046_s1 + $0x454] ss:$8 sps:$4 sm:$0xff]   ;;  %v15607_v31 = vsel %vm15091_vm5, %v532_v45, %v537_v42  ;;  %v21474_v3 = vshll.u32 %v14864_v36, 16 }
  0x83   :  { %8966 = vmatmul.mubr.bf16.vlgmr.msra.gmra.mxu1 %v11904_v23  ;;  %9047 = vmatpush1.bf16.msra.mxu0 %v13342_v26  ;;  %v15585_v59 = vrot.slane %v21470_v20, 5  ;;  %v15589_v18 = vrot.slane %v21471_v47, 6  ;;  %v13359_v23 = vld [vmem:[%s21046_s1 + $0x554] ss:$8 sps:$4 sm:$0xff]   ;;  %v15599_v26 = vsel %vm15379_vm8, %v11855_v14, %v402_v55  ;;  %21473 = vst [vmem:[#allocation52_spill] sm:$0xff] %v15607_v31  ;;  %v555_v55 = vrot.slane %v553_v60, 5 }
  0x84   :  { %9160 = vmatpush1.bf16.msra.mxu1 %v13345_v4  ;;  %9048 = vmatprep.subr.bf16.mxu0 %v13350_v43  ;;  %v15603_v4 = vsel %vm15091_vm5, %v522_v53, %v527_v51  ;;  %v546_v33 = vrot.slane %v21474_v3, 6  ;;  %v13354_v14 = vld [vmem:[%s21046_s1 + $0x450] ss:$8 sps:$4 sm:$0xff]   ;;  %v545_v53 = vrot.slane %v543_v44, 5  ;;  %v21475_v42 = vshll.u32 %v14869_v37, 16 }
  0x85   :  { %9161 = vmatprep.subr.bf16.mxu1 %v13353_v8  ;;  %21472 = vst [vmem:[#allocation51_spill] sm:$0xff] %v15603_v4  ;;  %8862 = vmatprep.mubr.bf16.mxu0 %v15540_v29  ;;  %v13357_v51 = vld [vmem:[%s21046_s1 + $0x550] ss:$8 sps:$4 sm:$0xff]   ;;  %v15625_v50 = vcombine.low %v15481_v40, %v15490_v52  ;;  %v15629_v45 = vcombine.low %v15494_v54, %v15509_v63  ;;  %v13362_v49 = vld [vmem:[%s21046_s1 + $0x444] ss:$8 sps:$4 sm:$0xff]   ;;  %v11856_v20 = vrot.slane %v14840_v28, 9 }
  0x86   :  { %8975 = vmatprep.mubr.bf16.mxu1 %v15547_v62  ;;  %v556_v43 = vrot.slane %v21475_v42, 6  ;;  %v13365_v44 = vld [vmem:[%s21046_s1 + $0x544] ss:$8 sps:$4 sm:$0xff]   ;;  %v15639_v60 = vcombine.high %v15579_v48, %v15599_v26  ;;  %v406_v47 = vrot.slane %v14864_v36, 5  ;;  %v11857_v3 = vrot.slane %v14859_v35, 9 }
  0x87   :  { %21476 = vst [vmem:[#allocation53_spill] sm:$0xff] %v15625_v50  ;;  %21477 = vst [vmem:[#allocation54_spill] sm:$0xff] %v15629_v45  ;;  %9049 = vmatpush1.bf16.msra.mxu0 %v13348_v11  ;;  %v15646_v11 = vcombine.high %v15603_v4, %v15607_v31  ;;  %v21480_v42 = vshrl.u32 %v15033_v41, 16  ;;  %v21481_v24 = vshll.u32 %v15033_v41, 16  ;;  %v21482_v28 = vor.u32 %v15502_v46, %v15498_v27 }
  0x88   :  { %9162 = vmatpush1.bf16.msra.mxu1 %v13351_v6  ;;  %21478 = vst [vmem:[#allocation55_spill] sm:$0xff] %v15639_v60  ;;  %9050 = vmatprep.subr.bf16.mxu0 %v13356_v22  ;;  %v410_v6 = vrot.slane %v14869_v37, 5  ;;  %v547_v36 = vor.u32 %v546_v33, %v545_v53  ;;  %v21483_v22 = vor.u32 %v15526_v12, %v15515_v56  ;;  %v13360_v37 = vld [vmem:[%s21046_s1 + $0x440] ss:$8 sps:$4 sm:$0xff]   ;;  %v21484_v46 = vshrl.u32 %v15038_v39, 16 }
  0x89   :  { %9163 = vmatprep.subr.bf16.mxu1 %v13359_v23  ;;  %21479 = vst [vmem:[#allocation56_spill] sm:$0xff] %v15646_v11  ;;  %v15651_v8 = vrot.slane %v21480_v42, 5  ;;  %v15655_v62 = vrot.slane %v21481_v24, 6  ;;  %v542_v35 = vrot.slane %v21482_v28, 4  ;;  %v557_v29 = vor.u32 %v556_v43, %v555_v55  ;;  %v13363_v12 = vld [vmem:[%s21046_s1 + $0x540] ss:$8 sps:$4 sm:$0xff]  }
  0x8a   :  { %v552_v23 = vrot.slane %v21483_v22, 4  ;;  %8863 = vmatmul.mubr.bf16.gmra.mxu0 %v15625_v50  ;;  %v563_v24 = vshrl.u32 %v14962_v57, 16  ;;  %v573_v42 = vshrl.u32 %v14967_v1, 16  ;;  %v15674_v56 = vrot.slane %v21484_v46, 5  ;;  %v13369_v22 = vld [vmem:[%s21046_s1 + $0x530] ss:$8 sps:$4 sm:$0xff]  }
  0x8b   :  { %8976 = vmatmul.mubr.bf16.gmra.mxu1 %v15629_v45  ;;  %9051 = vmatpush1.bf16.msra.mxu0 %v13354_v14  ;;  %v15681_v33 = vcombine.low %v15579_v48, %v15599_v26  ;;  %v21486_v53 = vshll.u32 %v15038_v39, 16  ;;  %v15689_v43 = vcombine.low %v15603_v4, %v15607_v31  ;;  %v13368_v14 = vld [vmem:[%s21046_s1 + $0x434] ss:$8 sps:$4 sm:$0xff]   ;;  %v15699_v28 = vsel %vm15379_vm8, %v11856_v20, %v406_v47  ;;  %v13375_v31 = vld [vmem:[%s21046_s1 + $0x520] ss:$8 sps:$4 sm:$0xff]  }
  0x8c   :  { %9164 = vmatpush1.bf16.msra.mxu1 %v13357_v51  ;;  %9052 = vmatprep.subr.bf16.mxu0 %v13362_v49  ;;  %v13371_v51 = vld [vmem:[%s21046_s1 + $0x534] ss:$8 sps:$4 sm:$0xff]   ;;  %v15703_v49 = vsel %vm15379_vm8, %v11857_v3, %v410_v6  ;;  %v15715_v20 = vsel %vm15091_vm5, %v542_v35, %v547_v36  ;;  %v15719_v47 = vsel %vm15091_vm5, %v552_v23, %v557_v29  ;;  %v21488_v3 = vshll.u32 %v14962_v57, 16  ;;  %v13377_v29 = vld [vmem:[%s21046_s1 + $0x524] ss:$8 sps:$4 sm:$0xff]  }
  0x8d   :  { %21485 = vst [vmem:[#allocation57_spill] sm:$0xff] %v15681_v33  ;;  %v15685_v55 = vrot.slane %v21486_v53, 6  ;;  %9165 = vmatprep.subr.bf16.mxu1 %v13365_v44  ;;  %21487 = vst [vmem:[#allocation58_spill] sm:$0xff] %v15689_v43  ;;  %8872 = vmatprep.mubr.bf16.mxu0 %v15639_v60  ;;  %v13366_v44 = vld [vmem:[%s21046_s1 + $0x430] ss:$8 sps:$4 sm:$0xff]   ;;  %v565_v27 = vrot.slane %v563_v24, 5  ;;  %v15739_v23 = vcombine.high %v15699_v28, %v15703_v49 }
  0x8e   :  { %8985 = vmatprep.mubr.bf16.mxu1 %v15646_v11  ;;  %v566_v6 = vrot.slane %v21488_v3, 6  ;;  %v13374_v53 = vld [vmem:[%s21046_s1 + $0x424] ss:$8 sps:$4 sm:$0xff]   ;;  %v575_v11 = vrot.slane %v573_v42, 5  ;;  %v21489_v60 = vshll.u32 %v14967_v1, 16  ;;  %v21490_v36 = vshrl.u32 %v15133_v17, 16 }
  0x8f   :  { %9053 = vmatpush1.bf16.msra.mxu0 %v13360_v37  ;;  %21491 = vst [vmem:[#allocation59_spill] sm:$0xff] %v15739_v23  ;;  %v11858_v24 = vrot.slane %v14934_v30, 9  ;;  %v583_v42 = vshrl.u32 %v15057_v5, 16  ;;  %v414_v37 = vrot.slane %v14962_v57, 5  ;;  %v418_v46 = vrot.slane %v14967_v1, 5 }
  0x90   :  { %v576_v35 = vrot.slane %v21489_v60, 6  ;;  %v15732_v45 = vrot.slane %v21490_v36, 5  ;;  %9166 = vmatpush1.bf16.msra.mxu1 %v13363_v12  ;;  %v21492_v60 = vshll.u32 %v15133_v17, 16  ;;  %9054 = vmatprep.subr.bf16.mxu0 %v13368_v14  ;;  %v15751_v12 = vld [vmem:[%s21045_s0 + $0xd0] sm:$0xff]  ;;  %v593_v30 = vshrl.u32 %v15065_v15, 16 }
  0x91   :  { %9167 = vmatprep.subr.bf16.mxu1 %v13371_v51  ;;  %v11859_v36 = vrot.slane %v15751_v12, 9  ;;  %v13372_v17 = vld [vmem:[%s21046_s1 + $0x420] ss:$8 sps:$4 sm:$0xff]   ;;  %v15761_v14 = vcombine.high %v15715_v20, %v15719_v47  ;;  %v21494_v51 = vshrl.u32 %v15146_v2, 16  ;;  %v21495_v50 = vshll.u32 %v15146_v2, 16 }
  0x92   :  { %v15745_v3 = vrot.slane %v21492_v60, 6  ;;  %8873 = vmatmul.mubr.bf16.gmra.mxu0 %v15681_v33  ;;  %v21496_v63 = vor.u32 %v15569_v34, %v15565_v19  ;;  %v567_v4 = vor.u32 %v566_v6, %v565_v27  ;;  %v577_v10 = vor.u32 %v576_v35, %v575_v11 }
  0x93   :  { %21493 = vst [vmem:[#allocation60_spill] sm:$0xff] %v15761_v14  ;;  %v15767_v60 = vrot.slane %v21494_v51, 5  ;;  %v15771_v1 = vrot.slane %v21495_v50, 6  ;;  %8986 = vmatmul.mubr.bf16.gmra.mxu1 %v15689_v43  ;;  %v21497_v51 = vor.u32 %v15589_v18, %v15585_v59  ;;  %9055 = vmatpush1.bf16.msra.mxu0 %v13366_v44  ;;  %v15786_v50 = vcombine.low %v15699_v28, %v15703_v49  ;;  %v13380_v43 = vld [vmem:[%s21046_s1 + $0x414] ss:$8 sps:$4 sm:$0xff]  }
  0x94   :  { %v562_v57 = vrot.slane %v21496_v63, 4  ;;  %9168 = vmatpush1.bf16.msra.mxu1 %v13369_v22  ;;  %v585_v33 = vrot.slane %v583_v42, 5  ;;  %v21499_v34 = vshll.u32 %v15057_v5, 16  ;;  %9056 = vmatprep.subr.bf16.mxu0 %v13374_v53  ;;  %v13383_v59 = vld [vmem:[%s21046_s1 + $0x514] ss:$8 sps:$4 sm:$0xff]   ;;  %v15800_v18 = vsel %vm15379_vm8, %v11858_v24, %v414_v37 }
  0x95   :  { %v572_v54 = vrot.slane %v21497_v51, 4  ;;  %21498 = vst [vmem:[#allocation61_spill] sm:$0xff] %v15786_v50  ;;  %v611_v19 = vor.u32 %v15771_v1, %v15767_v60  ;;  %9169 = vmatprep.subr.bf16.mxu1 %v13377_v29  ;;  %v15804_v11 = vsel %vm15379_vm8, %v11859_v36, %v418_v46  ;;  %v595_v27 = vrot.slane %v593_v30, 5  ;;  %8882 = vmatprep.mubr.bf16.mxu0 %v15739_v23  ;;  %v13378_v53 = vld [vmem:[%s21046_s1 + $0x410] ss:$8 sps:$4 sm:$0xff]  }
  0x96   :  { %v586_v63 = vrot.slane %v21499_v34, 6  ;;  %v21500_v44 = vshll.u32 %v15065_v15, 16  ;;  %8995 = vmatprep.mubr.bf16.mxu1 %v15761_v14  ;;  %v15812_v6 = vcombine.low %v15715_v20, %v15719_v47  ;;  %v11860_v35 = vrot.slane %v15033_v41, 9  ;;  %v13381_v24 = vld [vmem:[%s21046_s1 + $0x510] ss:$8 sps:$4 sm:$0xff]  }
  0x97   :  { %v422_v46 = vrot.slane %v15057_v5, 5  ;;  %v11861_v29 = vrot.slane %v15038_v39, 9  ;;  %v15825_v42 = vsel %vm15091_vm5, %v562_v57, %v567_v4  ;;  %v15829_v37 = vsel %vm15091_vm5, %v572_v54, %v577_v10  ;;  %9057 = vmatpush1.bf16.msra.mxu0 %v13372_v17  ;;  %v13386_v39 = vld [vmem:[%s21046_s1 + $0x404] ss:$8 sps:$4 sm:$0xff]  }
  0x98   :  { %v596_v22 = vrot.slane %v21500_v44, 6  ;;  %21501 = vst [vmem:[#allocation62_spill] sm:$0xff] %v15812_v6  ;;  %v21502_v36 = vshrl.u32 %v15223_v58, 16  ;;  %v21503_v41 = vshll.u32 %v15223_v58, 16  ;;  %9170 = vmatpush1.bf16.msra.mxu1 %v13375_v31  ;;  %v426_v4 = vrot.slane %v15065_v15, 5  ;;  %9058 = vmatprep.subr.bf16.mxu0 %v13380_v43 }
  0x99   :  { %v21504_v10 = vor.u32 %v15655_v62, %v15651_v8  ;;  %v587_v57 = vor.u32 %v586_v63, %v585_v33  ;;  %v21505_v51 = vor.u32 %v15685_v55, %v15674_v56  ;;  %9171 = vmatprep.subr.bf16.mxu1 %v13383_v59  ;;  %v13389_v58 = vld [vmem:[%s21046_s1 + $0x504] ss:$8 sps:$4 sm:$0xff]   ;;  %v603_v17 = vshrl.u32 %v15151_v0, 16  ;;  %v13384_v59 = vld [vmem:[%s21046_s1 + $0x400] ss:$8 sps:$4 sm:$0xff]  }
  0x9a   :  { %v15833_v30 = vrot.slane %v21502_v36, 5  ;;  %v15837_v5 = vrot.slane %v21503_v41, 6  ;;  %v597_v31 = vor.u32 %v596_v22, %v595_v27  ;;  %v21506_v62 = vshrl.u32 %v15228_v21, 16  ;;  %8883 = vmatmul.mubr.bf16.gmra.mxu0 %v15786_v50 }
  0x9b   :  { %v582_v54 = vrot.slane %v21504_v10, 4  ;;  %v592_v34 = vrot.slane %v21505_v51, 4  ;;  %v12103_v56 = vcombine.high %v15800_v18, %v15804_v11  ;;  %v12105_v33 = vcombine.high %v15825_v42, %v15829_v37  ;;  %8996 = vmatmul.mubr.bf16.gmra.mxu1 %v15812_v6  ;;  %9059 = vmatpush1.bf16.msra.mxu0 %v13378_v53  ;;  %v13392_v53 = vld [vmem:[%s21046_s1 + $0x4f4] ss:$8 sps:$4 sm:$0xff]  }
  0x9c   :  { %v15857_v8 = vrot.slane %v21506_v62, 5  ;;  %v613_v55 = vshrl.u32 %v15156_v61, 16  ;;  %v21507_v43 = vshll.u32 %v15228_v21, 16  ;;  %v15875_v27 = vsel %vm15379_vm8, %v11860_v35, %v422_v46  ;;  %9172 = vmatpush1.bf16.msra.mxu1 %v13381_v24  ;;  %v13387_v21 = vld [vmem:[%s21046_s1 + $0x500] ss:$8 sps:$4 sm:$0xff]   ;;  %9060 = vmatprep.subr.bf16.mxu0 %v13386_v39 }
  0x9d   :  { %v15882_v44 = vsel %vm15379_vm8, %v11861_v29, %v426_v4  ;;  %9173 = vmatprep.subr.bf16.mxu1 %v13389_v58  ;;  %v13395_v35 = vld [vmem:[%s21046_s1 + $0x5f4] ss:$8 sps:$4 sm:$0xff]   ;;  %v15894_v46 = vsel %vm15091_vm5, %v582_v54, %v587_v57  ;;  %v15898_v29 = vsel %vm15091_vm5, %v592_v34, %v597_v31  ;;  %v605_v24 = vrot.slane %v603_v17, 5  ;;  %8892 = vmatprep.mubr.bf16.mxu0 %v12103_v56  ;;  %v13390_v39 = vld [vmem:[%s21046_s1 + $0x4f0] ss:$8 sps:$4 sm:$0xff]  }
  0x9e   :  { %v15866_v63 = vrot.slane %v21507_v43, 6  ;;  %21508 = vst [vmem:[#allocation63_spill] sm:$0xff] %v15898_v29  ;;  %v21509_v36 = vshll.u32 %v15151_v0, 16  ;;  %9005 = vmatprep.mubr.bf16.mxu1 %v12105_v33  ;;  %v615_v4 = vrot.slane %v613_v55, 5  ;;  %v21510_v10 = vshll.u32 %v15156_v61, 16  ;;  %v15910_v54 = vld [vmem:[%s21045_s0 + $0x10] sm:$0xff] }
  0x9f   :  { %v11867_v57 = vrot.slane %v15910_v54, 10  ;;  %v14384_v34 = vld [vmem:[%s21045_s0 + $0x18] sm:$0x33]  ;;  %v12102_v31 = vcombine.low %v15800_v18, %v15804_v11  ;;  %v12104_v17 = vcombine.low %v15825_v42, %v15829_v37  ;;  %v15925_v62 = vcombine.high %v15875_v27, %v15882_v44  ;;  %v15936_v18 = vld [vmem:[%s21045_s0 + $0x20] sm:$0xff]  ;;  %9061 = vmatpush1.bf16.msra.mxu0 %v13384_v59  ;;  %v14387_v59 = vld [vmem:[%s21045_s0 + $0x28] sm:$0x33] }
  0xa0   :  { %v606_v41 = vrot.slane %v21509_v36, 6  ;;  %v616_v51 = vrot.slane %v21510_v10, 6  ;;  %v680_v58 = vrot.slane %v14384_v34, 6  ;;  %v13393_v61 = vld [vmem:[%s21046_s1 + $0x5f0] ss:$8 sps:$4 sm:$0xff]   ;;  %v21512_v56 = vmov 0  ;;  %9174 = vmatpush1.bf16.msra.mxu1 %v13387_v21  ;;  %9062 = vmatprep.subr.bf16.mxu0 %v13392_v53 }
  0xa1   :  { %21511 = vst [vmem:[#allocation64_spill] sm:$0xff] %v15925_v62  ;;  %v21513_v56 = vsel %vm15929_vm11, 4294967295, %v21512_v56  ;;  %v11868_v42 = vrot.slane %v15936_v18, 10  ;;  %v13398_v33 = vld [vmem:[%s21046_s1 + $0x4e4] ss:$8 sps:$4 sm:$0xff]   ;;  %v430_v36 = vrot.slane %v15151_v0, 5  ;;  %9175 = vmatprep.subr.bf16.mxu1 %v13395_v35  ;;  %v15958_v22 = vcombine.high %v15894_v46, %v15898_v29 }
  0xa2   :  { %21514 = vst [vmem:[#allocation65_spill] sm:$0xff] %v21513_v56  ;;  %v15945_v55 = vld [vmem:[%s21045_s0 + $0x100] sm:$0xff]  ;;  %v11863_v10 = vrot.slane %v15146_v2, 9  ;;  %v684_v21 = vrot.slane %v14387_v59, 6  ;;  %v15963_v0 = vld [vmem:[%s21045_s0 + $0x118] sm:$0x33]  ;;  %v21516_v59 = vor.u32 %v15745_v3, %v15732_v45  ;;  %v607_v35 = vor.u32 %v606_v41, %v605_v24  ;;  %8893 = vmatmul.mubr.bf16.gmra.mxu0 %v12102_v31 }
  0xa3   :  { %v11862_v43 = vrot.slane %v15945_v55, 9  ;;  %v13401_v34 = vld [vmem:[%s21046_s1 + $0x5e4] ss:$8 sps:$4 sm:$0xff]   ;;  %21515 = vst [vmem:[#allocation66_spill] sm:$0xff] %v15958_v22  ;;  %v434_v2 = vrot.slane %v15963_v0, 5  ;;  %v612_v15 = vrot.slane %v611_v19, 4  ;;  %v617_v6 = vor.u32 %v616_v51, %v615_v4  ;;  %9006 = vmatmul.mubr.bf16.gmra.mxu1 %v12104_v17  ;;  %9063 = vmatpush2.bf16.msra.mxu0 %v13390_v39 }
  0xa4   :  { %v602_v53 = vrot.slane %v21516_v59, 4  ;;  %v15974_v50 = vsel %vm15929_vm11, %v11867_v57, %v680_v58  ;;  %v15978_v14 = vsel %vm15929_vm11, %v11868_v42, %v684_v21  ;;  %v13396_v45 = vld [vmem:[%s21046_s1 + $0x4e0] ss:$8 sps:$4 sm:$0xff]   ;;  %v623_v3 = vshrl.u32 %v15253_v32, 16  ;;  %9176 = vmatpush2.bf16.msra.mxu1 %v13393_v61  ;;  %v13404_v41 = vld [vmem:[%s21046_s1 + $0x4d4] ss:$8 sps:$4 sm:$0xff]   ;;  %9064 = vmatprep.subr.bf16.mxu0 %v13398_v33 }
  0xa5   :  { %v633_v60 = vshrl.u32 %v15263_v9, 16  ;;  %v13399_v19 = vld [vmem:[%s21046_s1 + $0x5e0] ss:$8 sps:$4 sm:$0xff]   ;;  %v15992_v24 = vcombine.low %v15875_v27, %v15882_v44  ;;  %v15999_v4 = vcombine.high %v15490_v52, %v15579_v48  ;;  %9177 = vmatprep.subr.bf16.mxu1 %v13401_v34  ;;  %v16003_v39 = vcombine.low %v15894_v46, %v15898_v29  ;;  %v13407_v51 = vld [vmem:[%s21046_s1 + $0x5d4] ss:$8 sps:$4 sm:$0xff]   ;;  %8902 = vmatprep.mubr.bf16.mxu0 %v15925_v62 }
  0xa6   :  { %v431_v57 = vsel %vm15379_vm8, %v11862_v43, %v430_v36  ;;  %v16012_v58 = vsel %vm15379_vm8, %v11863_v10, %v434_v2  ;;  %9015 = vmatprep.mubr.bf16.mxu1 %v15958_v22  ;;  %v16018_v31 = vsel %vm15091_vm5, %v602_v53, %v607_v35  ;;  %v16022_v17 = vsel %vm15091_vm5, %v612_v15, %v617_v6  ;;  %v13402_v43 = vld [vmem:[%s21046_s1 + $0x4d0] ss:$8 sps:$4 sm:$0xff]   ;;  %v13413_v15 = vld [vmem:[%s21046_s1 + $0x5c4] ss:$8 sps:$4 sm:$0xff]   ;;  %v13501_v22 = vld [vmem:[%s21046_s1 + $0x7f4] ss:$8 sps:$4 sm:$0xff]  }
  0xa7   :  { %21517 = vst [vmem:[#allocation67_spill] sm:$0xff] %v15992_v24  ;;  %21518 = vst [vmem:[#allocation68_spill] sm:$0xff] %v15999_v4  ;;  %v21521_v61 = vshll.u32 %v15253_v32, 16  ;;  %v16028_v33 = vcombine.low %v15490_v52, %v15579_v48  ;;  %v625_v36 = vrot.slane %v623_v3, 5  ;;  %v635_v10 = vrot.slane %v633_v60, 5  ;;  %9065 = vmatpush2.bf16.msra.mxu0 %v13396_v45  ;;  %v16054_v59 = vld [vmem:[%s21045_s0 + $0x120] sm:$0xff] }
  0xa8   :  { %21519 = vst [vmem:[#allocation69_spill] sm:$0xff] %v16003_v39  ;;  %21520 = vst [vmem:[#allocation70_spill] sm:$0xff] %v16022_v17  ;;  %v21523_v21 = vshll.u32 %v15263_v9, 16  ;;  %v16037_v6 = vcombine.high %v15599_v26, %v15699_v28  ;;  %9178 = vmatpush2.bf16.msra.mxu1 %v13399_v19  ;;  %v13405_v52 = vld [vmem:[%s21046_s1 + $0x5d0] ss:$8 sps:$4 sm:$0xff]   ;;  %9066 = vmatprep.subr.bf16.mxu0 %v13404_v41  ;;  %v16049_v2 = vcombine.high %v431_v57, %v16012_v58 }
  0xa9   :  { %v626_v42 = vrot.slane %v21521_v61, 6  ;;  %21522 = vst [vmem:[#allocation71_spill] sm:$0xff] %v16028_v33  ;;  %v13410_v48 = vld [vmem:[%s21046_s1 + $0x4c4] ss:$8 sps:$4 sm:$0xff]   ;;  %9179 = vmatprep.subr.bf16.mxu1 %v13407_v51  ;;  %v11864_v53 = vrot.slane %v16054_v59, 9  ;;  %v438_v35 = vrot.slane %v15253_v32, 5  ;;  %v16060_v45 = vcombine.low %v15599_v26, %v15699_v28 }
  0xaa   :  { %v636_v34 = vrot.slane %v21523_v21, 6  ;;  %21524 = vst [vmem:[#allocation72_spill] sm:$0xff] %v16037_v6  ;;  %21525 = vst [vmem:[#allocation73_spill] sm:$0xff] %v16049_v2  ;;  %v16064_v3 = vcombine.high %v16018_v31, %v16022_v17  ;;  %v16069_v60 = vld [vmem:[%s21045_s0 + $0x130] sm:$0xff]  ;;  %v442_v41 = vrot.slane %v15263_v9, 5  ;;  %v21528_v32 = vor.u32 %v15837_v5, %v15833_v30  ;;  %8903 = vmatmul.mubr.bf16.gmra.mxu0 %v15992_v24 }
  0xab   :  { %21526 = vst [vmem:[#allocation74_spill] sm:$0xff] %v16060_v45  ;;  %v11865_v19 = vrot.slane %v16069_v60, 9  ;;  %9016 = vmatmul.mubr.bf16.gmra.mxu1 %v16003_v39  ;;  %v13408_v26 = vld [vmem:[%s21046_s1 + $0x4c0] ss:$8 sps:$4 sm:$0xff]   ;;  %v627_v61 = vor.u32 %v626_v42, %v625_v36  ;;  %v21529_v9 = vor.u32 %v15866_v63, %v15857_v8  ;;  %9067 = vmatpush2.bf16.msra.mxu0 %v13402_v43  ;;  %v13416_v5 = vld [vmem:[%s21046_s1 + $0x4b4] ss:$8 sps:$4 sm:$0xff]  }
  0xac   :  { %21527 = vst [vmem:[#allocation75_spill] sm:$0xff] %v16064_v3  ;;  %v622_v51 = vrot.slane %v21528_v32, 4  ;;  %v13411_v28 = vld [vmem:[%s21046_s1 + $0x5c0] ss:$8 sps:$4 sm:$0xff]   ;;  %v637_v1 = vor.u32 %v636_v34, %v635_v10  ;;  %9180 = vmatpush2.bf16.msra.mxu1 %v13405_v52  ;;  %9068 = vmatprep.subr.bf16.mxu0 %v13410_v48  ;;  %v16093_v32 = vcombine.low %v431_v57, %v16012_v58  ;;  %v13419_v8 = vld [vmem:[%s21046_s1 + $0x5b4] ss:$8 sps:$4 sm:$0xff]  }
  0xad   :  { %v632_v21 = vrot.slane %v21529_v9, 4  ;;  %9181 = vmatprep.subr.bf16.mxu1 %v13413_v15  ;;  %8912 = vmatprep.mubr.bf16.mxu0 %v16049_v2  ;;  %v439_v63 = vsel %vm15379_vm8, %v11864_v53, %v438_v35  ;;  %v16104_v42 = vsel %vm15379_vm8, %v11865_v19, %v442_v41  ;;  %v16110_v36 = vcombine.low %v16018_v31, %v16022_v17  ;;  %v13414_v10 = vld [vmem:[%s21046_s1 + $0x4b0] ss:$8 sps:$4 sm:$0xff]   ;;  %v13422_v53 = vld [vmem:[%s21046_s1 + $0x4a4] ss:$8 sps:$4 sm:$0xff]  }
  0xae   :  { %21530 = vst [vmem:[#allocation76_spill] sm:$0xff] %v16093_v32  ;;  %9025 = vmatprep.mubr.bf16.mxu1 %v16064_v3  ;;  %v13417_v34 = vld [vmem:[%s21046_s1 + $0x5b0] ss:$8 sps:$4 sm:$0xff]   ;;  %v16120_v52 = vsel %vm15091_vm5, %v622_v51, %v627_v61  ;;  %v16127_v15 = vcombine.high %v15882_v44, %v431_v57  ;;  %v13425_v35 = vld [vmem:[%s21046_s1 + $0x5a4] ss:$8 sps:$4 sm:$0xff]   ;;  %v16136_v19 = vcombine.low %v15882_v44, %v431_v57  ;;  %v11875_v39 = vrot.slane %v15751_v12, 10 }
  0xaf   :  { %21531 = vst [vmem:[#allocation77_spill] sm:$0xff] %v16110_v36  ;;  %21532 = vst [vmem:[#allocation78_spill] sm:$0xff] %v16120_v52  ;;  %v16124_v48 = vsel %vm15091_vm5, %v632_v21, %v637_v1  ;;  %9069 = vmatpush2.bf16.msra.mxu0 %v13408_v26  ;;  %v13420_v1 = vld [vmem:[%s21046_s1 + $0x4a0] ss:$8 sps:$4 sm:$0xff]   ;;  %v16142_v41 = vcombine.high %v439_v63, %v16104_v42  ;;  %v16149_v26 = vcombine.high %v16012_v58, %v439_v63  ;;  %v13428_v21 = vld [vmem:[%s21046_s1 + $0x494] ss:$8 sps:$4 sm:$0xff]  }
  0xb0   :  { %21533 = vst [vmem:[#allocation79_spill] sm:$0xff] %v16124_v48  ;;  %21534 = vst [vmem:[#allocation80_spill] sm:$0xff] %v16127_v15  ;;  %9182 = vmatpush2.bf16.msra.mxu1 %v13411_v28  ;;  %9070 = vmatprep.subr.bf16.mxu0 %v13416_v5  ;;  %v16146_v51 = vcombine.high %v16120_v52, %v16124_v48  ;;  %v13423_v44 = vld [vmem:[%s21046_s1 + $0x5a0] ss:$8 sps:$4 sm:$0xff]   ;;  %v16166_v5 = vcombine.low %v16012_v58, %v439_v63  ;;  %v13426_v58 = vld [vmem:[%s21046_s1 + $0x490] ss:$8 sps:$4 sm:$0xff]  }
  0xb1   :  { %9183 = vmatprep.subr.bf16.mxu1 %v13419_v8  ;;  %21535 = vst [vmem:[#allocation81_spill] sm:$0xff] %v16136_v19  ;;  %21536 = vst [vmem:[#allocation82_spill] sm:$0xff] %v16142_v41  ;;  %v14391_v57 = vld [vmem:[%s21045_s0] sm:$0xff]  ;;  %v14392_v61 = vld [vmem:[%s21045_s0 + $0x8] sm:$0x33] }
  0xb2   :  { %21537 = vst [vmem:[#allocation83_spill] sm:$0xff] %v16146_v51  ;;  %21538 = vst [vmem:[#allocation84_spill] sm:$0xff] %v16149_v26  ;;  %8913 = vmatmul.mubr.bf16.gmra.mxu0 %v16093_v32  ;;  %v11866_v28 = vrot.slane %v14391_v57, 10  ;;  %v676_v9 = vrot.slane %v14392_v61, 6  ;;  %v13431_v8 = vld [vmem:[%s21046_s1 + $0x594] ss:$8 sps:$4 sm:$0xff]  }
  0xb3   :  { %9026 = vmatmul.mubr.bf16.gmra.mxu1 %v16110_v36  ;;  %9071 = vmatpush2.bf16.msra.mxu0 %v13414_v10  ;;  %21539 = vst [vmem:[#allocation85_spill] sm:$0xff] %v16166_v5  ;;  %v16174_v10 = vcombine.low %v439_v63, %v16104_v42  ;;  %v13434_v63 = vld [vmem:[%s21046_s1 + $0x484] ss:$8 sps:$4 sm:$0xff]   ;;  %v13432_v61 = vld [vmem:[%s21046_s1 + $0x480] ss:$8 sps:$4 sm:$0xff]  }
  0xb4   :  { %9184 = vmatpush2.bf16.msra.mxu1 %v13417_v34  ;;  %9072 = vmatprep.subr.bf16.mxu0 %v13422_v53  ;;  %v16178_v34 = vcombine.low %v16120_v52, %v16124_v48  ;;  %v13429_v53 = vld [vmem:[%s21046_s1 + $0x590] ss:$8 sps:$4 sm:$0xff]   ;;  %v13437_v57 = vld [vmem:[%s21046_s1 + $0x584] ss:$8 sps:$4 sm:$0xff]   ;;  %v13442_v30 = vld [vmem:[%s21046_s1 + $0x674] ss:$8 sps:$4 sm:$0xff]  }
  0xb5   :  { %9185 = vmatprep.subr.bf16.mxu1 %v13425_v35  ;;  %8922 = vmatprep.mubr.bf16.mxu0 %v16142_v41  ;;  %21540 = vst [vmem:[#allocation86_spill] sm:$0xff] %v16174_v10  ;;  %v677_v35 = vsel %vm15929_vm11, %v11866_v28, %v676_v9  ;;  %v14393_v28 = vld [vmem:[%s21045_s0 + $0x30] sm:$0xff]  ;;  %v14402_v36 = vld [vmem:[%s21045_s0 + $0x78] sm:$0x33]  ;;  %v14404_v3 = vld [vmem:[%s21045_s0 + $0xc8] sm:$0x33] }
  0xb6   :  { %9035 = vmatprep.mubr.bf16.mxu1 %v16146_v51  ;;  %21541 = vst [vmem:[#allocation87_spill] sm:$0xff] %v16178_v34  ;;  %v11907_v43 = vcombine.high %v677_v35, %v15974_v50  ;;  %v11869_v9 = vrot.slane %v14393_v28, 10  ;;  %v11908_v51 = vcombine.low %v15910_v54, %v15936_v18  ;;  %v704_v32 = vrot.slane %v14402_v36, 6 }
  0xb7   :  { %9073 = vmatpush2.bf16.msra.mxu0 %v13420_v1  ;;  %v11909_v1 = vcombine.high %v15910_v54, %v15936_v18  ;;  %v13448_v54 = vld [vmem:[%s21046_s1 + $0x664] ss:$8 sps:$4 sm:$0xff]   ;;  %v708_v2 = vrot.slane %v14404_v3, 6  ;;  %v13484_v3 = vld [vmem:[%s21046_s1 + $0x614] ss:$8 sps:$4 sm:$0xff]  }
  0xb8   :  { %9186 = vmatpush2.bf16.msra.mxu1 %v13423_v44  ;;  %9074 = vmatprep.subr.bf16.mxu0 %v13428_v21  ;;  %v13435_v44 = vld [vmem:[%s21046_s1 + $0x580] ss:$8 sps:$4 sm:$0xff]   ;;  %v14394_v21 = vld [vmem:[%s21045_s0 + $0x38] sm:$0x33]  ;;  %v13451_v18 = vld [vmem:[%s21046_s1 + $0x764] ss:$8 sps:$4 sm:$0xff]  }
  0xb9   :  { %9187 = vmatprep.subr.bf16.mxu1 %v13431_v8  ;;  %v688_v8 = vrot.slane %v14394_v21, 6 }
  0xba   :  { %8923 = vmatmul.mubr.bf16.gmra.mxu0 %v16174_v10  ;;  %v11906_v10 = vcombine.low %v677_v35, %v15974_v50  ;;  %v13446_v35 = vld [vmem:[%s21046_s1 + $0x660] ss:$8 sps:$4 sm:$0xff]  }
  0xbb   :  { %9036 = vmatmul.mubr.bf16.gmra.mxu1 %v16178_v34  ;;  %9075 = vmatpush2.bf16.msra.mxu0 %v13426_v58  ;;  %v13445_v34 = vld [vmem:[%s21046_s1 + $0x774] ss:$8 sps:$4 sm:$0xff]   ;;  %v13440_v58 = vld [vmem:[%s21046_s1 + $0x670] ss:$8 sps:$4 sm:$0xff]  }
  0xbc   :  { %9188 = vmatpush2.bf16.msra.mxu1 %v13429_v53  ;;  %9076 = vmatprep.subr.bf16.mxu0 %v13434_v63  ;;  %v689_v53 = vsel %vm15929_vm11, %v11869_v9, %v688_v8  ;;  %v13443_v63 = vld [vmem:[%s21046_s1 + $0x770] ss:$8 sps:$4 sm:$0xff]  }
  0xbd   :  { %9189 = vmatprep.subr.bf16.mxu1 %v13437_v57  ;;  %9078 = vmatprep.mubr.bf16.mxu0 %v11907_v43  ;;  %v16240_v57 = vcombine.high %v15978_v14, %v689_v53  ;;  %v14397_v9 = vld [vmem:[%s21045_s0 + $0x50] sm:$0xff]  ;;  %v14398_v8 = vld [vmem:[%s21045_s0 + $0x58] sm:$0x33] }
  0xbe   :  { %9191 = vmatprep.mubr.bf16.mxu1 %v11909_v1  ;;  %v14396_v1 = vld [vmem:[%s21045_s0 + $0x48] sm:$0x33]  ;;  %v11871_v21 = vrot.slane %v14397_v9, 10  ;;  %v696_v43 = vrot.slane %v14398_v8, 6 }
  0xbf   :  { %9077 = vmatpush2.bf16.msra.mxu0 %v13432_v61  ;;  %21542 = vst [vmem:[#allocation88_spill] sm:$0xff] %v16240_v57 }
  0xc0   :  { %9190 = vmatpush2.bf16.msra.mxu1 %v13435_v44  ;;  %9272 = vmatprep.subr.bf16.mxu0 %v13442_v30  ;;  %v14395_v30 = vld [vmem:[%s21045_s0 + $0x40] sm:$0xff]  ;;  %v692_v44 = vrot.slane %v14396_v1, 6  ;;  %v13459_v1 = vld [vmem:[%s21046_s1 + $0x754] ss:$8 sps:$4 sm:$0xff]   ;;  %v697_v8 = vsel %vm15929_vm11, %v11871_v21, %v696_v43 }
  0xc1   :  { %9385 = vmatprep.subr.bf16.mxu1 %v13445_v34  ;;  %v16245_v34 = vcombine.high %v14393_v28, %v14395_v30  ;;  %v11870_v61 = vrot.slane %v14395_v30, 10  ;;  %v13460_v43 = vld [vmem:[%s21046_s1 + $0x640] ss:$8 sps:$4 sm:$0xff]  }
  0xc2   :  { %9079 = vmatmul.mubr.bf16.vlgmr.msra.gmra.mxu0 %v11906_v10  ;;  %v13456_v10 = vld [vmem:[%s21046_s1 + $0x654] ss:$8 sps:$4 sm:$0xff]  }
  0xc3   :  { %21543 = vst [vmem:[#allocation89_spill] sm:$0xff] %v16245_v34  ;;  %9192 = vmatmul.mubr.bf16.vlgmr.msra.gmra.mxu1 %v11908_v51  ;;  %9273 = vmatpush1.bf16.msra.mxu0 %v13440_v58  ;;  %v13449_v51 = vld [vmem:[%s21046_s1 + $0x760] ss:$8 sps:$4 sm:$0xff]   ;;  %v16268_v58 = vcombine.low %v15978_v14, %v689_v53 }
  0xc4   :  { %9386 = vmatpush1.bf16.msra.mxu1 %v13443_v63  ;;  %9274 = vmatprep.subr.bf16.mxu0 %v13448_v54  ;;  %v16270_v63 = vcombine.low %v14393_v28, %v14395_v30  ;;  %v13454_v54 = vld [vmem:[%s21046_s1 + $0x650] ss:$8 sps:$4 sm:$0xff]   ;;  %v13462_v28 = vld [vmem:[%s21046_s1 + $0x644] ss:$8 sps:$4 sm:$0xff]  }
  0xc5   :  { %9387 = vmatprep.subr.bf16.mxu1 %v13451_v18  ;;  %9088 = vmatprep.mubr.bf16.mxu0 %v16240_v57  ;;  %21544 = vst [vmem:[#allocation90_spill] sm:$0xff] %v16268_v58  ;;  %v693_v18 = vsel %vm15929_vm11, %v11870_v61, %v692_v44  ;;  %v13465_v30 = vld [vmem:[%s21046_s1 + $0x744] ss:$8 sps:$4 sm:$0xff]  }
  0xc6   :  { %9201 = vmatprep.mubr.bf16.mxu1 %v16245_v34  ;;  %21545 = vst [vmem:[#allocation91_spill] sm:$0xff] %v16270_v63  ;;  %v13457_v34 = vld [vmem:[%s21046_s1 + $0x750] ss:$8 sps:$4 sm:$0xff]   ;;  %v16282_v57 = vcombine.high %v689_v53, %v693_v18  ;;  %v16290_v61 = vcombine.low %v689_v53, %v693_v18  ;;  %v14399_v44 = vld [vmem:[%s21045_s0 + $0x60] sm:$0xff]  ;;  %v14400_v53 = vld [vmem:[%s21045_s0 + $0x68] sm:$0x33] }
  0xc7   :  { %9275 = vmatpush1.bf16.msra.mxu0 %v13446_v35  ;;  %v16295_v35 = vcombine.high %v693_v18, %v697_v8  ;;  %v16300_v21 = vcombine.high %v14397_v9, %v14399_v44  ;;  %v16324_v36 = vcombine.low %v14397_v9, %v14399_v44 }
  0xc8   :  { %9388 = vmatpush1.bf16.msra.mxu1 %v13449_v51  ;;  %21546 = vst [vmem:[#allocation92_spill] sm:$0xff] %v16282_v57  ;;  %9276 = vmatprep.subr.bf16.mxu0 %v13456_v10  ;;  %21547 = vst [vmem:[#allocation93_spill] sm:$0xff] %v16290_v61  ;;  %v11872_v51 = vrot.slane %v14399_v44, 10  ;;  %v700_v10 = vrot.slane %v14400_v53, 6  ;;  %v13470_v53 = vld [vmem:[%s21046_s1 + $0x634] ss:$8 sps:$4 sm:$0xff]  }
  0xc9   :  { %9389 = vmatprep.subr.bf16.mxu1 %v13459_v1  ;;  %21548 = vst [vmem:[#allocation94_spill] sm:$0xff] %v16295_v35  ;;  %21549 = vst [vmem:[#allocation95_spill] sm:$0xff] %v16300_v21  ;;  %v14401_v1 = vld [vmem:[%s21045_s0 + $0x70] sm:$0xff] }
  0xca   :  { %9089 = vmatmul.mubr.bf16.gmra.mxu0 %v16268_v58  ;;  %v11873_v41 = vrot.slane %v14401_v1, 10  ;;  %v13473_v58 = vld [vmem:[%s21046_s1 + $0x734] ss:$8 sps:$4 sm:$0xff]   ;;  %21550 = vst [vmem:[#allocation96_spill] sm:$0xff] %v16324_v36 }
  0xcb   :  { %9202 = vmatmul.mubr.bf16.gmra.mxu1 %v16270_v63  ;;  %9277 = vmatpush1.bf16.msra.mxu0 %v13454_v54  ;;  %v13463_v63 = vld [vmem:[%s21046_s1 + $0x740] ss:$8 sps:$4 sm:$0xff]   ;;  %v16331_v54 = vcombine.low %v693_v18, %v697_v8  ;;  %v13471_v18 = vld [vmem:[%s21046_s1 + $0x730] ss:$8 sps:$4 sm:$0xff]  }
  0xcc   :  { %9390 = vmatpush1.bf16.msra.mxu1 %v13457_v34  ;;  %9278 = vmatprep.subr.bf16.mxu0 %v13462_v28  ;;  %v16329_v34 = vld [vmem:[%s21045_s0 + $0x80] sm:$0xff]  ;;  %v13468_v28 = vld [vmem:[%s21046_s1 + $0x630] ss:$8 sps:$4 sm:$0xff]  }
  0xcd   :  { %9391 = vmatprep.subr.bf16.mxu1 %v13465_v30  ;;  %9098 = vmatprep.mubr.bf16.mxu0 %v16295_v35  ;;  %21551 = vst [vmem:[#allocation97_spill] sm:$0xff] %v16331_v54  ;;  %v701_v30 = vsel %vm15929_vm11, %v11872_v51, %v700_v10  ;;  %v16340_v35 = vsel %vm15929_vm11, %v11873_v41, %v704_v32  ;;  %v21200_v9 = vshrl.u32 %v16329_v34, 16  ;;  %v21206_v44 = vshll.u32 %v16329_v34, 16  ;;  %v13476_v51 = vld [vmem:[%s21046_s1 + $0x624] ss:$8 sps:$4 sm:$0xff]  }
  0xce   :  { %9211 = vmatprep.mubr.bf16.mxu1 %v16300_v21  ;;  %v16347_v21 = vcombine.high %v697_v8, %v701_v30  ;;  %v13479_v32 = vld [vmem:[%s21046_s1 + $0x724] ss:$8 sps:$4 sm:$0xff]   ;;  %v16355_v41 = vcombine.low %v697_v8, %v701_v30  ;;  %v16368_v10 = vcombine.high %v14401_v1, %v16329_v34 }
  0xcf   :  { %9279 = vmatpush1.bf16.msra.mxu0 %v13460_v43  ;;  %v13474_v43 = vld [vmem:[%s21046_s1 + $0x620] ss:$8 sps:$4 sm:$0xff]  }
  0xd0   :  { %9392 = vmatpush1.bf16.msra.mxu1 %v13463_v63  ;;  %21552 = vst [vmem:[#allocation98_spill] sm:$0xff] %v16347_v21  ;;  %9280 = vmatprep.subr.bf16.mxu0 %v13470_v53  ;;  %21553 = vst [vmem:[#allocation99_spill] sm:$0xff] %v16355_v41  ;;  %v16359_v63 = vrot.slane %v21200_v9, 5  ;;  %v16372_v53 = vrot.slane %v21206_v44, 6  ;;  %v14403_v8 = vld [vmem:[%s21045_s0 + $0xc0] sm:$0xff] }
  0xd1   :  { %9393 = vmatprep.subr.bf16.mxu1 %v13473_v58  ;;  %v16365_v58 = vcombine.high %v701_v30, %v16340_v35  ;;  %21555 = vst [vmem:[#allocation101_spill] sm:$0xff] %v16368_v10  ;;  %v11874_v9 = vrot.slane %v14403_v8, 10  ;;  %v14405_v44 = vld [vmem:[%s21045_s0 + $0xd8] sm:$0x33]  ;;  %v14408_v8 = vld [vmem:[%s21045_s0 + $0xf0] sm:$0xff] }
  0xd2   :  { %9099 = vmatmul.mubr.bf16.gmra.mxu0 %v16331_v54  ;;  %v712_v24 = vrot.slane %v14405_v44, 6  ;;  %v13487_v54 = vld [vmem:[%s21046_s1 + $0x714] ss:$8 sps:$4 sm:$0xff]  }
  0xd3   :  { %21554 = vst [vmem:[#allocation100_spill] sm:$0xff] %v16365_v58  ;;  %9212 = vmatmul.mubr.bf16.gmra.mxu1 %v16324_v36  ;;  %9281 = vmatpush1.bf16.msra.mxu0 %v13468_v28  ;;  %v13477_v36 = vld [vmem:[%s21046_s1 + $0x720] ss:$8 sps:$4 sm:$0xff]   ;;  %v16400_v28 = vcombine.low %v701_v30, %v16340_v35  ;;  %v709_v44 = vsel %vm15929_vm11, %v11874_v9, %v708_v2  ;;  %v13485_v30 = vld [vmem:[%s21046_s1 + $0x710] ss:$8 sps:$4 sm:$0xff]  }
  0xd4   :  { %9394 = vmatpush1.bf16.msra.mxu1 %v13471_v18  ;;  %9282 = vmatprep.subr.bf16.mxu0 %v13476_v51  ;;  %v16403_v18 = vcombine.low %v14401_v1, %v16329_v34  ;;  %v16409_v51 = vsel %vm15929_vm11, %v11875_v39, %v712_v24  ;;  %v13490_v1 = vld [vmem:[%s21046_s1 + $0x604] ss:$8 sps:$4 sm:$0xff]  }
  0xd5   :  { %9395 = vmatprep.subr.bf16.mxu1 %v13479_v32  ;;  %9108 = vmatprep.mubr.bf16.mxu0 %v16365_v58  ;;  %21556 = vst [vmem:[#allocation102_spill] sm:$0xff] %v16400_v28  ;;  %v13482_v32 = vld [vmem:[%s21046_s1 + $0x610] ss:$8 sps:$4 sm:$0xff]   ;;  %v13493_v24 = vld [vmem:[%s21046_s1 + $0x704] ss:$8 sps:$4 sm:$0xff]   ;;  %v12107_v39 = vcombine.high %v709_v44, %v16409_v51 }
  0xd6   :  { %9221 = vmatprep.mubr.bf16.mxu1 %v16368_v10  ;;  %21557 = vst [vmem:[#allocation103_spill] sm:$0xff] %v16403_v18  ;;  %v14406_v2 = vld [vmem:[%s21045_s0 + $0xe0] sm:$0xff]  ;;  %v11877_v10 = vrot.slane %v14408_v8, 10 }
  0xd7   :  { %9283 = vmatpush1.bf16.msra.mxu0 %v13474_v43  ;;  %v11876_v9 = vrot.slane %v14406_v2, 10  ;;  %v14407_v43 = vld [vmem:[%s21045_s0 + $0xe8] sm:$0x33] }
  0xd8   :  { %9396 = vmatpush1.bf16.msra.mxu1 %v13477_v36  ;;  %9284 = vmatprep.subr.bf16.mxu0 %v13484_v3  ;;  %v12109_v36 = vcombine.high %v15751_v12, %v14406_v2  ;;  %v716_v3 = vrot.slane %v14407_v43, 6  ;;  %v13498_v43 = vld [vmem:[%s21046_s1 + $0x6f4] ss:$8 sps:$4 sm:$0xff]  }
  0xd9   :  { %9397 = vmatprep.subr.bf16.mxu1 %v13487_v54  ;;  %v13488_v54 = vld [vmem:[%s21046_s1 + $0x600] ss:$8 sps:$4 sm:$0xff]  }
  0xda   :  { %9109 = vmatmul.mubr.bf16.gmra.mxu0 %v16400_v28  ;;  %v14409_v28 = vld [vmem:[%s21045_s0 + $0xf8] sm:$0x33]  ;;  %v16458_v62 = vsel %vm15929_vm11, %v11876_v9, %v716_v3 }
  0xdb   :  { %9222 = vmatmul.mubr.bf16.gmra.mxu1 %v16403_v18  ;;  %v720_v58 = vrot.slane %v14409_v28, 6  ;;  %9285 = vmatpush1.bf16.msra.mxu0 %v13482_v32  ;;  %v13491_v18 = vld [vmem:[%s21046_s1 + $0x700] ss:$8 sps:$4 sm:$0xff]   ;;  %v12106_v28 = vcombine.low %v709_v44, %v16409_v51  ;;  %v12108_v32 = vcombine.low %v15751_v12, %v14406_v2  ;;  %v13504_v12 = vld [vmem:[%s21046_s1 + $0x6e4] ss:$8 sps:$4 sm:$0xff]   ;;  %v11878_v2 = vrot.slane %v15945_v55, 10 }
  0xdc   :  { %9398 = vmatpush1.bf16.msra.mxu1 %v13485_v30  ;;  %9286 = vmatprep.subr.bf16.mxu0 %v13490_v1  ;;  %v13496_v30 = vld [vmem:[%s21046_s1 + $0x6f0] ss:$8 sps:$4 sm:$0xff]   ;;  %v13507_v44 = vld [vmem:[%s21046_s1 + $0x7e4] ss:$8 sps:$4 sm:$0xff]  }
  0xdd   :  { %9399 = vmatprep.subr.bf16.mxu1 %v13493_v24  ;;  %9118 = vmatprep.mubr.bf16.mxu0 %v12107_v39  ;;  %v721_v1 = vsel %vm15929_vm11, %v11877_v10, %v720_v58  ;;  %v13499_v24 = vld [vmem:[%s21046_s1 + $0x7f0] ss:$8 sps:$4 sm:$0xff]  }
  0xde   :  { %9231 = vmatprep.mubr.bf16.mxu1 %v12109_v36  ;;  %v16476_v10 = vcombine.high %v16458_v62, %v721_v1  ;;  %v14410_v36 = vld [vmem:[%s21045_s0 + $0x108] sm:$0x33]  ;;  %v13513_v58 = vld [vmem:[%s21046_s1 + $0x7d0] ss:$8 sps:$4 sm:$0xff]  }
  0xdf   :  { %9287 = vmatpush1.bf16.msra.mxu0 %v13488_v54  ;;  %v724_v9 = vrot.slane %v14410_v36, 6  ;;  %v14411_v54 = vld [vmem:[%s21045_s0 + $0x110] sm:$0xff]  ;;  %v14413_v39 = vld [vmem:[%s21045_s0 + $0x138] sm:$0x33] }
  0xe0   :  { %9400 = vmatpush1.bf16.msra.mxu1 %v13491_v18  ;;  %9288 = vmatprep.subr.bf16.mxu0 %v13498_v43  ;;  %21558 = vst [vmem:[#allocation104_spill] sm:$0xff] %v16476_v10  ;;  %v16479_v18 = vcombine.high %v14408_v8, %v15945_v55  ;;  %v11879_v3 = vrot.slane %v14411_v54, 10  ;;  %v728_v43 = vrot.slane %v15963_v0, 6  ;;  %v13515_v36 = vld [vmem:[%s21046_s1 + $0x7d4] ss:$8 sps:$4 sm:$0xff]   ;;  %v16504_v0 = vcombine.low %v16458_v62, %v721_v1 }
  0xe1   :  { %9401 = vmatprep.subr.bf16.mxu1 %v13501_v22  ;;  %v13502_v22 = vld [vmem:[%s21046_s1 + $0x6e0] ss:$8 sps:$4 sm:$0xff]  }
  0xe2   :  { %21559 = vst [vmem:[#allocation105_spill] sm:$0xff] %v16479_v18  ;;  %9119 = vmatmul.mubr.bf16.gmra.mxu0 %v12106_v28  ;;  %v13505_v28 = vld [vmem:[%s21046_s1 + $0x7e0] ss:$8 sps:$4 sm:$0xff]   ;;  %21560 = vst [vmem:[#allocation106_spill] sm:$0xff] %v16504_v0 }
  0xe3   :  { %9232 = vmatmul.mubr.bf16.gmra.mxu1 %v12108_v32  ;;  %9289 = vmatpush2.bf16.msra.mxu0 %v13496_v30  ;;  %v13512_v32 = vld [vmem:[%s21046_s1 + $0x6d4] ss:$8 sps:$4 sm:$0xff]   ;;  %v16507_v30 = vcombine.low %v14408_v8, %v15945_v55  ;;  %v13518_v55 = vld [vmem:[%s21046_s1 + $0x6c4] ss:$8 sps:$4 sm:$0xff]  }
  0xe4   :  { %9402 = vmatpush2.bf16.msra.mxu1 %v13499_v24  ;;  %9290 = vmatprep.subr.bf16.mxu0 %v13504_v12  ;;  %v13510_v24 = vld [vmem:[%s21046_s1 + $0x6d0] ss:$8 sps:$4 sm:$0xff]   ;;  %v725_v12 = vsel %vm15929_vm11, %v11878_v2, %v724_v9  ;;  %v13521_v2 = vld [vmem:[%s21046_s1 + $0x7c4] ss:$8 sps:$4 sm:$0xff]  }
  0xe5   :  { %9403 = vmatprep.subr.bf16.mxu1 %v13507_v44  ;;  %9128 = vmatprep.mubr.bf16.mxu0 %v16476_v10  ;;  %21561 = vst [vmem:[#allocation107_spill] sm:$0xff] %v16507_v30  ;;  %v729_v44 = vsel %vm15929_vm11, %v11879_v3, %v728_v43  ;;  %v16522_v8 = vcombine.high %v721_v1, %v725_v12  ;;  %v11880_v43 = vrot.slane %v16054_v59, 10  ;;  %v16697_v10 = vld [vmem:[%s21045_s0 + $0x88] sm:$0x33] }
  0xe6   :  { %9241 = vmatprep.mubr.bf16.mxu1 %v16479_v18  ;;  %v16527_v9 = vcombine.low %v721_v1, %v725_v12  ;;  %v16532_v3 = vcombine.high %v14411_v54, %v16054_v59  ;;  %v14412_v1 = vld [vmem:[%s21045_s0 + $0x128] sm:$0x33]  ;;  %v736_v18 = vrot.slane %v14413_v39, 6  ;;  %v16559_v39 = vcombine.low %v14411_v54, %v16054_v59  ;;  %v13527_v54 = vld [vmem:[%s21046_s1 + $0x7b0] ss:$8 sps:$4 sm:$0xff]  }
  0xe7   :  { %9291 = vmatpush2.bf16.msra.mxu0 %v13502_v22  ;;  %21562 = vst [vmem:[#allocation108_spill] sm:$0xff] %v16522_v8  ;;  %v16529_v22 = vcombine.high %v725_v12, %v729_v44 }
  0xe8   :  { %9404 = vmatpush2.bf16.msra.mxu1 %v13505_v28  ;;  %9292 = vmatprep.subr.bf16.mxu0 %v13512_v32  ;;  %21563 = vst [vmem:[#allocation109_spill] sm:$0xff] %v16527_v9  ;;  %21565 = vst [vmem:[#allocation111_spill] sm:$0xff] %v16532_v3  ;;  %v13516_v28 = vld [vmem:[%s21046_s1 + $0x6c0] ss:$8 sps:$4 sm:$0xff]   ;;  %v732_v32 = vrot.slane %v14412_v1, 6 }
  0xe9   :  { %9405 = vmatprep.subr.bf16.mxu1 %v13515_v36  ;;  %21564 = vst [vmem:[#allocation110_spill] sm:$0xff] %v16529_v22  ;;  %v11881_v36 = vrot.slane %v16069_v60, 10  ;;  %v13529_v1 = vld [vmem:[%s21046_s1 + $0x7b4] ss:$8 sps:$4 sm:$0xff]   ;;  %21566 = vst [vmem:[#allocation112_spill] sm:$0xff] %v16559_v39 }
  0xea   :  { %9129 = vmatmul.mubr.bf16.gmra.mxu0 %v16504_v0  ;;  %v13526_v0 = vld [vmem:[%s21046_s1 + $0x6b4] ss:$8 sps:$4 sm:$0xff]  }
  0xeb   :  { %9242 = vmatmul.mubr.bf16.gmra.mxu1 %v16507_v30  ;;  %9293 = vmatpush2.bf16.msra.mxu0 %v13510_v24  ;;  %v13519_v30 = vld [vmem:[%s21046_s1 + $0x7c0] ss:$8 sps:$4 sm:$0xff]   ;;  %v16566_v24 = vcombine.low %v725_v12, %v729_v44 }
  0xec   :  { %9406 = vmatpush2.bf16.msra.mxu1 %v13513_v58  ;;  %9294 = vmatprep.subr.bf16.mxu0 %v13518_v55  ;;  %v16564_v58 = vld [vmem:[%s21045_s0 + $0x140] sm:$0xff]  ;;  %v13524_v55 = vld [vmem:[%s21046_s1 + $0x6b0] ss:$8 sps:$4 sm:$0xff]  }
  0xed   :  { %9407 = vmatprep.subr.bf16.mxu1 %v13521_v2  ;;  %9138 = vmatprep.mubr.bf16.mxu0 %v16529_v22  ;;  %21567 = vst [vmem:[#allocation113_spill] sm:$0xff] %v16566_v24  ;;  %v733_v2 = vsel %vm15929_vm11, %v11880_v43, %v732_v32  ;;  %v21225_v59 = vshrl.u32 %v16564_v58, 16  ;;  %v21226_v12 = vshll.u32 %v16564_v58, 16  ;;  %v13532_v43 = vld [vmem:[%s21046_s1 + $0x6a4] ss:$8 sps:$4 sm:$0xff]   ;;  %v16599_v32 = vcombine.high %v16069_v60, %v16564_v58 }
  0xee   :  { %9251 = vmatprep.mubr.bf16.mxu1 %v16532_v3  ;;  %v16575_v3 = vsel %vm15929_vm11, %v11881_v36, %v736_v18  ;;  %v16582_v22 = vcombine.high %v729_v44, %v733_v2  ;;  %v13535_v18 = vld [vmem:[%s21046_s1 + $0x7a4] ss:$8 sps:$4 sm:$0xff]  }
  0xef   :  { %21568 = vst [vmem:[#allocation114_spill] sm:$0xff] %v16575_v3  ;;  %9295 = vmatpush2.bf16.msra.mxu0 %v13516_v28  ;;  %v16595_v28 = vcombine.high %v733_v2, %v16575_v3  ;;  %21572 = vst [vmem:[#allocation118_spill] sm:$0xff] %v16599_v32  ;;  %v16605_v36 = vrot.slane %v21226_v12, 6  ;;  %v13540_v12 = vld [vmem:[%s21046_s1 + $0x694] ss:$8 sps:$4 sm:$0xff]  }
  0xf0   :  { %9408 = vmatpush2.bf16.msra.mxu1 %v13519_v30  ;;  %21569 = vst [vmem:[#allocation115_spill] sm:$0xff] %v16582_v22  ;;  %9296 = vmatprep.subr.bf16.mxu0 %v13526_v0  ;;  %v16592_v30 = vrot.slane %v21225_v59, 5  ;;  %v16601_v0 = vcombine.low %v729_v44, %v733_v2  ;;  %v13533_v59 = vld [vmem:[%s21046_s1 + $0x7a0] ss:$8 sps:$4 sm:$0xff]   ;;  %v11911_v44 = vcombine.high %v14737_v25, %v14808_v7 }
  0xf1   :  { %9409 = vmatprep.subr.bf16.mxu1 %v13529_v1  ;;  %21571 = vst [vmem:[#allocation117_spill] sm:$0xff] %v16595_v28  ;;  %21574 = vst [vmem:[#allocation120_spill] sm:$0xff] %v16605_v36  ;;  %v13530_v1 = vld [vmem:[%s21046_s1 + $0x6a0] ss:$8 sps:$4 sm:$0xff]   ;;  %v21603_v36 = vshll.u32 %v16564_v58, 16 }
  0xf2   :  { %21570 = vst [vmem:[#allocation116_spill] sm:$0xff] %v16592_v30  ;;  %21573 = vst [vmem:[#allocation119_spill] sm:$0xff] %v16601_v0  ;;  %9139 = vmatmul.mubr.bf16.gmra.mxu0 %v16566_v24 }
  0xf3   :  { %9252 = vmatmul.mubr.bf16.gmra.mxu1 %v16559_v39  ;;  %9297 = vmatpush2.bf16.msra.mxu0 %v13524_v55  ;;  %v13543_v39 = vld [vmem:[%s21046_s1 + $0x794] ss:$8 sps:$4 sm:$0xff]   ;;  %v16626_v55 = vcombine.low %v733_v2, %v16575_v3  ;;  %v13546_v2 = vld [vmem:[%s21046_s1 + $0x684] ss:$8 sps:$4 sm:$0xff]   ;;  %v806_v9 = vrot.slane %v21603_v36, 5 }
  0xf4   :  { %9410 = vmatpush2.bf16.msra.mxu1 %v13527_v54  ;;  %9298 = vmatprep.subr.bf16.mxu0 %v13532_v43  ;;  %v16630_v54 = vcombine.low %v16069_v60, %v16564_v58  ;;  %v13538_v43 = vld [vmem:[%s21046_s1 + $0x690] ss:$8 sps:$4 sm:$0xff]   ;;  %v13549_v60 = vld [vmem:[%s21046_s1 + $0x784] ss:$8 sps:$4 sm:$0xff]  }
  0xf5   :  { %9411 = vmatprep.subr.bf16.mxu1 %v13535_v18  ;;  %9148 = vmatprep.mubr.bf16.mxu0 %v16595_v28  ;;  %21575 = vst [vmem:[#allocation121_spill] sm:$0xff] %v16626_v55  ;;  %v13541_v18 = vld [vmem:[%s21046_s1 + $0x790] ss:$8 sps:$4 sm:$0xff]   ;;  %v13559_v28 = vld [vmem:[%s21046_s1 + $0x960] ss:$8 sps:$4 sm:$0xff]  }
  0xf6   :  { %9261 = vmatprep.mubr.bf16.mxu1 %v16599_v32  ;;  %21576 = vst [vmem:[#allocation122_spill] sm:$0xff] %v16630_v54 }
  0xf7   :  { %9299 = vmatpush2.bf16.msra.mxu0 %v13530_v1  ;;  %v13552_v1 = vld [vmem:[%s21046_s1 + $0x874] ss:$8 sps:$4 sm:$0xff]  }
  0xf8   :  { %9412 = vmatpush2.bf16.msra.mxu1 %v13533_v59  ;;  %9300 = vmatprep.subr.bf16.mxu0 %v13540_v12  ;;  %v11913_v59 = vcombine.high %v15434_v13, %v15481_v40  ;;  %v13547_v12 = vld [vmem:[%s21046_s1 + $0x780] ss:$8 sps:$4 sm:$0xff]  }
  0xf9   :  { %9413 = vmatprep.subr.bf16.mxu1 %v13543_v39  ;;  %v13544_v39 = vld [vmem:[%s21046_s1 + $0x680] ss:$8 sps:$4 sm:$0xff]  }
  0xfa   :  { %9149 = vmatmul.mubr.bf16.gmra.mxu0 %v16626_v55 }
  0xfb   :  { %9262 = vmatmul.mubr.bf16.gmra.mxu1 %v16630_v54  ;;  %9301 = vmatpush2.bf16.msra.mxu0 %v13538_v43  ;;  %v13555_v54 = vld [vmem:[%s21046_s1 + $0x974] ss:$8 sps:$4 sm:$0xff]   ;;  %v11910_v43 = vcombine.low %v14737_v25, %v14808_v7  ;;  %v13561_v25 = vld [vmem:[%s21046_s1 + $0x964] ss:$8 sps:$4 sm:$0xff]   ;;  %v13556_v7 = vld [vmem:[%s21046_s1 + $0x860] ss:$8 sps:$4 sm:$0xff]  }
  0xfc   :  { %9414 = vmatpush2.bf16.msra.mxu1 %v13541_v18  ;;  %9302 = vmatprep.subr.bf16.mxu0 %v13546_v2  ;;  %v11912_v18 = vcombine.low %v15434_v13, %v15481_v40  ;;  %v13550_v2 = vld [vmem:[%s21046_s1 + $0x870] ss:$8 sps:$4 sm:$0xff]   ;;  %v21578_v40 = vld [vmem:[#allocation8_spill] sm:$0xff] }
  0xfd   :  { %9415 = vmatprep.subr.bf16.mxu1 %v13549_v60  ;;  %9304 = vmatprep.mubr.bf16.mxu0 %v11911_v44  ;;  %v13553_v60 = vld [vmem:[%s21046_s1 + $0x970] ss:$8 sps:$4 sm:$0xff]   ;;  %v13558_v44 = vld [vmem:[%s21046_s1 + $0x864] ss:$8 sps:$4 sm:$0xff]  }
  0xfe   :  { %9417 = vmatprep.mubr.bf16.mxu1 %v11913_v59  ;;  %v21577_v13 = vld [vmem:[#allocation13_spill] sm:$0xff] }
  0xff   :  { %9303 = vmatpush2.bf16.msra.mxu0 %v13544_v39  ;;  %v16683_v59 = vcombine.high %v21578_v40, %v21577_v13  ;;  %v21580_v39 = vshrl.u32 %v16329_v34, 16 }
 0x100   :  { %9416 = vmatpush2.bf16.msra.mxu1 %v13547_v12  ;;  %9498 = vmatprep.subr.bf16.mxu0 %v13552_v1 }
 0x101   :  { %9611 = vmatprep.subr.bf16.mxu1 %v13555_v54  ;;  %21579 = vst [vmem:[#allocation13_spill] sm:$0xff] %v16683_v59  ;;  %v789_v12 = vrot.slane %v21580_v39, 4  ;;  %v21581_v54 = vshll.u32 %v16329_v34, 16 }
 0x102   :  { %v8628_v55 = vpop.f32.mrf.mxu0  ;;  %9305 = vmatmul.mubr.bf16.vlgmr.msra.gmra.mxu0 %v11910_v43  ;;  %v13564_v43 = vld [vmem:[%s21046_s1 + $0x854] ss:$8 sps:$4 sm:$0xff]  }
 0x103   :  { %v792_v1 = vrot.slane %v21581_v54, 5  ;;  %v8741_v32 = vpop.f32.mrf.mxu1  ;;  %9418 = vmatmul.mubr.bf16.vlgmr.msra.gmra.mxu1 %v11912_v18  ;;  %9499 = vmatpush1.bf16.msra.mxu0 %v13550_v2  ;;  %v11882_v54 = vrot.slane %v16329_v34, 9  ;;  %v13571_v34 = vld [vmem:[%s21046_s1 + $0x940] ss:$8 sps:$4 sm:$0xff]  }
 0x104   :  { %v16692_v24 = vadd.f32 %v8741_v32, %v8628_v55  ;;  %9612 = vmatpush1.bf16.msra.mxu1 %v13553_v60  ;;  %v8630_v39 = vpop.f32.mrf.mxu0  ;;  %9500 = vmatprep.subr.bf16.mxu0 %v13558_v44  ;;  %v13567_v32 = vld [vmem:[%s21046_s1 + $0x954] ss:$8 sps:$4 sm:$0xff]   ;;  %v16711_v44 = vcombine.low %v21578_v40, %v21577_v13  ;;  %v13570_v13 = vld [vmem:[%s21046_s1 + $0x844] ss:$8 sps:$4 sm:$0xff]  }
 0x105   :  { %v8743_v23 = vpop.f32.mrf.mxu1  ;;  %9613 = vmatprep.subr.bf16.mxu1 %v13561_v25  ;;  %9314 = vmatprep.mubr.bf16.mxu0 %v16683_v59  ;;  %v793_v18 = vor.u32 %v792_v1, %v789_v12  ;;  %v13562_v25 = vld [vmem:[%s21046_s1 + $0x850] ss:$8 sps:$4 sm:$0xff]   ;;  %v13573_v40 = vld [vmem:[%s21046_s1 + $0x944] ss:$8 sps:$4 sm:$0xff]   ;;  %v838_v59 = vrot.slane %v16697_v10, 5 }
 0x106   :  { %v16705_v55 = vadd.f32 %v8743_v23, %v8630_v39  ;;  %9427 = vmatprep.mubr.bf16.mxu1 %v15999_v4  ;;  %v8632_v2 = vpop.f32.mrf.mxu0  ;;  %21582 = vst [vmem:[#allocation8_spill] sm:$0xff] %v16711_v44  ;;  %v13565_v23 = vld [vmem:[%s21046_s1 + $0x950] ss:$8 sps:$4 sm:$0xff]  }
 0x107   :  { %v8745_v60 = vpop.f32.mrf.mxu1  ;;  %9501 = vmatpush1.bf16.msra.mxu0 %v13556_v7  ;;  %v21583_v7 = vld [vmem:[#allocation19_spill] sm:$0xff] }
 0x108   :  { %v16717_v0 = vadd.f32 %v8745_v60, %v8632_v2  ;;  %9614 = vmatpush1.bf16.msra.mxu1 %v13559_v28  ;;  %v8634_v12 = vpop.f32.mrf.mxu0  ;;  %9502 = vmatprep.subr.bf16.mxu0 %v13564_v43  ;;  %v21584_v28 = vld [vmem:[#allocation14_spill] sm:$0xff]  ;;  %v794_v60 = vrot.slane %v793_v18, 4 }
 0x109   :  { %v8747_v1 = vpop.f32.mrf.mxu1  ;;  %9615 = vmatprep.subr.bf16.mxu1 %v13567_v32  ;;  %v16732_v2 = vcombine.high %v21584_v28, %v21583_v7  ;;  %v13568_v32 = vld [vmem:[%s21046_s1 + $0x840] ss:$8 sps:$4 sm:$0xff]  }
 0x10a   :  { %v16728_v39 = vadd.f32 %v8747_v1, %v8634_v12  ;;  %v8638_v4 = vpop.f32.mrf.mxu0  ;;  %9315 = vmatmul.mubr.bf16.gmra.mxu0 %v16711_v44  ;;  %v21586_v12 = vshll.u32 %v16697_v10, 16 }
 0x10b   :  { %21585 = vst [vmem:[#allocation19_spill] sm:$0xff] %v16732_v2  ;;  %v8751_v43 = vpop.f32.mrf.mxu1  ;;  %9428 = vmatmul.mubr.bf16.gmra.mxu1 %v16028_v33  ;;  %9503 = vmatpush1.bf16.msra.mxu0 %v13562_v25  ;;  %v13576_v33 = vld [vmem:[%s21046_s1 + $0x834] ss:$8 sps:$4 sm:$0xff]  }
 0x10c   :  { %v798_v1 = vrot.slane %v21586_v12, 5  ;;  %v16743_v3 = vadd.f32 %v8751_v43, %v8638_v4  ;;  %9616 = vmatpush1.bf16.msra.mxu1 %v13565_v23  ;;  %v8640_v18 = vpop.f32.mrf.mxu0  ;;  %9504 = vmatprep.subr.bf16.mxu0 %v13570_v13  ;;  %v13579_v12 = vld [vmem:[%s21046_s1 + $0x934] ss:$8 sps:$4 sm:$0xff]   ;;  %v16760_v13 = vcombine.low %v21584_v28, %v21583_v7  ;;  %v13577_v7 = vld [vmem:[%s21046_s1 + $0x930] ss:$8 sps:$4 sm:$0xff]  }
 0x10d   :  { %v8753_v44 = vpop.f32.mrf.mxu1  ;;  %9617 = vmatprep.subr.bf16.mxu1 %v13573_v40  ;;  %9324 = vmatprep.mubr.bf16.mxu0 %v16732_v2  ;;  %v13574_v40 = vld [vmem:[%s21046_s1 + $0x830] ss:$8 sps:$4 sm:$0xff]  }
 0x10e   :  { %v16754_v4 = vadd.f32 %v8753_v44, %v8640_v18  ;;  %9437 = vmatprep.mubr.bf16.mxu1 %v16037_v6  ;;  %v8642_v25 = vpop.f32.mrf.mxu0  ;;  %21587 = vst [vmem:[#allocation14_spill] sm:$0xff] %v16760_v13  ;;  %v16767_v48 = vsel %vm14694_vm2, %v794_v60, %v798_v1  ;;  %v16771_v44 = vsel %vm15379_vm8, %v11882_v54, %v838_v59  ;;  %v13582_v60 = vld [vmem:[%s21046_s1 + $0x824] ss:$8 sps:$4 sm:$0xff]  }
 0x10f   :  { %v8755_v23 = vpop.f32.mrf.mxu1  ;;  %21589 = vst [vmem:[#allocation123_spill] sm:$0xff] %v16767_v48  ;;  %21590 = vst [vmem:[#allocation124_spill] sm:$0xff] %v16771_v44  ;;  %9505 = vmatpush1.bf16.msra.mxu0 %v13568_v32  ;;  %v13585_v59 = vld [vmem:[%s21046_s1 + $0x924] ss:$8 sps:$4 sm:$0xff]  }
 0x110   :  { %v16773_v18 = vadd.f32 %v8755_v23, %v8642_v25  ;;  %9618 = vmatpush1.bf16.msra.mxu1 %v13571_v34  ;;  %v8644_v28 = vpop.f32.mrf.mxu0  ;;  %9506 = vmatprep.subr.bf16.mxu0 %v13576_v33  ;;  %v21591_v32 = vld [vmem:[#allocation20_spill] sm:$0xff]  ;;  %v16792_v34 = vcombine.high %v15703_v49, %v16771_v44 }
 0x111   :  { %v8757_v6 = vpop.f32.mrf.mxu1  ;;  %9619 = vmatprep.subr.bf16.mxu1 %v13579_v12  ;;  %v16788_v1 = vcombine.high %v21591_v32, %v16767_v48  ;;  %v13580_v25 = vld [vmem:[%s21046_s1 + $0x820] ss:$8 sps:$4 sm:$0xff]  }
 0x112   :  { %v16784_v54 = vadd.f32 %v8757_v6, %v8644_v28  ;;  %21593 = vst [vmem:[#allocation125_spill] sm:$0xff] %v16792_v34  ;;  %v8648_v33 = vpop.f32.mrf.mxu0  ;;  %9325 = vmatmul.mubr.bf16.gmra.mxu0 %v16760_v13  ;;  %v13583_v23 = vld [vmem:[%s21046_s1 + $0x920] ss:$8 sps:$4 sm:$0xff]   ;;  %v13591_v13 = vld [vmem:[%s21046_s1 + $0x914] ss:$8 sps:$4 sm:$0xff]  }
 0x113   :  { %21592 = vst [vmem:[#allocation20_spill] sm:$0xff] %v16788_v1  ;;  %v8761_v12 = vpop.f32.mrf.mxu1  ;;  %9438 = vmatmul.mubr.bf16.gmra.mxu1 %v16060_v45  ;;  %9507 = vmatpush1.bf16.msra.mxu0 %v13574_v40  ;;  %v13588_v45 = vld [vmem:[%s21046_s1 + $0x814] ss:$8 sps:$4 sm:$0xff]  }
 0x114   :  { %v16799_v6 = vadd.f32 %v8761_v12, %v8648_v33  ;;  %9620 = vmatpush1.bf16.msra.mxu1 %v13577_v7  ;;  %v8650_v28 = vpop.f32.mrf.mxu0  ;;  %9508 = vmatprep.subr.bf16.mxu0 %v13582_v60  ;;  %v16816_v60 = vcombine.low %v21591_v32, %v16767_v48  ;;  %v13586_v12 = vld [vmem:[%s21046_s1 + $0x810] ss:$8 sps:$4 sm:$0xff]   ;;  %v13597_v32 = vld [vmem:[%s21046_s1 + $0x904] ss:$8 sps:$4 sm:$0xff]  }
 0x115   :  { %v8763_v2 = vpop.f32.mrf.mxu1  ;;  %9621 = vmatprep.subr.bf16.mxu1 %v13585_v59  ;;  %9334 = vmatprep.mubr.bf16.mxu0 %v16788_v1  ;;  %v16820_v59 = vcombine.low %v15703_v49, %v16771_v44  ;;  %v13594_v49 = vld [vmem:[%s21046_s1 + $0x804] ss:$8 sps:$4 sm:$0xff]  }
 0x116   :  { %v16810_v33 = vadd.f32 %v8763_v2, %v8650_v28  ;;  %9447 = vmatprep.mubr.bf16.mxu1 %v16792_v34  ;;  %v8652_v40 = vpop.f32.mrf.mxu0  ;;  %21594 = vst [vmem:[#allocation126_spill] sm:$0xff] %v16816_v60  ;;  %v13589_v28 = vld [vmem:[%s21046_s1 + $0x910] ss:$8 sps:$4 sm:$0xff]  }
 0x117   :  { %v8765_v7 = vpop.f32.mrf.mxu1  ;;  %21595 = vst [vmem:[#allocation127_spill] sm:$0xff] %v16820_v59  ;;  %9509 = vmatpush1.bf16.msra.mxu0 %v13580_v25  ;;  %v21596_v25 = vld [vmem:[#allocation27_spill] sm:$0xff] }
 0x118   :  { %v16825_v2 = vadd.f32 %v8765_v7, %v8652_v40  ;;  %9622 = vmatpush1.bf16.msra.mxu1 %v13583_v23  ;;  %v8654_v34 = vpop.f32.mrf.mxu0  ;;  %9510 = vmatprep.subr.bf16.mxu0 %v13588_v45  ;;  %v21597_v23 = vld [vmem:[#allocation26_spill] sm:$0xff]  ;;  %v13592_v45 = vld [vmem:[%s21046_s1 + $0x800] ss:$8 sps:$4 sm:$0xff]  }
 0x119   :  { %v8767_v1 = vpop.f32.mrf.mxu1  ;;  %9623 = vmatprep.subr.bf16.mxu1 %v13591_v13  ;;  %v12111_v7 = vcombine.high %v21597_v23, %v21596_v25 }
 0x11a   :  { %v16836_v40 = vadd.f32 %v8767_v1, %v8654_v34  ;;  %v8658_v44 = vpop.f32.mrf.mxu0  ;;  %9335 = vmatmul.mubr.bf16.gmra.mxu0 %v16816_v60  ;;  %v13595_v1 = vld [vmem:[%s21046_s1 + $0x900] ss:$8 sps:$4 sm:$0xff]   ;;  %v13603_v60 = vld [vmem:[%s21046_s1 + $0x9f4] ss:$8 sps:$4 sm:$0xff]  }
 0x11b   :  { %v8771_v48 = vpop.f32.mrf.mxu1  ;;  %9448 = vmatmul.mubr.bf16.gmra.mxu1 %v16820_v59  ;;  %9511 = vmatpush1.bf16.msra.mxu0 %v13586_v12  ;;  %v13600_v59 = vld [vmem:[%s21046_s1 + $0x8f4] ss:$8 sps:$4 sm:$0xff]  }
 0x11c   :  { %v16845_v13 = vadd.f32 %v8771_v48, %v8658_v44  ;;  %9624 = vmatpush1.bf16.msra.mxu1 %v13589_v28  ;;  %v8660_v34 = vpop.f32.mrf.mxu0  ;;  %9512 = vmatprep.subr.bf16.mxu0 %v13594_v49  ;;  %v21598_v44 = vcombine.high %v15804_v11, %v15875_v27  ;;  %v12110_v49 = vcombine.low %v21597_v23, %v21596_v25  ;;  %v13606_v25 = vld [vmem:[%s21046_s1 + $0x8e4] ss:$8 sps:$4 sm:$0xff]  }
 0x11d   :  { %v8773_v22 = vpop.f32.mrf.mxu1  ;;  %9625 = vmatprep.subr.bf16.mxu1 %v13597_v32  ;;  %9344 = vmatprep.mubr.bf16.mxu0 %v12111_v7  ;;  %v13598_v32 = vld [vmem:[%s21046_s1 + $0x8f0] ss:$8 sps:$4 sm:$0xff]   ;;  %v13609_v23 = vld [vmem:[%s21046_s1 + $0x9e4] ss:$8 sps:$4 sm:$0xff]  }
 0x11e   :  { %v16856_v48 = vadd.f32 %v8773_v22, %v8660_v34  ;;  %9457 = vmatprep.mubr.bf16.mxu1 %v21598_v44  ;;  %v8662_v12 = vpop.f32.mrf.mxu0  ;;  %v13601_v22 = vld [vmem:[%s21046_s1 + $0x9f0] ss:$8 sps:$4 sm:$0xff]  }
 0x11f   :  { %v8775_v28 = vpop.f32.mrf.mxu1  ;;  %9513 = vmatpush1.bf16.msra.mxu0 %v13592_v45  ;;  %v13604_v45 = vld [vmem:[%s21046_s1 + $0x8e0] ss:$8 sps:$4 sm:$0xff]  }
 0x120   :  { %v16866_v30 = vadd.f32 %v8775_v28, %v8662_v12  ;;  %9626 = vmatpush1.bf16.msra.mxu1 %v13595_v1  ;;  %v8664_v7 = vpop.f32.mrf.mxu0  ;;  %9514 = vmatprep.subr.bf16.mxu0 %v13600_v59  ;;  %v21599_v1 = vld [vmem:[#allocation33_spill] sm:$0xff]  ;;  %v21600_v12 = vld [vmem:[#allocation28_spill] sm:$0xff] }
 0x121   :  { %v8777_v34 = vpop.f32.mrf.mxu1  ;;  %9627 = vmatprep.subr.bf16.mxu1 %v13603_v60  ;;  %v16884_v28 = vcombine.high %v21600_v12, %v21599_v1  ;;  %v21602_v60 = vshrl.u32 %v16564_v58, 16 }
 0x122   :  { %v16877_v44 = vadd.f32 %v8777_v34, %v8664_v7  ;;  %v8668_v17 = vpop.f32.mrf.mxu0  ;;  %9345 = vmatmul.mubr.bf16.gmra.mxu0 %v12110_v49  ;;  %v21604_v7 = vcombine.low %v15804_v11, %v15875_v27  ;;  %v13607_v34 = vld [vmem:[%s21046_s1 + $0x9e0] ss:$8 sps:$4 sm:$0xff]   ;;  %v13612_v11 = vld [vmem:[%s21046_s1 + $0x8d4] ss:$8 sps:$4 sm:$0xff]  }
 0x123   :  { %21601 = vst [vmem:[#allocation27_spill] sm:$0xff] %v16884_v28  ;;  %v803_v59 = vrot.slane %v21602_v60, 4  ;;  %v8781_v52 = vpop.f32.mrf.mxu1  ;;  %9515 = vmatpush2.bf16.msra.mxu0 %v13598_v32  ;;  %v16901_v60 = vld [vmem:[%s21045_s0 + $0x148] sm:$0x33]  ;;  %v13615_v27 = vld [vmem:[%s21046_s1 + $0x9d4] ss:$8 sps:$4 sm:$0xff]   ;;  %9354 = vmatprep.mubr.bf16.mxu0 %v16884_v28 }
 0x124   :  { %9458 = vmatmul.mubr.bf16.gmra.mxu1 %v21604_v7  ;;  %v16896_v8 = vadd.f32 %v8781_v52, %v8668_v17  ;;  %v8670_v36 = vpop.f32.mrf.mxu0  ;;  %9516 = vmatprep.subr.bf16.mxu0 %v13606_v25  ;;  %v13610_v25 = vld [vmem:[%s21046_s1 + $0x8d0] ss:$8 sps:$4 sm:$0xff]   ;;  %v842_v28 = vrot.slane %v16901_v60, 5 }
 0x125   :  { %9628 = vmatpush2.bf16.msra.mxu1 %v13601_v22  ;;  %v8783_v29 = vpop.f32.mrf.mxu1  ;;  %9467 = vmatprep.mubr.bf16.mxu1 %v16127_v15  ;;  %v807_v52 = vor.u32 %v806_v9, %v803_v59  ;;  %v16915_v22 = vcombine.low %v21600_v12, %v21599_v1  ;;  %v13618_v1 = vld [vmem:[%s21046_s1 + $0x8c4] ss:$8 sps:$4 sm:$0xff]  }
 0x126   :  { %9629 = vmatprep.subr.bf16.mxu1 %v13609_v23  ;;  %v16909_v17 = vadd.f32 %v8783_v29, %v8670_v36  ;;  %v8672_v49 = vpop.f32.mrf.mxu0  ;;  %v13613_v29 = vld [vmem:[%s21046_s1 + $0x9d0] ss:$8 sps:$4 sm:$0xff]   ;;  %v13621_v12 = vld [vmem:[%s21046_s1 + $0x9c4] ss:$8 sps:$4 sm:$0xff]   ;;  %v11883_v23 = vrot.slane %v16564_v58, 9 }
 0x127   :  { %v8785_v32 = vpop.f32.mrf.mxu1  ;;  %21605 = vst [vmem:[#allocation26_spill] sm:$0xff] %v16915_v22  ;;  %9517 = vmatpush2.bf16.msra.mxu0 %v13604_v45  ;;  %v21607_v45 = vld [vmem:[#allocation40_spill] sm:$0xff] }
 0x128   :  { %v16921_v7 = vadd.f32 %v8785_v32, %v8672_v49  ;;  %v8674_v9 = vpop.f32.mrf.mxu0  ;;  %9518 = vmatprep.subr.bf16.mxu0 %v13612_v11  ;;  %v808_v32 = vrot.slane %v807_v52, 4  ;;  %v13619_v58 = vld [vmem:[%s21046_s1 + $0x9c0] ss:$8 sps:$4 sm:$0xff]  }
 0x129   :  { %9630 = vmatpush2.bf16.msra.mxu1 %v13607_v34  ;;  %v8787_v59 = vpop.f32.mrf.mxu1  ;;  %v21608_v34 = vld [vmem:[#allocation35_spill] sm:$0xff] }
 0x12a   :  { %9631 = vmatprep.subr.bf16.mxu1 %v13615_v27  ;;  %v16932_v36 = vadd.f32 %v8787_v59, %v8674_v9  ;;  %v16936_v49 = vcombine.high %v21608_v34, %v21607_v45  ;;  %v8678_v15 = vpop.f32.mrf.mxu0  ;;  %9355 = vmatmul.mubr.bf16.gmra.mxu0 %v16915_v22  ;;  %v13616_v27 = vld [vmem:[%s21046_s1 + $0x8c0] ss:$8 sps:$4 sm:$0xff]   ;;  %v21610_v9 = vshll.u32 %v16901_v60, 16 }
 0x12b   :  { %v8791_v11 = vpop.f32.mrf.mxu1  ;;  %9519 = vmatpush2.bf16.msra.mxu0 %v13610_v25 }
 0x12c   :  { %21606 = vst [vmem:[#allocation33_spill] sm:$0xff] %v16932_v36  ;;  %21609 = vst [vmem:[#allocation28_spill] sm:$0xff] %v16936_v49  ;;  %9468 = vmatmul.mubr.bf16.gmra.mxu1 %v16136_v19  ;;  %v812_v59 = vrot.slane %v21610_v9, 5  ;;  %v16947_v36 = vadd.f32 %v8791_v11, %v8678_v15  ;;  %v8680_v52 = vpop.f32.mrf.mxu0  ;;  %9520 = vmatprep.subr.bf16.mxu0 %v13618_v1  ;;  %v13624_v19 = vld [vmem:[%s21046_s1 + $0x8b4] ss:$8 sps:$4 sm:$0xff]   ;;  %v16964_v1 = vcombine.low %v21608_v34, %v21607_v45 }
 0x12d   :  { %9632 = vmatpush2.bf16.msra.mxu1 %v13613_v29  ;;  %v8793_v22 = vpop.f32.mrf.mxu1  ;;  %v13627_v9 = vld [vmem:[%s21046_s1 + $0x9b4] ss:$8 sps:$4 sm:$0xff]   ;;  %9364 = vmatprep.mubr.bf16.mxu0 %v16936_v49  ;;  %v13625_v45 = vld [vmem:[%s21046_s1 + $0x9b0] ss:$8 sps:$4 sm:$0xff]  }
 0x12e   :  { %9633 = vmatprep.subr.bf16.mxu1 %v13621_v12  ;;  %v16958_v15 = vadd.f32 %v8793_v22, %v8680_v52  ;;  %9477 = vmatprep.mubr.bf16.mxu1 %v16149_v26  ;;  %v8682_v25 = vpop.f32.mrf.mxu0  ;;  %21611 = vst [vmem:[#allocation40_spill] sm:$0xff] %v16964_v1  ;;  %v13622_v12 = vld [vmem:[%s21046_s1 + $0x8b0] ss:$8 sps:$4 sm:$0xff]   ;;  %v16971_v11 = vsel %vm14694_vm2, %v808_v32, %v812_v59  ;;  %v13630_v32 = vld [vmem:[%s21046_s1 + $0x8a4] ss:$8 sps:$4 sm:$0xff]  }
 0x12f   :  { %v8795_v29 = vpop.f32.mrf.mxu1  ;;  %21612 = vst [vmem:[#allocation35_spill] sm:$0xff] %v16971_v11  ;;  %v16975_v22 = vsel %vm15379_vm8, %v11883_v23, %v842_v28  ;;  %9521 = vmatpush2.bf16.msra.mxu0 %v13616_v27  ;;  %v13633_v28 = vld [vmem:[%s21046_s1 + $0x9a4] ss:$8 sps:$4 sm:$0xff]   ;;  %v21614_v27 = vld [vmem:[#allocation41_spill] sm:$0xff] }
 0x130   :  { %21613 = vst [vmem:[#allocation128_spill] sm:$0xff] %v16975_v22  ;;  %v16977_v52 = vadd.f32 %v8795_v29, %v8682_v25  ;;  %v8684_v34 = vpop.f32.mrf.mxu0  ;;  %9522 = vmatprep.subr.bf16.mxu0 %v13624_v19  ;;  %v16992_v59 = vcombine.high %v21614_v27, %v16971_v11  ;;  %v13628_v25 = vld [vmem:[%s21046_s1 + $0x8a0] ss:$8 sps:$4 sm:$0xff]  }
 0x131   :  { %9634 = vmatpush2.bf16.msra.mxu1 %v13619_v58  ;;  %v8797_v26 = vpop.f32.mrf.mxu1  ;;  %v16996_v58 = vcombine.high %v16104_v42, %v16975_v22  ;;  %v13631_v29 = vld [vmem:[%s21046_s1 + $0x9a0] ss:$8 sps:$4 sm:$0xff]  }
 0x132   :  { %9635 = vmatprep.subr.bf16.mxu1 %v13627_v9  ;;  %v16988_v23 = vadd.f32 %v8797_v26, %v8684_v34  ;;  %21615 = vst [vmem:[#allocation41_spill] sm:$0xff] %v16992_v59  ;;  %v8688_v19 = vpop.f32.mrf.mxu0  ;;  %9365 = vmatmul.mubr.bf16.gmra.mxu0 %v16964_v1  ;;  %v13636_v34 = vld [vmem:[%s21046_s1 + $0x894] ss:$8 sps:$4 sm:$0xff]  }
 0x133   :  { %21616 = vst [vmem:[#allocation129_spill] sm:$0xff] %v16996_v58  ;;  %v8801_v9 = vpop.f32.mrf.mxu1  ;;  %9523 = vmatpush2.bf16.msra.mxu0 %v13622_v12  ;;  %9374 = vmatprep.mubr.bf16.mxu0 %v16992_v59 }
 0x134   :  { %9478 = vmatmul.mubr.bf16.gmra.mxu1 %v16166_v5  ;;  %v17003_v26 = vadd.f32 %v8801_v9, %v8688_v19  ;;  %v8690_v49 = vpop.f32.mrf.mxu0  ;;  %9524 = vmatprep.subr.bf16.mxu0 %v13630_v32  ;;  %v13639_v5 = vld [vmem:[%s21046_s1 + $0x994] ss:$8 sps:$4 sm:$0xff]   ;;  %v17020_v9 = vcombine.low %v21614_v27, %v16971_v11  ;;  %v17024_v32 = vcombine.low %v16104_v42, %v16975_v22  ;;  %v13642_v27 = vld [vmem:[%s21046_s1 + $0x884] ss:$8 sps:$4 sm:$0xff]  }
 0x135   :  { %9636 = vmatpush2.bf16.msra.mxu1 %v13625_v45  ;;  %v8803_v1 = vpop.f32.mrf.mxu1  ;;  %9487 = vmatprep.mubr.bf16.mxu1 %v16996_v58  ;;  %v13645_v42 = vld [vmem:[%s21046_s1 + $0x984] ss:$8 sps:$4 sm:$0xff]  }
 0x136   :  { %9637 = vmatprep.subr.bf16.mxu1 %v13633_v28  ;;  %v17014_v19 = vadd.f32 %v8803_v1, %v8690_v49  ;;  %v8692_v12 = vpop.f32.mrf.mxu0  ;;  %21617 = vst [vmem:[#allocation130_spill] sm:$0xff] %v17020_v9  ;;  %21618 = vst [vmem:[#allocation131_spill] sm:$0xff] %v17024_v32  ;;  %v13634_v28 = vld [vmem:[%s21046_s1 + $0x890] ss:$8 sps:$4 sm:$0xff]  }
 0x137   :  { %v8805_v45 = vpop.f32.mrf.mxu1  ;;  %9525 = vmatpush2.bf16.msra.mxu0 %v13628_v25  ;;  %v13637_v1 = vld [vmem:[%s21046_s1 + $0x990] ss:$8 sps:$4 sm:$0xff]   ;;  %v21619_v25 = vld [vmem:[#allocation47_spill] sm:$0xff] }
 0x138   :  { %v17029_v49 = vadd.f32 %v8805_v45, %v8692_v12  ;;  %v8694_v58 = vpop.f32.mrf.mxu0  ;;  %9526 = vmatprep.subr.bf16.mxu0 %v13636_v34  ;;  %v13640_v34 = vld [vmem:[%s21046_s1 + $0x880] ss:$8 sps:$4 sm:$0xff]  }
 0x139   :  { %9638 = vmatpush2.bf16.msra.mxu1 %v13631_v29  ;;  %v8807_v59 = vpop.f32.mrf.mxu1  ;;  %v21620_v29 = vld [vmem:[#allocation34_spill] sm:$0xff] }
 0x13a   :  { %9639 = vmatprep.subr.bf16.mxu1 %v13639_v5  ;;  %v17040_v12 = vadd.f32 %v8807_v59, %v8694_v58  ;;  %v11915_v45 = vcombine.high %v21620_v29, %v21619_v25  ;;  %v8698_v22 = vpop.f32.mrf.mxu0  ;;  %9375 = vmatmul.mubr.bf16.gmra.mxu0 %v17020_v9  ;;  %v13643_v59 = vld [vmem:[%s21046_s1 + $0x980] ss:$8 sps:$4 sm:$0xff]   ;;  %v13648_v58 = vld [vmem:[%s21046_s1 + $0xa74] ss:$8 sps:$4 sm:$0xff]  }
 0x13b   :  { %v8811_v38 = vpop.f32.mrf.mxu1  ;;  %9527 = vmatpush2.bf16.msra.mxu0 %v13634_v28  ;;  %v11914_v28 = vcombine.low %v21620_v29, %v21619_v25  ;;  %v13657_v29 = vld [vmem:[%s21046_s1 + $0xb64] ss:$8 sps:$4 sm:$0xff]  }
 0x13c   :  { %9488 = vmatmul.mubr.bf16.gmra.mxu1 %v17024_v32  ;;  %v17049_v5 = vadd.f32 %v8811_v38, %v8698_v22  ;;  %v8700_v11 = vpop.f32.mrf.mxu0  ;;  %9528 = vmatprep.subr.bf16.mxu0 %v13642_v27  ;;  %v13651_v32 = vld [vmem:[%s21046_s1 + $0xb74] ss:$8 sps:$4 sm:$0xff]   ;;  %v21622_v22 = vcombine.high %v15974_v50, %v15978_v14  ;;  %v13646_v27 = vld [vmem:[%s21046_s1 + $0xa70] ss:$8 sps:$4 sm:$0xff]  }
 0x13d   :  { %9640 = vmatpush2.bf16.msra.mxu1 %v13637_v1  ;;  %v8813_v9 = vpop.f32.mrf.mxu1  ;;  %9530 = vmatprep.mubr.bf16.mxu0 %v11915_v45 }
 0x13e   :  { %9641 = vmatprep.subr.bf16.mxu1 %v13645_v42  ;;  %v17060_v38 = vadd.f32 %v8813_v9, %v8700_v11  ;;  %9643 = vmatprep.mubr.bf16.mxu1 %v21622_v22  ;;  %v8702_v1 = vpop.f32.mrf.mxu0  ;;  %v13649_v11 = vld [vmem:[%s21046_s1 + $0xb70] ss:$8 sps:$4 sm:$0xff]   ;;  %v13654_v9 = vld [vmem:[%s21046_s1 + $0xa64] ss:$8 sps:$4 sm:$0xff]  }
 0x13f   :  { %v8815_v43 = vpop.f32.mrf.mxu1  ;;  %9529 = vmatpush2.bf16.msra.mxu0 %v13640_v34  ;;  %v21625_v34 = vld [vmem:[#allocation51_spill] sm:$0xff] }
 0x140   :  { %21621 = vst [vmem:[#allocation47_spill] sm:$0xff] %v17060_v38  ;;  %v17070_v42 = vadd.f32 %v8815_v43, %v8702_v1  ;;  %v8704_v45 = vpop.f32.mrf.mxu0  ;;  %9724 = vmatprep.subr.bf16.mxu0 %v13648_v58  ;;  %v21628_v38 = vcombine.low %v15974_v50, %v15978_v14  ;;  %v866_v58 = vshrl.u32 %v16697_v10, 16  ;;  %v13660_v14 = vld [vmem:[%s21046_s1 + $0xa54] ss:$8 sps:$4 sm:$0xff]  }
 0x141   :  { %9642 = vmatpush2.bf16.msra.mxu1 %v13643_v59  ;;  %v8817_v25 = vpop.f32.mrf.mxu1  ;;  %v21626_v59 = vld [vmem:[#allocation48_spill] sm:$0xff]  ;;  %v13663_v50 = vld [vmem:[%s21046_s1 + $0xb54] ss:$8 sps:$4 sm:$0xff]  }
 0x142   :  { %21623 = vst [vmem:[#allocation34_spill] sm:$0xff] %v17070_v42  ;;  %9837 = vmatprep.subr.bf16.mxu1 %v13651_v32  ;;  %v17081_v43 = vadd.f32 %v8817_v25, %v8704_v45  ;;  %v17085_v22 = vcombine.high %v21626_v59, %v21625_v34  ;;  %v8854_v1 = vpop.f32.mrf.mxu0  ;;  %9531 = vmatmul.mubr.bf16.vlgmr.msra.gmra.mxu0 %v11914_v28  ;;  %v13652_v32 = vld [vmem:[%s21046_s1 + $0xa60] ss:$8 sps:$4 sm:$0xff]  }
 0x143   :  { %v8967_v42 = vpop.f32.mrf.mxu1  ;;  %v8855_v45 = vadd.f32 %v8854_v1, %v16692_v24  ;;  %9725 = vmatpush1.bf16.msra.mxu0 %v13646_v27  ;;  %v13655_v25 = vld [vmem:[%s21046_s1 + $0xb60] ss:$8 sps:$4 sm:$0xff]   ;;  %v868_v1 = vrot.slane %v866_v58, 5  ;;  %v13666_v58 = vld [vmem:[%s21046_s1 + $0xa44] ss:$8 sps:$4 sm:$0xff]  }
 0x144   :  { %21624 = vst [vmem:[#allocation132_spill] sm:$0xff] %v17081_v43  ;;  %21627 = vst [vmem:[#allocation51_spill] sm:$0xff] %v17085_v22  ;;  %9644 = vmatmul.mubr.bf16.vlgmr.msra.gmra.mxu1 %v21628_v38  ;;  %v8856_v43 = vpop.f32.mrf.mxu0  ;;  %9726 = vmatprep.subr.bf16.mxu0 %v13654_v9  ;;  %v17111_v9 = vcombine.low %v21626_v59, %v21625_v34 }
 0x145   :  { %9838 = vmatpush1.bf16.msra.mxu1 %v13649_v11  ;;  %v8969_v28 = vpop.f32.mrf.mxu1  ;;  %v17104_v38 = vadd.f32 %v8967_v42, %v8855_v45  ;;  %v8857_v24 = vadd.f32 %v8856_v43, %v16705_v55  ;;  %9540 = vmatprep.mubr.bf16.mxu0 %v17085_v22  ;;  %v21631_v42 = vshll.u32 %v16697_v10, 16  ;;  %v13661_v43 = vld [vmem:[%s21046_s1 + $0xb50] ss:$8 sps:$4 sm:$0xff]  }
 0x146   :  { %9839 = vmatprep.subr.bf16.mxu1 %v13657_v29  ;;  %9653 = vmatprep.mubr.bf16.mxu1 %v16282_v57  ;;  %v8858_v27 = vpop.f32.mrf.mxu0  ;;  %21630 = vst [vmem:[#allocation133_spill] sm:$0xff] %v17111_v9  ;;  %v13658_v29 = vld [vmem:[%s21046_s1 + $0xa50] ss:$8 sps:$4 sm:$0xff]  }
 0x147   :  { %21629 = vst [vmem:[#allocation48_spill] sm:$0xff] %v17104_v38  ;;  %v8971_v11 = vpop.f32.mrf.mxu1  ;;  %v869_v45 = vrot.slane %v21631_v42, 6  ;;  %v17118_v38 = vadd.f32 %v8969_v28, %v8857_v24  ;;  %v8859_v55 = vadd.f32 %v8858_v27, %v16717_v0  ;;  %9727 = vmatpush1.bf16.msra.mxu0 %v13652_v32  ;;  %v13669_v28 = vld [vmem:[%s21046_s1 + $0xb44] ss:$8 sps:$4 sm:$0xff]   ;;  %v902_v42 = vrot.slane %v16697_v10, 6  ;;  %v17161_v10 = vld [vmem:[%s21045_s0 + $0x90] sm:$0xff] }
 0x148   :  { %v8860_v34 = vpop.f32.mrf.mxu0  ;;  %9728 = vmatprep.subr.bf16.mxu0 %v13660_v14  ;;  %v21632_v0 = vld [vmem:[#allocation52_spill] sm:$0xff] }
 0x149   :  { %9840 = vmatpush1.bf16.msra.mxu1 %v13655_v25  ;;  %v8973_v59 = vpop.f32.mrf.mxu1  ;;  %v17132_v32 = vcombine.high %v21632_v0, %v15715_v20  ;;  %v17134_v25 = vadd.f32 %v8971_v11, %v8859_v55  ;;  %v8861_v24 = vadd.f32 %v8860_v34, %v16728_v39  ;;  %v13664_v14 = vld [vmem:[%s21046_s1 + $0xa40] ss:$8 sps:$4 sm:$0xff]   ;;  %v21636_v11 = vor.u32 %v16372_v53, %v16359_v63  ;;  %v13672_v63 = vld [vmem:[%s21046_s1 + $0xa34] ss:$8 sps:$4 sm:$0xff]  }
 0x14a   :  { %9841 = vmatprep.subr.bf16.mxu1 %v13663_v50  ;;  %v17143_v50 = vld [vmem:[%s21045_s0 + $0x80] sm:$0xff]  ;;  %v8864_v57 = vpop.f32.mrf.mxu0  ;;  %9541 = vmatmul.mubr.bf16.gmra.mxu0 %v17111_v9  ;;  %v870_v34 = vor.u32 %v869_v45, %v868_v1  ;;  %v13675_v53 = vld [vmem:[%s21046_s1 + $0xb34] ss:$8 sps:$4 sm:$0xff]  }
 0x14b   :  { %21633 = vst [vmem:[#allocation52_spill] sm:$0xff] %v17132_v32  ;;  %21634 = vst [vmem:[#allocation134_spill] sm:$0xff] %v17134_v25  ;;  %v11884_v27 = vrot.slane %v17143_v50, 10  ;;  %v8977_v22 = vpop.f32.mrf.mxu1  ;;  %v13667_v39 = vld [vmem:[%s21046_s1 + $0xb40] ss:$8 sps:$4 sm:$0xff]   ;;  %v865_v55 = vrot.slane %v21636_v11, 4  ;;  %v17155_v25 = vadd.f32 %v8973_v59, %v8861_v24  ;;  %9729 = vmatpush1.bf16.msra.mxu0 %v13658_v29  ;;  %9550 = vmatprep.mubr.bf16.mxu0 %v17132_v32 }
 0x14c   :  { %21635 = vst [vmem:[#allocation135_spill] sm:$0xff] %v17143_v50  ;;  %9654 = vmatmul.mubr.bf16.gmra.mxu1 %v16290_v61  ;;  %v8865_v50 = vadd.f32 %v8864_v57, %v16743_v3  ;;  %v8866_v61 = vpop.f32.mrf.mxu0  ;;  %9730 = vmatprep.subr.bf16.mxu0 %v13666_v58 }
 0x14d   :  { %9842 = vmatpush1.bf16.msra.mxu1 %v13661_v43  ;;  %v8979_v9 = vpop.f32.mrf.mxu1  ;;  %v8867_v3 = vadd.f32 %v8866_v61, %v16754_v4  ;;  %9663 = vmatprep.mubr.bf16.mxu1 %v16347_v21  ;;  %v17176_v29 = vsel %vm15929_vm11, %v11884_v27, %v902_v42  ;;  %v17180_v43 = vcombine.low %v21632_v0, %v15715_v20  ;;  %v21296_v4 = vshrl.u32 %v17161_v10, 16  ;;  %v13673_v20 = vld [vmem:[%s21046_s1 + $0xb30] ss:$8 sps:$4 sm:$0xff]  }
 0x14e   :  { %9843 = vmatprep.subr.bf16.mxu1 %v13669_v28  ;;  %v17169_v57 = vadd.f32 %v8977_v22, %v8865_v50  ;;  %21637 = vst [vmem:[#allocation136_spill] sm:$0xff] %v17176_v29  ;;  %v8868_v1 = vpop.f32.mrf.mxu0  ;;  %v13670_v22 = vld [vmem:[%s21046_s1 + $0xa30] ss:$8 sps:$4 sm:$0xff]   ;;  %v17187_v61 = vsel %vm15091_vm5, %v865_v55, %v870_v34  ;;  %v21295_v28 = vshll.u32 %v17161_v10, 16  ;;  %v13678_v50 = vld [vmem:[%s21046_s1 + $0xa24] ss:$8 sps:$4 sm:$0xff]  }
 0x14f   :  { %v8981_v45 = vpop.f32.mrf.mxu1  ;;  %21638 = vst [vmem:[#allocation137_spill] sm:$0xff] %v17180_v43  ;;  %v17190_v59 = vadd.f32 %v8979_v9, %v8867_v3  ;;  %v8869_v58 = vadd.f32 %v8868_v1, %v16773_v18  ;;  %9731 = vmatpush1.bf16.msra.mxu0 %v13664_v14  ;;  %v13681_v18 = vld [vmem:[%s21046_s1 + $0xb24] ss:$8 sps:$4 sm:$0xff]   ;;  %v17205_v9 = vcombine.high %v16340_v35, %v17176_v29  ;;  %v17209_v14 = vrot.slane %v21296_v4, 5  ;;  %v13679_v3 = vld [vmem:[%s21046_s1 + $0xb20] ss:$8 sps:$4 sm:$0xff]  }
 0x150   :  { %v8870_v0 = vpop.f32.mrf.mxu0  ;;  %9732 = vmatprep.subr.bf16.mxu0 %v13672_v63  ;;  %v17220_v11 = vrot.slane %v21295_v28, 6  ;;  %v13676_v63 = vld [vmem:[%s21046_s1 + $0xa20] ss:$8 sps:$4 sm:$0xff]   ;;  %v13699_v28 = vld [vmem:[%s21046_s1 + $0xbf4] ss:$8 sps:$4 sm:$0xff]  }
 0x151   :  { %9844 = vmatpush1.bf16.msra.mxu1 %v13667_v39  ;;  %v8983_v24 = vpop.f32.mrf.mxu1  ;;  %21639 = vst [vmem:[#allocation138_spill] sm:$0xff] %v17205_v9  ;;  %v17211_v27 = vadd.f32 %v8981_v45, %v8869_v58  ;;  %v8871_v42 = vadd.f32 %v8870_v0, %v16784_v54  ;;  %v17216_v39 = vcombine.high %v15719_v47, %v17187_v61  ;;  %v13684_v0 = vld [vmem:[%s21046_s1 + $0xa14] ss:$8 sps:$4 sm:$0xff]  }
 0x152   :  { %9845 = vmatprep.subr.bf16.mxu1 %v13675_v53  ;;  %v8874_v55 = vpop.f32.mrf.mxu0  ;;  %9551 = vmatmul.mubr.bf16.gmra.mxu0 %v17180_v43 }
 0x153   :  { %21640 = vst [vmem:[#allocation139_spill] sm:$0xff] %v17216_v39  ;;  %v8987_v34 = vpop.f32.mrf.mxu1  ;;  %v17227_v53 = vadd.f32 %v8983_v24, %v8871_v42  ;;  %v8875_v54 = vadd.f32 %v8874_v55, %v16799_v6  ;;  %9733 = vmatpush1.bf16.msra.mxu0 %v13670_v22  ;;  %v13687_v6 = vld [vmem:[%s21046_s1 + $0xb14] ss:$8 sps:$4 sm:$0xff]   ;;  %9560 = vmatprep.mubr.bf16.mxu0 %v17216_v39  ;;  %v13682_v55 = vld [vmem:[%s21046_s1 + $0xa10] ss:$8 sps:$4 sm:$0xff]   ;;  %v906_v39 = vrot.slane %v16901_v60, 6 }
 0x154   :  { %9664 = vmatmul.mubr.bf16.gmra.mxu1 %v16355_v41  ;;  %v8876_v45 = vpop.f32.mrf.mxu0  ;;  %9734 = vmatprep.subr.bf16.mxu0 %v13678_v50  ;;  %v17248_v50 = vcombine.low %v15719_v47, %v17187_v61 }
 0x155   :  { %9846 = vmatpush1.bf16.msra.mxu1 %v13673_v20  ;;  %v8989_v58 = vpop.f32.mrf.mxu1  ;;  %v17241_v22 = vadd.f32 %v8987_v34, %v8875_v54  ;;  %v8877_v20 = vadd.f32 %v8876_v45, %v16810_v33  ;;  %9673 = vmatprep.mubr.bf16.mxu1 %v17205_v9  ;;  %v13685_v54 = vld [vmem:[%s21046_s1 + $0xb10] ss:$8 sps:$4 sm:$0xff]  }
 0x156   :  { %9847 = vmatprep.subr.bf16.mxu1 %v13681_v18  ;;  %v8878_v24 = vpop.f32.mrf.mxu0  ;;  %21641 = vst [vmem:[#allocation140_spill] sm:$0xff] %v17248_v50  ;;  %v17252_v18 = vcombine.low %v16340_v35, %v17176_v29  ;;  %v13690_v35 = vld [vmem:[%s21046_s1 + $0xa04] ss:$8 sps:$4 sm:$0xff]  }
 0x157   :  { %v8991_v42 = vpop.f32.mrf.mxu1  ;;  %v17257_v34 = vadd.f32 %v8989_v58, %v8877_v20  ;;  %v8879_v33 = vadd.f32 %v8878_v24, %v16825_v2  ;;  %9735 = vmatpush1.bf16.msra.mxu0 %v13676_v63  ;;  %v13693_v58 = vld [vmem:[%s21046_s1 + $0xb04] ss:$8 sps:$4 sm:$0xff]   ;;  %v13688_v63 = vld [vmem:[%s21046_s1 + $0xa00] ss:$8 sps:$4 sm:$0xff]  }
 0x158   :  { %21642 = vst [vmem:[#allocation141_spill] sm:$0xff] %v17252_v18  ;;  %v8880_v47 = vpop.f32.mrf.mxu0  ;;  %9736 = vmatprep.subr.bf16.mxu0 %v13684_v0  ;;  %v13691_v24 = vld [vmem:[%s21046_s1 + $0xb00] ss:$8 sps:$4 sm:$0xff]  }
 0x159   :  { %9848 = vmatpush1.bf16.msra.mxu1 %v13679_v3  ;;  %v8993_v45 = vpop.f32.mrf.mxu1  ;;  %v17269_v20 = vadd.f32 %v8991_v42, %v8879_v33  ;;  %v8881_v2 = vadd.f32 %v8880_v47, %v16836_v40  ;;  %v12115_v3 = vcombine.high %v15829_v37, %v15894_v46  ;;  %v13696_v33 = vld [vmem:[%s21046_s1 + $0xaf4] ss:$8 sps:$4 sm:$0xff]  }
 0x15a   :  { %9849 = vmatprep.subr.bf16.mxu1 %v13687_v6  ;;  %v8884_v0 = vpop.f32.mrf.mxu0  ;;  %9561 = vmatmul.mubr.bf16.gmra.mxu0 %v17248_v50  ;;  %v17392_v50 = vld [vmem:[%s21045_s0 + $0x140] sm:$0xff] }
 0x15b   :  { %v8997_v6 = vpop.f32.mrf.mxu1  ;;  %v17282_v42 = vadd.f32 %v8993_v45, %v8881_v2  ;;  %v8885_v40 = vadd.f32 %v8884_v0, %v16845_v13  ;;  %9737 = vmatpush1.bf16.msra.mxu0 %v13682_v55  ;;  %9570 = vmatprep.mubr.bf16.mxu0 %v12115_v3  ;;  %v21643_v13 = vcombine.high %v16409_v51, %v16458_v62  ;;  %v13694_v55 = vld [vmem:[%s21046_s1 + $0xaf0] ss:$8 sps:$4 sm:$0xff]   ;;  %v11885_v9 = vrot.slane %v17392_v50, 10 }
 0x15c   :  { %9674 = vmatmul.mubr.bf16.gmra.mxu1 %v17252_v18  ;;  %v8886_v47 = vpop.f32.mrf.mxu0  ;;  %9738 = vmatprep.subr.bf16.mxu0 %v13690_v35  ;;  %v12114_v2 = vcombine.low %v15829_v37, %v15894_v46  ;;  %v13700_v46 = vld [vmem:[%s21046_s1 + $0xae0] ss:$8 sps:$4 sm:$0xff]  }
 0x15d   :  { %9850 = vmatpush1.bf16.msra.mxu1 %v13685_v54  ;;  %v8999_v1 = vpop.f32.mrf.mxu1  ;;  %v17291_v4 = vadd.f32 %v8997_v6, %v8885_v40  ;;  %v8887_v45 = vadd.f32 %v8886_v47, %v16856_v48  ;;  %9683 = vmatprep.mubr.bf16.mxu1 %v21643_v13  ;;  %v13697_v54 = vld [vmem:[%s21046_s1 + $0xbf0] ss:$8 sps:$4 sm:$0xff]   ;;  %v13702_v40 = vld [vmem:[%s21046_s1 + $0xae4] ss:$8 sps:$4 sm:$0xff]  }
 0x15e   :  { %9851 = vmatprep.subr.bf16.mxu1 %v13693_v58  ;;  %v8888_v35 = vpop.f32.mrf.mxu0  ;;  %v13705_v47 = vld [vmem:[%s21046_s1 + $0xbe4] ss:$8 sps:$4 sm:$0xff]  }
 0x15f   :  { %v9001_v58 = vpop.f32.mrf.mxu1  ;;  %v17305_v0 = vadd.f32 %v8999_v1, %v8887_v45  ;;  %v8889_v48 = vadd.f32 %v8888_v35, %v16866_v30  ;;  %9739 = vmatpush1.bf16.msra.mxu0 %v13688_v63  ;;  %v13703_v30 = vld [vmem:[%s21046_s1 + $0xbe0] ss:$8 sps:$4 sm:$0xff]  }
 0x160   :  { %v8890_v3 = vpop.f32.mrf.mxu0  ;;  %9740 = vmatprep.subr.bf16.mxu0 %v13696_v33  ;;  %v21646_v33 = vcombine.low %v16409_v51, %v16458_v62  ;;  %v13711_v62 = vld [vmem:[%s21046_s1 + $0xbd4] ss:$8 sps:$4 sm:$0xff]  }
 0x161   :  { %9852 = vmatpush1.bf16.msra.mxu1 %v13691_v24  ;;  %v9003_v6 = vpop.f32.mrf.mxu1  ;;  %v17314_v13 = vadd.f32 %v9001_v58, %v8889_v48  ;;  %v8891_v37 = vadd.f32 %v8890_v3, %v16877_v44  ;;  %v876_v44 = vshrl.u32 %v16901_v60, 16 }
 0x162   :  { %9853 = vmatprep.subr.bf16.mxu1 %v13699_v28  ;;  %v21644_v28 = vld [vmem:[#allocation63_spill] sm:$0xff]  ;;  %v8894_v63 = vpop.f32.mrf.mxu0  ;;  %9571 = vmatmul.mubr.bf16.gmra.mxu0 %v12114_v2  ;;  %v13708_v2 = vld [vmem:[%s21046_s1 + $0xad4] ss:$8 sps:$4 sm:$0xff]  }
 0x163   :  { %v17325_v1 = vcombine.high %v21644_v28, %v16018_v31  ;;  %v9007_v24 = vpop.f32.mrf.mxu1  ;;  %v17331_v45 = vadd.f32 %v9003_v6, %v8891_v37  ;;  %v8895_v35 = vadd.f32 %v8894_v63, %v16896_v8  ;;  %9741 = vmatpush2.bf16.msra.mxu0 %v13694_v55  ;;  %v21647_v8 = vld [vmem:[#allocation108_spill] sm:$0xff]  ;;  %v13706_v55 = vld [vmem:[%s21046_s1 + $0xad0] ss:$8 sps:$4 sm:$0xff]   ;;  %v878_v37 = vrot.slane %v876_v44, 5 }
 0x164   :  { %9684 = vmatmul.mubr.bf16.gmra.mxu1 %v21646_v33  ;;  %v8896_v58 = vpop.f32.mrf.mxu0  ;;  %9742 = vmatprep.subr.bf16.mxu0 %v13702_v40  ;;  %v21650_v44 = vld [vmem:[#allocation33_spill] sm:$0xff] }
 0x165   :  { %21645 = vst [vmem:[#allocation63_spill] sm:$0xff] %v17325_v1  ;;  %9854 = vmatpush2.bf16.msra.mxu1 %v13697_v54  ;;  %v9009_v48 = vpop.f32.mrf.mxu1  ;;  %v17340_v51 = vadd.f32 %v9007_v24, %v8895_v35  ;;  %v8897_v3 = vadd.f32 %v8896_v58, %v16909_v17  ;;  %9580 = vmatprep.mubr.bf16.mxu0 %v17325_v1  ;;  %v13709_v54 = vld [vmem:[%s21046_s1 + $0xbd0] ss:$8 sps:$4 sm:$0xff]   ;;  %v21649_v17 = vshll.u32 %v16901_v60, 16 }
 0x166   :  { %9855 = vmatprep.subr.bf16.mxu1 %v13705_v47  ;;  %9693 = vmatprep.mubr.bf16.mxu1 %v21647_v8  ;;  %v8898_v6 = vpop.f32.mrf.mxu0  ;;  %v17353_v47 = vcombine.low %v21644_v28, %v16018_v31  ;;  %v13714_v8 = vld [vmem:[%s21046_s1 + $0xac4] ss:$8 sps:$4 sm:$0xff]  }
 0x167   :  { %v9011_v40 = vpop.f32.mrf.mxu1  ;;  %v879_v63 = vrot.slane %v21649_v17, 6  ;;  %v17357_v24 = vadd.f32 %v9009_v48, %v8897_v3  ;;  %v8899_v33 = vadd.f32 %v8898_v6, %v16921_v7  ;;  %9743 = vmatpush2.bf16.msra.mxu0 %v13700_v46  ;;  %v13717_v31 = vld [vmem:[%s21046_s1 + $0xbc4] ss:$8 sps:$4 sm:$0xff]   ;;  %v13712_v7 = vld [vmem:[%s21046_s1 + $0xac0] ss:$8 sps:$4 sm:$0xff]   ;;  %v17382_v3 = vld [vmem:[%s21045_s0 + $0x150] sm:$0xff] }
 0x168   :  { %21648 = vst [vmem:[#allocation142_spill] sm:$0xff] %v17353_v47  ;;  %v8900_v35 = vpop.f32.mrf.mxu0  ;;  %9744 = vmatprep.subr.bf16.mxu0 %v13708_v2  ;;  %v13715_v46 = vld [vmem:[%s21046_s1 + $0xbc0] ss:$8 sps:$4 sm:$0xff]   ;;  %v21652_v2 = vld [vmem:[#allocation70_spill] sm:$0xff]  ;;  %v21654_v17 = vld [vmem:[#allocation109_spill] sm:$0xff] }
 0x169   :  { %9856 = vmatpush2.bf16.msra.mxu1 %v13703_v30  ;;  %v9013_v58 = vpop.f32.mrf.mxu1  ;;  %v17366_v28 = vadd.f32 %v9011_v40, %v8899_v33  ;;  %v8901_v48 = vadd.f32 %v8900_v35, %v21650_v44  ;;  %v21651_v30 = vld [vmem:[#allocation78_spill] sm:$0xff]  ;;  %v21655_v33 = vld [vmem:[#allocation120_spill] sm:$0xff]  ;;  %v880_v18 = vor.u32 %v879_v63, %v878_v37 }
 0x16a   :  { %9857 = vmatprep.subr.bf16.mxu1 %v13711_v62  ;;  %v17377_v62 = vcombine.high %v21652_v2, %v21651_v30  ;;  %v8904_v6 = vpop.f32.mrf.mxu0  ;;  %9581 = vmatmul.mubr.bf16.gmra.mxu0 %v17353_v47  ;;  %v21656_v35 = vld [vmem:[#allocation116_spill] sm:$0xff]  ;;  %v13720_v37 = vld [vmem:[%s21046_s1 + $0xab4] ss:$8 sps:$4 sm:$0xff]  }
 0x16b   :  { %v9017_v40 = vpop.f32.mrf.mxu1  ;;  %v21657_v44 = vor.u32 %v21655_v33, %v21656_v35  ;;  %v17396_v41 = vadd.f32 %v9013_v58, %v8901_v48  ;;  %v8905_v47 = vadd.f32 %v8904_v6, %v16947_v36  ;;  %9745 = vmatpush2.bf16.msra.mxu0 %v13706_v55  ;;  %v13723_v63 = vld [vmem:[%s21046_s1 + $0xbb4] ss:$8 sps:$4 sm:$0xff]   ;;  %v21658_v36 = vld [vmem:[#allocation115_spill] sm:$0xff]  ;;  %v13718_v55 = vld [vmem:[%s21046_s1 + $0xab0] ss:$8 sps:$4 sm:$0xff]   ;;  %v21306_v48 = vshrl.u32 %v17382_v3, 16 }
 0x16c   :  { %21653 = vst [vmem:[#allocation33_spill] sm:$0xff] %v17377_v62  ;;  %9694 = vmatmul.mubr.bf16.gmra.mxu1 %v21654_v17  ;;  %v8906_v17 = vpop.f32.mrf.mxu0  ;;  %9746 = vmatprep.subr.bf16.mxu0 %v13714_v8  ;;  %v17412_v8 = vcombine.low %v21652_v2, %v21651_v30  ;;  %v21305_v30 = vshll.u32 %v17382_v3, 16  ;;  %v21661_v35 = vld [vmem:[#allocation79_spill] sm:$0xff] }
 0x16d   :  { %v875_v1 = vrot.slane %v21657_v44, 4  ;;  %9858 = vmatpush2.bf16.msra.mxu1 %v13709_v54  ;;  %v9019_v43 = vpop.f32.mrf.mxu1  ;;  %v17405_v33 = vadd.f32 %v9017_v40, %v8905_v47  ;;  %v8907_v60 = vadd.f32 %v8906_v17, %v16958_v15  ;;  %9590 = vmatprep.mubr.bf16.mxu0 %v17377_v62  ;;  %v13721_v54 = vld [vmem:[%s21046_s1 + $0xbb0] ss:$8 sps:$4 sm:$0xff]  }
 0x16e   :  { %9859 = vmatprep.subr.bf16.mxu1 %v13717_v31  ;;  %9703 = vmatprep.mubr.bf16.mxu1 %v21658_v36  ;;  %21659 = vst [vmem:[#allocation78_spill] sm:$0xff] %v17412_v8  ;;  %v8908_v47 = vpop.f32.mrf.mxu0  ;;  %v17426_v31 = vsel %vm15929_vm11, %v11885_v9, %v906_v39  ;;  %v13729_v9 = vld [vmem:[%s21046_s1 + $0xba4] ss:$8 sps:$4 sm:$0xff]   ;;  %v13732_v36 = vld [vmem:[%s21046_s1 + $0xa94] ss:$8 sps:$4 sm:$0xff]  }
 0x16f   :  { %v9021_v58 = vpop.f32.mrf.mxu1  ;;  %v17422_v15 = vsel %vm15091_vm5, %v875_v1, %v880_v18  ;;  %21660 = vst [vmem:[#allocation70_spill] sm:$0xff] %v17426_v31  ;;  %v17430_v2 = vadd.f32 %v9019_v43, %v8907_v60  ;;  %v8909_v6 = vadd.f32 %v8908_v47, %v16977_v52  ;;  %9747 = vmatpush2.bf16.msra.mxu0 %v13712_v7  ;;  %v13726_v18 = vld [vmem:[%s21046_s1 + $0xaa4] ss:$8 sps:$4 sm:$0xff]   ;;  %v17441_v43 = vrot.slane %v21306_v48, 5  ;;  %v13724_v7 = vld [vmem:[%s21046_s1 + $0xaa0] ss:$8 sps:$4 sm:$0xff]  }
 0x170   :  { %v8910_v40 = vpop.f32.mrf.mxu0  ;;  %9748 = vmatprep.subr.bf16.mxu0 %v13720_v37  ;;  %v17445_v52 = vrot.slane %v21305_v30, 6  ;;  %v17458_v44 = vcombine.high %v21661_v35, %v17422_v15  ;;  %v21663_v37 = vld [vmem:[#allocation114_spill] sm:$0xff] }
 0x171   :  { %9860 = vmatpush2.bf16.msra.mxu1 %v13715_v46  ;;  %v9023_v17 = vpop.f32.mrf.mxu1  ;;  %v17447_v39 = vadd.f32 %v9021_v58, %v8909_v6  ;;  %v8911_v1 = vadd.f32 %v8910_v40, %v16988_v23  ;;  %v13727_v46 = vld [vmem:[%s21046_s1 + $0xba0] ss:$8 sps:$4 sm:$0xff]   ;;  %v21669_v58 = vld [vmem:[#allocation9_spill] sm:$0xff] }
 0x172   :  { %9861 = vmatprep.subr.bf16.mxu1 %v13723_v63  ;;  %21662 = vst [vmem:[#allocation120_spill] sm:$0xff] %v17458_v44  ;;  %v17462_v63 = vcombine.high %v21663_v37, %v17426_v31  ;;  %v8914_v60 = vpop.f32.mrf.mxu0  ;;  %9591 = vmatmul.mubr.bf16.gmra.mxu0 %v17412_v8  ;;  %v21665_v23 = vld [vmem:[#allocation119_spill] sm:$0xff] }
 0x173   :  { %v9027_v47 = vpop.f32.mrf.mxu1  ;;  %v17468_v6 = vadd.f32 %v9023_v17, %v8911_v1  ;;  %v8915_v40 = vadd.f32 %v8914_v60, %v17003_v26  ;;  %9749 = vmatpush2.bf16.msra.mxu0 %v13718_v55  ;;  %9600 = vmatprep.mubr.bf16.mxu0 %v17458_v44  ;;  %v13730_v26 = vld [vmem:[%s21046_s1 + $0xa90] ss:$8 sps:$4 sm:$0xff]   ;;  %v21677_v44 = vld [vmem:[#allocation48_spill] sm:$0xff] }
 0x174   :  { %21664 = vst [vmem:[#allocation116_spill] sm:$0xff] %v17462_v63  ;;  %9704 = vmatmul.mubr.bf16.gmra.mxu1 %v21665_v23  ;;  %v8916_v30 = vpop.f32.mrf.mxu0  ;;  %9750 = vmatprep.subr.bf16.mxu0 %v13726_v18  ;;  %v13735_v23 = vld [vmem:[%s21046_s1 + $0xb94] ss:$8 sps:$4 sm:$0xff]   ;;  %v13733_v55 = vld [vmem:[%s21046_s1 + $0xb90] ss:$8 sps:$4 sm:$0xff]  }
 0x175   :  { %9862 = vmatpush2.bf16.msra.mxu1 %v13721_v54  ;;  %v9029_v48 = vpop.f32.mrf.mxu1  ;;  %v17477_v8 = vadd.f32 %v9027_v47, %v8915_v40  ;;  %v8917_v17 = vadd.f32 %v8916_v30, %v17014_v19  ;;  %9713 = vmatprep.mubr.bf16.mxu1 %v17462_v63  ;;  %v17494_v19 = vcombine.low %v21663_v37, %v17426_v31  ;;  %v13738_v40 = vld [vmem:[%s21046_s1 + $0xa84] ss:$8 sps:$4 sm:$0xff]  }
 0x176   :  { %9863 = vmatprep.subr.bf16.mxu1 %v13729_v9  ;;  %v8918_v54 = vpop.f32.mrf.mxu0  ;;  %v17490_v9 = vcombine.low %v21661_v35, %v17422_v15  ;;  %v13741_v35 = vld [vmem:[%s21046_s1 + $0xb84] ss:$8 sps:$4 sm:$0xff]  }
 0x177   :  { %v9031_v18 = vpop.f32.mrf.mxu1  ;;  %21667 = vst [vmem:[#allocation114_spill] sm:$0xff] %v17494_v19  ;;  %v17496_v30 = vadd.f32 %v9029_v48, %v8917_v17  ;;  %v8919_v1 = vadd.f32 %v8918_v54, %v17029_v49  ;;  %9751 = vmatpush2.bf16.msra.mxu0 %v13724_v7  ;;  %v13736_v49 = vld [vmem:[%s21046_s1 + $0xa80] ss:$8 sps:$4 sm:$0xff]  }
 0x178   :  { %21666 = vst [vmem:[#allocation79_spill] sm:$0xff] %v17490_v9  ;;  %v8920_v60 = vpop.f32.mrf.mxu0  ;;  %9752 = vmatprep.subr.bf16.mxu0 %v13732_v36  ;;  %v13739_v36 = vld [vmem:[%s21046_s1 + $0xb80] ss:$8 sps:$4 sm:$0xff]  }
 0x179   :  { %9864 = vmatpush2.bf16.msra.mxu1 %v13727_v46  ;;  %v9033_v47 = vpop.f32.mrf.mxu1  ;;  %v17505_v37 = vadd.f32 %v9031_v18, %v8919_v1  ;;  %v8921_v48 = vadd.f32 %v8920_v60, %v17040_v12  ;;  %v13744_v18 = vld [vmem:[%s21046_s1 + $0xc74] ss:$8 sps:$4 sm:$0xff]  }
 0x17a   :  { %9865 = vmatprep.subr.bf16.mxu1 %v13735_v23  ;;  %v8924_v7 = vpop.f32.mrf.mxu0  ;;  %9601 = vmatmul.mubr.bf16.gmra.mxu0 %v17490_v9  ;;  %v13747_v1 = vld [vmem:[%s21046_s1 + $0xd74] ss:$8 sps:$4 sm:$0xff]  }
 0x17b   :  { %v9037_v46 = vpop.f32.mrf.mxu1  ;;  %v17516_v23 = vadd.f32 %v9033_v47, %v8921_v48  ;;  %v8925_v17 = vadd.f32 %v8924_v7, %v17049_v5  ;;  %9753 = vmatpush2.bf16.msra.mxu0 %v13730_v26  ;;  %v21668_v47 = vld [vmem:[#allocation47_spill] sm:$0xff]  ;;  %9756 = vmatprep.mubr.bf16.mxu0 %v21669_v58  ;;  %v21670_v5 = vld [vmem:[#allocation10_spill] sm:$0xff] }
 0x17c   :  { %9714 = vmatmul.mubr.bf16.gmra.mxu1 %v17494_v19  ;;  %v8926_v12 = vpop.f32.mrf.mxu0  ;;  %9754 = vmatprep.subr.bf16.mxu0 %v13738_v40  ;;  %v13742_v26 = vld [vmem:[%s21046_s1 + $0xc70] ss:$8 sps:$4 sm:$0xff]  }
 0x17d   :  { %9866 = vmatpush2.bf16.msra.mxu1 %v13733_v55  ;;  %v9039_v54 = vpop.f32.mrf.mxu1  ;;  %v17525_v60 = vadd.f32 %v9037_v46, %v8925_v17  ;;  %v8927_v48 = vadd.f32 %v8926_v12, %v21668_v47  ;;  %9869 = vmatprep.mubr.bf16.mxu1 %v21670_v5  ;;  %v13745_v55 = vld [vmem:[%s21046_s1 + $0xd70] ss:$8 sps:$4 sm:$0xff]   ;;  %v13750_v47 = vld [vmem:[%s21046_s1 + $0xc64] ss:$8 sps:$4 sm:$0xff]  }
 0x17e   :  { %9867 = vmatprep.subr.bf16.mxu1 %v13741_v35  ;;  %v8928_v40 = vpop.f32.mrf.mxu0  ;;  %v21671_v46 = vld [vmem:[#allocation34_spill] sm:$0xff]  ;;  %v13753_v5 = vld [vmem:[%s21046_s1 + $0xd64] ss:$8 sps:$4 sm:$0xff]  }
 0x17f   :  { %v9041_v35 = vpop.f32.mrf.mxu1  ;;  %v17536_v7 = vadd.f32 %v9039_v54, %v8927_v48  ;;  %v8929_v17 = vadd.f32 %v8928_v40, %v21671_v46  ;;  %9755 = vmatpush2.bf16.msra.mxu0 %v13736_v49  ;;  %v21672_v54 = vld [vmem:[#allocation132_spill] sm:$0xff]  ;;  %v21673_v46 = vld [vmem:[#allocation11_spill] sm:$0xff] }
 0x180   :  { %v8930_v12 = vpop.f32.mrf.mxu0  ;;  %9950 = vmatprep.subr.bf16.mxu0 %v13744_v18  ;;  %v13748_v49 = vld [vmem:[%s21046_s1 + $0xc60] ss:$8 sps:$4 sm:$0xff]   ;;  %v17557_v18 = vld [vmem:[%s21045_s0 + $0x98] sm:$0x33] }
 0x181   :  { %9868 = vmatpush2.bf16.msra.mxu1 %v13739_v36  ;;  %v9043_v58 = vpop.f32.mrf.mxu1  ;;  %v17545_v19 = vadd.f32 %v9041_v35, %v8929_v17  ;;  %v8931_v48 = vadd.f32 %v8930_v12, %v21672_v54  ;;  %v13751_v36 = vld [vmem:[%s21046_s1 + $0xd60] ss:$8 sps:$4 sm:$0xff]   ;;  %v21675_v17 = vshrl.u32 %v17161_v10, 16  ;;  %v21676_v54 = vshll.u32 %v17161_v10, 16 }
 0x182   :  { %10063 = vmatprep.subr.bf16.mxu1 %v13747_v1  ;;  %v9080_v1 = vpop.f32.mrf.mxu0  ;;  %9757 = vmatmul.mubr.bf16.vlgmr.msra.gmra.mxu0 %v21673_v46  ;;  %v21674_v35 = vld [vmem:[#allocation12_spill] sm:$0xff]  ;;  %v13756_v46 = vld [vmem:[%s21046_s1 + $0xc54] ss:$8 sps:$4 sm:$0xff]  }
 0x183   :  { %v9193_v40 = vpop.f32.mrf.mxu1  ;;  %v945_v12 = vrot.slane %v21675_v17, 4  ;;  %v948_v9 = vrot.slane %v21676_v54, 5  ;;  %v17565_v63 = vadd.f32 %v9043_v58, %v8931_v48  ;;  %v9081_v62 = vadd.f32 %v9080_v1, %v21677_v44  ;;  %9951 = vmatpush1.bf16.msra.mxu0 %v13742_v26  ;;  %v21678_v48 = vld [vmem:[#allocation15_spill] sm:$0xff]  ;;  %v21679_v44 = vld [vmem:[#allocation16_spill] sm:$0xff]  ;;  %v13754_v26 = vld [vmem:[%s21046_s1 + $0xc50] ss:$8 sps:$4 sm:$0xff]  }
 0x184   :  { %9870 = vmatmul.mubr.bf16.vlgmr.msra.gmra.mxu1 %v21674_v35  ;;  %v9082_v21 = vpop.f32.mrf.mxu0  ;;  %9952 = vmatprep.subr.bf16.mxu0 %v13750_v47  ;;  %v13759_v35 = vld [vmem:[%s21046_s1 + $0xd54] ss:$8 sps:$4 sm:$0xff]  }
 0x185   :  { %10064 = vmatpush1.bf16.msra.mxu1 %v13745_v55  ;;  %v9195_v32 = vpop.f32.mrf.mxu1  ;;  %v17574_v17 = vadd.f32 %v9193_v40, %v9081_v62  ;;  %v9083_v58 = vadd.f32 %v9082_v21, %v17118_v38  ;;  %9766 = vmatprep.mubr.bf16.mxu0 %v21678_v48  ;;  %v13757_v55 = vld [vmem:[%s21046_s1 + $0xd50] ss:$8 sps:$4 sm:$0xff]   ;;  %v949_v1 = vor.u32 %v948_v9, %v945_v12  ;;  %v21317_v62 = vshll.u32 %v17557_v18, 16  ;;  %v13762_v48 = vld [vmem:[%s21046_s1 + $0xc44] ss:$8 sps:$4 sm:$0xff]  }
 0x186   :  { %10065 = vmatprep.subr.bf16.mxu1 %v13753_v5  ;;  %9879 = vmatprep.mubr.bf16.mxu1 %v21679_v44  ;;  %v9084_v47 = vpop.f32.mrf.mxu0  ;;  %v21680_v21 = vld [vmem:[#allocation134_spill] sm:$0xff]  ;;  %v13765_v9 = vld [vmem:[%s21046_s1 + $0xd44] ss:$8 sps:$4 sm:$0xff]  }
 0x187   :  { %v9197_v5 = vpop.f32.mrf.mxu1  ;;  %v17586_v40 = vadd.f32 %v9195_v32, %v9083_v58  ;;  %v9085_v38 = vadd.f32 %v9084_v47, %v21680_v21  ;;  %9953 = vmatpush1.bf16.msra.mxu0 %v13748_v49  ;;  %v13760_v49 = vld [vmem:[%s21046_s1 + $0xc40] ss:$8 sps:$4 sm:$0xff]   ;;  %v21681_v58 = vld [vmem:[#allocation17_spill] sm:$0xff]  ;;  %v21682_v47 = vld [vmem:[#allocation18_spill] sm:$0xff]  ;;  %v950_v21 = vrot.slane %v949_v1, 4 }
 0x188   :  { %v9086_v54 = vpop.f32.mrf.mxu0  ;;  %9954 = vmatprep.subr.bf16.mxu0 %v13756_v46  ;;  %v13771_v1 = vld [vmem:[%s21046_s1 + $0xd34] ss:$8 sps:$4 sm:$0xff]  }
 0x189   :  { %10066 = vmatpush1.bf16.msra.mxu1 %v13751_v36  ;;  %v9199_v44 = vpop.f32.mrf.mxu1  ;;  %v17595_v12 = vadd.f32 %v9197_v5, %v9085_v38  ;;  %v9087_v32 = vadd.f32 %v9086_v54, %v17155_v25  ;;  %v13763_v36 = vld [vmem:[%s21046_s1 + $0xd40] ss:$8 sps:$4 sm:$0xff]   ;;  %v954_v5 = vrot.slane %v21317_v62, 5 }
 0x18a   :  { %10067 = vmatprep.subr.bf16.mxu1 %v13759_v35  ;;  %v9090_v46 = vpop.f32.mrf.mxu0  ;;  %9767 = vmatmul.mubr.bf16.gmra.mxu0 %v21681_v58  ;;  %v13768_v58 = vld [vmem:[%s21046_s1 + $0xc34] ss:$8 sps:$4 sm:$0xff]  }
 0x18b   :  { %v9203_v35 = vpop.f32.mrf.mxu1  ;;  %v17608_v38 = vadd.f32 %v9199_v44, %v9087_v32  ;;  %v9091_v25 = vadd.f32 %v9090_v46, %v17169_v57  ;;  %9955 = vmatpush1.bf16.msra.mxu0 %v13754_v26  ;;  %v21683_v32 = vld [vmem:[#allocation21_spill] sm:$0xff]  ;;  %v21684_v57 = vld [vmem:[#allocation22_spill] sm:$0xff] }
 0x18c   :  { %9880 = vmatmul.mubr.bf16.gmra.mxu1 %v21682_v47  ;;  %v9092_v54 = vpop.f32.mrf.mxu0  ;;  %9956 = vmatprep.subr.bf16.mxu0 %v13762_v48  ;;  %v13766_v48 = vld [vmem:[%s21046_s1 + $0xc30] ss:$8 sps:$4 sm:$0xff]  }
 0x18d   :  { %10068 = vmatpush1.bf16.msra.mxu1 %v13757_v55  ;;  %v9205_v31 = vpop.f32.mrf.mxu1  ;;  %v17617_v47 = vadd.f32 %v9203_v35, %v9091_v25  ;;  %v9093_v44 = vadd.f32 %v9092_v54, %v17190_v59  ;;  %9776 = vmatprep.mubr.bf16.mxu0 %v21683_v32  ;;  %v13769_v26 = vld [vmem:[%s21046_s1 + $0xd30] ss:$8 sps:$4 sm:$0xff]   ;;  %v17630_v35 = vsel %vm14694_vm2, %v950_v21, %v954_v5  ;;  %v13777_v32 = vld [vmem:[%s21046_s1 + $0xd24] ss:$8 sps:$4 sm:$0xff]  }
 0x18e   :  { %10069 = vmatprep.subr.bf16.mxu1 %v13765_v9  ;;  %9889 = vmatprep.mubr.bf16.mxu1 %v21684_v57  ;;  %v9094_v55 = vpop.f32.mrf.mxu0  ;;  %21686 = vst [vmem:[#allocation47_spill] sm:$0xff] %v17630_v35  ;;  %v13774_v57 = vld [vmem:[%s21046_s1 + $0xc24] ss:$8 sps:$4 sm:$0xff]  }
 0x18f   :  { %v9207_v9 = vpop.f32.mrf.mxu1  ;;  %v17632_v25 = vadd.f32 %v9205_v31, %v9093_v44  ;;  %v9095_v59 = vadd.f32 %v9094_v55, %v17211_v27  ;;  %9957 = vmatpush1.bf16.msra.mxu0 %v13760_v49  ;;  %v13772_v27 = vld [vmem:[%s21046_s1 + $0xc20] ss:$8 sps:$4 sm:$0xff]  }
 0x190   :  { %v9096_v54 = vpop.f32.mrf.mxu0  ;;  %9958 = vmatprep.subr.bf16.mxu0 %v13768_v58  ;;  %v13775_v49 = vld [vmem:[%s21046_s1 + $0xd20] ss:$8 sps:$4 sm:$0xff]  }
 0x191   :  { %10070 = vmatpush1.bf16.msra.mxu1 %v13763_v36  ;;  %v9209_v62 = vpop.f32.mrf.mxu1  ;;  %v17641_v21 = vadd.f32 %v9207_v9, %v9095_v59  ;;  %v9097_v31 = vadd.f32 %v9096_v54, %v17227_v53  ;;  %v21687_v36 = vld [vmem:[#allocation135_spill] sm:$0xff]  ;;  %v21692_v53 = vld [vmem:[#allocation24_spill] sm:$0xff] }
 0x192   :  { %10071 = vmatprep.subr.bf16.mxu1 %v13771_v1  ;;  %v17652_v58 = vcombine.high %v21687_v36, %v17161_v10  ;;  %v21689_v5 = vld [vmem:[#allocation123_spill] sm:$0xff]  ;;  %v9100_v44 = vpop.f32.mrf.mxu0  ;;  %v13782_v10 = vld [vmem:[%s21046_s1 + $0xc14] ss:$8 sps:$4 sm:$0xff]  }
 0x193   :  { %v17656_v1 = vcombine.high %v21689_v5, %v17630_v35  ;;  %v9213_v55 = vpop.f32.mrf.mxu1  ;;  %v21691_v9 = vld [vmem:[#allocation23_spill] sm:$0xff]  ;;  %v17660_v59 = vadd.f32 %v9209_v62, %v9097_v31  ;;  %v9101_v54 = vadd.f32 %v9100_v44, %v17241_v22  ;;  %9959 = vmatpush1.bf16.msra.mxu0 %v13766_v48  ;;  %v13785_v36 = vld [vmem:[%s21046_s1 + $0xd14] ss:$8 sps:$4 sm:$0xff]   ;;  %v13780_v22 = vld [vmem:[%s21046_s1 + $0xc10] ss:$8 sps:$4 sm:$0xff]  }
 0x194   :  { %21688 = vst [vmem:[#allocation9_spill] sm:$0xff] %v17652_v58  ;;  %9777 = vmatmul.mubr.bf16.gmra.mxu0 %v21691_v9  ;;  %9890 = vmatmul.mubr.bf16.gmra.mxu1 %v21692_v53  ;;  %v9102_v29 = vpop.f32.mrf.mxu0  ;;  %v14416_v48 = vld [vmem:[%s21045_s0 + $0x80] sm:$0xff]  ;;  %v13783_v31 = vld [vmem:[%s21046_s1 + $0xd10] ss:$8 sps:$4 sm:$0xff]  }
 0x195   :  { %21690 = vst [vmem:[#allocation10_spill] sm:$0xff] %v17656_v1  ;;  %10072 = vmatpush1.bf16.msra.mxu1 %v13769_v26  ;;  %v9215_v56 = vpop.f32.mrf.mxu1  ;;  %9960 = vmatprep.subr.bf16.mxu0 %v13774_v57  ;;  %v17669_v9 = vadd.f32 %v9213_v55, %v9101_v54  ;;  %v9103_v62 = vadd.f32 %v9102_v29, %v17257_v34  ;;  %v17683_v26 = vld [vmem:[%s21045_s0 + $0x90] sm:$0xff] }
 0x196   :  { %10073 = vmatprep.subr.bf16.mxu1 %v13777_v32  ;;  %9786 = vmatprep.mubr.bf16.mxu0 %v17652_v58  ;;  %v9104_v32 = vpop.f32.mrf.mxu0  ;;  %v17686_v29 = vcombine.low %v14416_v48, %v17683_v26  ;;  %v17690_v34 = vcombine.low %v21689_v5, %v17630_v35  ;;  %v13788_v48 = vld [vmem:[%s21046_s1 + $0xc04] ss:$8 sps:$4 sm:$0xff]  }
 0x197   :  { %9899 = vmatprep.mubr.bf16.mxu1 %v17656_v1  ;;  %v9217_v57 = vpop.f32.mrf.mxu1  ;;  %v17695_v44 = vadd.f32 %v9215_v56, %v9103_v62  ;;  %v9105_v55 = vadd.f32 %v9104_v32, %v17269_v20  ;;  %9961 = vmatpush1.bf16.msra.mxu0 %v13772_v27  ;;  %v13791_v5 = vld [vmem:[%s21046_s1 + $0xd04] ss:$8 sps:$4 sm:$0xff]   ;;  %v13786_v20 = vld [vmem:[%s21046_s1 + $0xc00] ss:$8 sps:$4 sm:$0xff]  }
 0x198   :  { %21693 = vst [vmem:[#allocation34_spill] sm:$0xff] %v17686_v29  ;;  %21694 = vst [vmem:[#allocation132_spill] sm:$0xff] %v17690_v34  ;;  %v9106_v54 = vpop.f32.mrf.mxu0  ;;  %9962 = vmatprep.subr.bf16.mxu0 %v13782_v10  ;;  %v13789_v27 = vld [vmem:[%s21046_s1 + $0xd00] ss:$8 sps:$4 sm:$0xff]  }
 0x199   :  { %10074 = vmatpush1.bf16.msra.mxu1 %v13775_v49  ;;  %v9219_v1 = vpop.f32.mrf.mxu1  ;;  %v17704_v58 = vadd.f32 %v9217_v57, %v9105_v55  ;;  %v9107_v56 = vadd.f32 %v9106_v54, %v17282_v42  ;;  %v13794_v57 = vld [vmem:[%s21046_s1 + $0xcf4] ss:$8 sps:$4 sm:$0xff]  }
 0x19a   :  { %10075 = vmatprep.subr.bf16.mxu1 %v13785_v36  ;;  %v9110_v49 = vpop.f32.mrf.mxu0  ;;  %v13797_v55 = vld [vmem:[%s21046_s1 + $0xdf4] ss:$8 sps:$4 sm:$0xff]  }
 0x19b   :  { %v9223_v10 = vpop.f32.mrf.mxu1  ;;  %v17715_v36 = vadd.f32 %v9219_v1, %v9107_v56  ;;  %v9111_v62 = vadd.f32 %v9110_v49, %v17291_v4  ;;  %9963 = vmatpush1.bf16.msra.mxu0 %v13780_v22  ;;  %v21695_v56 = vld [vmem:[#allocation29_spill] sm:$0xff]  ;;  %v21696_v4 = vld [vmem:[#allocation30_spill] sm:$0xff] }
 0x19c   :  { %9787 = vmatmul.mubr.bf16.gmra.mxu0 %v17686_v29  ;;  %9900 = vmatmul.mubr.bf16.gmra.mxu1 %v17690_v34  ;;  %v9112_v42 = vpop.f32.mrf.mxu0  ;;  %v13792_v22 = vld [vmem:[%s21046_s1 + $0xcf0] ss:$8 sps:$4 sm:$0xff]  }
 0x19d   :  { %10076 = vmatpush1.bf16.msra.mxu1 %v13783_v31  ;;  %v9225_v32 = vpop.f32.mrf.mxu1  ;;  %9964 = vmatprep.subr.bf16.mxu0 %v13788_v48  ;;  %v17724_v54 = vadd.f32 %v9223_v10, %v9111_v62  ;;  %v9113_v1 = vadd.f32 %v9112_v42, %v17305_v0  ;;  %v13795_v31 = vld [vmem:[%s21046_s1 + $0xdf0] ss:$8 sps:$4 sm:$0xff]   ;;  %v13800_v42 = vld [vmem:[%s21046_s1 + $0xce4] ss:$8 sps:$4 sm:$0xff]  }
 0x19e   :  { %10077 = vmatprep.subr.bf16.mxu1 %v13791_v5  ;;  %9796 = vmatprep.mubr.bf16.mxu0 %v21695_v56  ;;  %v9114_v48 = vpop.f32.mrf.mxu0  ;;  %v13803_v56 = vld [vmem:[%s21046_s1 + $0xde4] ss:$8 sps:$4 sm:$0xff]  }
 0x19f   :  { %9909 = vmatprep.mubr.bf16.mxu1 %v21696_v4  ;;  %v9227_v5 = vpop.f32.mrf.mxu1  ;;  %v17735_v49 = vadd.f32 %v9225_v32, %v9113_v1  ;;  %v9115_v10 = vadd.f32 %v9114_v48, %v17314_v13  ;;  %9965 = vmatpush1.bf16.msra.mxu0 %v13786_v20  ;;  %v13798_v13 = vld [vmem:[%s21046_s1 + $0xce0] ss:$8 sps:$4 sm:$0xff]  }
 0x1a0   :  { %v9116_v0 = vpop.f32.mrf.mxu0  ;;  %9966 = vmatprep.subr.bf16.mxu0 %v13794_v57  ;;  %v13801_v20 = vld [vmem:[%s21046_s1 + $0xde0] ss:$8 sps:$4 sm:$0xff]  }
 0x1a1   :  { %10078 = vmatpush1.bf16.msra.mxu1 %v13789_v27  ;;  %v9229_v62 = vpop.f32.mrf.mxu1  ;;  %v17744_v4 = vadd.f32 %v9227_v5, %v9115_v10  ;;  %v9117_v32 = vadd.f32 %v9116_v0, %v17331_v45  ;;  %v17756_v27 = vld [vmem:[%s21045_s0 + $0x158] sm:$0x33]  ;;  %v21697_v1 = vld [vmem:[#allocation31_spill] sm:$0xff]  ;;  %v21698_v48 = vld [vmem:[#allocation32_spill] sm:$0xff]  ;;  %v21699_v45 = vshrl.u32 %v17382_v3, 16  ;;  %v21700_v10 = vshll.u32 %v17382_v3, 16 }
 0x1a2   :  { %10079 = vmatprep.subr.bf16.mxu1 %v13797_v55  ;;  %v9120_v57 = vpop.f32.mrf.mxu0 }
 0x1a3   :  { %v9233_v55 = vpop.f32.mrf.mxu1  ;;  %v959_v5 = vrot.slane %v21699_v45, 4  ;;  %v962_v0 = vrot.slane %v21700_v10, 5  ;;  %v17764_v34 = vadd.f32 %v9229_v62, %v9117_v32  ;;  %v9121_v29 = vadd.f32 %v9120_v57, %v17340_v51  ;;  %9967 = vmatpush2.bf16.msra.mxu0 %v13792_v22  ;;  %v21701_v32 = vld [vmem:[#allocation36_spill] sm:$0xff]  ;;  %v21702_v51 = vld [vmem:[#allocation37_spill] sm:$0xff] }
 0x1a4   :  { %9797 = vmatmul.mubr.bf16.gmra.mxu0 %v21697_v1  ;;  %9910 = vmatmul.mubr.bf16.gmra.mxu1 %v21698_v48  ;;  %v9122_v53 = vpop.f32.mrf.mxu0  ;;  %v13806_v1 = vld [vmem:[%s21046_s1 + $0xcd4] ss:$8 sps:$4 sm:$0xff]   ;;  %v13804_v22 = vld [vmem:[%s21046_s1 + $0xcd0] ss:$8 sps:$4 sm:$0xff]  }
 0x1a5   :  { %10080 = vmatpush2.bf16.msra.mxu1 %v13795_v31  ;;  %v9235_v35 = vpop.f32.mrf.mxu1  ;;  %9968 = vmatprep.subr.bf16.mxu0 %v13800_v42  ;;  %v13809_v48 = vld [vmem:[%s21046_s1 + $0xdd4] ss:$8 sps:$4 sm:$0xff]   ;;  %v17773_v45 = vadd.f32 %v9233_v55, %v9121_v29  ;;  %v9123_v62 = vadd.f32 %v9122_v53, %v17357_v24  ;;  %v13807_v31 = vld [vmem:[%s21046_s1 + $0xdd0] ss:$8 sps:$4 sm:$0xff]   ;;  %v963_v57 = vor.u32 %v962_v0, %v959_v5  ;;  %v21328_v29 = vshll.u32 %v17756_v27, 16 }
 0x1a6   :  { %10081 = vmatprep.subr.bf16.mxu1 %v13803_v56  ;;  %9806 = vmatprep.mubr.bf16.mxu0 %v21701_v32  ;;  %v9124_v42 = vpop.f32.mrf.mxu0  ;;  %v13815_v5 = vld [vmem:[%s21046_s1 + $0xdc4] ss:$8 sps:$4 sm:$0xff]  }
 0x1a7   :  { %9919 = vmatprep.mubr.bf16.mxu1 %v21702_v51  ;;  %v9237_v56 = vpop.f32.mrf.mxu1  ;;  %v17785_v55 = vadd.f32 %v9235_v35, %v9123_v62  ;;  %v9125_v24 = vadd.f32 %v9124_v42, %v17366_v28  ;;  %9969 = vmatpush2.bf16.msra.mxu0 %v13798_v13  ;;  %v13812_v51 = vld [vmem:[%s21046_s1 + $0xcc4] ss:$8 sps:$4 sm:$0xff]   ;;  %v13810_v28 = vld [vmem:[%s21046_s1 + $0xcc0] ss:$8 sps:$4 sm:$0xff]   ;;  %v964_v42 = vrot.slane %v963_v57, 4 }
 0x1a8   :  { %v9126_v53 = vpop.f32.mrf.mxu0  ;;  %9970 = vmatprep.subr.bf16.mxu0 %v13806_v1  ;;  %v13813_v13 = vld [vmem:[%s21046_s1 + $0xdc0] ss:$8 sps:$4 sm:$0xff]   ;;  %v13821_v57 = vld [vmem:[%s21046_s1 + $0xdb4] ss:$8 sps:$4 sm:$0xff]  }
 0x1a9   :  { %10082 = vmatpush2.bf16.msra.mxu1 %v13801_v20  ;;  %v9239_v10 = vpop.f32.mrf.mxu1  ;;  %v17794_v0 = vadd.f32 %v9237_v56, %v9125_v24  ;;  %v9127_v35 = vadd.f32 %v9126_v53, %v17396_v41  ;;  %v21704_v62 = vld [vmem:[#allocation39_spill] sm:$0xff]  ;;  %v968_v56 = vrot.slane %v21328_v29, 5 }
 0x1aa   :  { %10083 = vmatprep.subr.bf16.mxu1 %v13809_v48  ;;  %v9130_v20 = vpop.f32.mrf.mxu0  ;;  %v21703_v48 = vld [vmem:[#allocation38_spill] sm:$0xff]  ;;  %v13824_v29 = vld [vmem:[%s21046_s1 + $0xca4] ss:$8 sps:$4 sm:$0xff]  }
 0x1ab   :  { %v9243_v1 = vpop.f32.mrf.mxu1  ;;  %v17807_v24 = vadd.f32 %v9239_v10, %v9127_v35  ;;  %v9131_v41 = vadd.f32 %v9130_v20, %v17405_v33  ;;  %9971 = vmatpush2.bf16.msra.mxu0 %v13804_v22  ;;  %v21705_v35 = vld [vmem:[#allocation43_spill] sm:$0xff]  ;;  %v21706_v33 = vld [vmem:[#allocation44_spill] sm:$0xff]  ;;  %v13819_v22 = vld [vmem:[%s21046_s1 + $0xdb0] ss:$8 sps:$4 sm:$0xff]   ;;  %v17829_v20 = vsel %vm14694_vm2, %v964_v42, %v968_v56 }
 0x1ac   :  { %9807 = vmatmul.mubr.bf16.gmra.mxu0 %v21703_v48  ;;  %9920 = vmatmul.mubr.bf16.gmra.mxu1 %v21704_v62  ;;  %v9132_v53 = vpop.f32.mrf.mxu0  ;;  %v13818_v48 = vld [vmem:[%s21046_s1 + $0xcb4] ss:$8 sps:$4 sm:$0xff]   ;;  %21707 = vst [vmem:[#allocation11_spill] sm:$0xff] %v17829_v20 }
 0x1ad   :  { %10084 = vmatpush2.bf16.msra.mxu1 %v13807_v31  ;;  %v9245_v32 = vpop.f32.mrf.mxu1  ;;  %9972 = vmatprep.subr.bf16.mxu0 %v13812_v51  ;;  %v17816_v62 = vadd.f32 %v9243_v1, %v9131_v41  ;;  %v9133_v10 = vadd.f32 %v9132_v53, %v17430_v2  ;;  %v13816_v51 = vld [vmem:[%s21046_s1 + $0xcb0] ss:$8 sps:$4 sm:$0xff]  }
 0x1ae   :  { %10085 = vmatprep.subr.bf16.mxu1 %v13815_v5  ;;  %9816 = vmatprep.mubr.bf16.mxu0 %v21705_v35  ;;  %v9134_v31 = vpop.f32.mrf.mxu0 }
 0x1af   :  { %9929 = vmatprep.mubr.bf16.mxu1 %v21706_v33  ;;  %v9247_v5 = vpop.f32.mrf.mxu1  ;;  %v17831_v1 = vadd.f32 %v9245_v32, %v9133_v10  ;;  %v9135_v2 = vadd.f32 %v9134_v31, %v17447_v39  ;;  %9973 = vmatpush2.bf16.msra.mxu0 %v13810_v28  ;;  %v13827_v33 = vld [vmem:[%s21046_s1 + $0xda4] ss:$8 sps:$4 sm:$0xff]   ;;  %v13822_v39 = vld [vmem:[%s21046_s1 + $0xca0] ss:$8 sps:$4 sm:$0xff]   ;;  %v21711_v31 = vld [vmem:[#allocation45_spill] sm:$0xff] }
 0x1b0   :  { %v9136_v41 = vpop.f32.mrf.mxu0  ;;  %9974 = vmatprep.subr.bf16.mxu0 %v13818_v48  ;;  %v13825_v28 = vld [vmem:[%s21046_s1 + $0xda0] ss:$8 sps:$4 sm:$0xff]  }
 0x1b1   :  { %10086 = vmatpush2.bf16.msra.mxu1 %v13813_v13  ;;  %v9249_v53 = vpop.f32.mrf.mxu1  ;;  %v17840_v42 = vadd.f32 %v9247_v5, %v9135_v2  ;;  %v9137_v32 = vadd.f32 %v9136_v41, %v17468_v6  ;;  %v17851_v13 = vcombine.high %v17392_v50, %v17382_v3  ;;  %v21709_v48 = vld [vmem:[#allocation35_spill] sm:$0xff]  ;;  %v21712_v6 = vld [vmem:[#allocation46_spill] sm:$0xff] }
 0x1b2   :  { %10087 = vmatprep.subr.bf16.mxu1 %v13821_v57  ;;  %v17855_v56 = vcombine.high %v21709_v48, %v17829_v20  ;;  %v9140_v57 = vpop.f32.mrf.mxu0  ;;  %v13832_v50 = vld [vmem:[%s21046_s1 + $0xc94] ss:$8 sps:$4 sm:$0xff]  }
 0x1b3   :  { %21708 = vst [vmem:[#allocation12_spill] sm:$0xff] %v17851_v13  ;;  %v9253_v10 = vpop.f32.mrf.mxu1  ;;  %v17859_v5 = vadd.f32 %v9249_v53, %v9137_v32  ;;  %v9141_v2 = vadd.f32 %v9140_v57, %v17477_v8  ;;  %9975 = vmatpush2.bf16.msra.mxu0 %v13816_v51  ;;  %v13835_v3 = vld [vmem:[%s21046_s1 + $0xd94] ss:$8 sps:$4 sm:$0xff]   ;;  %v13830_v8 = vld [vmem:[%s21046_s1 + $0xc90] ss:$8 sps:$4 sm:$0xff]   ;;  %v14418_v51 = vld [vmem:[%s21045_s0 + $0x140] sm:$0xff]  ;;  %v17889_v32 = vcombine.low %v21709_v48, %v17829_v20 }
 0x1b4   :  { %21710 = vst [vmem:[#allocation48_spill] sm:$0xff] %v17855_v56  ;;  %9817 = vmatmul.mubr.bf16.gmra.mxu0 %v21711_v31  ;;  %9930 = vmatmul.mubr.bf16.gmra.mxu1 %v21712_v6  ;;  %v9142_v41 = vpop.f32.mrf.mxu0  ;;  %v13833_v57 = vld [vmem:[%s21046_s1 + $0xd90] ss:$8 sps:$4 sm:$0xff]   ;;  %v13841_v48 = vld [vmem:[%s21046_s1 + $0xd84] ss:$8 sps:$4 sm:$0xff]  }
 0x1b5   :  { %10088 = vmatpush2.bf16.msra.mxu1 %v13819_v22  ;;  %v9255_v35 = vpop.f32.mrf.mxu1  ;;  %9976 = vmatprep.subr.bf16.mxu0 %v13824_v29  ;;  %v17868_v31 = vadd.f32 %v9253_v10, %v9141_v2  ;;  %v9143_v53 = vadd.f32 %v9142_v41, %v17496_v30  ;;  %v17882_v22 = vld [vmem:[%s21045_s0 + $0x150] sm:$0xff]  ;;  %21714 = vst [vmem:[#allocation135_spill] sm:$0xff] %v17889_v32 }
 0x1b6   :  { %10089 = vmatprep.subr.bf16.mxu1 %v13827_v33  ;;  %9826 = vmatprep.mubr.bf16.mxu0 %v17851_v13  ;;  %v9144_v29 = vpop.f32.mrf.mxu0  ;;  %v17885_v30 = vcombine.low %v14418_v51, %v17882_v22  ;;  %v13838_v51 = vld [vmem:[%s21046_s1 + $0xc84] ss:$8 sps:$4 sm:$0xff]  }
 0x1b7   :  { %9939 = vmatprep.mubr.bf16.mxu1 %v17855_v56  ;;  %v9257_v33 = vpop.f32.mrf.mxu1  ;;  %v17894_v10 = vadd.f32 %v9255_v35, %v9143_v53  ;;  %v9145_v2 = vadd.f32 %v9144_v29, %v17505_v37  ;;  %9977 = vmatpush2.bf16.msra.mxu0 %v13822_v39  ;;  %v13836_v37 = vld [vmem:[%s21046_s1 + $0xc80] ss:$8 sps:$4 sm:$0xff]  }
 0x1b8   :  { %21713 = vst [vmem:[#allocation134_spill] sm:$0xff] %v17885_v30  ;;  %v9146_v41 = vpop.f32.mrf.mxu0  ;;  %9978 = vmatprep.subr.bf16.mxu0 %v13832_v50  ;;  %v13839_v39 = vld [vmem:[%s21046_s1 + $0xd80] ss:$8 sps:$4 sm:$0xff]  }
 0x1b9   :  { %10090 = vmatpush2.bf16.msra.mxu1 %v13825_v28  ;;  %v9259_v56 = vpop.f32.mrf.mxu1  ;;  %v17903_v13 = vadd.f32 %v9257_v33, %v9145_v2  ;;  %v9147_v35 = vadd.f32 %v9146_v41, %v17516_v23  ;;  %v13844_v33 = vld [vmem:[%s21046_s1 + $0xe74] ss:$8 sps:$4 sm:$0xff]  }
 0x1ba   :  { %10091 = vmatprep.subr.bf16.mxu1 %v13835_v3  ;;  %v9150_v28 = vpop.f32.mrf.mxu0  ;;  %v13847_v2 = vld [vmem:[%s21046_s1 + $0xf74] ss:$8 sps:$4 sm:$0xff]  }
 0x1bb   :  { %v9263_v50 = vpop.f32.mrf.mxu1  ;;  %v17914_v3 = vadd.f32 %v9259_v56, %v9147_v35  ;;  %v9151_v53 = vadd.f32 %v9150_v28, %v17525_v60  ;;  %9979 = vmatpush2.bf16.msra.mxu0 %v13830_v8  ;;  %v21715_v35 = vld [vmem:[#allocation49_spill] sm:$0xff]  ;;  %v21716_v60 = vld [vmem:[#allocation50_spill] sm:$0xff] }
 0x1bc   :  { %9827 = vmatmul.mubr.bf16.gmra.mxu0 %v17885_v30  ;;  %9940 = vmatmul.mubr.bf16.gmra.mxu1 %v17889_v32  ;;  %v9152_v23 = vpop.f32.mrf.mxu0  ;;  %v13842_v8 = vld [vmem:[%s21046_s1 + $0xe70] ss:$8 sps:$4 sm:$0xff]   ;;  %v13856_v32 = vld [vmem:[%s21046_s1 + $0xe54] ss:$8 sps:$4 sm:$0xff]  }
 0x1bd   :  { %10092 = vmatpush2.bf16.msra.mxu1 %v13833_v57  ;;  %v9265_v29 = vpop.f32.mrf.mxu1  ;;  %9980 = vmatprep.subr.bf16.mxu0 %v13838_v51  ;;  %v17923_v41 = vadd.f32 %v9263_v50, %v9151_v53  ;;  %v9153_v56 = vadd.f32 %v9152_v23, %v17536_v7  ;;  %v13845_v57 = vld [vmem:[%s21046_s1 + $0xf70] ss:$8 sps:$4 sm:$0xff]   ;;  %v13850_v23 = vld [vmem:[%s21046_s1 + $0xe64] ss:$8 sps:$4 sm:$0xff]  }
 0x1be   :  { %10093 = vmatprep.subr.bf16.mxu1 %v13841_v48  ;;  %9982 = vmatprep.mubr.bf16.mxu0 %v21715_v35  ;;  %v9154_v51 = vpop.f32.mrf.mxu0  ;;  %v13853_v35 = vld [vmem:[%s21046_s1 + $0xf64] ss:$8 sps:$4 sm:$0xff]  }
 0x1bf   :  { %10095 = vmatprep.mubr.bf16.mxu1 %v21716_v60  ;;  %v9267_v48 = vpop.f32.mrf.mxu1  ;;  %v17934_v28 = vadd.f32 %v9265_v29, %v9153_v56  ;;  %v9155_v50 = vadd.f32 %v9154_v51, %v17545_v19  ;;  %9981 = vmatpush2.bf16.msra.mxu0 %v13836_v37  ;;  %v13848_v19 = vld [vmem:[%s21046_s1 + $0xe60] ss:$8 sps:$4 sm:$0xff]   ;;  %v21718_v56 = vld [vmem:[#allocation54_spill] sm:$0xff]  ;;  %v1022_v51 = vshrl.u32 %v17557_v18, 16 }
 0x1c0   :  { %v9156_v7 = vpop.f32.mrf.mxu0  ;;  %10176 = vmatprep.subr.bf16.mxu0 %v13844_v33  ;;  %v13851_v37 = vld [vmem:[%s21046_s1 + $0xf60] ss:$8 sps:$4 sm:$0xff]  }
 0x1c1   :  { %10094 = vmatpush2.bf16.msra.mxu1 %v13839_v39  ;;  %v9269_v53 = vpop.f32.mrf.mxu1  ;;  %v17943_v60 = vadd.f32 %v9267_v48, %v9155_v50  ;;  %v9157_v29 = vadd.f32 %v9156_v7, %v17565_v63 }
 0x1c2   :  { %10289 = vmatprep.subr.bf16.mxu1 %v13847_v2  ;;  %v9306_v39 = vpop.f32.mrf.mxu0  ;;  %v21717_v2 = vld [vmem:[#allocation53_spill] sm:$0xff] }
 0x1c3   :  { %v9419_v33 = vpop.f32.mrf.mxu1  ;;  %v17955_v48 = vadd.f32 %v9269_v53, %v9157_v29  ;;  %v9307_v63 = vadd.f32 %v9306_v39, %v17574_v17  ;;  %v21719_v29 = vld [vmem:[#allocation55_spill] sm:$0xff]  ;;  %v21720_v17 = vld [vmem:[#allocation56_spill] sm:$0xff]  ;;  %v1024_v39 = vrot.slane %v1022_v51, 5 }
 0x1c4   :  { %9983 = vmatmul.mubr.bf16.vlgmr.msra.gmra.mxu0 %v21717_v2  ;;  %10096 = vmatmul.mubr.bf16.vlgmr.msra.gmra.mxu1 %v21718_v56  ;;  %v9308_v50 = vpop.f32.mrf.mxu0  ;;  %v13859_v2 = vld [vmem:[%s21046_s1 + $0xf54] ss:$8 sps:$4 sm:$0xff]   ;;  %v13865_v51 = vld [vmem:[%s21046_s1 + $0xf44] ss:$8 sps:$4 sm:$0xff]  }
 0x1c5   :  { %10177 = vmatpush1.bf16.msra.mxu0 %v13842_v8  ;;  %10290 = vmatpush1.bf16.msra.mxu1 %v13845_v57  ;;  %v9421_v7 = vpop.f32.mrf.mxu1  ;;  %v17964_v56 = vadd.f32 %v9419_v33, %v9307_v63  ;;  %v9309_v53 = vadd.f32 %v9308_v50, %v17586_v40  ;;  %v13854_v8 = vld [vmem:[%s21046_s1 + $0xe50] ss:$8 sps:$4 sm:$0xff]   ;;  %v21721_v33 = vshll.u32 %v17557_v18, 16 }
 0x1c6   :  { %10178 = vmatprep.subr.bf16.mxu0 %v13850_v23  ;;  %10291 = vmatprep.subr.bf16.mxu1 %v13853_v35  ;;  %v13857_v57 = vld [vmem:[%s21046_s1 + $0xf50] ss:$8 sps:$4 sm:$0xff]   ;;  %v9310_v23 = vpop.f32.mrf.mxu0 }
 0x1c7   :  { %9992 = vmatprep.mubr.bf16.mxu0 %v21719_v29  ;;  %10105 = vmatprep.mubr.bf16.mxu1 %v21720_v17  ;;  %v9423_v35 = vpop.f32.mrf.mxu1  ;;  %v1025_v63 = vrot.slane %v21721_v33, 6  ;;  %v17977_v30 = vadd.f32 %v9421_v7, %v9309_v53  ;;  %v9311_v40 = vadd.f32 %v9310_v23, %v17595_v12  ;;  %v13862_v29 = vld [vmem:[%s21046_s1 + $0xe44] ss:$8 sps:$4 sm:$0xff]   ;;  %v13860_v12 = vld [vmem:[%s21046_s1 + $0xe40] ss:$8 sps:$4 sm:$0xff]   ;;  %v21724_v53 = vld [vmem:[#allocation58_spill] sm:$0xff] }
 0x1c8   :  { %v9312_v50 = vpop.f32.mrf.mxu0  ;;  %v11886_v23 = vrot.slane %v17683_v26, 9  ;;  %v13868_v26 = vld [vmem:[%s21046_s1 + $0xe34] ss:$8 sps:$4 sm:$0xff]  }
 0x1c9   :  { %10179 = vmatpush1.bf16.msra.mxu0 %v13848_v19  ;;  %10292 = vmatpush1.bf16.msra.mxu1 %v13851_v37  ;;  %v9425_v17 = vpop.f32.mrf.mxu1  ;;  %v17986_v6 = vadd.f32 %v9423_v35, %v9311_v40  ;;  %v9313_v7 = vadd.f32 %v9312_v50, %v17608_v38  ;;  %v994_v35 = vrot.slane %v17557_v18, 5  ;;  %v21725_v38 = vor.u32 %v17220_v11, %v17209_v14  ;;  %v13871_v14 = vld [vmem:[%s21046_s1 + $0xf34] ss:$8 sps:$4 sm:$0xff]  }
 0x1ca   :  { %10180 = vmatprep.subr.bf16.mxu0 %v13856_v32  ;;  %10293 = vmatprep.subr.bf16.mxu1 %v13859_v2  ;;  %v13863_v32 = vld [vmem:[%s21046_s1 + $0xf40] ss:$8 sps:$4 sm:$0xff]   ;;  %v9316_v19 = vpop.f32.mrf.mxu0  ;;  %v21723_v2 = vld [vmem:[#allocation57_spill] sm:$0xff]  ;;  %v1026_v40 = vor.u32 %v1025_v63, %v1024_v39 }
 0x1cb   :  { %21722 = vst [vmem:[#allocation123_spill] sm:$0xff] %v17986_v6  ;;  %v9429_v37 = vpop.f32.mrf.mxu1  ;;  %v1021_v33 = vrot.slane %v21725_v38, 4  ;;  %v18002_v50 = vadd.f32 %v9425_v17, %v9313_v7  ;;  %v9317_v20 = vadd.f32 %v9316_v19, %v17617_v47  ;;  %v21726_v17 = vld [vmem:[#allocation59_spill] sm:$0xff]  ;;  %v21727_v47 = vld [vmem:[#allocation60_spill] sm:$0xff] }
 0x1cc   :  { %9993 = vmatmul.mubr.bf16.gmra.mxu0 %v21723_v2  ;;  %10106 = vmatmul.mubr.bf16.gmra.mxu1 %v21724_v53  ;;  %v9318_v46 = vpop.f32.mrf.mxu0 }
 0x1cd   :  { %10181 = vmatpush1.bf16.msra.mxu0 %v13854_v8  ;;  %10294 = vmatpush1.bf16.msra.mxu1 %v13857_v57  ;;  %v9431_v6 = vpop.f32.mrf.mxu1  ;;  %v18011_v11 = vadd.f32 %v9429_v37, %v9317_v20  ;;  %v9319_v18 = vadd.f32 %v9318_v46, %v17632_v25  ;;  %v13869_v8 = vld [vmem:[%s21046_s1 + $0xf30] ss:$8 sps:$4 sm:$0xff]   ;;  %v18024_v20 = vsel %vm15379_vm8, %v11886_v23, %v994_v35  ;;  %v13874_v37 = vld [vmem:[%s21046_s1 + $0xe24] ss:$8 sps:$4 sm:$0xff]  }
 0x1ce   :  { %10182 = vmatprep.subr.bf16.mxu0 %v13862_v29  ;;  %10295 = vmatprep.subr.bf16.mxu1 %v13865_v51  ;;  %v13866_v29 = vld [vmem:[%s21046_s1 + $0xe30] ss:$8 sps:$4 sm:$0xff]   ;;  %v9320_v57 = vpop.f32.mrf.mxu0  ;;  %v18028_v46 = vsel %vm15091_vm5, %v1021_v33, %v1026_v40  ;;  %v13877_v23 = vld [vmem:[%s21046_s1 + $0xf24] ss:$8 sps:$4 sm:$0xff]  }
 0x1cf   :  { %10002 = vmatprep.mubr.bf16.mxu0 %v21726_v17  ;;  %10115 = vmatprep.mubr.bf16.mxu1 %v21727_v47  ;;  %v9433_v39 = vpop.f32.mrf.mxu1  ;;  %v18030_v25 = vadd.f32 %v9431_v6, %v9319_v18  ;;  %v9321_v51 = vadd.f32 %v9320_v57, %v17641_v21  ;;  %v13872_v21 = vld [vmem:[%s21046_s1 + $0xe20] ss:$8 sps:$4 sm:$0xff]   ;;  %v18054_v33 = vcombine.high %v17187_v61, %v18028_v46 }
 0x1d0   :  { %v9322_v7 = vpop.f32.mrf.mxu0 }
 0x1d1   :  { %10183 = vmatpush1.bf16.msra.mxu0 %v13860_v12  ;;  %10296 = vmatpush1.bf16.msra.mxu1 %v13863_v32  ;;  %v9435_v19 = vpop.f32.mrf.mxu1  ;;  %v18039_v35 = vadd.f32 %v9433_v39, %v9321_v51  ;;  %v9323_v6 = vadd.f32 %v9322_v7, %v17660_v59  ;;  %v13875_v12 = vld [vmem:[%s21046_s1 + $0xf20] ss:$8 sps:$4 sm:$0xff]   ;;  %21731 = vst [vmem:[#allocation30_spill] sm:$0xff] %v18054_v33  ;;  %v21733_v59 = vld [vmem:[#allocation62_spill] sm:$0xff] }
 0x1d2   :  { %10184 = vmatprep.subr.bf16.mxu0 %v13868_v26  ;;  %10297 = vmatprep.subr.bf16.mxu1 %v13871_v14  ;;  %v21729_v32 = vld [vmem:[#allocation124_spill] sm:$0xff]  ;;  %v9326_v40 = vpop.f32.mrf.mxu0  ;;  %v21732_v14 = vld [vmem:[#allocation61_spill] sm:$0xff] }
 0x1d3   :  { %v18050_v38 = vcombine.high %v21729_v32, %v18024_v20  ;;  %v9439_v26 = vpop.f32.mrf.mxu1  ;;  %v18058_v18 = vadd.f32 %v9435_v19, %v9323_v6  ;;  %v9327_v57 = vadd.f32 %v9326_v40, %v17669_v9  ;;  %v13880_v7 = vld [vmem:[%s21046_s1 + $0xe14] ss:$8 sps:$4 sm:$0xff]   ;;  %v13878_v9 = vld [vmem:[%s21046_s1 + $0xe10] ss:$8 sps:$4 sm:$0xff]  }
 0x1d4   :  { %10003 = vmatmul.mubr.bf16.gmra.mxu0 %v21732_v14  ;;  %10116 = vmatmul.mubr.bf16.gmra.mxu1 %v21733_v59  ;;  %v9328_v39 = vpop.f32.mrf.mxu0  ;;  %v13883_v14 = vld [vmem:[%s21046_s1 + $0xf14] ss:$8 sps:$4 sm:$0xff]  }
 0x1d5   :  { %21730 = vst [vmem:[#allocation29_spill] sm:$0xff] %v18050_v38  ;;  %10185 = vmatpush1.bf16.msra.mxu0 %v13866_v29  ;;  %10298 = vmatpush1.bf16.msra.mxu1 %v13869_v8  ;;  %v9441_v51 = vpop.f32.mrf.mxu1  ;;  %v18067_v47 = vadd.f32 %v9439_v26, %v9327_v57  ;;  %v9329_v19 = vadd.f32 %v9328_v39, %v17695_v44  ;;  %v13881_v29 = vld [vmem:[%s21046_s1 + $0xf10] ss:$8 sps:$4 sm:$0xff]   ;;  %v13886_v39 = vld [vmem:[%s21046_s1 + $0xe04] ss:$8 sps:$4 sm:$0xff]  }
 0x1d6   :  { %10186 = vmatprep.subr.bf16.mxu0 %v13874_v37  ;;  %10299 = vmatprep.subr.bf16.mxu1 %v13877_v23  ;;  %v9330_v8 = vpop.f32.mrf.mxu0  ;;  %v18080_v23 = vcombine.low %v21729_v32, %v18024_v20  ;;  %v18084_v44 = vcombine.low %v17187_v61, %v18028_v46  ;;  %v13889_v32 = vld [vmem:[%s21046_s1 + $0xf04] ss:$8 sps:$4 sm:$0xff]  }
 0x1d7   :  { %10012 = vmatprep.mubr.bf16.mxu0 %v18050_v38  ;;  %10125 = vmatprep.mubr.bf16.mxu1 %v18054_v33  ;;  %v9443_v37 = vpop.f32.mrf.mxu1  ;;  %v18086_v6 = vadd.f32 %v9441_v51, %v9329_v19  ;;  %v9331_v40 = vadd.f32 %v9330_v8, %v17704_v58  ;;  %v13884_v58 = vld [vmem:[%s21046_s1 + $0xe00] ss:$8 sps:$4 sm:$0xff]  }
 0x1d8   :  { %21734 = vst [vmem:[#allocation31_spill] sm:$0xff] %v18080_v23  ;;  %21735 = vst [vmem:[#allocation32_spill] sm:$0xff] %v18084_v44  ;;  %v9332_v26 = vpop.f32.mrf.mxu0 }
 0x1d9   :  { %10187 = vmatpush1.bf16.msra.mxu0 %v13872_v21  ;;  %10300 = vmatpush1.bf16.msra.mxu1 %v13875_v12  ;;  %v9445_v57 = vpop.f32.mrf.mxu1  ;;  %v18095_v61 = vadd.f32 %v9443_v37, %v9331_v40  ;;  %v9333_v51 = vadd.f32 %v9332_v26, %v17715_v36  ;;  %v13887_v21 = vld [vmem:[%s21046_s1 + $0xf00] ss:$8 sps:$4 sm:$0xff]   ;;  %v13892_v37 = vld [vmem:[%s21046_s1 + $0xef4] ss:$8 sps:$4 sm:$0xff]  }
 0x1da   :  { %10188 = vmatprep.subr.bf16.mxu0 %v13880_v7  ;;  %10301 = vmatprep.subr.bf16.mxu1 %v13883_v14  ;;  %v9336_v12 = vpop.f32.mrf.mxu0  ;;  %v13895_v40 = vld [vmem:[%s21046_s1 + $0xff4] ss:$8 sps:$4 sm:$0xff]  }
 0x1db   :  { %v9449_v14 = vpop.f32.mrf.mxu1  ;;  %v18106_v7 = vadd.f32 %v9445_v57, %v9333_v51  ;;  %v9337_v19 = vadd.f32 %v9336_v12, %v17724_v54  ;;  %v21736_v51 = vld [vmem:[#allocation64_spill] sm:$0xff]  ;;  %v21737_v54 = vld [vmem:[#allocation66_spill] sm:$0xff] }
 0x1dc   :  { %10013 = vmatmul.mubr.bf16.gmra.mxu0 %v18080_v23  ;;  %10126 = vmatmul.mubr.bf16.gmra.mxu1 %v18084_v44  ;;  %v9338_v36 = vpop.f32.mrf.mxu0  ;;  %v13904_v44 = vld [vmem:[%s21046_s1 + $0xed4] ss:$8 sps:$4 sm:$0xff]  }
 0x1dd   :  { %10189 = vmatpush1.bf16.msra.mxu0 %v13878_v9  ;;  %10302 = vmatpush1.bf16.msra.mxu1 %v13881_v29  ;;  %v9451_v8 = vpop.f32.mrf.mxu1  ;;  %v18115_v26 = vadd.f32 %v9449_v14, %v9337_v19  ;;  %v9339_v57 = vadd.f32 %v9338_v36, %v17735_v49  ;;  %v13890_v9 = vld [vmem:[%s21046_s1 + $0xef0] ss:$8 sps:$4 sm:$0xff]   ;;  %v13898_v36 = vld [vmem:[%s21046_s1 + $0xee4] ss:$8 sps:$4 sm:$0xff]  }
 0x1de   :  { %10190 = vmatprep.subr.bf16.mxu0 %v13886_v39  ;;  %10303 = vmatprep.subr.bf16.mxu1 %v13889_v32  ;;  %v13893_v29 = vld [vmem:[%s21046_s1 + $0xff0] ss:$8 sps:$4 sm:$0xff]   ;;  %v9340_v39 = vpop.f32.mrf.mxu0 }
 0x1df   :  { %10022 = vmatprep.mubr.bf16.mxu0 %v21736_v51  ;;  %10135 = vmatprep.mubr.bf16.mxu1 %v21737_v54  ;;  %v9453_v32 = vpop.f32.mrf.mxu1  ;;  %v18126_v12 = vadd.f32 %v9451_v8, %v9339_v57  ;;  %v9341_v14 = vadd.f32 %v9340_v39, %v17744_v4  ;;  %v13901_v51 = vld [vmem:[%s21046_s1 + $0xfe4] ss:$8 sps:$4 sm:$0xff]   ;;  %v13896_v4 = vld [vmem:[%s21046_s1 + $0xee0] ss:$8 sps:$4 sm:$0xff]   ;;  %v21739_v57 = vld [vmem:[#allocation69_spill] sm:$0xff]  ;;  %v1032_v39 = vshrl.u32 %v17756_v27, 16 }
 0x1e0   :  { %v9342_v49 = vpop.f32.mrf.mxu0 }
 0x1e1   :  { %10191 = vmatpush1.bf16.msra.mxu0 %v13884_v58  ;;  %10304 = vmatpush1.bf16.msra.mxu1 %v13887_v21  ;;  %v9455_v19 = vpop.f32.mrf.mxu1  ;;  %v18135_v54 = vadd.f32 %v9453_v32, %v9341_v14  ;;  %v9343_v8 = vadd.f32 %v9342_v49, %v17764_v34  ;;  %v13899_v58 = vld [vmem:[%s21046_s1 + $0xfe0] ss:$8 sps:$4 sm:$0xff]  }
 0x1e2   :  { %10192 = vmatprep.subr.bf16.mxu0 %v13892_v37  ;;  %10305 = vmatprep.subr.bf16.mxu1 %v13895_v40  ;;  %v9346_v21 = vpop.f32.mrf.mxu0  ;;  %v21738_v40 = vld [vmem:[#allocation67_spill] sm:$0xff] }
 0x1e3   :  { %v18147_v32 = vadd.f32 %v9455_v19, %v9343_v8  ;;  %v9347_v34 = vadd.f32 %v9346_v21, %v17773_v45  ;;  %v21740_v8 = vld [vmem:[#allocation73_spill] sm:$0xff]  ;;  %v21741_v45 = vld [vmem:[#allocation75_spill] sm:$0xff]  ;;  %v1034_v21 = vrot.slane %v1032_v39, 5 }
 0x1e4   :  { %v9459_v37 = vpop.f32.mrf.mxu1  ;;  %10023 = vmatmul.mubr.bf16.gmra.mxu0 %v21738_v40  ;;  %10136 = vmatmul.mubr.bf16.gmra.mxu1 %v21739_v57  ;;  %v9348_v14 = vpop.f32.mrf.mxu0  ;;  %v13907_v40 = vld [vmem:[%s21046_s1 + $0xfd4] ss:$8 sps:$4 sm:$0xff]   ;;  %v13913_v39 = vld [vmem:[%s21046_s1 + $0xfc4] ss:$8 sps:$4 sm:$0xff]  }
 0x1e5   :  { %10193 = vmatpush2.bf16.msra.mxu0 %v13890_v9  ;;  %10306 = vmatpush2.bf16.msra.mxu1 %v13893_v29  ;;  %v18156_v57 = vadd.f32 %v9459_v37, %v9347_v34  ;;  %v9349_v19 = vadd.f32 %v9348_v14, %v17785_v55  ;;  %v13902_v9 = vld [vmem:[%s21046_s1 + $0xed0] ss:$8 sps:$4 sm:$0xff]   ;;  %v21742_v37 = vshll.u32 %v17756_v27, 16 }
 0x1e6   :  { %v9461_v49 = vpop.f32.mrf.mxu1  ;;  %10194 = vmatprep.subr.bf16.mxu0 %v13898_v36  ;;  %10307 = vmatprep.subr.bf16.mxu1 %v13901_v51  ;;  %v13905_v29 = vld [vmem:[%s21046_s1 + $0xfd0] ss:$8 sps:$4 sm:$0xff]   ;;  %v9350_v36 = vpop.f32.mrf.mxu0 }
 0x1e7   :  { %10032 = vmatprep.mubr.bf16.mxu0 %v21740_v8  ;;  %10145 = vmatprep.mubr.bf16.mxu1 %v21741_v45  ;;  %v1035_v34 = vrot.slane %v21742_v37, 6  ;;  %v18169_v23 = vadd.f32 %v9461_v49, %v9349_v19  ;;  %v9351_v55 = vadd.f32 %v9350_v36, %v17794_v0  ;;  %v13910_v8 = vld [vmem:[%s21046_s1 + $0xec4] ss:$8 sps:$4 sm:$0xff]   ;;  %v13908_v0 = vld [vmem:[%s21046_s1 + $0xec0] ss:$8 sps:$4 sm:$0xff]   ;;  %v21744_v19 = vld [vmem:[#allocation77_spill] sm:$0xff] }
 0x1e8   :  { %v9463_v51 = vpop.f32.mrf.mxu1  ;;  %v9352_v14 = vpop.f32.mrf.mxu0  ;;  %v11887_v36 = vrot.slane %v17882_v22, 9  ;;  %v13916_v22 = vld [vmem:[%s21046_s1 + $0xeb4] ss:$8 sps:$4 sm:$0xff]  }
 0x1e9   :  { %10195 = vmatpush2.bf16.msra.mxu0 %v13896_v4  ;;  %10308 = vmatpush2.bf16.msra.mxu1 %v13899_v58  ;;  %v18178_v33 = vadd.f32 %v9463_v51, %v9351_v55  ;;  %v9353_v49 = vadd.f32 %v9352_v14, %v17807_v24  ;;  %v998_v51 = vrot.slane %v17756_v27, 5  ;;  %v21745_v24 = vor.u32 %v17445_v52, %v17441_v43  ;;  %v13919_v43 = vld [vmem:[%s21046_s1 + $0xfb4] ss:$8 sps:$4 sm:$0xff]  }
 0x1ea   :  { %v9465_v45 = vpop.f32.mrf.mxu1  ;;  %10196 = vmatprep.subr.bf16.mxu0 %v13904_v44  ;;  %10309 = vmatprep.subr.bf16.mxu1 %v13907_v40  ;;  %v13911_v44 = vld [vmem:[%s21046_s1 + $0xfc0] ss:$8 sps:$4 sm:$0xff]   ;;  %v9356_v4 = vpop.f32.mrf.mxu0  ;;  %v1036_v55 = vor.u32 %v1035_v34, %v1034_v21 }
 0x1eb   :  { %v21743_v40 = vld [vmem:[#allocation76_spill] sm:$0xff]  ;;  %v1031_v37 = vrot.slane %v21745_v24, 4  ;;  %v18194_v14 = vadd.f32 %v9465_v45, %v9353_v49  ;;  %v9357_v38 = vadd.f32 %v9356_v4, %v17816_v62  ;;  %v21746_v45 = vld [vmem:[#allocation82_spill] sm:$0xff]  ;;  %v21747_v62 = vld [vmem:[#allocation83_spill] sm:$0xff] }
 0x1ec   :  { %v9469_v58 = vpop.f32.mrf.mxu1  ;;  %10033 = vmatmul.mubr.bf16.gmra.mxu0 %v21743_v40  ;;  %10146 = vmatmul.mubr.bf16.gmra.mxu1 %v21744_v19  ;;  %v9358_v59 = vpop.f32.mrf.mxu0  ;;  %v13922_v4 = vld [vmem:[%s21046_s1 + $0xea4] ss:$8 sps:$4 sm:$0xff]  }
 0x1ed   :  { %10197 = vmatpush2.bf16.msra.mxu0 %v13902_v9  ;;  %10310 = vmatpush2.bf16.msra.mxu1 %v13905_v29  ;;  %v18203_v52 = vadd.f32 %v9469_v58, %v9357_v38  ;;  %v9359_v27 = vadd.f32 %v9358_v59, %v17831_v1  ;;  %v13917_v9 = vld [vmem:[%s21046_s1 + $0xfb0] ss:$8 sps:$4 sm:$0xff]   ;;  %v18216_v38 = vsel %vm15379_vm8, %v11887_v36, %v998_v51  ;;  %v13925_v58 = vld [vmem:[%s21046_s1 + $0xfa4] ss:$8 sps:$4 sm:$0xff]  }
 0x1ee   :  { %v9471_v17 = vpop.f32.mrf.mxu1  ;;  %10198 = vmatprep.subr.bf16.mxu0 %v13910_v8  ;;  %10311 = vmatprep.subr.bf16.mxu1 %v13913_v39  ;;  %v13914_v8 = vld [vmem:[%s21046_s1 + $0xeb0] ss:$8 sps:$4 sm:$0xff]   ;;  %v9360_v29 = vpop.f32.mrf.mxu0  ;;  %v18220_v1 = vsel %vm15091_vm5, %v1031_v37, %v1036_v55 }
 0x1ef   :  { %10042 = vmatprep.mubr.bf16.mxu0 %v21746_v45  ;;  %10155 = vmatprep.mubr.bf16.mxu1 %v21747_v62  ;;  %21748 = vst [vmem:[#allocation35_spill] sm:$0xff] %v18220_v1  ;;  %v18222_v59 = vadd.f32 %v9471_v17, %v9359_v27  ;;  %v9361_v34 = vadd.f32 %v9360_v29, %v17840_v42  ;;  %v13920_v42 = vld [vmem:[%s21046_s1 + $0xea0] ss:$8 sps:$4 sm:$0xff]  }
 0x1f0   :  { %v9473_v21 = vpop.f32.mrf.mxu1  ;;  %v9362_v39 = vpop.f32.mrf.mxu0  ;;  %v18246_v24 = vcombine.high %v17422_v15, %v18220_v1 }
 0x1f1   :  { %10199 = vmatpush2.bf16.msra.mxu0 %v13908_v0  ;;  %10312 = vmatpush2.bf16.msra.mxu1 %v13911_v44  ;;  %v18231_v36 = vadd.f32 %v9473_v21, %v9361_v34  ;;  %v9363_v17 = vadd.f32 %v9362_v39, %v17859_v5  ;;  %v13923_v0 = vld [vmem:[%s21046_s1 + $0xfa0] ss:$8 sps:$4 sm:$0xff]   ;;  %v13928_v34 = vld [vmem:[%s21046_s1 + $0xe94] ss:$8 sps:$4 sm:$0xff]  }
 0x1f2   :  { %v9475_v49 = vpop.f32.mrf.mxu1  ;;  %10200 = vmatprep.subr.bf16.mxu0 %v13916_v22  ;;  %10313 = vmatprep.subr.bf16.mxu1 %v13919_v43  ;;  %v21749_v44 = vld [vmem:[#allocation128_spill] sm:$0xff]  ;;  %21751 = vst [vmem:[#allocation50_spill] sm:$0xff] %v18246_v24  ;;  %v9366_v37 = vpop.f32.mrf.mxu0  ;;  %v21752_v22 = vld [vmem:[#allocation86_spill] sm:$0xff]  ;;  %v21753_v5 = vld [vmem:[#allocation87_spill] sm:$0xff] }
 0x1f3   :  { %v18242_v51 = vcombine.high %v21749_v44, %v18216_v38  ;;  %v18250_v43 = vadd.f32 %v9475_v49, %v9363_v17  ;;  %v9367_v27 = vadd.f32 %v9366_v37, %v17868_v31  ;;  %v13931_v39 = vld [vmem:[%s21046_s1 + $0xf94] ss:$8 sps:$4 sm:$0xff]   ;;  %v13926_v31 = vld [vmem:[%s21046_s1 + $0xe90] ss:$8 sps:$4 sm:$0xff]  }
 0x1f4   :  { %v9479_v55 = vpop.f32.mrf.mxu1  ;;  %10043 = vmatmul.mubr.bf16.gmra.mxu0 %v21752_v22  ;;  %10156 = vmatmul.mubr.bf16.gmra.mxu1 %v21753_v5  ;;  %v9368_v29 = vpop.f32.mrf.mxu0 }
 0x1f5   :  { %21750 = vst [vmem:[#allocation49_spill] sm:$0xff] %v18242_v51  ;;  %10201 = vmatpush2.bf16.msra.mxu0 %v13914_v8  ;;  %10314 = vmatpush2.bf16.msra.mxu1 %v13917_v9  ;;  %v18259_v22 = vadd.f32 %v9479_v55, %v9367_v27  ;;  %v9369_v49 = vadd.f32 %v9368_v29, %v17894_v10  ;;  %v13929_v8 = vld [vmem:[%s21046_s1 + $0xf90] ss:$8 sps:$4 sm:$0xff]   ;;  %v13934_v29 = vld [vmem:[%s21046_s1 + $0xe84] ss:$8 sps:$4 sm:$0xff]  }
 0x1f6   :  { %v9481_v21 = vpop.f32.mrf.mxu1  ;;  %10202 = vmatprep.subr.bf16.mxu0 %v13922_v4  ;;  %10315 = vmatprep.subr.bf16.mxu1 %v13925_v58  ;;  %v9370_v9 = vpop.f32.mrf.mxu0  ;;  %v18272_v58 = vcombine.low %v21749_v44, %v18216_v38  ;;  %v18276_v10 = vcombine.low %v17422_v15, %v18220_v1  ;;  %v13937_v44 = vld [vmem:[%s21046_s1 + $0xf84] ss:$8 sps:$4 sm:$0xff]  }
 0x1f7   :  { %10052 = vmatprep.mubr.bf16.mxu0 %v18242_v51  ;;  %10165 = vmatprep.mubr.bf16.mxu1 %v18246_v24  ;;  %v18278_v17 = vadd.f32 %v9481_v21, %v9369_v49  ;;  %v9371_v37 = vadd.f32 %v9370_v9, %v17903_v13  ;;  %v13932_v13 = vld [vmem:[%s21046_s1 + $0xe80] ss:$8 sps:$4 sm:$0xff]  }
 0x1f8   :  { %v9483_v4 = vpop.f32.mrf.mxu1  ;;  %21754 = vst [vmem:[#allocation53_spill] sm:$0xff] %v18272_v58  ;;  %21755 = vst [vmem:[#allocation54_spill] sm:$0xff] %v18276_v10  ;;  %v9372_v55 = vpop.f32.mrf.mxu0 }
 0x1f9   :  { %10203 = vmatpush2.bf16.msra.mxu0 %v13920_v42  ;;  %10316 = vmatpush2.bf16.msra.mxu1 %v13923_v0  ;;  %v18287_v15 = vadd.f32 %v9483_v4, %v9371_v37  ;;  %v9373_v21 = vadd.f32 %v9372_v55, %v17914_v3  ;;  %v13935_v42 = vld [vmem:[%s21046_s1 + $0xf80] ss:$8 sps:$4 sm:$0xff]   ;;  %v13940_v4 = vld [vmem:[%s21046_s1 + $0x1074] ss:$8 sps:$4 sm:$0xff]  }
 0x1fa   :  { %v9485_v27 = vpop.f32.mrf.mxu1  ;;  %10204 = vmatprep.subr.bf16.mxu0 %v13928_v34  ;;  %10317 = vmatprep.subr.bf16.mxu1 %v13931_v39  ;;  %v9376_v0 = vpop.f32.mrf.mxu0  ;;  %v13943_v37 = vld [vmem:[%s21046_s1 + $0x1174] ss:$8 sps:$4 sm:$0xff]  }
 0x1fb   :  { %v18298_v39 = vadd.f32 %v9485_v27, %v9373_v21  ;;  %v9377_v49 = vadd.f32 %v9376_v0, %v17923_v41  ;;  %v21756_v21 = vld [vmem:[#allocation88_spill] sm:$0xff]  ;;  %v21757_v41 = vld [vmem:[#allocation89_spill] sm:$0xff] }
 0x1fc   :  { %v9489_v34 = vpop.f32.mrf.mxu1  ;;  %10053 = vmatmul.mubr.bf16.gmra.mxu0 %v18272_v58  ;;  %10166 = vmatmul.mubr.bf16.gmra.mxu1 %v18276_v10  ;;  %v9378_v3 = vpop.f32.mrf.mxu0 }
 0x1fd   :  { %10205 = vmatpush2.bf16.msra.mxu0 %v13926_v31  ;;  %10318 = vmatpush2.bf16.msra.mxu1 %v13929_v8  ;;  %v18307_v55 = vadd.f32 %v9489_v34, %v9377_v49  ;;  %v9379_v27 = vadd.f32 %v9378_v3, %v17934_v28  ;;  %v13938_v31 = vld [vmem:[%s21046_s1 + $0x1070] ss:$8 sps:$4 sm:$0xff]   ;;  %v13946_v3 = vld [vmem:[%s21046_s1 + $0x1064] ss:$8 sps:$4 sm:$0xff]  }
 0x1fe   :  { %v9491_v9 = vpop.f32.mrf.mxu1  ;;  %10206 = vmatprep.subr.bf16.mxu0 %v13934_v29  ;;  %10319 = vmatprep.subr.bf16.mxu1 %v13937_v44  ;;  %v13941_v8 = vld [vmem:[%s21046_s1 + $0x1170] ss:$8 sps:$4 sm:$0xff]   ;;  %v9380_v29 = vpop.f32.mrf.mxu0 }
 0x1ff   :  { %10208 = vmatprep.mubr.bf16.mxu0 %v21756_v21  ;;  %10321 = vmatprep.mubr.bf16.mxu1 %v21757_v41  ;;  %v18318_v0 = vadd.f32 %v9491_v9, %v9379_v27  ;;  %v9381_v34 = vadd.f32 %v9380_v29, %v17943_v60  ;;  %v13949_v21 = vld [vmem:[%s21046_s1 + $0x1164] ss:$8 sps:$4 sm:$0xff]   ;;  %v13944_v60 = vld [vmem:[%s21046_s1 + $0x1060] ss:$8 sps:$4 sm:$0xff]  }
 0x200   :  { %v9493_v44 = vpop.f32.mrf.mxu1  ;;  %v9382_v28 = vpop.f32.mrf.mxu0  ;;  %v21759_v27 = vld [vmem:[#allocation91_spill] sm:$0xff] }
 0x201   :  { %10207 = vmatpush2.bf16.msra.mxu0 %v13932_v13  ;;  %10320 = vmatpush2.bf16.msra.mxu1 %v13935_v42  ;;  %v18327_v41 = vadd.f32 %v9493_v44, %v9381_v34  ;;  %v9383_v9 = vadd.f32 %v9382_v28, %v17955_v48  ;;  %v13947_v13 = vld [vmem:[%s21046_s1 + $0x1160] ss:$8 sps:$4 sm:$0xff]   ;;  %v13952_v28 = vld [vmem:[%s21046_s1 + $0x1054] ss:$8 sps:$4 sm:$0xff]  }
 0x202   :  { %v9495_v49 = vpop.f32.mrf.mxu1  ;;  %10402 = vmatprep.subr.bf16.mxu0 %v13940_v4  ;;  %10515 = vmatprep.subr.bf16.mxu1 %v13943_v37  ;;  %v9532_v42 = vpop.f32.mrf.mxu0  ;;  %v21758_v37 = vld [vmem:[#allocation90_spill] sm:$0xff] }
 0x203   :  { %v18338_v29 = vadd.f32 %v9495_v49, %v9383_v9  ;;  %v9533_v44 = vadd.f32 %v9532_v42, %v17964_v56 }
 0x204   :  { %v9645_v4 = vpop.f32.mrf.mxu1  ;;  %10209 = vmatmul.mubr.bf16.vlgmr.msra.gmra.mxu0 %v21758_v37  ;;  %10322 = vmatmul.mubr.bf16.vlgmr.msra.gmra.mxu1 %v21759_v27  ;;  %v9534_v48 = vpop.f32.mrf.mxu0  ;;  %v13955_v37 = vld [vmem:[%s21046_s1 + $0x1154] ss:$8 sps:$4 sm:$0xff]  }
 0x205   :  { %10403 = vmatpush1.bf16.msra.mxu0 %v13938_v31  ;;  %10516 = vmatpush1.bf16.msra.mxu1 %v13941_v8 }
 0x206   :  { %v9647_v34 = vpop.f32.mrf.mxu1  ;;  %10404 = vmatprep.subr.bf16.mxu0 %v13946_v3  ;;  %10517 = vmatprep.subr.bf16.mxu1 %v13949_v21 }
 0x207   :  { %11 = vsyncpa [#allocation5], 0  ;;  %v18347_v27 = vadd.f32 %v9645_v4, %v9533_v44  ;;  %v9535_v49 = vadd.f32 %v9534_v48, %v17977_v30  ;;  %v21760_v56 = vld [vmem:[#allocation94_spill] sm:$0xff]  ;;  %v21761_v31 = vld [vmem:[#allocation95_spill] sm:$0xff]  ;;  %v9536_v8 = vpop.f32.mrf.mxu0 }
 0x208   :  { %10218 = vmatprep.mubr.bf16.mxu0 %v21760_v56  ;;  %10331 = vmatprep.mubr.bf16.mxu1 %v21761_v31  ;;  %v9649_v3 = vpop.f32.mrf.mxu1  ;;  %v21762_v9 = vld [vmem:[#allocation123_spill] sm:$0xff]  ;;  %v13950_v10 = vld [vmem:[%s21046_s1 + $0x1050] ss:$8 sps:$4 sm:$0xff]  }
 0x209   :  { %v18352_v21 = vadd.f32 %v9647_v34, %v9535_v49  ;;  %v9537_v42 = vadd.f32 %v9536_v8, %v21762_v9  ;;  %10405 = vmatpush1.bf16.msra.mxu0 %v13944_v60  ;;  %10518 = vmatpush1.bf16.msra.mxu1 %v13947_v13  ;;  %v13953_v30 = vld [vmem:[%s21046_s1 + $0x1150] ss:$8 sps:$4 sm:$0xff]   ;;  %v9538_v4 = vpop.f32.mrf.mxu0  ;;  %v13958_v48 = vld [vmem:[%s21046_s1 + $0x1044] ss:$8 sps:$4 sm:$0xff]  }
 0x20a   :  { %v9651_v44 = vpop.f32.mrf.mxu1  ;;  %10406 = vmatprep.subr.bf16.mxu0 %v13952_v28  ;;  %10519 = vmatprep.subr.bf16.mxu1 %v13955_v37  ;;  %v13961_v60 = vld [vmem:[%s21046_s1 + $0x1144] ss:$8 sps:$4 sm:$0xff]   ;;  %v9539_v34 = vadd.f32 %v9538_v4, %v18002_v50  ;;  %v21763_v8 = vld [vmem:[#allocation97_spill] sm:$0xff]  ;;  %v13956_v4 = vld [vmem:[%s21046_s1 + $0x1040] ss:$8 sps:$4 sm:$0xff]  }
 0x20b   :  { %v18367_v13 = vadd.f32 %v9649_v3, %v9537_v42  ;;  %v9542_v49 = vpop.f32.mrf.mxu0  ;;  %v21764_v9 = vld [vmem:[#allocation96_spill] sm:$0xff]  ;;  %v18375_v28 = vld [vmem:[%s21045_s0 + $0x90] sm:$0xff]  ;;  %v14421_v3 = vld [vmem:[%s21045_s0 + $0x98] sm:$0x33] }
 0x20c   :  { %v9655_v31 = vpop.f32.mrf.mxu1  ;;  %10219 = vmatmul.mubr.bf16.gmra.mxu0 %v21763_v8  ;;  %10332 = vmatmul.mubr.bf16.gmra.mxu1 %v21764_v9  ;;  %v11888_v37 = vrot.slane %v18375_v28, 10  ;;  %v1058_v42 = vrot.slane %v14421_v3, 6  ;;  %v18381_v56 = vadd.f32 %v9651_v44, %v9539_v34  ;;  %v9543_v50 = vadd.f32 %v9542_v49, %v18011_v11  ;;  %v13959_v9 = vld [vmem:[%s21046_s1 + $0x1140] ss:$8 sps:$4 sm:$0xff]   ;;  %v13964_v44 = vld [vmem:[%s21046_s1 + $0x1034] ss:$8 sps:$4 sm:$0xff]  }
 0x20d   :  { %10407 = vmatpush1.bf16.msra.mxu0 %v13950_v10  ;;  %10520 = vmatpush1.bf16.msra.mxu1 %v13953_v30  ;;  %v9544_v8 = vpop.f32.mrf.mxu0  ;;  %v13967_v11 = vld [vmem:[%s21046_s1 + $0x1134] ss:$8 sps:$4 sm:$0xff]   ;;  %v21765_v34 = vld [vmem:[#allocation100_spill] sm:$0xff] }
 0x20e   :  { %v9657_v58 = vpop.f32.mrf.mxu1  ;;  %10408 = vmatprep.subr.bf16.mxu0 %v13958_v48  ;;  %10521 = vmatprep.subr.bf16.mxu1 %v13961_v60  ;;  %v18396_v10 = vadd.f32 %v9655_v31, %v9543_v50  ;;  %v9545_v30 = vadd.f32 %v9544_v8, %v18030_v25  ;;  %v21766_v49 = vld [vmem:[#allocation101_spill] sm:$0xff]  ;;  %v18404_v48 = vld [vmem:[%s21045_s0 + $0xa0] sm:$0xff]  ;;  %v18408_v51 = vsel %vm15929_vm11, %v11888_v37, %v1058_v42  ;;  %v21771_v19 = vld [vmem:[#allocation102_spill] sm:$0xff] }
 0x20f   :  { %10228 = vmatprep.mubr.bf16.mxu0 %v21765_v34  ;;  %10341 = vmatprep.mubr.bf16.mxu1 %v21766_v49  ;;  %v9546_v60 = vpop.f32.mrf.mxu0  ;;  %21768 = vst [vmem:[#allocation42_spill] sm:$0xff] %v18408_v51  ;;  %v21344_v31 = vshrl.u32 %v18404_v48, 16  ;;  %v21345_v50 = vshll.u32 %v18404_v48, 16  ;;  %v13962_v49 = vld [vmem:[%s21046_s1 + $0x1030] ss:$8 sps:$4 sm:$0xff]   ;;  %v12079_v5 = vcombine.high %v18375_v28, %v18404_v48 }
 0x210   :  { %v9659_v3 = vpop.f32.mrf.mxu1  ;;  %v18412_v25 = vadd.f32 %v9657_v58, %v9545_v30  ;;  %v9547_v8 = vadd.f32 %v9546_v60, %v18039_v35  ;;  %v13965_v34 = vld [vmem:[%s21046_s1 + $0x1130] ss:$8 sps:$4 sm:$0xff]   ;;  %v13970_v58 = vld [vmem:[%s21046_s1 + $0x1024] ss:$8 sps:$4 sm:$0xff]  }
 0x211   :  { %10409 = vmatpush1.bf16.msra.mxu0 %v13956_v4  ;;  %10522 = vmatpush1.bf16.msra.mxu1 %v13959_v9  ;;  %v9548_v37 = vpop.f32.mrf.mxu0  ;;  %v13973_v35 = vld [vmem:[%s21046_s1 + $0x1124] ss:$8 sps:$4 sm:$0xff]   ;;  %v18429_v4 = vrot.slane %v21344_v31, 5  ;;  %v18433_v9 = vrot.slane %v21345_v50, 6  ;;  %v21788_v1 = vld [vmem:[#allocation121_spill] sm:$0xff] }
 0x212   :  { %v9661_v42 = vpop.f32.mrf.mxu1  ;;  %10410 = vmatprep.subr.bf16.mxu0 %v13964_v44  ;;  %10523 = vmatprep.subr.bf16.mxu1 %v13967_v11  ;;  %v18435_v30 = vadd.f32 %v9659_v3, %v9547_v8  ;;  %v9549_v44 = vadd.f32 %v9548_v37, %v18058_v18  ;;  %v21769_v11 = vld [vmem:[#allocation136_spill] sm:$0xff]  ;;  %v21772_v31 = vld [vmem:[#allocation103_spill] sm:$0xff] }
 0x213   :  { %v18440_v60 = vcombine.high %v21769_v11, %v18408_v51  ;;  %v9552_v62 = vpop.f32.mrf.mxu0  ;;  %v13968_v8 = vld [vmem:[%s21046_s1 + $0x1020] ss:$8 sps:$4 sm:$0xff]   ;;  %v14371_v63 = vld [vmem:[%s21046_s1 + $0x18a4] ss:$8 sps:$4 sm:$0xff]  }
 0x214   :  { %v9665_v45 = vpop.f32.mrf.mxu1  ;;  %10229 = vmatmul.mubr.bf16.gmra.mxu0 %v21771_v19  ;;  %10342 = vmatmul.mubr.bf16.gmra.mxu1 %v21772_v31  ;;  %v18448_v3 = vadd.f32 %v9661_v42, %v9549_v44  ;;  %v9553_v18 = vadd.f32 %v9552_v62, %v18067_v47  ;;  %v13971_v37 = vld [vmem:[%s21046_s1 + $0x1120] ss:$8 sps:$4 sm:$0xff]   ;;  %v13978_v31 = vld [vmem:[%s21046_s1 + $0x1014] ss:$8 sps:$4 sm:$0xff]  }
 0x215   :  { %21770 = vst [vmem:[#allocation124_spill] sm:$0xff] %v18440_v60  ;;  %10411 = vmatpush1.bf16.msra.mxu0 %v13962_v49  ;;  %10524 = vmatpush1.bf16.msra.mxu1 %v13965_v34  ;;  %v9554_v19 = vpop.f32.mrf.mxu0  ;;  %v13981_v47 = vld [vmem:[%s21046_s1 + $0x1114] ss:$8 sps:$4 sm:$0xff]  }
 0x216   :  { %v9667_v40 = vpop.f32.mrf.mxu1  ;;  %10412 = vmatprep.subr.bf16.mxu0 %v13970_v58  ;;  %10525 = vmatprep.subr.bf16.mxu1 %v13973_v35  ;;  %v18463_v62 = vadd.f32 %v9665_v45, %v9553_v18  ;;  %v9555_v34 = vadd.f32 %v9554_v19, %v18086_v6  ;;  %v18469_v58 = vcombine.low %v21769_v11, %v18408_v51  ;;  %v13976_v6 = vld [vmem:[%s21046_s1 + $0x1010] ss:$8 sps:$4 sm:$0xff]  }
 0x217   :  { %10238 = vmatprep.mubr.bf16.mxu0 %v18440_v60  ;;  %10351 = vmatprep.mubr.bf16.mxu1 %v12079_v5  ;;  %v9556_v49 = vpop.f32.mrf.mxu0  ;;  %v12078_v35 = vcombine.low %v18375_v28, %v18404_v48  ;;  %v13979_v19 = vld [vmem:[%s21046_s1 + $0x1110] ss:$8 sps:$4 sm:$0xff]  }
 0x218   :  { %v9669_v42 = vpop.f32.mrf.mxu1  ;;  %21773 = vst [vmem:[#allocation64_spill] sm:$0xff] %v18469_v58  ;;  %v18473_v44 = vadd.f32 %v9667_v40, %v9555_v34  ;;  %v9557_v50 = vadd.f32 %v9556_v49, %v18095_v61  ;;  %v13984_v40 = vld [vmem:[%s21046_s1 + $0x1004] ss:$8 sps:$4 sm:$0xff]   ;;  %v13990_v49 = vld [vmem:[%s21046_s1 + $0x10f4] ss:$8 sps:$4 sm:$0xff]  }
 0x219   :  { %10413 = vmatpush1.bf16.msra.mxu0 %v13968_v8  ;;  %10526 = vmatpush1.bf16.msra.mxu1 %v13971_v37  ;;  %v9558_v45 = vpop.f32.mrf.mxu0  ;;  %v13987_v61 = vld [vmem:[%s21046_s1 + $0x1104] ss:$8 sps:$4 sm:$0xff]  }
 0x21a   :  { %v9671_v5 = vpop.f32.mrf.mxu1  ;;  %10414 = vmatprep.subr.bf16.mxu0 %v13978_v31  ;;  %10527 = vmatprep.subr.bf16.mxu1 %v13981_v47  ;;  %v18488_v28 = vadd.f32 %v9669_v42, %v9557_v50  ;;  %v9559_v11 = vadd.f32 %v9558_v45, %v18106_v7  ;;  %v13982_v47 = vld [vmem:[%s21046_s1 + $0x1000] ss:$8 sps:$4 sm:$0xff]  }
 0x21b   :  { %v9562_v18 = vpop.f32.mrf.mxu0  ;;  %v13985_v50 = vld [vmem:[%s21046_s1 + $0x1100] ss:$8 sps:$4 sm:$0xff]  }
 0x21c   :  { %v9675_v8 = vpop.f32.mrf.mxu1  ;;  %10239 = vmatmul.mubr.bf16.gmra.mxu0 %v18469_v58  ;;  %10352 = vmatmul.mubr.bf16.gmra.mxu1 %v12078_v35  ;;  %v18492_v37 = vadd.f32 %v9671_v5, %v9559_v11  ;;  %v9563_v31 = vadd.f32 %v9562_v18, %v18115_v26  ;;  %v13993_v26 = vld [vmem:[%s21046_s1 + $0x11f4] ss:$8 sps:$4 sm:$0xff]   ;;  %v13988_v11 = vld [vmem:[%s21046_s1 + $0x10f0] ss:$8 sps:$4 sm:$0xff]  }
 0x21d   :  { %10415 = vmatpush1.bf16.msra.mxu0 %v13976_v6  ;;  %10528 = vmatpush1.bf16.msra.mxu1 %v13979_v19  ;;  %v9564_v7 = vpop.f32.mrf.mxu0  ;;  %v21774_v6 = vld [vmem:[#allocation104_spill] sm:$0xff]  ;;  %v21775_v19 = vld [vmem:[#allocation105_spill] sm:$0xff] }
 0x21e   :  { %v9677_v34 = vpop.f32.mrf.mxu1  ;;  %10416 = vmatprep.subr.bf16.mxu0 %v13984_v40  ;;  %10529 = vmatprep.subr.bf16.mxu1 %v13987_v61  ;;  %v18507_v42 = vadd.f32 %v9675_v8, %v9563_v31  ;;  %v9565_v35 = vadd.f32 %v9564_v7, %v18126_v12  ;;  %v13991_v12 = vld [vmem:[%s21046_s1 + $0x11f0] ss:$8 sps:$4 sm:$0xff]   ;;  %v13996_v31 = vld [vmem:[%s21046_s1 + $0x10e4] ss:$8 sps:$4 sm:$0xff]  }
 0x21f   :  { %10248 = vmatprep.mubr.bf16.mxu0 %v21774_v6  ;;  %10361 = vmatprep.mubr.bf16.mxu1 %v21775_v19  ;;  %v9566_v45 = vpop.f32.mrf.mxu0  ;;  %v21777_v6 = vld [vmem:[#allocation107_spill] sm:$0xff] }
 0x220   :  { %v9679_v5 = vpop.f32.mrf.mxu1  ;;  %v18512_v40 = vadd.f32 %v9677_v34, %v9565_v35  ;;  %v9567_v61 = vadd.f32 %v9566_v45, %v18135_v54  ;;  %v13999_v54 = vld [vmem:[%s21046_s1 + $0x11e4] ss:$8 sps:$4 sm:$0xff]   ;;  %v21776_v35 = vld [vmem:[#allocation106_spill] sm:$0xff]  ;;  %v13994_v19 = vld [vmem:[%s21046_s1 + $0x10e0] ss:$8 sps:$4 sm:$0xff]  }
 0x221   :  { %10417 = vmatpush1.bf16.msra.mxu0 %v13982_v47  ;;  %10530 = vmatpush1.bf16.msra.mxu1 %v13985_v50  ;;  %v9568_v18 = vpop.f32.mrf.mxu0 }
 0x222   :  { %v9681_v8 = vpop.f32.mrf.mxu1  ;;  %10418 = vmatprep.subr.bf16.mxu0 %v13990_v49  ;;  %10531 = vmatprep.subr.bf16.mxu1 %v13993_v26  ;;  %v18527_v47 = vadd.f32 %v9679_v5, %v9567_v61  ;;  %v9569_v50 = vadd.f32 %v9568_v18, %v18147_v32  ;;  %v13997_v32 = vld [vmem:[%s21046_s1 + $0x11e0] ss:$8 sps:$4 sm:$0xff]   ;;  %v14002_v61 = vld [vmem:[%s21046_s1 + $0x10d4] ss:$8 sps:$4 sm:$0xff]  }
 0x223   :  { %v9572_v7 = vpop.f32.mrf.mxu0  ;;  %v21778_v18 = vld [vmem:[#allocation110_spill] sm:$0xff] }
 0x224   :  { %v9685_v34 = vpop.f32.mrf.mxu1  ;;  %10249 = vmatmul.mubr.bf16.gmra.mxu0 %v21776_v35  ;;  %10362 = vmatmul.mubr.bf16.gmra.mxu1 %v21777_v6  ;;  %v18532_v49 = vadd.f32 %v9681_v8, %v9569_v50  ;;  %v9573_v26 = vadd.f32 %v9572_v7, %v18156_v57  ;;  %v14005_v57 = vld [vmem:[%s21046_s1 + $0x11d4] ss:$8 sps:$4 sm:$0xff]   ;;  %v21779_v8 = vld [vmem:[#allocation111_spill] sm:$0xff]  ;;  %v14000_v35 = vld [vmem:[%s21046_s1 + $0x10d0] ss:$8 sps:$4 sm:$0xff]  }
 0x225   :  { %10419 = vmatpush2.bf16.msra.mxu0 %v13988_v11  ;;  %10532 = vmatpush2.bf16.msra.mxu1 %v13991_v12  ;;  %v9574_v45 = vpop.f32.mrf.mxu0 }
 0x226   :  { %v9687_v5 = vpop.f32.mrf.mxu1  ;;  %10420 = vmatprep.subr.bf16.mxu0 %v13996_v31  ;;  %10533 = vmatprep.subr.bf16.mxu1 %v13999_v54  ;;  %v18547_v11 = vadd.f32 %v9685_v34, %v9573_v26  ;;  %v9575_v12 = vadd.f32 %v9574_v45, %v18169_v23  ;;  %v14003_v23 = vld [vmem:[%s21046_s1 + $0x11d0] ss:$8 sps:$4 sm:$0xff]   ;;  %v14008_v26 = vld [vmem:[%s21046_s1 + $0x10c4] ss:$8 sps:$4 sm:$0xff]  }
 0x227   :  { %10258 = vmatprep.mubr.bf16.mxu0 %v21778_v18  ;;  %10371 = vmatprep.mubr.bf16.mxu1 %v21779_v8  ;;  %v9576_v50 = vpop.f32.mrf.mxu0  ;;  %v21781_v8 = vld [vmem:[#allocation112_spill] sm:$0xff] }
 0x228   :  { %v9689_v7 = vpop.f32.mrf.mxu1  ;;  %v18552_v31 = vadd.f32 %v9687_v5, %v9575_v12  ;;  %v9577_v54 = vadd.f32 %v9576_v50, %v18178_v33  ;;  %v14011_v33 = vld [vmem:[%s21046_s1 + $0x11c4] ss:$8 sps:$4 sm:$0xff]   ;;  %v21780_v12 = vld [vmem:[#allocation113_spill] sm:$0xff]  ;;  %v14423_v50 = vld [vmem:[%s21045_s0 + $0x158] sm:$0x33] }
 0x229   :  { %10421 = vmatpush2.bf16.msra.mxu0 %v13994_v19  ;;  %10534 = vmatpush2.bf16.msra.mxu1 %v13997_v32  ;;  %v9578_v34 = vpop.f32.mrf.mxu0 }
 0x22a   :  { %v9691_v6 = vpop.f32.mrf.mxu1  ;;  %10422 = vmatprep.subr.bf16.mxu0 %v14002_v61  ;;  %10535 = vmatprep.subr.bf16.mxu1 %v14005_v57  ;;  %v18567_v19 = vadd.f32 %v9689_v7, %v9577_v54  ;;  %v9579_v32 = vadd.f32 %v9578_v34, %v18194_v14  ;;  %v18575_v61 = vld [vmem:[%s21045_s0 + $0x150] sm:$0xff]  ;;  %v1062_v7 = vrot.slane %v14423_v50, 6  ;;  %v14006_v34 = vld [vmem:[%s21046_s1 + $0x10c0] ss:$8 sps:$4 sm:$0xff]  }
 0x22b   :  { %v9582_v45 = vpop.f32.mrf.mxu0  ;;  %v11889_v57 = vrot.slane %v18575_v61, 10 }
 0x22c   :  { %v9695_v5 = vpop.f32.mrf.mxu1  ;;  %10259 = vmatmul.mubr.bf16.gmra.mxu0 %v21780_v12  ;;  %10372 = vmatmul.mubr.bf16.gmra.mxu1 %v21781_v8  ;;  %v18581_v54 = vadd.f32 %v9691_v6, %v9579_v32  ;;  %v9583_v14 = vadd.f32 %v9582_v45, %v18203_v52  ;;  %v14009_v8 = vld [vmem:[%s21046_s1 + $0x11c0] ss:$8 sps:$4 sm:$0xff]   ;;  %v14014_v6 = vld [vmem:[%s21046_s1 + $0x10b4] ss:$8 sps:$4 sm:$0xff]  }
 0x22d   :  { %10423 = vmatpush2.bf16.msra.mxu0 %v14000_v35  ;;  %10536 = vmatpush2.bf16.msra.mxu1 %v14003_v23  ;;  %v9584_v58 = vpop.f32.mrf.mxu0  ;;  %v14017_v52 = vld [vmem:[%s21046_s1 + $0x11b4] ss:$8 sps:$4 sm:$0xff]   ;;  %v18608_v12 = vsel %vm15929_vm11, %v11889_v57, %v1062_v7 }
 0x22e   :  { %v9697_v60 = vpop.f32.mrf.mxu1  ;;  %10424 = vmatprep.subr.bf16.mxu0 %v14008_v26  ;;  %10537 = vmatprep.subr.bf16.mxu1 %v14011_v33  ;;  %v18596_v35 = vadd.f32 %v9695_v5, %v9583_v14  ;;  %v9585_v23 = vadd.f32 %v9584_v58, %v18222_v59  ;;  %v21782_v32 = vld [vmem:[#allocation117_spill] sm:$0xff]  ;;  %v21783_v45 = vld [vmem:[#allocation118_spill] sm:$0xff]  ;;  %v18604_v26 = vld [vmem:[%s21045_s0 + $0x160] sm:$0xff]  ;;  %21784 = vst [vmem:[#allocation66_spill] sm:$0xff] %v18608_v12 }
 0x22f   :  { %10268 = vmatprep.mubr.bf16.mxu0 %v21782_v32  ;;  %10381 = vmatprep.mubr.bf16.mxu1 %v21783_v45  ;;  %v9586_v33 = vpop.f32.mrf.mxu0  ;;  %v21350_v5 = vshrl.u32 %v18604_v26, 16  ;;  %v21351_v14 = vshll.u32 %v18604_v26, 16  ;;  %v14012_v45 = vld [vmem:[%s21046_s1 + $0x10b0] ss:$8 sps:$4 sm:$0xff]   ;;  %v12279_v18 = vcombine.high %v18575_v61, %v18604_v26 }
 0x230   :  { %v9699_v50 = vpop.f32.mrf.mxu1  ;;  %v18612_v59 = vadd.f32 %v9697_v60, %v9585_v23  ;;  %v9587_v58 = vadd.f32 %v9586_v33, %v18231_v36  ;;  %v14015_v32 = vld [vmem:[%s21046_s1 + $0x11b0] ss:$8 sps:$4 sm:$0xff]   ;;  %v14020_v60 = vld [vmem:[%s21046_s1 + $0x10a4] ss:$8 sps:$4 sm:$0xff]  }
 0x231   :  { %10425 = vmatpush2.bf16.msra.mxu0 %v14006_v34  ;;  %10538 = vmatpush2.bf16.msra.mxu1 %v14009_v8  ;;  %v9588_v57 = vpop.f32.mrf.mxu0  ;;  %v14023_v36 = vld [vmem:[%s21046_s1 + $0x11a4] ss:$8 sps:$4 sm:$0xff]   ;;  %v18629_v34 = vrot.slane %v21350_v5, 5  ;;  %v18633_v8 = vrot.slane %v21351_v14, 6  ;;  %v21789_v5 = vld [vmem:[#allocation122_spill] sm:$0xff] }
 0x232   :  { %v9701_v7 = vpop.f32.mrf.mxu1  ;;  %10426 = vmatprep.subr.bf16.mxu0 %v14014_v6  ;;  %10539 = vmatprep.subr.bf16.mxu1 %v14017_v52  ;;  %v18635_v23 = vadd.f32 %v9699_v50, %v9587_v58  ;;  %v9589_v6 = vadd.f32 %v9588_v57, %v18250_v43  ;;  %v21786_v52 = vld [vmem:[#allocation70_spill] sm:$0xff]  ;;  %v14018_v58 = vld [vmem:[%s21046_s1 + $0x10a0] ss:$8 sps:$4 sm:$0xff]  }
 0x233   :  { %21785 = vst [vmem:[#allocation67_spill] sm:$0xff] %v18629_v34  ;;  %v18640_v33 = vcombine.high %v21786_v52, %v18608_v12  ;;  %v9592_v53 = vpop.f32.mrf.mxu0  ;;  %v14021_v57 = vld [vmem:[%s21046_s1 + $0x11a0] ss:$8 sps:$4 sm:$0xff]  }
 0x234   :  { %v9705_v2 = vpop.f32.mrf.mxu1  ;;  %10269 = vmatmul.mubr.bf16.gmra.mxu0 %v21788_v1  ;;  %10382 = vmatmul.mubr.bf16.gmra.mxu1 %v21789_v5  ;;  %v18648_v50 = vadd.f32 %v9701_v7, %v9589_v6  ;;  %v9593_v43 = vadd.f32 %v9592_v53, %v18259_v22  ;;  %v14028_v5 = vld [vmem:[%s21046_s1 + $0x1094] ss:$8 sps:$4 sm:$0xff]  }
 0x235   :  { %21787 = vst [vmem:[#allocation69_spill] sm:$0xff] %v18640_v33  ;;  %10427 = vmatpush2.bf16.msra.mxu0 %v14012_v45  ;;  %10540 = vmatpush2.bf16.msra.mxu1 %v14015_v32  ;;  %v9594_v1 = vpop.f32.mrf.mxu0  ;;  %v14031_v53 = vld [vmem:[%s21046_s1 + $0x1194] ss:$8 sps:$4 sm:$0xff]  }
 0x236   :  { %v9707_v51 = vpop.f32.mrf.mxu1  ;;  %10428 = vmatprep.subr.bf16.mxu0 %v14020_v60  ;;  %10541 = vmatprep.subr.bf16.mxu1 %v14023_v36  ;;  %v18663_v22 = vadd.f32 %v9705_v2, %v9593_v43  ;;  %v9595_v32 = vadd.f32 %v9594_v1, %v18278_v17  ;;  %v18669_v60 = vcombine.low %v21786_v52, %v18608_v12  ;;  %v14026_v2 = vld [vmem:[%s21046_s1 + $0x1090] ss:$8 sps:$4 sm:$0xff]  }
 0x237   :  { %10278 = vmatprep.mubr.bf16.mxu0 %v18640_v33  ;;  %10391 = vmatprep.mubr.bf16.mxu1 %v12279_v18  ;;  %v9596_v45 = vpop.f32.mrf.mxu0  ;;  %v12278_v36 = vcombine.low %v18575_v61, %v18604_v26  ;;  %v14029_v1 = vld [vmem:[%s21046_s1 + $0x1190] ss:$8 sps:$4 sm:$0xff]  }
 0x238   :  { %v9709_v7 = vpop.f32.mrf.mxu1  ;;  %21790 = vst [vmem:[#allocation128_spill] sm:$0xff] %v18669_v60  ;;  %v18673_v6 = vadd.f32 %v9707_v51, %v9595_v32  ;;  %v9597_v14 = vadd.f32 %v9596_v45, %v18287_v15  ;;  %v14034_v51 = vld [vmem:[%s21046_s1 + $0x1084] ss:$8 sps:$4 sm:$0xff]   ;;  %v14040_v45 = vld [vmem:[%s21046_s1 + $0x1274] ss:$8 sps:$4 sm:$0xff]  }
 0x239   :  { %10429 = vmatpush2.bf16.msra.mxu0 %v14018_v58  ;;  %10542 = vmatpush2.bf16.msra.mxu1 %v14021_v57  ;;  %v9598_v17 = vpop.f32.mrf.mxu0  ;;  %v14037_v15 = vld [vmem:[%s21046_s1 + $0x1184] ss:$8 sps:$4 sm:$0xff]  }
 0x23a   :  { %v9711_v18 = vpop.f32.mrf.mxu1  ;;  %10430 = vmatprep.subr.bf16.mxu0 %v14028_v5  ;;  %10543 = vmatprep.subr.bf16.mxu1 %v14031_v53  ;;  %v18688_v61 = vadd.f32 %v9709_v7, %v9597_v14  ;;  %v9599_v52 = vadd.f32 %v9598_v17, %v18298_v39  ;;  %v14032_v53 = vld [vmem:[%s21046_s1 + $0x1080] ss:$8 sps:$4 sm:$0xff]  }
 0x23b   :  { %v9602_v43 = vpop.f32.mrf.mxu0  ;;  %v14035_v14 = vld [vmem:[%s21046_s1 + $0x1180] ss:$8 sps:$4 sm:$0xff]  }
 0x23c   :  { %v9715_v58 = vpop.f32.mrf.mxu1  ;;  %10279 = vmatmul.mubr.bf16.gmra.mxu0 %v18669_v60  ;;  %10392 = vmatmul.mubr.bf16.gmra.mxu1 %v12278_v36  ;;  %v18692_v57 = vadd.f32 %v9711_v18, %v9599_v52  ;;  %v9603_v5 = vadd.f32 %v9602_v43, %v18307_v55  ;;  %v14043_v55 = vld [vmem:[%s21046_s1 + $0x1374] ss:$8 sps:$4 sm:$0xff]   ;;  %v14038_v52 = vld [vmem:[%s21046_s1 + $0x1270] ss:$8 sps:$4 sm:$0xff]  }
 0x23d   :  { %10431 = vmatpush2.bf16.msra.mxu0 %v14026_v2  ;;  %10544 = vmatpush2.bf16.msra.mxu1 %v14029_v1  ;;  %v9604_v39 = vpop.f32.mrf.mxu0  ;;  %v21791_v2 = vld [vmem:[#allocation13_spill] sm:$0xff]  ;;  %v21792_v1 = vld [vmem:[#allocation68_spill] sm:$0xff] }
 0x23e   :  { %v9717_v32 = vpop.f32.mrf.mxu1  ;;  %10432 = vmatprep.subr.bf16.mxu0 %v14034_v51  ;;  %10545 = vmatprep.subr.bf16.mxu1 %v14037_v15  ;;  %v18707_v7 = vadd.f32 %v9715_v58, %v9603_v5  ;;  %v9605_v36 = vadd.f32 %v9604_v39, %v18318_v0  ;;  %v14041_v0 = vld [vmem:[%s21046_s1 + $0x1370] ss:$8 sps:$4 sm:$0xff]   ;;  %v14046_v5 = vld [vmem:[%s21046_s1 + $0x1264] ss:$8 sps:$4 sm:$0xff]  }
 0x23f   :  { %10434 = vmatprep.mubr.bf16.mxu0 %v21791_v2  ;;  %10547 = vmatprep.mubr.bf16.mxu1 %v21792_v1  ;;  %v9606_v17 = vpop.f32.mrf.mxu0  ;;  %v21794_v2 = vld [vmem:[#allocation71_spill] sm:$0xff]  ;;  %v21796_v1 = vshll.u32 %v18404_v48, 16 }
 0x240   :  { %v9719_v18 = vpop.f32.mrf.mxu1  ;;  %v18712_v51 = vadd.f32 %v9717_v32, %v9605_v36  ;;  %v9607_v15 = vadd.f32 %v9606_v17, %v18327_v41  ;;  %v14049_v41 = vld [vmem:[%s21046_s1 + $0x1364] ss:$8 sps:$4 sm:$0xff]  }
 0x241   :  { %10433 = vmatpush2.bf16.msra.mxu0 %v14032_v53  ;;  %10546 = vmatpush2.bf16.msra.mxu1 %v14035_v14  ;;  %v9608_v43 = vpop.f32.mrf.mxu0  ;;  %v21793_v36 = vld [vmem:[#allocation8_spill] sm:$0xff]  ;;  %v1104_v17 = vrot.slane %v21796_v1, 5 }
 0x242   :  { %v9721_v58 = vpop.f32.mrf.mxu1  ;;  %10628 = vmatprep.subr.bf16.mxu0 %v14040_v45  ;;  %10741 = vmatprep.subr.bf16.mxu1 %v14043_v55  ;;  %v18727_v53 = vadd.f32 %v9719_v18, %v9607_v15  ;;  %v9609_v14 = vadd.f32 %v9608_v43, %v18338_v29  ;;  %v21795_v45 = vshrl.u32 %v18404_v48, 16  ;;  %v14044_v29 = vld [vmem:[%s21046_s1 + $0x1260] ss:$8 sps:$4 sm:$0xff]  }
 0x243   :  { %v9758_v39 = vpop.f32.mrf.mxu0  ;;  %v14047_v18 = vld [vmem:[%s21046_s1 + $0x1360] ss:$8 sps:$4 sm:$0xff]  }
 0x244   :  { %v9871_v32 = vpop.f32.mrf.mxu1  ;;  %10435 = vmatmul.mubr.bf16.vlgmr.msra.gmra.mxu0 %v21793_v36  ;;  %10548 = vmatmul.mubr.bf16.vlgmr.msra.gmra.mxu1 %v21794_v2  ;;  %v1101_v55 = vrot.slane %v21795_v45, 4  ;;  %v18736_v60 = vadd.f32 %v9721_v58, %v9609_v14  ;;  %v9759_v33 = vadd.f32 %v9758_v39, %v18347_v27  ;;  %v18748_v15 = vld [vmem:[%s21045_s0 + $0xa8] sm:$0x33]  ;;  %v14052_v27 = vld [vmem:[%s21046_s1 + $0x1254] ss:$8 sps:$4 sm:$0xff]   ;;  %v21797_v39 = vld [vmem:[#allocation19_spill] sm:$0xff] }
 0x245   :  { %10629 = vmatpush1.bf16.msra.mxu0 %v14038_v52  ;;  %10742 = vmatpush1.bf16.msra.mxu1 %v14041_v0  ;;  %v9760_v43 = vpop.f32.mrf.mxu0  ;;  %v14055_v52 = vld [vmem:[%s21046_s1 + $0x1354] ss:$8 sps:$4 sm:$0xff]   ;;  %v21798_v36 = vld [vmem:[#allocation72_spill] sm:$0xff] }
 0x246   :  { %v9873_v58 = vpop.f32.mrf.mxu1  ;;  %10630 = vmatprep.subr.bf16.mxu0 %v14046_v5  ;;  %10743 = vmatprep.subr.bf16.mxu1 %v14049_v41  ;;  %v18756_v0 = vadd.f32 %v9871_v32, %v9759_v33  ;;  %v9761_v14 = vadd.f32 %v9760_v43, %v18352_v21  ;;  %v1105_v5 = vor.u32 %v1104_v17, %v1101_v55  ;;  %v21359_v41 = vshll.u32 %v18748_v15, 16  ;;  %v14050_v33 = vld [vmem:[%s21046_s1 + $0x1250] ss:$8 sps:$4 sm:$0xff]   ;;  %v14058_v55 = vld [vmem:[%s21046_s1 + $0x1244] ss:$8 sps:$4 sm:$0xff]  }
 0x247   :  { %10444 = vmatprep.mubr.bf16.mxu0 %v21797_v39  ;;  %10557 = vmatprep.mubr.bf16.mxu1 %v21798_v36  ;;  %v9762_v2 = vpop.f32.mrf.mxu0  ;;  %v14053_v21 = vld [vmem:[%s21046_s1 + $0x1350] ss:$8 sps:$4 sm:$0xff]   ;;  %v11890_v36 = vrot.slane %v18404_v48, 9  ;;  %v14064_v48 = vld [vmem:[%s21046_s1 + $0x1234] ss:$8 sps:$4 sm:$0xff]  }
 0x248   :  { %v9875_v45 = vpop.f32.mrf.mxu1  ;;  %v18762_v1 = vadd.f32 %v9873_v58, %v9761_v14  ;;  %v9763_v12 = vadd.f32 %v9762_v2, %v18367_v13  ;;  %v14061_v13 = vld [vmem:[%s21046_s1 + $0x1344] ss:$8 sps:$4 sm:$0xff]   ;;  %v21799_v14 = vld [vmem:[#allocation14_spill] sm:$0xff]  ;;  %v1150_v2 = vrot.slane %v18748_v15, 5 }
 0x249   :  { %10631 = vmatpush1.bf16.msra.mxu0 %v14044_v29  ;;  %10744 = vmatpush1.bf16.msra.mxu1 %v14047_v18  ;;  %v9764_v32 = vpop.f32.mrf.mxu0  ;;  %v21800_v39 = vld [vmem:[#allocation74_spill] sm:$0xff] }
 0x24a   :  { %v9877_v43 = vpop.f32.mrf.mxu1  ;;  %10632 = vmatprep.subr.bf16.mxu0 %v14052_v27  ;;  %10745 = vmatprep.subr.bf16.mxu1 %v14055_v52  ;;  %v18777_v17 = vadd.f32 %v9875_v45, %v9763_v12  ;;  %v9765_v29 = vadd.f32 %v9764_v32, %v18381_v56  ;;  %v1106_v27 = vrot.slane %v1105_v5, 4  ;;  %v1110_v52 = vrot.slane %v21359_v41, 5  ;;  %v14056_v56 = vld [vmem:[%s21046_s1 + $0x1240] ss:$8 sps:$4 sm:$0xff]  }
 0x24b   :  { %v9768_v18 = vpop.f32.mrf.mxu0  ;;  %v14059_v45 = vld [vmem:[%s21046_s1 + $0x1340] ss:$8 sps:$4 sm:$0xff]  }
 0x24c   :  { %v9881_v58 = vpop.f32.mrf.mxu1  ;;  %10445 = vmatmul.mubr.bf16.gmra.mxu0 %v21799_v14  ;;  %10558 = vmatmul.mubr.bf16.gmra.mxu1 %v21800_v39  ;;  %v18786_v34 = vadd.f32 %v9877_v43, %v9765_v29  ;;  %v9769_v12 = vadd.f32 %v9768_v18, %v18396_v10  ;;  %v14067_v10 = vld [vmem:[%s21046_s1 + $0x1334] ss:$8 sps:$4 sm:$0xff]   ;;  %v21801_v43 = vld [vmem:[#allocation20_spill] sm:$0xff]  ;;  %v18812_v39 = vsel %vm15379_vm8, %v11890_v36, %v1150_v2 }
 0x24d   :  { %10633 = vmatpush1.bf16.msra.mxu0 %v14050_v33  ;;  %10746 = vmatpush1.bf16.msra.mxu1 %v14053_v21  ;;  %v9770_v5 = vpop.f32.mrf.mxu0  ;;  %v21802_v29 = vld [vmem:[#allocation125_spill] sm:$0xff]  ;;  %21805 = vst [vmem:[#allocation89_spill] sm:$0xff] %v18812_v39  ;;  %v14070_v36 = vld [vmem:[%s21046_s1 + $0x1224] ss:$8 sps:$4 sm:$0xff]  }
 0x24e   :  { %v9883_v32 = vpop.f32.mrf.mxu1  ;;  %10634 = vmatprep.subr.bf16.mxu0 %v14058_v55  ;;  %10747 = vmatprep.subr.bf16.mxu1 %v14061_v13  ;;  %v18801_v33 = vadd.f32 %v9881_v58, %v9769_v12  ;;  %v9771_v21 = vadd.f32 %v9770_v5, %v18412_v25  ;;  %v18808_v13 = vsel %vm14694_vm2, %v1106_v27, %v1110_v52  ;;  %v14062_v25 = vld [vmem:[%s21046_s1 + $0x1230] ss:$8 sps:$4 sm:$0xff]   ;;  %v14312_v55 = vld [vmem:[%s21046_s1 + $0x16a4] ss:$8 sps:$4 sm:$0xff]  }
 0x24f   :  { %10454 = vmatprep.mubr.bf16.mxu0 %v21801_v43  ;;  %10567 = vmatprep.mubr.bf16.mxu1 %v21802_v29  ;;  %v9772_v18 = vpop.f32.mrf.mxu0  ;;  %21804 = vst [vmem:[#allocation88_spill] sm:$0xff] %v18808_v13  ;;  %v14065_v12 = vld [vmem:[%s21046_s1 + $0x1330] ss:$8 sps:$4 sm:$0xff]   ;;  %v21808_v43 = vld [vmem:[#allocation127_spill] sm:$0xff] }
 0x250   :  { %v9885_v14 = vpop.f32.mrf.mxu1  ;;  %v18814_v41 = vadd.f32 %v9883_v32, %v9771_v21  ;;  %v9773_v58 = vadd.f32 %v9772_v18, %v18435_v30  ;;  %v14073_v30 = vld [vmem:[%s21046_s1 + $0x1324] ss:$8 sps:$4 sm:$0xff]   ;;  %v12083_v32 = vcombine.high %v18024_v20, %v18812_v39  ;;  %v21807_v21 = vld [vmem:[#allocation126_spill] sm:$0xff] }
 0x251   :  { %10635 = vmatpush1.bf16.msra.mxu0 %v14056_v56  ;;  %10748 = vmatpush1.bf16.msra.mxu1 %v14059_v45  ;;  %v9774_v27 = vpop.f32.mrf.mxu0  ;;  %v21806_v45 = vld [vmem:[#allocation47_spill] sm:$0xff] }
 0x252   :  { %v9887_v52 = vpop.f32.mrf.mxu1  ;;  %10636 = vmatprep.subr.bf16.mxu0 %v14064_v48  ;;  %10749 = vmatprep.subr.bf16.mxu1 %v14067_v10  ;;  %v18829_v2 = vadd.f32 %v9885_v14, %v9773_v58  ;;  %v9775_v56 = vadd.f32 %v9774_v27, %v18448_v3  ;;  %v12081_v5 = vcombine.high %v21806_v45, %v18808_v13  ;;  %v14068_v3 = vld [vmem:[%s21046_s1 + $0x1220] ss:$8 sps:$4 sm:$0xff]  }
 0x253   :  { %v14071_v14 = vld [vmem:[%s21046_s1 + $0x1320] ss:$8 sps:$4 sm:$0xff]  }
 0x254   :  { %v9778_v48 = vpop.f32.mrf.mxu0  ;;  %v9891_v10 = vpop.f32.mrf.mxu1  ;;  %10455 = vmatmul.mubr.bf16.gmra.mxu0 %v21807_v21  ;;  %10568 = vmatmul.mubr.bf16.gmra.mxu1 %v21808_v43  ;;  %v18838_v29 = vadd.f32 %v9887_v52, %v9775_v56  ;;  %v14076_v52 = vld [vmem:[%s21046_s1 + $0x1214] ss:$8 sps:$4 sm:$0xff]  }
 0x255   :  { %v9779_v18 = vadd.f32 %v9778_v48, %v18463_v62  ;;  %10637 = vmatpush1.bf16.msra.mxu0 %v14062_v25  ;;  %10750 = vmatpush1.bf16.msra.mxu1 %v14065_v12  ;;  %v14079_v62 = vld [vmem:[%s21046_s1 + $0x1314] ss:$8 sps:$4 sm:$0xff]  }
 0x256   :  { %v9780_v58 = vpop.f32.mrf.mxu0  ;;  %v9893_v27 = vpop.f32.mrf.mxu1  ;;  %10638 = vmatprep.subr.bf16.mxu0 %v14070_v36  ;;  %10751 = vmatprep.subr.bf16.mxu1 %v14073_v30  ;;  %v12080_v36 = vcombine.low %v21806_v45, %v18808_v13  ;;  %v12082_v30 = vcombine.low %v18024_v20, %v18812_v39  ;;  %v14082_v20 = vld [vmem:[%s21046_s1 + $0x1204] ss:$8 sps:$4 sm:$0xff]  }
 0x257   :  { %v18853_v25 = vadd.f32 %v9891_v10, %v9779_v18  ;;  %v9781_v12 = vadd.f32 %v9780_v58, %v18473_v44  ;;  %10464 = vmatprep.mubr.bf16.mxu0 %v12081_v5  ;;  %10577 = vmatprep.mubr.bf16.mxu1 %v12083_v32  ;;  %v14074_v44 = vld [vmem:[%s21046_s1 + $0x1210] ss:$8 sps:$4 sm:$0xff]  }
 0x258   :  { %v9782_v56 = vpop.f32.mrf.mxu0  ;;  %v9895_v48 = vpop.f32.mrf.mxu1  ;;  %v14077_v5 = vld [vmem:[%s21046_s1 + $0x1310] ss:$8 sps:$4 sm:$0xff]  }
 0x259   :  { %v18860_v21 = vadd.f32 %v9893_v27, %v9781_v12  ;;  %v9783_v43 = vadd.f32 %v9782_v56, %v18488_v28  ;;  %10639 = vmatpush1.bf16.msra.mxu0 %v14068_v3  ;;  %10752 = vmatpush1.bf16.msra.mxu1 %v14071_v14  ;;  %v14085_v28 = vld [vmem:[%s21046_s1 + $0x1304] ss:$8 sps:$4 sm:$0xff]   ;;  %v14088_v56 = vld [vmem:[%s21046_s1 + $0x12f4] ss:$8 sps:$4 sm:$0xff]  }
 0x25a   :  { %v9784_v32 = vpop.f32.mrf.mxu0  ;;  %v9897_v10 = vpop.f32.mrf.mxu1  ;;  %10640 = vmatprep.subr.bf16.mxu0 %v14076_v52  ;;  %10753 = vmatprep.subr.bf16.mxu1 %v14079_v62  ;;  %v14080_v52 = vld [vmem:[%s21046_s1 + $0x1200] ss:$8 sps:$4 sm:$0xff]  }
 0x25b   :  { %v18875_v45 = vadd.f32 %v9895_v48, %v9783_v43  ;;  %v9785_v18 = vadd.f32 %v9784_v32, %v18492_v37  ;;  %v14083_v62 = vld [vmem:[%s21046_s1 + $0x1300] ss:$8 sps:$4 sm:$0xff]  }
 0x25c   :  { %v9788_v3 = vpop.f32.mrf.mxu0  ;;  %v9901_v14 = vpop.f32.mrf.mxu1  ;;  %10465 = vmatmul.mubr.bf16.gmra.mxu0 %v12080_v36  ;;  %10578 = vmatmul.mubr.bf16.gmra.mxu1 %v12082_v30  ;;  %v21809_v30 = vld [vmem:[#allocation27_spill] sm:$0xff]  ;;  %v21810_v43 = vld [vmem:[#allocation80_spill] sm:$0xff] }
 0x25d   :  { %v18878_v58 = vadd.f32 %v9897_v10, %v9785_v18  ;;  %v9789_v27 = vadd.f32 %v9788_v3, %v18507_v42  ;;  %10641 = vmatpush1.bf16.msra.mxu0 %v14074_v44  ;;  %10754 = vmatpush1.bf16.msra.mxu1 %v14077_v5  ;;  %v14091_v42 = vld [vmem:[%s21046_s1 + $0x13f4] ss:$8 sps:$4 sm:$0xff]   ;;  %v14094_v3 = vld [vmem:[%s21046_s1 + $0x12e4] ss:$8 sps:$4 sm:$0xff]  }
 0x25e   :  { %v9790_v12 = vpop.f32.mrf.mxu0  ;;  %v9903_v37 = vpop.f32.mrf.mxu1  ;;  %10642 = vmatprep.subr.bf16.mxu0 %v14082_v20  ;;  %10755 = vmatprep.subr.bf16.mxu1 %v14085_v28  ;;  %v14086_v20 = vld [vmem:[%s21046_s1 + $0x12f0] ss:$8 sps:$4 sm:$0xff]  }
 0x25f   :  { %v18893_v48 = vadd.f32 %v9901_v14, %v9789_v27  ;;  %v9791_v36 = vadd.f32 %v9790_v12, %v18512_v40  ;;  %10474 = vmatprep.mubr.bf16.mxu0 %v21809_v30  ;;  %10587 = vmatprep.mubr.bf16.mxu1 %v21810_v43  ;;  %v14089_v40 = vld [vmem:[%s21046_s1 + $0x13f0] ss:$8 sps:$4 sm:$0xff]  }
 0x260   :  { %v9792_v44 = vpop.f32.mrf.mxu0  ;;  %v9905_v5 = vpop.f32.mrf.mxu1  ;;  %v21811_v12 = vld [vmem:[#allocation26_spill] sm:$0xff] }
 0x261   :  { %v18898_v32 = vadd.f32 %v9903_v37, %v9791_v36  ;;  %v9793_v10 = vadd.f32 %v9792_v44, %v18527_v47  ;;  %10643 = vmatpush1.bf16.msra.mxu0 %v14080_v52  ;;  %10756 = vmatpush1.bf16.msra.mxu1 %v14083_v62  ;;  %v14097_v47 = vld [vmem:[%s21046_s1 + $0x13e4] ss:$8 sps:$4 sm:$0xff]   ;;  %v21812_v37 = vld [vmem:[#allocation81_spill] sm:$0xff]  ;;  %v21814_v36 = vshll.u32 %v18604_v26, 16 }
 0x262   :  { %v9794_v28 = vpop.f32.mrf.mxu0  ;;  %v9907_v18 = vpop.f32.mrf.mxu1  ;;  %10644 = vmatprep.subr.bf16.mxu0 %v14088_v56  ;;  %10757 = vmatprep.subr.bf16.mxu1 %v14091_v42  ;;  %v21813_v56 = vshrl.u32 %v18604_v26, 16 }
 0x263   :  { %v18913_v14 = vadd.f32 %v9905_v5, %v9793_v10  ;;  %v9795_v27 = vadd.f32 %v9794_v28, %v18532_v49  ;;  %v1118_v30 = vrot.slane %v21814_v36, 5  ;;  %v14092_v49 = vld [vmem:[%s21046_s1 + $0x12e0] ss:$8 sps:$4 sm:$0xff]  }
 0x264   :  { %v9798_v52 = vpop.f32.mrf.mxu0  ;;  %v9911_v62 = vpop.f32.mrf.mxu1  ;;  %10475 = vmatmul.mubr.bf16.gmra.mxu0 %v21811_v12  ;;  %10588 = vmatmul.mubr.bf16.gmra.mxu1 %v21812_v37  ;;  %v1115_v42 = vrot.slane %v21813_v56, 4  ;;  %v14095_v5 = vld [vmem:[%s21046_s1 + $0x13e0] ss:$8 sps:$4 sm:$0xff]  }
 0x265   :  { %v18922_v43 = vadd.f32 %v9907_v18, %v9795_v27  ;;  %v9799_v44 = vadd.f32 %v9798_v52, %v18547_v11  ;;  %10645 = vmatpush2.bf16.msra.mxu0 %v14086_v20  ;;  %10758 = vmatpush2.bf16.msra.mxu1 %v14089_v40  ;;  %v18934_v10 = vld [vmem:[%s21045_s0 + $0x168] sm:$0x33]  ;;  %v14100_v11 = vld [vmem:[%s21046_s1 + $0x12d4] ss:$8 sps:$4 sm:$0xff]  }
 0x266   :  { %v9800_v28 = vpop.f32.mrf.mxu0  ;;  %v9913_v18 = vpop.f32.mrf.mxu1  ;;  %10646 = vmatprep.subr.bf16.mxu0 %v14094_v3  ;;  %10759 = vmatprep.subr.bf16.mxu1 %v14097_v47  ;;  %v14103_v20 = vld [vmem:[%s21046_s1 + $0x13d4] ss:$8 sps:$4 sm:$0xff]   ;;  %v21815_v52 = vld [vmem:[#allocation28_spill] sm:$0xff]  ;;  %v1119_v3 = vor.u32 %v1118_v30, %v1115_v42  ;;  %v21364_v47 = vshll.u32 %v18934_v10, 16 }
 0x267   :  { %v18942_v40 = vadd.f32 %v9911_v62, %v9799_v44  ;;  %v9801_v27 = vadd.f32 %v9800_v28, %v18552_v31  ;;  %10484 = vmatprep.mubr.bf16.mxu0 %v21815_v52  ;;  %v21816_v12 = vld [vmem:[#allocation84_spill] sm:$0xff]  ;;  %v14098_v62 = vld [vmem:[%s21046_s1 + $0x12d0] ss:$8 sps:$4 sm:$0xff]  }
 0x268   :  { %10597 = vmatprep.mubr.bf16.mxu1 %v21816_v12  ;;  %v9802_v37 = vpop.f32.mrf.mxu0  ;;  %v9915_v56 = vpop.f32.mrf.mxu1  ;;  %v14101_v31 = vld [vmem:[%s21046_s1 + $0x13d0] ss:$8 sps:$4 sm:$0xff]   ;;  %v14106_v42 = vld [vmem:[%s21046_s1 + $0x12c4] ss:$8 sps:$4 sm:$0xff]   ;;  %v11891_v12 = vrot.slane %v18604_v26, 9 }
 0x269   :  { %v18948_v36 = vadd.f32 %v9913_v18, %v9801_v27  ;;  %v9803_v39 = vadd.f32 %v9802_v37, %v18567_v19  ;;  %10647 = vmatpush2.bf16.msra.mxu0 %v14092_v49  ;;  %10760 = vmatpush2.bf16.msra.mxu1 %v14095_v5  ;;  %v14109_v19 = vld [vmem:[%s21046_s1 + $0x13c4] ss:$8 sps:$4 sm:$0xff]   ;;  %v21818_v52 = vld [vmem:[#allocation85_spill] sm:$0xff]  ;;  %v1154_v37 = vrot.slane %v18934_v10, 5 }
 0x26a   :  { %v9804_v44 = vpop.f32.mrf.mxu0  ;;  %v9917_v28 = vpop.f32.mrf.mxu1  ;;  %10648 = vmatprep.subr.bf16.mxu0 %v14100_v11  ;;  %10761 = vmatprep.subr.bf16.mxu1 %v14103_v20  ;;  %v21817_v27 = vld [vmem:[#allocation40_spill] sm:$0xff]  ;;  %v1120_v11 = vrot.slane %v1119_v3, 4  ;;  %v1124_v20 = vrot.slane %v21364_v47, 5  ;;  %v14112_v26 = vld [vmem:[%s21046_s1 + $0x12b4] ss:$8 sps:$4 sm:$0xff]  }
 0x26b   :  { %v18963_v30 = vadd.f32 %v9915_v56, %v9803_v39  ;;  %v9805_v49 = vadd.f32 %v9804_v44, %v18581_v54  ;;  %v14104_v54 = vld [vmem:[%s21046_s1 + $0x12c0] ss:$8 sps:$4 sm:$0xff]  }
 0x26c   :  { %v9808_v5 = vpop.f32.mrf.mxu0  ;;  %v9921_v18 = vpop.f32.mrf.mxu1  ;;  %10485 = vmatmul.mubr.bf16.gmra.mxu0 %v21817_v27  ;;  %10598 = vmatmul.mubr.bf16.gmra.mxu1 %v21818_v52  ;;  %v14107_v56 = vld [vmem:[%s21046_s1 + $0x13c0] ss:$8 sps:$4 sm:$0xff]  }
 0x26d   :  { %v18972_v13 = vadd.f32 %v9917_v28, %v9805_v49  ;;  %v9809_v39 = vadd.f32 %v9808_v5, %v18596_v35  ;;  %10649 = vmatpush2.bf16.msra.mxu0 %v14098_v62  ;;  %10762 = vmatpush2.bf16.msra.mxu1 %v14101_v31  ;;  %v14115_v35 = vld [vmem:[%s21046_s1 + $0x13b4] ss:$8 sps:$4 sm:$0xff]   ;;  %v21840_v47 = vld [vmem:[#allocation140_spill] sm:$0xff] }
 0x26e   :  { %v9810_v3 = vpop.f32.mrf.mxu0  ;;  %v9923_v44 = vpop.f32.mrf.mxu1  ;;  %10650 = vmatprep.subr.bf16.mxu0 %v14106_v42  ;;  %10763 = vmatprep.subr.bf16.mxu1 %v14109_v19  ;;  %v21819_v28 = vld [vmem:[#allocation41_spill] sm:$0xff]  ;;  %v18994_v42 = vsel %vm14694_vm2, %v1120_v11, %v1124_v20  ;;  %v18998_v19 = vsel %vm15379_vm8, %v11891_v12, %v1154_v37  ;;  %v14118_v12 = vld [vmem:[%s21046_s1 + $0x12a4] ss:$8 sps:$4 sm:$0xff]  }
 0x26f   :  { %v18987_v62 = vadd.f32 %v9921_v18, %v9809_v39  ;;  %v9811_v31 = vadd.f32 %v9810_v3, %v18612_v59  ;;  %10494 = vmatprep.mubr.bf16.mxu0 %v21819_v28  ;;  %v21820_v49 = vld [vmem:[#allocation129_spill] sm:$0xff]  ;;  %21821 = vst [vmem:[#allocation90_spill] sm:$0xff] %v18998_v19  ;;  %v21824_v28 = vld [vmem:[#allocation131_spill] sm:$0xff] }
 0x270   :  { %10607 = vmatprep.mubr.bf16.mxu1 %v21820_v49  ;;  %v9812_v5 = vpop.f32.mrf.mxu0  ;;  %v9925_v27 = vpop.f32.mrf.mxu1  ;;  %v14110_v59 = vld [vmem:[%s21046_s1 + $0x12b0] ss:$8 sps:$4 sm:$0xff]  }
 0x271   :  { %v19000_v52 = vadd.f32 %v9923_v44, %v9811_v31  ;;  %v9813_v18 = vadd.f32 %v9812_v5, %v18635_v23  ;;  %10651 = vmatpush2.bf16.msra.mxu0 %v14104_v54  ;;  %10764 = vmatpush2.bf16.msra.mxu1 %v14107_v56  ;;  %v14113_v39 = vld [vmem:[%s21046_s1 + $0x13b0] ss:$8 sps:$4 sm:$0xff]   ;;  %v14121_v23 = vld [vmem:[%s21046_s1 + $0x13a4] ss:$8 sps:$4 sm:$0xff]   ;;  %v12283_v44 = vcombine.high %v18216_v38, %v18998_v19 }
 0x272   :  { %v9814_v11 = vpop.f32.mrf.mxu0  ;;  %v9927_v20 = vpop.f32.mrf.mxu1  ;;  %10652 = vmatprep.subr.bf16.mxu0 %v14112_v26  ;;  %10765 = vmatprep.subr.bf16.mxu1 %v14115_v35  ;;  %v21822_v56 = vld [vmem:[#allocation11_spill] sm:$0xff]  ;;  %v21823_v31 = vld [vmem:[#allocation130_spill] sm:$0xff] }
 0x273   :  { %v19015_v37 = vadd.f32 %v9925_v27, %v9813_v18  ;;  %v9815_v54 = vadd.f32 %v9814_v11, %v18648_v50  ;;  %v12281_v3 = vcombine.high %v21822_v56, %v18994_v42  ;;  %v14116_v50 = vld [vmem:[%s21046_s1 + $0x12a0] ss:$8 sps:$4 sm:$0xff]  }
 0x274   :  { %v9818_v26 = vpop.f32.mrf.mxu0  ;;  %v9931_v35 = vpop.f32.mrf.mxu1  ;;  %10495 = vmatmul.mubr.bf16.gmra.mxu0 %v21823_v31  ;;  %10608 = vmatmul.mubr.bf16.gmra.mxu1 %v21824_v28  ;;  %v14119_v27 = vld [vmem:[%s21046_s1 + $0x13a0] ss:$8 sps:$4 sm:$0xff]  }
 0x275   :  { %v19024_v49 = vadd.f32 %v9927_v20, %v9815_v54  ;;  %v9819_v5 = vadd.f32 %v9818_v26, %v18663_v22  ;;  %10653 = vmatpush2.bf16.msra.mxu0 %v14110_v59  ;;  %10766 = vmatpush2.bf16.msra.mxu1 %v14113_v39  ;;  %v14124_v20 = vld [vmem:[%s21046_s1 + $0x1294] ss:$8 sps:$4 sm:$0xff]  }
 0x276   :  { %v9820_v18 = vpop.f32.mrf.mxu0  ;;  %v9933_v11 = vpop.f32.mrf.mxu1  ;;  %10654 = vmatprep.subr.bf16.mxu0 %v14118_v12  ;;  %10767 = vmatprep.subr.bf16.mxu1 %v14121_v23  ;;  %v14127_v22 = vld [vmem:[%s21046_s1 + $0x1394] ss:$8 sps:$4 sm:$0xff]   ;;  %v12280_v12 = vcombine.low %v21822_v56, %v18994_v42  ;;  %v12282_v23 = vcombine.low %v18216_v38, %v18998_v19  ;;  %v14130_v38 = vld [vmem:[%s21046_s1 + $0x1284] ss:$8 sps:$4 sm:$0xff]  }
 0x277   :  { %v19039_v59 = vadd.f32 %v9931_v35, %v9819_v5  ;;  %v9821_v39 = vadd.f32 %v9820_v18, %v18673_v6  ;;  %10504 = vmatprep.mubr.bf16.mxu0 %v12281_v3  ;;  %10617 = vmatprep.mubr.bf16.mxu1 %v12283_v44  ;;  %v14122_v6 = vld [vmem:[%s21046_s1 + $0x1290] ss:$8 sps:$4 sm:$0xff]  }
 0x278   :  { %v9822_v54 = vpop.f32.mrf.mxu0  ;;  %v9935_v26 = vpop.f32.mrf.mxu1  ;;  %v14125_v3 = vld [vmem:[%s21046_s1 + $0x1390] ss:$8 sps:$4 sm:$0xff]  }
 0x279   :  { %v19046_v31 = vadd.f32 %v9933_v11, %v9821_v39  ;;  %v9823_v28 = vadd.f32 %v9822_v54, %v18688_v61  ;;  %10655 = vmatpush2.bf16.msra.mxu0 %v14116_v50  ;;  %10768 = vmatpush2.bf16.msra.mxu1 %v14119_v27  ;;  %v14133_v61 = vld [vmem:[%s21046_s1 + $0x1384] ss:$8 sps:$4 sm:$0xff]   ;;  %v14136_v54 = vld [vmem:[%s21046_s1 + $0x1474] ss:$8 sps:$4 sm:$0xff]  }
 0x27a   :  { %v9824_v44 = vpop.f32.mrf.mxu0  ;;  %v9937_v35 = vpop.f32.mrf.mxu1  ;;  %10656 = vmatprep.subr.bf16.mxu0 %v14124_v20  ;;  %10769 = vmatprep.subr.bf16.mxu1 %v14127_v22  ;;  %v14128_v20 = vld [vmem:[%s21046_s1 + $0x1280] ss:$8 sps:$4 sm:$0xff]  }
 0x27b   :  { %v19061_v56 = vadd.f32 %v9935_v26, %v9823_v28  ;;  %v9825_v5 = vadd.f32 %v9824_v44, %v18692_v57  ;;  %v14131_v22 = vld [vmem:[%s21046_s1 + $0x1380] ss:$8 sps:$4 sm:$0xff]  }
 0x27c   :  { %v9828_v50 = vpop.f32.mrf.mxu0  ;;  %v9941_v27 = vpop.f32.mrf.mxu1  ;;  %10505 = vmatmul.mubr.bf16.gmra.mxu0 %v12280_v12  ;;  %10618 = vmatmul.mubr.bf16.gmra.mxu1 %v12282_v23  ;;  %v21825_v23 = vld [vmem:[#allocation51_spill] sm:$0xff]  ;;  %v21826_v28 = vld [vmem:[#allocation92_spill] sm:$0xff] }
 0x27d   :  { %v19064_v18 = vadd.f32 %v9937_v35, %v9825_v5  ;;  %v9829_v11 = vadd.f32 %v9828_v50, %v18707_v7  ;;  %10657 = vmatpush2.bf16.msra.mxu0 %v14122_v6  ;;  %10770 = vmatpush2.bf16.msra.mxu1 %v14125_v3  ;;  %v14139_v7 = vld [vmem:[%s21046_s1 + $0x1574] ss:$8 sps:$4 sm:$0xff]   ;;  %v14142_v50 = vld [vmem:[%s21046_s1 + $0x1464] ss:$8 sps:$4 sm:$0xff]  }
 0x27e   :  { %v9830_v39 = vpop.f32.mrf.mxu0  ;;  %v9943_v57 = vpop.f32.mrf.mxu1  ;;  %10658 = vmatprep.subr.bf16.mxu0 %v14130_v38  ;;  %10771 = vmatprep.subr.bf16.mxu1 %v14133_v61  ;;  %v14134_v38 = vld [vmem:[%s21046_s1 + $0x1470] ss:$8 sps:$4 sm:$0xff]  }
 0x27f   :  { %v19079_v26 = vadd.f32 %v9941_v27, %v9829_v11  ;;  %v9831_v12 = vadd.f32 %v9830_v39, %v18712_v51  ;;  %10660 = vmatprep.mubr.bf16.mxu0 %v21825_v23  ;;  %10773 = vmatprep.mubr.bf16.mxu1 %v21826_v28  ;;  %v14137_v51 = vld [vmem:[%s21046_s1 + $0x1570] ss:$8 sps:$4 sm:$0xff]   ;;  %v14140_v23 = vld [vmem:[%s21046_s1 + $0x1460] ss:$8 sps:$4 sm:$0xff]  }
 0x280   :  { %v9832_v6 = vpop.f32.mrf.mxu0  ;;  %v9945_v3 = vpop.f32.mrf.mxu1  ;;  %v21827_v39 = vld [vmem:[#allocation133_spill] sm:$0xff] }
 0x281   :  { %v19084_v44 = vadd.f32 %v9943_v57, %v9831_v12  ;;  %v9833_v35 = vadd.f32 %v9832_v6, %v18727_v53  ;;  %10659 = vmatpush2.bf16.msra.mxu0 %v14128_v20  ;;  %10772 = vmatpush2.bf16.msra.mxu1 %v14131_v22  ;;  %v14145_v53 = vld [vmem:[%s21046_s1 + $0x1564] ss:$8 sps:$4 sm:$0xff]   ;;  %v21828_v57 = vld [vmem:[#allocation93_spill] sm:$0xff] }
 0x282   :  { %v9834_v61 = vpop.f32.mrf.mxu0  ;;  %v9947_v5 = vpop.f32.mrf.mxu1  ;;  %10854 = vmatprep.subr.bf16.mxu0 %v14136_v54  ;;  %10967 = vmatprep.subr.bf16.mxu1 %v14139_v7  ;;  %v1178_v54 = vshrl.u32 %v18748_v15, 16 }
 0x283   :  { %v19099_v27 = vadd.f32 %v9945_v3, %v9833_v35  ;;  %v9835_v11 = vadd.f32 %v9834_v61, %v18736_v60  ;;  %v14143_v60 = vld [vmem:[%s21046_s1 + $0x1560] ss:$8 sps:$4 sm:$0xff]   ;;  %v14148_v3 = vld [vmem:[%s21046_s1 + $0x1454] ss:$8 sps:$4 sm:$0xff]  }
 0x284   :  { %v9984_v20 = vpop.f32.mrf.mxu0  ;;  %v10097_v22 = vpop.f32.mrf.mxu1  ;;  %10661 = vmatmul.mubr.bf16.vlgmr.msra.gmra.mxu0 %v21827_v39  ;;  %10774 = vmatmul.mubr.bf16.vlgmr.msra.gmra.mxu1 %v21828_v57  ;;  %v21830_v61 = vld [vmem:[#allocation98_spill] sm:$0xff] }
 0x285   :  { %v19105_v7 = vadd.f32 %v9947_v5, %v9835_v11  ;;  %v9985_v12 = vadd.f32 %v9984_v20, %v18756_v0  ;;  %10855 = vmatpush1.bf16.msra.mxu0 %v14134_v38  ;;  %10968 = vmatpush1.bf16.msra.mxu1 %v14137_v51  ;;  %v14151_v0 = vld [vmem:[%s21046_s1 + $0x1554] ss:$8 sps:$4 sm:$0xff]   ;;  %v21829_v51 = vld [vmem:[#allocation52_spill] sm:$0xff] }
 0x286   :  { %v9986_v28 = vpop.f32.mrf.mxu0  ;;  %v10099_v6 = vpop.f32.mrf.mxu1  ;;  %10856 = vmatprep.subr.bf16.mxu0 %v14142_v50  ;;  %10969 = vmatprep.subr.bf16.mxu1 %v14145_v53  ;;  %v1180_v50 = vrot.slane %v1178_v54, 5  ;;  %v21831_v53 = vshll.u32 %v18748_v15, 16  ;;  %v14154_v54 = vld [vmem:[%s21046_s1 + $0x1444] ss:$8 sps:$4 sm:$0xff]  }
 0x287   :  { %v19120_v35 = vadd.f32 %v10097_v22, %v9985_v12  ;;  %v9987_v38 = vadd.f32 %v9986_v28, %v18762_v1  ;;  %10670 = vmatprep.mubr.bf16.mxu0 %v21829_v51  ;;  %10783 = vmatprep.mubr.bf16.mxu1 %v21830_v61  ;;  %v14146_v1 = vld [vmem:[%s21046_s1 + $0x1450] ss:$8 sps:$4 sm:$0xff]   ;;  %v21833_v61 = vld [vmem:[#allocation99_spill] sm:$0xff] }
 0x288   :  { %v9988_v5 = vpop.f32.mrf.mxu0  ;;  %v10101_v11 = vpop.f32.mrf.mxu1  ;;  %v1181_v20 = vrot.slane %v21831_v53, 6  ;;  %v14149_v22 = vld [vmem:[%s21046_s1 + $0x1550] ss:$8 sps:$4 sm:$0xff]   ;;  %v19153_v53 = vld [vmem:[%s21045_s0 + $0xa0] sm:$0xff] }
 0x289   :  { %v19127_v39 = vadd.f32 %v10099_v6, %v9987_v38  ;;  %v9989_v57 = vadd.f32 %v9988_v5, %v18777_v17  ;;  %10857 = vmatpush1.bf16.msra.mxu0 %v14140_v23  ;;  %10970 = vmatpush1.bf16.msra.mxu1 %v14143_v60  ;;  %v14157_v17 = vld [vmem:[%s21046_s1 + $0x1544] ss:$8 sps:$4 sm:$0xff]   ;;  %v21832_v51 = vld [vmem:[#allocation137_spill] sm:$0xff] }
 0x28a   :  { %v9990_v12 = vpop.f32.mrf.mxu0  ;;  %v10103_v28 = vpop.f32.mrf.mxu1  ;;  %10858 = vmatprep.subr.bf16.mxu0 %v14148_v3  ;;  %10971 = vmatprep.subr.bf16.mxu1 %v14151_v0  ;;  %v21834_v3 = vor.u32 %v18433_v9, %v18429_v4  ;;  %v1182_v5 = vor.u32 %v1181_v20, %v1180_v50  ;;  %v14152_v4 = vld [vmem:[%s21046_s1 + $0x1440] ss:$8 sps:$4 sm:$0xff]   ;;  %v19169_v50 = vld [vmem:[%s21045_s0 + $0xb0] sm:$0xff] }
 0x28b   :  { %v19142_v23 = vadd.f32 %v10101_v11, %v9989_v57  ;;  %v9991_v60 = vadd.f32 %v9990_v12, %v18786_v34  ;;  %v11892_v11 = vrot.slane %v19153_v53, 10  ;;  %v1214_v34 = vrot.slane %v18748_v15, 6  ;;  %v14155_v9 = vld [vmem:[%s21046_s1 + $0x1540] ss:$8 sps:$4 sm:$0xff]  }
 0x28c   :  { %v9994_v6 = vpop.f32.mrf.mxu0  ;;  %v10107_v38 = vpop.f32.mrf.mxu1  ;;  %10671 = vmatmul.mubr.bf16.gmra.mxu0 %v21832_v51  ;;  %10784 = vmatmul.mubr.bf16.gmra.mxu1 %v21833_v61  ;;  %v1177_v0 = vrot.slane %v21834_v3, 4  ;;  %v21365_v3 = vshrl.u32 %v19169_v50, 16 }
 0x28d   :  { %v19157_v57 = vadd.f32 %v10103_v28, %v9991_v60  ;;  %v9995_v12 = vadd.f32 %v9994_v6, %v18801_v33  ;;  %10859 = vmatpush1.bf16.msra.mxu0 %v14146_v1  ;;  %10972 = vmatpush1.bf16.msra.mxu1 %v14149_v22  ;;  %v14160_v33 = vld [vmem:[%s21046_s1 + $0x1434] ss:$8 sps:$4 sm:$0xff]   ;;  %v21835_v60 = vld [vmem:[#allocation139_spill] sm:$0xff] }
 0x28e   :  { %v9996_v15 = vpop.f32.mrf.mxu0  ;;  %v10109_v20 = vpop.f32.mrf.mxu1  ;;  %10860 = vmatprep.subr.bf16.mxu0 %v14154_v54  ;;  %10973 = vmatprep.subr.bf16.mxu1 %v14157_v17  ;;  %v14163_v1 = vld [vmem:[%s21046_s1 + $0x1534] ss:$8 sps:$4 sm:$0xff]   ;;  %v19184_v54 = vsel %vm15091_vm5, %v1177_v0, %v1182_v5  ;;  %v19188_v17 = vsel %vm15929_vm11, %v11892_v11, %v1214_v34  ;;  %v14161_v0 = vld [vmem:[%s21046_s1 + $0x1530] ss:$8 sps:$4 sm:$0xff]   ;;  %v14166_v34 = vld [vmem:[%s21046_s1 + $0x1424] ss:$8 sps:$4 sm:$0xff]  }
 0x28f   :  { %v19177_v22 = vadd.f32 %v10107_v38, %v9995_v12  ;;  %v9997_v28 = vadd.f32 %v9996_v15, %v18814_v41  ;;  %10680 = vmatprep.mubr.bf16.mxu0 %v21835_v60  ;;  %v21836_v6 = vld [vmem:[#allocation138_spill] sm:$0xff]  ;;  %21837 = vst [vmem:[#allocation91_spill] sm:$0xff] %v19184_v54  ;;  %21838 = vst [vmem:[#allocation95_spill] sm:$0xff] %v19188_v17  ;;  %v21366_v38 = vshll.u32 %v19169_v50, 16 }
 0x290   :  { %10793 = vmatprep.mubr.bf16.mxu1 %v21836_v6  ;;  %v9998_v51 = vpop.f32.mrf.mxu0  ;;  %v10111_v61 = vpop.f32.mrf.mxu1  ;;  %v14158_v15 = vld [vmem:[%s21046_s1 + $0x1430] ss:$8 sps:$4 sm:$0xff]  }
 0x291   :  { %v19192_v12 = vadd.f32 %v10109_v20, %v9997_v28  ;;  %v9999_v41 = vadd.f32 %v9998_v51, %v18829_v2  ;;  %10861 = vmatpush1.bf16.msra.mxu0 %v14152_v4  ;;  %10974 = vmatpush1.bf16.msra.mxu1 %v14155_v9  ;;  %v14169_v2 = vld [vmem:[%s21046_s1 + $0x1524] ss:$8 sps:$4 sm:$0xff]   ;;  %v19209_v4 = vrot.slane %v21365_v3, 5  ;;  %v19213_v9 = vrot.slane %v21366_v38, 6  ;;  %v21839_v28 = vld [vmem:[#allocation42_spill] sm:$0xff]  ;;  %v21841_v3 = vld [vmem:[#allocation141_spill] sm:$0xff] }
 0x292   :  { %v10000_v5 = vpop.f32.mrf.mxu0  ;;  %v10113_v11 = vpop.f32.mrf.mxu1  ;;  %10862 = vmatprep.subr.bf16.mxu0 %v14160_v33  ;;  %10975 = vmatprep.subr.bf16.mxu1 %v14163_v1  ;;  %v12085_v1 = vcombine.high %v18028_v46, %v19184_v54  ;;  %v12087_v60 = vcombine.high %v21839_v28, %v19188_v17 }
 0x293   :  { %v19215_v20 = vadd.f32 %v10111_v61, %v9999_v41  ;;  %v10001_v33 = vadd.f32 %v10000_v5, %v18838_v29  ;;  %v14164_v29 = vld [vmem:[%s21046_s1 + $0x1420] ss:$8 sps:$4 sm:$0xff]  }
 0x294   :  { %v10004_v6 = vpop.f32.mrf.mxu0  ;;  %v10117_v51 = vpop.f32.mrf.mxu1  ;;  %10681 = vmatmul.mubr.bf16.gmra.mxu0 %v21840_v47  ;;  %10794 = vmatmul.mubr.bf16.gmra.mxu1 %v21841_v3  ;;  %v14167_v41 = vld [vmem:[%s21046_s1 + $0x1520] ss:$8 sps:$4 sm:$0xff]   ;;  %v14172_v3 = vld [vmem:[%s21046_s1 + $0x1414] ss:$8 sps:$4 sm:$0xff]  }
 0x295   :  { %v19226_v19 = vadd.f32 %v10113_v11, %v10001_v33  ;;  %v10005_v61 = vadd.f32 %v10004_v6, %v18853_v25  ;;  %10863 = vmatpush1.bf16.msra.mxu0 %v14158_v15  ;;  %10976 = vmatpush1.bf16.msra.mxu1 %v14161_v0  ;;  %v14175_v25 = vld [vmem:[%s21046_s1 + $0x1514] ss:$8 sps:$4 sm:$0xff]  }
 0x296   :  { %v10006_v47 = vpop.f32.mrf.mxu0  ;;  %v10119_v5 = vpop.f32.mrf.mxu1  ;;  %10864 = vmatprep.subr.bf16.mxu0 %v14166_v34  ;;  %10977 = vmatprep.subr.bf16.mxu1 %v14169_v2  ;;  %v12084_v34 = vcombine.low %v18028_v46, %v19184_v54  ;;  %v12086_v2 = vcombine.low %v21839_v28, %v19188_v17  ;;  %v14178_v46 = vld [vmem:[%s21046_s1 + $0x1404] ss:$8 sps:$4 sm:$0xff]  }
 0x297   :  { %v19241_v15 = vadd.f32 %v10117_v51, %v10005_v61  ;;  %v10007_v0 = vadd.f32 %v10006_v47, %v18860_v21  ;;  %10690 = vmatprep.mubr.bf16.mxu0 %v12085_v1  ;;  %10803 = vmatprep.mubr.bf16.mxu1 %v12087_v60  ;;  %v14170_v21 = vld [vmem:[%s21046_s1 + $0x1410] ss:$8 sps:$4 sm:$0xff]   ;;  %v19355_v17 = vld [vmem:[%s21045_s0 + $0x160] sm:$0xff] }
 0x298   :  { %v10008_v11 = vpop.f32.mrf.mxu0  ;;  %v10121_v33 = vpop.f32.mrf.mxu1  ;;  %v14173_v1 = vld [vmem:[%s21046_s1 + $0x1510] ss:$8 sps:$4 sm:$0xff]   ;;  %v21858_v54 = vld [vmem:[#allocation79_spill] sm:$0xff] }
 0x299   :  { %v19248_v6 = vadd.f32 %v10119_v5, %v10007_v0  ;;  %v10009_v38 = vadd.f32 %v10008_v11, %v18875_v45  ;;  %10865 = vmatpush1.bf16.msra.mxu0 %v14164_v29  ;;  %10978 = vmatpush1.bf16.msra.mxu1 %v14167_v41  ;;  %v14181_v45 = vld [vmem:[%s21046_s1 + $0x1504] ss:$8 sps:$4 sm:$0xff]   ;;  %v14184_v0 = vld [vmem:[%s21046_s1 + $0x14f4] ss:$8 sps:$4 sm:$0xff]  }
 0x29a   :  { %v10010_v60 = vpop.f32.mrf.mxu0  ;;  %v10123_v51 = vpop.f32.mrf.mxu1  ;;  %10866 = vmatprep.subr.bf16.mxu0 %v14172_v3  ;;  %10979 = vmatprep.subr.bf16.mxu1 %v14175_v25  ;;  %v14176_v3 = vld [vmem:[%s21046_s1 + $0x1400] ss:$8 sps:$4 sm:$0xff]  }
 0x29b   :  { %v19263_v28 = vadd.f32 %v10121_v33, %v10009_v38  ;;  %v10011_v61 = vadd.f32 %v10010_v60, %v18878_v58  ;;  %v14179_v38 = vld [vmem:[%s21046_s1 + $0x1500] ss:$8 sps:$4 sm:$0xff]  }
 0x29c   :  { %v10014_v29 = vpop.f32.mrf.mxu0  ;;  %v10127_v41 = vpop.f32.mrf.mxu1  ;;  %10691 = vmatmul.mubr.bf16.gmra.mxu0 %v12084_v34  ;;  %10804 = vmatmul.mubr.bf16.gmra.mxu1 %v12086_v2  ;;  %v21842_v34 = vld [vmem:[#allocation63_spill] sm:$0xff]  ;;  %v21843_v2 = vld [vmem:[#allocation108_spill] sm:$0xff] }
 0x29d   :  { %v19266_v47 = vadd.f32 %v10123_v51, %v10011_v61  ;;  %v10015_v5 = vadd.f32 %v10014_v29, %v18893_v48  ;;  %10867 = vmatpush1.bf16.msra.mxu0 %v14170_v21  ;;  %10980 = vmatpush1.bf16.msra.mxu1 %v14173_v1  ;;  %v14187_v48 = vld [vmem:[%s21046_s1 + $0x15f4] ss:$8 sps:$4 sm:$0xff]   ;;  %v14190_v29 = vld [vmem:[%s21046_s1 + $0x14e4] ss:$8 sps:$4 sm:$0xff]  }
 0x29e   :  { %v10016_v25 = vpop.f32.mrf.mxu0  ;;  %v10129_v58 = vpop.f32.mrf.mxu1  ;;  %10868 = vmatprep.subr.bf16.mxu0 %v14178_v46  ;;  %10981 = vmatprep.subr.bf16.mxu1 %v14181_v45  ;;  %v14182_v46 = vld [vmem:[%s21046_s1 + $0x14f0] ss:$8 sps:$4 sm:$0xff]  }
 0x29f   :  { %v19281_v11 = vadd.f32 %v10127_v41, %v10015_v5  ;;  %v10017_v33 = vadd.f32 %v10016_v25, %v18898_v32  ;;  %10700 = vmatprep.mubr.bf16.mxu0 %v21842_v34  ;;  %10813 = vmatprep.mubr.bf16.mxu1 %v21843_v2  ;;  %v14185_v32 = vld [vmem:[%s21046_s1 + $0x15f0] ss:$8 sps:$4 sm:$0xff]   ;;  %v14188_v34 = vld [vmem:[%s21046_s1 + $0x14e0] ss:$8 sps:$4 sm:$0xff]  }
 0x2a0   :  { %v10018_v21 = vpop.f32.mrf.mxu0  ;;  %v10131_v1 = vpop.f32.mrf.mxu1  ;;  %v21844_v25 = vld [vmem:[#allocation142_spill] sm:$0xff] }
 0x2a1   :  { %v19286_v60 = vadd.f32 %v10129_v58, %v10017_v33  ;;  %v10019_v51 = vadd.f32 %v10018_v21, %v18913_v14  ;;  %10869 = vmatpush1.bf16.msra.mxu0 %v14176_v3  ;;  %10982 = vmatpush1.bf16.msra.mxu1 %v14179_v38  ;;  %v14193_v14 = vld [vmem:[%s21046_s1 + $0x15e4] ss:$8 sps:$4 sm:$0xff]   ;;  %v21845_v58 = vld [vmem:[#allocation109_spill] sm:$0xff] }
 0x2a2   :  { %v10020_v45 = vpop.f32.mrf.mxu0  ;;  %v10133_v61 = vpop.f32.mrf.mxu1  ;;  %10870 = vmatprep.subr.bf16.mxu0 %v14184_v0  ;;  %10983 = vmatprep.subr.bf16.mxu1 %v14187_v48  ;;  %v1188_v0 = vshrl.u32 %v18934_v10, 16 }
 0x2a3   :  { %v19301_v41 = vadd.f32 %v10131_v1, %v10019_v51  ;;  %v10021_v5 = vadd.f32 %v10020_v45, %v18922_v43  ;;  %v14191_v43 = vld [vmem:[%s21046_s1 + $0x15e0] ss:$8 sps:$4 sm:$0xff]   ;;  %v14196_v1 = vld [vmem:[%s21046_s1 + $0x14d4] ss:$8 sps:$4 sm:$0xff]  }
 0x2a4   :  { %v10024_v3 = vpop.f32.mrf.mxu0  ;;  %v10137_v38 = vpop.f32.mrf.mxu1  ;;  %10701 = vmatmul.mubr.bf16.gmra.mxu0 %v21844_v25  ;;  %10814 = vmatmul.mubr.bf16.gmra.mxu1 %v21845_v58  ;;  %v21847_v45 = vld [vmem:[#allocation115_spill] sm:$0xff] }
 0x2a5   :  { %v19307_v48 = vadd.f32 %v10133_v61, %v10021_v5  ;;  %v10025_v33 = vadd.f32 %v10024_v3, %v18942_v40  ;;  %10871 = vmatpush2.bf16.msra.mxu0 %v14182_v46  ;;  %10984 = vmatpush2.bf16.msra.mxu1 %v14185_v32  ;;  %v14199_v40 = vld [vmem:[%s21046_s1 + $0x15d4] ss:$8 sps:$4 sm:$0xff]  }
 0x2a6   :  { %v10026_v2 = vpop.f32.mrf.mxu0  ;;  %v10139_v21 = vpop.f32.mrf.mxu1  ;;  %10872 = vmatprep.subr.bf16.mxu0 %v14190_v29  ;;  %10985 = vmatprep.subr.bf16.mxu1 %v14193_v14  ;;  %v21846_v32 = vld [vmem:[#allocation33_spill] sm:$0xff]  ;;  %v1190_v29 = vrot.slane %v1188_v0, 5  ;;  %v21848_v14 = vshll.u32 %v18934_v10, 16  ;;  %v14202_v0 = vld [vmem:[%s21046_s1 + $0x14c4] ss:$8 sps:$4 sm:$0xff]  }
 0x2a7   :  { %v19322_v51 = vadd.f32 %v10137_v38, %v10025_v33  ;;  %v10027_v46 = vadd.f32 %v10026_v2, %v18948_v36  ;;  %10710 = vmatprep.mubr.bf16.mxu0 %v21846_v32  ;;  %10823 = vmatprep.mubr.bf16.mxu1 %v21847_v45  ;;  %v14194_v36 = vld [vmem:[%s21046_s1 + $0x14d0] ss:$8 sps:$4 sm:$0xff]   ;;  %v21850_v45 = vld [vmem:[#allocation119_spill] sm:$0xff] }
 0x2a8   :  { %v10028_v61 = vpop.f32.mrf.mxu0  ;;  %v10141_v5 = vpop.f32.mrf.mxu1  ;;  %v1191_v3 = vrot.slane %v21848_v14, 6  ;;  %v14197_v38 = vld [vmem:[%s21046_s1 + $0x15d0] ss:$8 sps:$4 sm:$0xff]  }
 0x2a9   :  { %v19329_v25 = vadd.f32 %v10139_v21, %v10027_v46  ;;  %v10029_v58 = vadd.f32 %v10028_v61, %v18963_v30  ;;  %10873 = vmatpush2.bf16.msra.mxu0 %v14188_v34  ;;  %10986 = vmatpush2.bf16.msra.mxu1 %v14191_v43  ;;  %v14205_v30 = vld [vmem:[%s21046_s1 + $0x15c4] ss:$8 sps:$4 sm:$0xff]   ;;  %v21849_v32 = vld [vmem:[#allocation78_spill] sm:$0xff] }
 0x2aa   :  { %v10030_v33 = vpop.f32.mrf.mxu0  ;;  %v10143_v2 = vpop.f32.mrf.mxu1  ;;  %10874 = vmatprep.subr.bf16.mxu0 %v14196_v1  ;;  %10987 = vmatprep.subr.bf16.mxu1 %v14199_v40  ;;  %v21851_v1 = vld [vmem:[#allocation67_spill] sm:$0xff]  ;;  %v1192_v14 = vor.u32 %v1191_v3, %v1190_v29  ;;  %v19371_v3 = vld [vmem:[%s21045_s0 + $0x170] sm:$0xff] }
 0x2ab   :  { %v19344_v34 = vadd.f32 %v10141_v5, %v10029_v58  ;;  %v10031_v43 = vadd.f32 %v10030_v33, %v18972_v13  ;;  %v21852_v40 = vor.u32 %v18633_v8, %v21851_v1  ;;  %v11893_v5 = vrot.slane %v19355_v17, 10  ;;  %v14200_v8 = vld [vmem:[%s21046_s1 + $0x14c0] ss:$8 sps:$4 sm:$0xff]  }
 0x2ac   :  { %v10034_v21 = vpop.f32.mrf.mxu0  ;;  %v10147_v46 = vpop.f32.mrf.mxu1  ;;  %10711 = vmatmul.mubr.bf16.gmra.mxu0 %v21849_v32  ;;  %10824 = vmatmul.mubr.bf16.gmra.mxu1 %v21850_v45  ;;  %v1218_v13 = vrot.slane %v18934_v10, 6  ;;  %v14203_v29 = vld [vmem:[%s21046_s1 + $0x15c0] ss:$8 sps:$4 sm:$0xff]  }
 0x2ad   :  { %v1187_v61 = vrot.slane %v21852_v40, 4  ;;  %v19359_v58 = vadd.f32 %v10143_v2, %v10031_v43  ;;  %v10035_v33 = vadd.f32 %v10034_v21, %v18987_v62  ;;  %10875 = vmatpush2.bf16.msra.mxu0 %v14194_v36  ;;  %10988 = vmatpush2.bf16.msra.mxu1 %v14197_v38  ;;  %v14208_v62 = vld [vmem:[%s21046_s1 + $0x14b4] ss:$8 sps:$4 sm:$0xff]   ;;  %v21853_v21 = vld [vmem:[#allocation120_spill] sm:$0xff]  ;;  %v21374_v40 = vshrl.u32 %v19371_v3, 16 }
 0x2ae   :  { %v10036_v10 = vpop.f32.mrf.mxu0  ;;  %v10149_v2 = vpop.f32.mrf.mxu1  ;;  %10876 = vmatprep.subr.bf16.mxu0 %v14202_v0  ;;  %10989 = vmatprep.subr.bf16.mxu1 %v14205_v30  ;;  %v14211_v36 = vld [vmem:[%s21046_s1 + $0x15b4] ss:$8 sps:$4 sm:$0xff]   ;;  %v21854_v32 = vld [vmem:[#allocation116_spill] sm:$0xff]  ;;  %v19390_v30 = vsel %vm15929_vm11, %v11893_v5, %v1218_v13 }
 0x2af   :  { %v19379_v38 = vadd.f32 %v10147_v46, %v10035_v33  ;;  %v10037_v43 = vadd.f32 %v10036_v10, %v19000_v52  ;;  %10720 = vmatprep.mubr.bf16.mxu0 %v21853_v21  ;;  %10833 = vmatprep.mubr.bf16.mxu1 %v21854_v32  ;;  %v19386_v0 = vsel %vm15091_vm5, %v1187_v61, %v1192_v14  ;;  %v21375_v46 = vshll.u32 %v19371_v3, 16  ;;  %v14206_v10 = vld [vmem:[%s21046_s1 + $0x14b0] ss:$8 sps:$4 sm:$0xff]   ;;  %v14214_v13 = vld [vmem:[%s21046_s1 + $0x14a4] ss:$8 sps:$4 sm:$0xff]  }
 0x2b0   :  { %v10038_v45 = vpop.f32.mrf.mxu0  ;;  %v10151_v1 = vpop.f32.mrf.mxu1  ;;  %21855 = vst [vmem:[#allocation123_spill] sm:$0xff] %v19390_v30  ;;  %v14209_v61 = vld [vmem:[%s21046_s1 + $0x15b0] ss:$8 sps:$4 sm:$0xff]  }
 0x2b1   :  { %v19394_v33 = vadd.f32 %v10149_v2, %v10037_v43  ;;  %v10039_v52 = vadd.f32 %v10038_v45, %v19015_v37  ;;  %10877 = vmatpush2.bf16.msra.mxu0 %v14200_v8  ;;  %10990 = vmatpush2.bf16.msra.mxu1 %v14203_v29  ;;  %v14217_v37 = vld [vmem:[%s21046_s1 + $0x15a4] ss:$8 sps:$4 sm:$0xff]   ;;  %v19411_v8 = vrot.slane %v21374_v40, 5  ;;  %v19415_v29 = vrot.slane %v21375_v46, 6  ;;  %v21857_v21 = vld [vmem:[#allocation66_spill] sm:$0xff] }
 0x2b2   :  { %v10040_v14 = vpop.f32.mrf.mxu0  ;;  %v10153_v5 = vpop.f32.mrf.mxu1  ;;  %10878 = vmatprep.subr.bf16.mxu0 %v14208_v62  ;;  %10991 = vmatprep.subr.bf16.mxu1 %v14211_v36  ;;  %v21856_v36 = vld [vmem:[#allocation35_spill] sm:$0xff]  ;;  %v12287_v32 = vcombine.high %v21857_v21, %v19390_v30  ;;  %v21859_v40 = vld [vmem:[#allocation114_spill] sm:$0xff] }
 0x2b3   :  { %v19417_v2 = vadd.f32 %v10151_v1, %v10039_v52  ;;  %v10041_v62 = vadd.f32 %v10040_v14, %v19024_v49  ;;  %v12285_v43 = vcombine.high %v21856_v36, %v19386_v0  ;;  %v14212_v49 = vld [vmem:[%s21046_s1 + $0x14a0] ss:$8 sps:$4 sm:$0xff]  }
 0x2b4   :  { %v10044_v45 = vpop.f32.mrf.mxu0  ;;  %v10157_v24 = vpop.f32.mrf.mxu1  ;;  %10721 = vmatmul.mubr.bf16.gmra.mxu0 %v21858_v54  ;;  %10834 = vmatmul.mubr.bf16.gmra.mxu1 %v21859_v40  ;;  %v14215_v52 = vld [vmem:[%s21046_s1 + $0x15a0] ss:$8 sps:$4 sm:$0xff]   ;;  %v14220_v40 = vld [vmem:[%s21046_s1 + $0x1494] ss:$8 sps:$4 sm:$0xff]  }
 0x2b5   :  { %v19428_v16 = vadd.f32 %v10153_v5, %v10041_v62  ;;  %v10045_v1 = vadd.f32 %v10044_v45, %v19039_v59  ;;  %10879 = vmatpush2.bf16.msra.mxu0 %v14206_v10  ;;  %10992 = vmatpush2.bf16.msra.mxu1 %v14209_v61  ;;  %v14223_v59 = vld [vmem:[%s21046_s1 + $0x1594] ss:$8 sps:$4 sm:$0xff]  }
 0x2b6   :  { %v10046_v54 = vpop.f32.mrf.mxu0  ;;  %v10159_v14 = vpop.f32.mrf.mxu1  ;;  %10880 = vmatprep.subr.bf16.mxu0 %v14214_v13  ;;  %10993 = vmatprep.subr.bf16.mxu1 %v14217_v37  ;;  %v12284_v13 = vcombine.low %v21856_v36, %v19386_v0  ;;  %v12286_v37 = vcombine.low %v21857_v21, %v19390_v30  ;;  %v14226_v36 = vld [vmem:[%s21046_s1 + $0x1484] ss:$8 sps:$4 sm:$0xff]  }
 0x2b7   :  { %v19443_v10 = vadd.f32 %v10157_v24, %v10045_v1  ;;  %v10047_v61 = vadd.f32 %v10046_v54, %v19046_v31  ;;  %10730 = vmatprep.mubr.bf16.mxu0 %v12285_v43  ;;  %10843 = vmatprep.mubr.bf16.mxu1 %v12287_v32  ;;  %v14218_v24 = vld [vmem:[%s21046_s1 + $0x1490] ss:$8 sps:$4 sm:$0xff]  }
 0x2b8   :  { %v10048_v5 = vpop.f32.mrf.mxu0  ;;  %v10161_v62 = vpop.f32.mrf.mxu1  ;;  %v14221_v31 = vld [vmem:[%s21046_s1 + $0x1590] ss:$8 sps:$4 sm:$0xff]  }
 0x2b9   :  { %v19450_v45 = vadd.f32 %v10159_v14, %v10047_v61  ;;  %v10049_v46 = vadd.f32 %v10048_v5, %v19061_v56  ;;  %10881 = vmatpush2.bf16.msra.mxu0 %v14212_v49  ;;  %10994 = vmatpush2.bf16.msra.mxu1 %v14215_v52  ;;  %v14229_v56 = vld [vmem:[%s21046_s1 + $0x1584] ss:$8 sps:$4 sm:$0xff]   ;;  %v14232_v61 = vld [vmem:[%s21046_s1 + $0x1674] ss:$8 sps:$4 sm:$0xff]  }
 0x2ba   :  { %v10050_v43 = vpop.f32.mrf.mxu0  ;;  %v10163_v32 = vpop.f32.mrf.mxu1  ;;  %10882 = vmatprep.subr.bf16.mxu0 %v14220_v40  ;;  %10995 = vmatprep.subr.bf16.mxu1 %v14223_v59  ;;  %v14224_v40 = vld [vmem:[%s21046_s1 + $0x1480] ss:$8 sps:$4 sm:$0xff]  }
 0x2bb   :  { %v19465_v21 = vadd.f32 %v10161_v62, %v10049_v46  ;;  %v10051_v1 = vadd.f32 %v10050_v43, %v19064_v18  ;;  %v14227_v46 = vld [vmem:[%s21046_s1 + $0x1580] ss:$8 sps:$4 sm:$0xff]  }
 0x2bc   :  { %v10054_v49 = vpop.f32.mrf.mxu0  ;;  %v10167_v52 = vpop.f32.mrf.mxu1  ;;  %10731 = vmatmul.mubr.bf16.gmra.mxu0 %v12284_v13  ;;  %10844 = vmatmul.mubr.bf16.gmra.mxu1 %v12286_v37  ;;  %v21860_v13 = vld [vmem:[#allocation15_spill] sm:$0xff]  ;;  %v21861_v37 = vld [vmem:[#allocation16_spill] sm:$0xff] }
 0x2bd   :  { %v19468_v54 = vadd.f32 %v10163_v32, %v10051_v1  ;;  %v10055_v14 = vadd.f32 %v10054_v49, %v19079_v26  ;;  %10883 = vmatpush2.bf16.msra.mxu0 %v14218_v24  ;;  %10996 = vmatpush2.bf16.msra.mxu1 %v14221_v31  ;;  %v14235_v26 = vld [vmem:[%s21046_s1 + $0x1774] ss:$8 sps:$4 sm:$0xff]   ;;  %v14238_v49 = vld [vmem:[%s21046_s1 + $0x1664] ss:$8 sps:$4 sm:$0xff]  }
 0x2be   :  { %v10056_v59 = vpop.f32.mrf.mxu0  ;;  %v10169_v18 = vpop.f32.mrf.mxu1  ;;  %10884 = vmatprep.subr.bf16.mxu0 %v14226_v36  ;;  %10997 = vmatprep.subr.bf16.mxu1 %v14229_v56  ;;  %v14230_v36 = vld [vmem:[%s21046_s1 + $0x1670] ss:$8 sps:$4 sm:$0xff]  }
 0x2bf   :  { %v19483_v5 = vadd.f32 %v10167_v52, %v10055_v14  ;;  %v10057_v62 = vadd.f32 %v10056_v59, %v19084_v44  ;;  %10886 = vmatprep.mubr.bf16.mxu0 %v21860_v13  ;;  %10999 = vmatprep.mubr.bf16.mxu1 %v21861_v37  ;;  %v14233_v44 = vld [vmem:[%s21046_s1 + $0x1770] ss:$8 sps:$4 sm:$0xff]  }
 0x2c0   :  { %v10058_v24 = vpop.f32.mrf.mxu0  ;;  %v10171_v31 = vpop.f32.mrf.mxu1  ;;  %v21862_v59 = vld [vmem:[#allocation17_spill] sm:$0xff] }
 0x2c1   :  { %v19488_v43 = vadd.f32 %v10169_v18, %v10057_v62  ;;  %v10059_v32 = vadd.f32 %v10058_v24, %v19099_v27  ;;  %10885 = vmatpush2.bf16.msra.mxu0 %v14224_v40  ;;  %10998 = vmatpush2.bf16.msra.mxu1 %v14227_v46  ;;  %v14241_v27 = vld [vmem:[%s21046_s1 + $0x1764] ss:$8 sps:$4 sm:$0xff]   ;;  %v21863_v18 = vld [vmem:[#allocation18_spill] sm:$0xff]  ;;  %v21865_v62 = vshll.u32 %v19169_v50, 16 }
 0x2c2   :  { %v10060_v56 = vpop.f32.mrf.mxu0  ;;  %v10173_v1 = vpop.f32.mrf.mxu1  ;;  %11080 = vmatprep.subr.bf16.mxu0 %v14232_v61  ;;  %11193 = vmatprep.subr.bf16.mxu1 %v14235_v26  ;;  %v21864_v61 = vshrl.u32 %v19169_v50, 16 }
 0x2c3   :  { %v19503_v52 = vadd.f32 %v10171_v31, %v10059_v32  ;;  %v10061_v14 = vadd.f32 %v10060_v56, %v19105_v7  ;;  %v1260_v13 = vrot.slane %v21865_v62, 5  ;;  %v14236_v7 = vld [vmem:[%s21046_s1 + $0x1660] ss:$8 sps:$4 sm:$0xff]   ;;  %v19524_v32 = vld [vmem:[%s21045_s0 + $0xb8] sm:$0x33] }
 0x2c4   :  { %v10210_v40 = vpop.f32.mrf.mxu0  ;;  %v10323_v46 = vpop.f32.mrf.mxu1  ;;  %10887 = vmatmul.mubr.bf16.vlgmr.msra.gmra.mxu0 %v21862_v59  ;;  %11000 = vmatmul.mubr.bf16.vlgmr.msra.gmra.mxu1 %v21863_v18  ;;  %v1257_v26 = vrot.slane %v21864_v61, 4  ;;  %v14239_v31 = vld [vmem:[%s21046_s1 + $0x1760] ss:$8 sps:$4 sm:$0xff]   ;;  %v21867_v59 = vld [vmem:[#allocation22_spill] sm:$0xff] }
 0x2c5   :  { %v19512_v37 = vadd.f32 %v10173_v1, %v10061_v14  ;;  %v10211_v24 = vadd.f32 %v10210_v40, %v19120_v35  ;;  %11081 = vmatpush1.bf16.msra.mxu0 %v14230_v36  ;;  %11194 = vmatpush1.bf16.msra.mxu1 %v14233_v44  ;;  %v14244_v35 = vld [vmem:[%s21046_s1 + $0x1654] ss:$8 sps:$4 sm:$0xff]  }
 0x2c6   :  { %v10212_v56 = vpop.f32.mrf.mxu0  ;;  %v10325_v1 = vpop.f32.mrf.mxu1  ;;  %11082 = vmatprep.subr.bf16.mxu0 %v14238_v49  ;;  %11195 = vmatprep.subr.bf16.mxu1 %v14241_v27  ;;  %v14247_v36 = vld [vmem:[%s21046_s1 + $0x1754] ss:$8 sps:$4 sm:$0xff]   ;;  %v1261_v49 = vor.u32 %v1260_v13, %v1257_v26  ;;  %v21380_v27 = vshll.u32 %v19524_v32, 16  ;;  %v14250_v26 = vld [vmem:[%s21046_s1 + $0x1644] ss:$8 sps:$4 sm:$0xff]  }
 0x2c7   :  { %v19532_v44 = vadd.f32 %v10323_v46, %v10211_v24  ;;  %v10213_v14 = vadd.f32 %v10212_v56, %v19127_v39  ;;  %v21866_v40 = vld [vmem:[#allocation21_spill] sm:$0xff]  ;;  %11009 = vmatprep.mubr.bf16.mxu1 %v21867_v59 }
 0x2c8   :  { %10896 = vmatprep.mubr.bf16.mxu0 %v21866_v40  ;;  %v10214_v18 = vpop.f32.mrf.mxu0  ;;  %v10327_v61 = vpop.f32.mrf.mxu1  ;;  %v14242_v46 = vld [vmem:[%s21046_s1 + $0x1650] ss:$8 sps:$4 sm:$0xff]   ;;  %v21869_v40 = vld [vmem:[#allocation24_spill] sm:$0xff] }
 0x2c9   :  { %v19538_v62 = vadd.f32 %v10325_v1, %v10213_v14  ;;  %v10215_v30 = vadd.f32 %v10214_v18, %v19142_v23  ;;  %11083 = vmatpush1.bf16.msra.mxu0 %v14236_v7  ;;  %11196 = vmatpush1.bf16.msra.mxu1 %v14239_v31  ;;  %v14245_v39 = vld [vmem:[%s21046_s1 + $0x1750] ss:$8 sps:$4 sm:$0xff]   ;;  %v14253_v23 = vld [vmem:[%s21046_s1 + $0x1744] ss:$8 sps:$4 sm:$0xff]  }
 0x2ca   :  { %v10216_v24 = vpop.f32.mrf.mxu0  ;;  %v10329_v56 = vpop.f32.mrf.mxu1  ;;  %11084 = vmatprep.subr.bf16.mxu0 %v14244_v35  ;;  %11197 = vmatprep.subr.bf16.mxu1 %v14247_v36  ;;  %v21868_v14 = vld [vmem:[#allocation23_spill] sm:$0xff]  ;;  %v1262_v35 = vrot.slane %v1261_v49, 4  ;;  %v1266_v36 = vrot.slane %v21380_v27, 5  ;;  %v14256_v49 = vld [vmem:[%s21046_s1 + $0x1634] ss:$8 sps:$4 sm:$0xff]  }
 0x2cb   :  { %v19553_v13 = vadd.f32 %v10327_v61, %v10215_v30  ;;  %v10217_v7 = vadd.f32 %v10216_v24, %v19157_v57  ;;  %v14248_v57 = vld [vmem:[%s21046_s1 + $0x1640] ss:$8 sps:$4 sm:$0xff]  }
 0x2cc   :  { %v10220_v31 = vpop.f32.mrf.mxu0  ;;  %v10333_v1 = vpop.f32.mrf.mxu1  ;;  %10897 = vmatmul.mubr.bf16.gmra.mxu0 %v21868_v14  ;;  %11010 = vmatmul.mubr.bf16.gmra.mxu1 %v21869_v40  ;;  %v14251_v30 = vld [vmem:[%s21046_s1 + $0x1740] ss:$8 sps:$4 sm:$0xff]  }
 0x2cd   :  { %v19560_v59 = vadd.f32 %v10329_v56, %v10217_v7  ;;  %v10221_v18 = vadd.f32 %v10220_v31, %v19177_v22  ;;  %11085 = vmatpush1.bf16.msra.mxu0 %v14242_v46  ;;  %11198 = vmatpush1.bf16.msra.mxu1 %v14245_v39  ;;  %v14259_v22 = vld [vmem:[%s21046_s1 + $0x1734] ss:$8 sps:$4 sm:$0xff]  }
 0x2ce   :  { %v10222_v61 = vpop.f32.mrf.mxu0  ;;  %v10335_v24 = vpop.f32.mrf.mxu1  ;;  %11086 = vmatprep.subr.bf16.mxu0 %v14250_v26  ;;  %11199 = vmatprep.subr.bf16.mxu1 %v14253_v23  ;;  %v21870_v56 = vld [vmem:[#allocation9_spill] sm:$0xff]  ;;  %v21871_v7 = vld [vmem:[#allocation10_spill] sm:$0xff]  ;;  %v1267_v26 = vsel %vm14694_vm2, %v1262_v35, %v1266_v36  ;;  %v14262_v35 = vld [vmem:[%s21046_s1 + $0x1624] ss:$8 sps:$4 sm:$0xff]  }
 0x2cf   :  { %v19575_v46 = vadd.f32 %v10333_v1, %v10221_v18  ;;  %v10223_v39 = vadd.f32 %v10222_v61, %v19192_v12  ;;  %10906 = vmatprep.mubr.bf16.mxu0 %v21870_v56  ;;  %11019 = vmatprep.mubr.bf16.mxu1 %v21871_v7  ;;  %v14254_v1 = vld [vmem:[%s21046_s1 + $0x1630] ss:$8 sps:$4 sm:$0xff]   ;;  %v21874_v7 = vld [vmem:[#allocation132_spill] sm:$0xff] }
 0x2d0   :  { %v10224_v31 = vpop.f32.mrf.mxu0  ;;  %v10337_v14 = vpop.f32.mrf.mxu1  ;;  %v14257_v12 = vld [vmem:[%s21046_s1 + $0x1730] ss:$8 sps:$4 sm:$0xff]  }
 0x2d1   :  { %v19582_v23 = vadd.f32 %v10335_v24, %v10223_v39  ;;  %v10225_v40 = vadd.f32 %v10224_v31, %v19215_v20  ;;  %11087 = vmatpush1.bf16.msra.mxu0 %v14248_v57  ;;  %11200 = vmatpush1.bf16.msra.mxu1 %v14251_v30  ;;  %v14265_v20 = vld [vmem:[%s21046_s1 + $0x1724] ss:$8 sps:$4 sm:$0xff]   ;;  %v12089_v30 = vcombine.high %v19153_v53, %v19169_v50 }
 0x2d2   :  { %v10226_v18 = vpop.f32.mrf.mxu0  ;;  %v10339_v61 = vpop.f32.mrf.mxu1  ;;  %11088 = vmatprep.subr.bf16.mxu0 %v14256_v49  ;;  %11201 = vmatprep.subr.bf16.mxu1 %v14259_v22  ;;  %v21872_v24 = vld [vmem:[#allocation88_spill] sm:$0xff]  ;;  %v21873_v22 = vld [vmem:[#allocation34_spill] sm:$0xff] }
 0x2d3   :  { %v19597_v36 = vadd.f32 %v10337_v14, %v10225_v40  ;;  %v10227_v57 = vadd.f32 %v10226_v18, %v19226_v19  ;;  %v12091_v39 = vcombine.high %v21872_v24, %v1267_v26  ;;  %v14260_v19 = vld [vmem:[%s21046_s1 + $0x1620] ss:$8 sps:$4 sm:$0xff]  }
 0x2d4   :  { %v10230_v56 = vpop.f32.mrf.mxu0  ;;  %v10343_v49 = vpop.f32.mrf.mxu1  ;;  %10907 = vmatmul.mubr.bf16.gmra.mxu0 %v21873_v22  ;;  %11020 = vmatmul.mubr.bf16.gmra.mxu1 %v21874_v7  ;;  %v14263_v14 = vld [vmem:[%s21046_s1 + $0x1720] ss:$8 sps:$4 sm:$0xff]   ;;  %v12090_v22 = vcombine.low %v21872_v24, %v1267_v26 }
 0x2d5   :  { %v19605_v31 = vadd.f32 %v10339_v61, %v10227_v57  ;;  %v10231_v27 = vadd.f32 %v10230_v56, %v19241_v15  ;;  %11089 = vmatpush1.bf16.msra.mxu0 %v14254_v1  ;;  %11202 = vmatpush1.bf16.msra.mxu1 %v14257_v12  ;;  %v14270_v61 = vld [vmem:[%s21046_s1 + $0x1614] ss:$8 sps:$4 sm:$0xff]  }
 0x2d6   :  { %v10232_v40 = vpop.f32.mrf.mxu0  ;;  %v10345_v18 = vpop.f32.mrf.mxu1  ;;  %11090 = vmatprep.subr.bf16.mxu0 %v14262_v35  ;;  %11203 = vmatprep.subr.bf16.mxu1 %v14265_v20  ;;  %v14273_v15 = vld [vmem:[%s21046_s1 + $0x1714] ss:$8 sps:$4 sm:$0xff]   ;;  %v12088_v35 = vcombine.low %v19153_v53, %v19169_v50  ;;  %v14276_v53 = vld [vmem:[%s21046_s1 + $0x1604] ss:$8 sps:$4 sm:$0xff]  }
 0x2d7   :  { %v19620_v1 = vadd.f32 %v10343_v49, %v10231_v27  ;;  %v10233_v12 = vadd.f32 %v10232_v40, %v19248_v6  ;;  %10916 = vmatprep.mubr.bf16.mxu0 %v12089_v30  ;;  %11029 = vmatprep.mubr.bf16.mxu1 %v12091_v39  ;;  %v14268_v27 = vld [vmem:[%s21046_s1 + $0x1610] ss:$8 sps:$4 sm:$0xff]   ;;  %v14279_v50 = vld [vmem:[%s21046_s1 + $0x1704] ss:$8 sps:$4 sm:$0xff]   ;;  %v14274_v40 = vld [vmem:[%s21046_s1 + $0x1600] ss:$8 sps:$4 sm:$0xff]  }
 0x2d8   :  { %v10234_v57 = vpop.f32.mrf.mxu0  ;;  %v10347_v56 = vpop.f32.mrf.mxu1  ;;  %v14271_v6 = vld [vmem:[%s21046_s1 + $0x1710] ss:$8 sps:$4 sm:$0xff]  }
 0x2d9   :  { %v19626_v20 = vadd.f32 %v10345_v18, %v10233_v12  ;;  %v10235_v7 = vadd.f32 %v10234_v57, %v19263_v28  ;;  %11091 = vmatpush1.bf16.msra.mxu0 %v14260_v19  ;;  %11204 = vmatpush1.bf16.msra.mxu1 %v14263_v14  ;;  %v14277_v18 = vld [vmem:[%s21046_s1 + $0x1700] ss:$8 sps:$4 sm:$0xff]  }
 0x2da   :  { %v10236_v30 = vpop.f32.mrf.mxu0  ;;  %v10349_v39 = vpop.f32.mrf.mxu1  ;;  %11092 = vmatprep.subr.bf16.mxu0 %v14270_v61  ;;  %11205 = vmatprep.subr.bf16.mxu1 %v14273_v15  ;;  %v14282_v15 = vld [vmem:[%s21046_s1 + $0x16f4] ss:$8 sps:$4 sm:$0xff]  }
 0x2db   :  { %v19641_v28 = vadd.f32 %v10347_v56, %v10235_v7  ;;  %v10237_v26 = vadd.f32 %v10236_v30, %v19266_v47  ;;  %v21875_v56 = vld [vmem:[#allocation36_spill] sm:$0xff]  ;;  %v14280_v30 = vld [vmem:[%s21046_s1 + $0x16f0] ss:$8 sps:$4 sm:$0xff]  }
 0x2dc   :  { %v10240_v24 = vpop.f32.mrf.mxu0  ;;  %v10353_v49 = vpop.f32.mrf.mxu1  ;;  %10917 = vmatmul.mubr.bf16.gmra.mxu0 %v12088_v35  ;;  %11030 = vmatmul.mubr.bf16.gmra.mxu1 %v12090_v22  ;;  %v21876_v22 = vld [vmem:[#allocation37_spill] sm:$0xff] }
 0x2dd   :  { %v19644_v19 = vadd.f32 %v10349_v39, %v10237_v26  ;;  %v10241_v14 = vadd.f32 %v10240_v24, %v19281_v11  ;;  %11093 = vmatpush1.bf16.msra.mxu0 %v14268_v27  ;;  %11206 = vmatpush1.bf16.msra.mxu1 %v14271_v6  ;;  %v14285_v11 = vld [vmem:[%s21046_s1 + $0x17f4] ss:$8 sps:$4 sm:$0xff]  }
 0x2de   :  { %v10242_v61 = vpop.f32.mrf.mxu0  ;;  %v10355_v47 = vpop.f32.mrf.mxu1  ;;  %11094 = vmatprep.subr.bf16.mxu0 %v14276_v53  ;;  %11207 = vmatprep.subr.bf16.mxu1 %v14279_v50  ;;  %v14288_v50 = vld [vmem:[%s21046_s1 + $0x16e4] ss:$8 sps:$4 sm:$0xff]  }
 0x2df   :  { %v19659_v12 = vadd.f32 %v10353_v49, %v10241_v14  ;;  %v10243_v57 = vadd.f32 %v10242_v61, %v19286_v60  ;;  %10926 = vmatprep.mubr.bf16.mxu0 %v21875_v56  ;;  %11039 = vmatprep.mubr.bf16.mxu1 %v21876_v22  ;;  %v14283_v60 = vld [vmem:[%s21046_s1 + $0x17f0] ss:$8 sps:$4 sm:$0xff]   ;;  %v21879_v61 = vshrl.u32 %v19371_v3, 16  ;;  %v14289_v22 = vld [vmem:[%s21046_s1 + $0x17e0] ss:$8 sps:$4 sm:$0xff]  }
 0x2e0   :  { %v10244_v35 = vpop.f32.mrf.mxu0  ;;  %v10357_v7 = vpop.f32.mrf.mxu1 }
 0x2e1   :  { %v19664_v27 = vadd.f32 %v10355_v47, %v10243_v57  ;;  %v10245_v6 = vadd.f32 %v10244_v35, %v19301_v41  ;;  %11095 = vmatpush1.bf16.msra.mxu0 %v14274_v40  ;;  %11208 = vmatpush1.bf16.msra.mxu1 %v14277_v18  ;;  %v14291_v41 = vld [vmem:[%s21046_s1 + $0x17e4] ss:$8 sps:$4 sm:$0xff]   ;;  %v21877_v40 = vld [vmem:[#allocation38_spill] sm:$0xff]  ;;  %v1271_v47 = vrot.slane %v21879_v61, 4 }
 0x2e2   :  { %v10246_v39 = vpop.f32.mrf.mxu0  ;;  %v10359_v53 = vpop.f32.mrf.mxu1  ;;  %11096 = vmatprep.subr.bf16.mxu0 %v14282_v15  ;;  %11209 = vmatprep.subr.bf16.mxu1 %v14285_v11  ;;  %v21878_v18 = vld [vmem:[#allocation39_spill] sm:$0xff]  ;;  %v21880_v15 = vshll.u32 %v19371_v3, 16  ;;  %v19700_v35 = vld [vmem:[%s21045_s0 + $0x178] sm:$0x33] }
 0x2e3   :  { %v19679_v26 = vadd.f32 %v10357_v7, %v10245_v6  ;;  %v10247_v24 = vadd.f32 %v10246_v39, %v19307_v48  ;;  %v14286_v48 = vld [vmem:[%s21046_s1 + $0x16e0] ss:$8 sps:$4 sm:$0xff]  }
 0x2e4   :  { %v10250_v49 = vpop.f32.mrf.mxu0  ;;  %v10363_v14 = vpop.f32.mrf.mxu1  ;;  %10927 = vmatmul.mubr.bf16.gmra.mxu0 %v21877_v40  ;;  %11040 = vmatmul.mubr.bf16.gmra.mxu1 %v21878_v18  ;;  %v1274_v11 = vrot.slane %v21880_v15, 5 }
 0x2e5   :  { %v19688_v57 = vadd.f32 %v10359_v53, %v10247_v24  ;;  %v10251_v56 = vadd.f32 %v10250_v49, %v19322_v51  ;;  %11097 = vmatpush2.bf16.msra.mxu0 %v14280_v30  ;;  %11210 = vmatpush2.bf16.msra.mxu1 %v14283_v60  ;;  %v14294_v51 = vld [vmem:[%s21046_s1 + $0x16d4] ss:$8 sps:$4 sm:$0xff]   ;;  %v21881_v53 = vld [vmem:[#allocation43_spill] sm:$0xff]  ;;  %v21882_v24 = vld [vmem:[#allocation44_spill] sm:$0xff] }
 0x2e6   :  { %v10252_v7 = vpop.f32.mrf.mxu0  ;;  %v10365_v6 = vpop.f32.mrf.mxu1  ;;  %11098 = vmatprep.subr.bf16.mxu0 %v14288_v50  ;;  %11211 = vmatprep.subr.bf16.mxu1 %v14291_v41  ;;  %v14297_v30 = vld [vmem:[%s21046_s1 + $0x17d4] ss:$8 sps:$4 sm:$0xff]   ;;  %v1275_v50 = vor.u32 %v1274_v11, %v1271_v47  ;;  %v1278_v41 = vshll.u32 %v19700_v35, 16  ;;  %v14300_v47 = vld [vmem:[%s21046_s1 + $0x16c4] ss:$8 sps:$4 sm:$0xff]  }
 0x2e7   :  { %v19708_v60 = vadd.f32 %v10363_v14, %v10251_v56  ;;  %v10253_v39 = vadd.f32 %v10252_v7, %v19329_v25  ;;  %10936 = vmatprep.mubr.bf16.mxu0 %v21881_v53  ;;  %11049 = vmatprep.mubr.bf16.mxu1 %v21882_v24  ;;  %v14292_v14 = vld [vmem:[%s21046_s1 + $0x16d0] ss:$8 sps:$4 sm:$0xff]  }
 0x2e8   :  { %v10254_v49 = vpop.f32.mrf.mxu0  ;;  %v10367_v40 = vpop.f32.mrf.mxu1  ;;  %v14295_v25 = vld [vmem:[%s21046_s1 + $0x17d0] ss:$8 sps:$4 sm:$0xff]  }
 0x2e9   :  { %v19714_v18 = vadd.f32 %v10365_v6, %v10253_v39  ;;  %v10255_v61 = vadd.f32 %v10254_v49, %v19344_v34  ;;  %11099 = vmatpush2.bf16.msra.mxu0 %v14286_v48  ;;  %11212 = vmatpush2.bf16.msra.mxu1 %v14289_v22  ;;  %v14303_v34 = vld [vmem:[%s21046_s1 + $0x17c4] ss:$8 sps:$4 sm:$0xff]   ;;  %v21883_v6 = vld [vmem:[#allocation45_spill] sm:$0xff]  ;;  %v21884_v39 = vld [vmem:[#allocation46_spill] sm:$0xff] }
 0x2ea   :  { %v10256_v15 = vpop.f32.mrf.mxu0  ;;  %v10369_v56 = vpop.f32.mrf.mxu1  ;;  %11100 = vmatprep.subr.bf16.mxu0 %v14294_v51  ;;  %11213 = vmatprep.subr.bf16.mxu1 %v14297_v30  ;;  %v1276_v51 = vrot.slane %v1275_v50, 4  ;;  %v1280_v30 = vrot.slane %v1278_v41, 5  ;;  %v14301_v49 = vld [vmem:[%s21046_s1 + $0x17c0] ss:$8 sps:$4 sm:$0xff]   ;;  %v14306_v50 = vld [vmem:[%s21046_s1 + $0x16b4] ss:$8 sps:$4 sm:$0xff]  }
 0x2eb   :  { %v19729_v11 = vadd.f32 %v10367_v40, %v10255_v61  ;;  %v10257_v48 = vadd.f32 %v10256_v15, %v19359_v58  ;;  %v14298_v58 = vld [vmem:[%s21046_s1 + $0x16c0] ss:$8 sps:$4 sm:$0xff]  }
 0x2ec   :  { %v10260_v22 = vpop.f32.mrf.mxu0  ;;  %v10373_v7 = vpop.f32.mrf.mxu1  ;;  %10937 = vmatmul.mubr.bf16.gmra.mxu0 %v21883_v6  ;;  %11050 = vmatmul.mubr.bf16.gmra.mxu1 %v21884_v39  ;;  %v21885_v15 = vld [vmem:[#allocation12_spill] sm:$0xff] }
 0x2ed   :  { %v19736_v53 = vadd.f32 %v10369_v56, %v10257_v48  ;;  %v10261_v24 = vadd.f32 %v10260_v22, %v19379_v38  ;;  %11101 = vmatpush2.bf16.msra.mxu0 %v14292_v14  ;;  %11214 = vmatpush2.bf16.msra.mxu1 %v14295_v25  ;;  %v14309_v38 = vld [vmem:[%s21046_s1 + $0x17b4] ss:$8 sps:$4 sm:$0xff]   ;;  %v21886_v56 = vld [vmem:[#allocation48_spill] sm:$0xff] }
 0x2ee   :  { %v10262_v40 = vpop.f32.mrf.mxu0  ;;  %v10375_v61 = vpop.f32.mrf.mxu1  ;;  %11102 = vmatprep.subr.bf16.mxu0 %v14300_v47  ;;  %11215 = vmatprep.subr.bf16.mxu1 %v14303_v34  ;;  %v1281_v47 = vsel %vm14694_vm2, %v1276_v51, %v1280_v30 }
 0x2ef   :  { %v19751_v14 = vadd.f32 %v10373_v7, %v10261_v24  ;;  %v10263_v25 = vadd.f32 %v10262_v40, %v19394_v33  ;;  %10946 = vmatprep.mubr.bf16.mxu0 %v21885_v15  ;;  %11059 = vmatprep.mubr.bf16.mxu1 %v21886_v56  ;;  %v14304_v7 = vld [vmem:[%s21046_s1 + $0x16b0] ss:$8 sps:$4 sm:$0xff]   ;;  %v14313_v56 = vld [vmem:[%s21046_s1 + $0x17a0] ss:$8 sps:$4 sm:$0xff]  }
 0x2f0   :  { %v10264_v48 = vpop.f32.mrf.mxu0  ;;  %v10377_v22 = vpop.f32.mrf.mxu1  ;;  %v14307_v33 = vld [vmem:[%s21046_s1 + $0x17b0] ss:$8 sps:$4 sm:$0xff]  }
 0x2f1   :  { %v19758_v34 = vadd.f32 %v10375_v61, %v10263_v25  ;;  %v10265_v6 = vadd.f32 %v10264_v48, %v19417_v2  ;;  %11103 = vmatpush2.bf16.msra.mxu0 %v14298_v58  ;;  %11216 = vmatpush2.bf16.msra.mxu1 %v14301_v49  ;;  %v14315_v2 = vld [vmem:[%s21046_s1 + $0x17a4] ss:$8 sps:$4 sm:$0xff]   ;;  %v12289_v58 = vcombine.high %v19355_v17, %v19371_v3 }
 0x2f2   :  { %v10266_v39 = vpop.f32.mrf.mxu0  ;;  %v10379_v24 = vpop.f32.mrf.mxu1  ;;  %11104 = vmatprep.subr.bf16.mxu0 %v14306_v50  ;;  %11217 = vmatprep.subr.bf16.mxu1 %v14309_v38  ;;  %v12291_v49 = vcombine.high %v18994_v42, %v1281_v47  ;;  %v21887_v50 = vld [vmem:[#allocation134_spill] sm:$0xff]  ;;  %v21888_v38 = vld [vmem:[#allocation135_spill] sm:$0xff] }
 0x2f3   :  { %v19773_v51 = vadd.f32 %v10377_v22, %v10265_v6  ;;  %v10267_v30 = vadd.f32 %v10266_v39, %v19428_v16  ;;  %v14310_v16 = vld [vmem:[%s21046_s1 + $0x16a0] ss:$8 sps:$4 sm:$0xff]   ;;  %v14320_v6 = vld [vmem:[%s21046_s1 + $0x1694] ss:$8 sps:$4 sm:$0xff]  }
 0x2f4   :  { %v10270_v40 = vpop.f32.mrf.mxu0  ;;  %v10383_v61 = vpop.f32.mrf.mxu1  ;;  %10947 = vmatmul.mubr.bf16.gmra.mxu0 %v21887_v50  ;;  %11060 = vmatmul.mubr.bf16.gmra.mxu1 %v21888_v38 }
 0x2f5   :  { %v19781_v25 = vadd.f32 %v10379_v24, %v10267_v30  ;;  %v10271_v15 = vadd.f32 %v10270_v40, %v19443_v10  ;;  %11105 = vmatpush2.bf16.msra.mxu0 %v14304_v7  ;;  %11218 = vmatpush2.bf16.msra.mxu1 %v14307_v33  ;;  %v14323_v10 = vld [vmem:[%s21046_s1 + $0x1794] ss:$8 sps:$4 sm:$0xff]   ;;  %v12290_v30 = vcombine.low %v18994_v42, %v1281_v47  ;;  %v14326_v42 = vld [vmem:[%s21046_s1 + $0x1684] ss:$8 sps:$4 sm:$0xff]  }
 0x2f6   :  { %v10272_v48 = vpop.f32.mrf.mxu0  ;;  %v10385_v22 = vpop.f32.mrf.mxu1  ;;  %11106 = vmatprep.subr.bf16.mxu0 %v14312_v55  ;;  %11219 = vmatprep.subr.bf16.mxu1 %v14315_v2  ;;  %v12288_v55 = vcombine.low %v19355_v17, %v19371_v3  ;;  %v14329_v17 = vld [vmem:[%s21046_s1 + $0x1784] ss:$8 sps:$4 sm:$0xff]  }
 0x2f7   :  { %v19796_v7 = vadd.f32 %v10383_v61, %v10271_v15  ;;  %v10273_v33 = vadd.f32 %v10272_v48, %v19450_v45  ;;  %10956 = vmatprep.mubr.bf16.mxu0 %v12289_v58  ;;  %11069 = vmatprep.mubr.bf16.mxu1 %v12291_v49  ;;  %v14318_v61 = vld [vmem:[%s21046_s1 + $0x1690] ss:$8 sps:$4 sm:$0xff]  }
 0x2f8   :  { %v10274_v39 = vpop.f32.mrf.mxu0  ;;  %v10387_v24 = vpop.f32.mrf.mxu1  ;;  %v14321_v45 = vld [vmem:[%s21046_s1 + $0x1790] ss:$8 sps:$4 sm:$0xff]  }
 0x2f9   :  { %v19802_v2 = vadd.f32 %v10385_v22, %v10273_v33  ;;  %v10275_v40 = vadd.f32 %v10274_v39, %v19465_v21  ;;  %11107 = vmatpush2.bf16.msra.mxu0 %v14310_v16  ;;  %11220 = vmatpush2.bf16.msra.mxu1 %v14313_v56  ;;  %v14324_v16 = vld [vmem:[%s21046_s1 + $0x1680] ss:$8 sps:$4 sm:$0xff]   ;;  %v14332_v22 = vld [vmem:[%s21046_s1 + $0x1874] ss:$8 sps:$4 sm:$0xff]  }
 0x2fa   :  { %v10276_v58 = vpop.f32.mrf.mxu0  ;;  %v10389_v49 = vpop.f32.mrf.mxu1  ;;  %11108 = vmatprep.subr.bf16.mxu0 %v14320_v6  ;;  %11221 = vmatprep.subr.bf16.mxu1 %v14323_v10  ;;  %v14327_v56 = vld [vmem:[%s21046_s1 + $0x1780] ss:$8 sps:$4 sm:$0xff]  }
 0x2fb   :  { %v19817_v3 = vadd.f32 %v10387_v24, %v10275_v40  ;;  %v10277_v21 = vadd.f32 %v10276_v58, %v19468_v54  ;;  %v21889_v10 = vld [vmem:[#allocation55_spill] sm:$0xff]  ;;  %v21890_v33 = vld [vmem:[#allocation56_spill] sm:$0xff]  ;;  %v14330_v40 = vld [vmem:[%s21046_s1 + $0x1870] ss:$8 sps:$4 sm:$0xff]  }
 0x2fc   :  { %v10280_v47 = vpop.f32.mrf.mxu0  ;;  %v10393_v50 = vpop.f32.mrf.mxu1  ;;  %10957 = vmatmul.mubr.bf16.gmra.mxu0 %v12288_v55  ;;  %11070 = vmatmul.mubr.bf16.gmra.mxu1 %v12290_v30 }
 0x2fd   :  { %v19820_v38 = vadd.f32 %v10389_v49, %v10277_v21  ;;  %v10281_v15 = vadd.f32 %v10280_v47, %v19483_v5  ;;  %11109 = vmatpush2.bf16.msra.mxu0 %v14318_v61  ;;  %11222 = vmatpush2.bf16.msra.mxu1 %v14321_v45  ;;  %v21892_v21 = vld [vmem:[#allocation58_spill] sm:$0xff]  ;;  %v1334_v47 = vshrl.u32 %v19524_v32, 16 }
 0x2fe   :  { %v10282_v48 = vpop.f32.mrf.mxu0  ;;  %v10395_v54 = vpop.f32.mrf.mxu1  ;;  %11110 = vmatprep.subr.bf16.mxu0 %v14326_v42  ;;  %11223 = vmatprep.subr.bf16.mxu1 %v14329_v17  ;;  %v21891_v17 = vld [vmem:[#allocation57_spill] sm:$0xff] }
 0x2ff   :  { %v19832_v6 = vadd.f32 %v10393_v50, %v10281_v15  ;;  %v10283_v5 = vadd.f32 %v10282_v48, %v19488_v43  ;;  %11112 = vmatprep.mubr.bf16.mxu0 %v21889_v10  ;;  %11225 = vmatprep.mubr.bf16.mxu1 %v21890_v33  ;;  %v14335_v43 = vld [vmem:[%s21046_s1 + $0x1864] ss:$8 sps:$4 sm:$0xff]   ;;  %v14338_v48 = vld [vmem:[%s21046_s1 + $0x1854] ss:$8 sps:$4 sm:$0xff]  }
 0x300   :  { %v10284_v39 = vpop.f32.mrf.mxu0  ;;  %v10397_v24 = vpop.f32.mrf.mxu1 }
 0x301   :  { %v19837_v30 = vadd.f32 %v10395_v54, %v10283_v5  ;;  %v10285_v55 = vadd.f32 %v10284_v39, %v19503_v52  ;;  %11111 = vmatpush2.bf16.msra.mxu0 %v14324_v16  ;;  %11224 = vmatpush2.bf16.msra.mxu1 %v14327_v56  ;;  %v14333_v16 = vld [vmem:[%s21046_s1 + $0x1860] ss:$8 sps:$4 sm:$0xff]   ;;  %v1336_v39 = vrot.slane %v1334_v47, 5  ;;  %v21897_v47 = vld [vmem:[#allocation62_spill] sm:$0xff] }
 0x302   :  { %v10286_v61 = vpop.f32.mrf.mxu0  ;;  %v10399_v45 = vpop.f32.mrf.mxu1  ;;  %11306 = vmatprep.subr.bf16.mxu0 %v14332_v22  ;;  %13098 = vmatprep.subr.bf16.mxu1 %v14332_v22  ;;  %v21893_v5 = vld [vmem:[#allocation59_spill] sm:$0xff] }
 0x303   :  { %v19846_v58 = vadd.f32 %v10397_v24, %v10285_v55  ;;  %v10287_v49 = vadd.f32 %v10286_v61, %v19512_v37  ;;  %v21895_v24 = vshll.u32 %v19524_v32, 16 }
 0x304   :  { %v10436_v42 = vpop.f32.mrf.mxu0  ;;  %v10549_v52 = vpop.f32.mrf.mxu1  ;;  %11113 = vmatmul.mubr.bf16.vlgmr.msra.gmra.mxu0 %v21891_v17  ;;  %11226 = vmatmul.mubr.bf16.vlgmr.msra.gmra.mxu1 %v21892_v21  ;;  %v21896_v21 = vld [vmem:[#allocation61_spill] sm:$0xff] }
 0x305   :  { %v19852_v50 = vadd.f32 %v10399_v45, %v10287_v49  ;;  %v10437_v15 = vadd.f32 %v10436_v42, %v19532_v44  ;;  %11307 = vmatpush1.bf16.msra.mxu0 %v14330_v40  ;;  %13114 = vmatpush1.bf16.msra.mxu1 %v14330_v40  ;;  %v21894_v44 = vld [vmem:[#allocation60_spill] sm:$0xff]  ;;  %v1337_v55 = vrot.slane %v21895_v24, 6 }
 0x306   :  { %v10438_v56 = vpop.f32.mrf.mxu0  ;;  %v10551_v37 = vpop.f32.mrf.mxu1  ;;  %11308 = vmatprep.subr.bf16.mxu0 %v14335_v43  ;;  %13099 = vmatprep.subr.bf16.mxu1 %v14335_v43  ;;  %v14341_v49 = vld [vmem:[%s21046_s1 + $0x1844] ss:$8 sps:$4 sm:$0xff]  }
 0x307   :  { %v19861_v54 = vadd.f32 %v10549_v52, %v10437_v15  ;;  %v10439_v22 = vadd.f32 %v10438_v56, %v19538_v62  ;;  %11122 = vmatprep.mubr.bf16.mxu0 %v21893_v5  ;;  %11235 = vmatprep.mubr.bf16.mxu1 %v21894_v44  ;;  %v14336_v62 = vld [vmem:[%s21046_s1 + $0x1850] ss:$8 sps:$4 sm:$0xff]   ;;  %v1306_v56 = vrot.slane %v19524_v32, 5  ;;  %v14339_v44 = vld [vmem:[%s21046_s1 + $0x1840] ss:$8 sps:$4 sm:$0xff]  }
 0x308   :  { %v10440_v10 = vpop.f32.mrf.mxu0  ;;  %v10553_v33 = vpop.f32.mrf.mxu1  ;;  %v19885_v15 = vld [vmem:[%s21045_s0 + $0xb0] sm:$0xff] }
 0x309   :  { %v19868_v40 = vadd.f32 %v10551_v37, %v10439_v22  ;;  %v10441_v61 = vadd.f32 %v10440_v10, %v19553_v13  ;;  %11309 = vmatpush1.bf16.msra.mxu0 %v14333_v16  ;;  %13115 = vmatpush1.bf16.msra.mxu1 %v14333_v16  ;;  %v11894_v16 = vrot.slane %v19885_v15, 9  ;;  %v21898_v37 = vor.u32 %v19213_v9, %v19209_v4  ;;  %v14344_v4 = vld [vmem:[%s21046_s1 + $0x1834] ss:$8 sps:$4 sm:$0xff]  }
 0x30a   :  { %v10442_v45 = vpop.f32.mrf.mxu0  ;;  %v10555_v43 = vpop.f32.mrf.mxu1  ;;  %11310 = vmatprep.subr.bf16.mxu0 %v14338_v48  ;;  %13100 = vmatprep.subr.bf16.mxu1 %v14338_v48 }
 0x30b   :  { %v19877_v42 = vadd.f32 %v10553_v33, %v10441_v61  ;;  %v10443_v52 = vadd.f32 %v10442_v45, %v19560_v59  ;;  %v1333_v48 = vrot.slane %v21898_v37, 4  ;;  %v1338_v59 = vor.u32 %v1337_v55, %v1336_v39  ;;  %v21899_v39 = vld [vmem:[#allocation29_spill] sm:$0xff] }
 0x30c   :  { %v10446_v17 = vpop.f32.mrf.mxu0  ;;  %v10559_v13 = vpop.f32.mrf.mxu1  ;;  %11123 = vmatmul.mubr.bf16.gmra.mxu0 %v21896_v21  ;;  %11236 = vmatmul.mubr.bf16.gmra.mxu1 %v21897_v47  ;;  %v1307_v61 = vsel %vm15379_vm8, %v11894_v16, %v1306_v56  ;;  %v21902_v16 = vld [vmem:[#allocation89_spill] sm:$0xff]  ;;  %v21903_v56 = vld [vmem:[#allocation91_spill] sm:$0xff] }
 0x30d   :  { %v19892_v22 = vadd.f32 %v10555_v43, %v10443_v52  ;;  %v10447_v5 = vadd.f32 %v10446_v17, %v19575_v46  ;;  %11311 = vmatpush1.bf16.msra.mxu0 %v14336_v62  ;;  %13116 = vmatpush1.bf16.msra.mxu1 %v14336_v62  ;;  %v21900_v46 = vld [vmem:[#allocation30_spill] sm:$0xff]  ;;  %v1339_v45 = vsel %vm15091_vm5, %v1333_v48, %v1338_v59 }
 0x30e   :  { %v10448_v10 = vpop.f32.mrf.mxu0  ;;  %v10561_v33 = vpop.f32.mrf.mxu1  ;;  %11312 = vmatprep.subr.bf16.mxu0 %v14341_v49  ;;  %13101 = vmatprep.subr.bf16.mxu1 %v14341_v49  ;;  %v12095_v37 = vcombine.high %v21903_v56, %v1339_v45 }
 0x30f   :  { %v19901_v9 = vadd.f32 %v10559_v13, %v10447_v5  ;;  %v10449_v32 = vadd.f32 %v10448_v10, %v19582_v23  ;;  %11132 = vmatprep.mubr.bf16.mxu0 %v21899_v39  ;;  %11245 = vmatprep.mubr.bf16.mxu1 %v21900_v46  ;;  %v14342_v23 = vld [vmem:[%s21046_s1 + $0x1830] ss:$8 sps:$4 sm:$0xff]   ;;  %v14347_v13 = vld [vmem:[%s21046_s1 + $0x1824] ss:$8 sps:$4 sm:$0xff]   ;;  %v14350_v39 = vld [vmem:[%s21046_s1 + $0x1814] ss:$8 sps:$4 sm:$0xff]  }
 0x310   :  { %v10450_v24 = vpop.f32.mrf.mxu0  ;;  %v10563_v55 = vpop.f32.mrf.mxu1  ;;  %v21904_v5 = vld [vmem:[#allocation31_spill] sm:$0xff] }
 0x311   :  { %v19910_v43 = vadd.f32 %v10561_v33, %v10449_v32  ;;  %v10451_v49 = vadd.f32 %v10450_v24, %v19597_v36  ;;  %11313 = vmatpush1.bf16.msra.mxu0 %v14339_v44  ;;  %13117 = vmatpush1.bf16.msra.mxu1 %v14339_v44  ;;  %v12093_v36 = vcombine.high %v21902_v16, %v1307_v61  ;;  %v21905_v44 = vld [vmem:[#allocation32_spill] sm:$0xff] }
 0x312   :  { %v10452_v52 = vpop.f32.mrf.mxu0  ;;  %v10565_v17 = vpop.f32.mrf.mxu1  ;;  %11314 = vmatprep.subr.bf16.mxu0 %v14344_v4  ;;  %13102 = vmatprep.subr.bf16.mxu1 %v14344_v4 }
 0x313   :  { %v19919_v21 = vadd.f32 %v10563_v55, %v10451_v49  ;;  %v10453_v47 = vadd.f32 %v10452_v52, %v19605_v31  ;;  %v14345_v31 = vld [vmem:[%s21046_s1 + $0x1820] ss:$8 sps:$4 sm:$0xff]   ;;  %v12092_v49 = vcombine.low %v21902_v16, %v1307_v61  ;;  %v14353_v61 = vld [vmem:[%s21046_s1 + $0x1804] ss:$8 sps:$4 sm:$0xff]  }
 0x314   :  { %v10456_v48 = vpop.f32.mrf.mxu0  ;;  %v10569_v59 = vpop.f32.mrf.mxu1  ;;  %11133 = vmatmul.mubr.bf16.gmra.mxu0 %v21904_v5  ;;  %11246 = vmatmul.mubr.bf16.gmra.mxu1 %v21905_v44 }
 0x315   :  { %v19926_v10 = vadd.f32 %v10565_v17, %v10453_v47  ;;  %v10457_v33 = vadd.f32 %v10456_v48, %v19620_v1  ;;  %11315 = vmatpush1.bf16.msra.mxu0 %v14342_v23  ;;  %13118 = vmatpush1.bf16.msra.mxu1 %v14342_v23  ;;  %v12094_v23 = vcombine.low %v21903_v56, %v1339_v45  ;;  %v14351_v48 = vld [vmem:[%s21046_s1 + $0x1800] ss:$8 sps:$4 sm:$0xff]  }
 0x316   :  { %v10458_v4 = vpop.f32.mrf.mxu0  ;;  %v10571_v32 = vpop.f32.mrf.mxu1  ;;  %11316 = vmatprep.subr.bf16.mxu0 %v14347_v13  ;;  %13103 = vmatprep.subr.bf16.mxu1 %v14347_v13  ;;  %v14348_v13 = vld [vmem:[%s21046_s1 + $0x1810] ss:$8 sps:$4 sm:$0xff]  }
 0x317   :  { %v19935_v46 = vadd.f32 %v10569_v59, %v10457_v33  ;;  %v10459_v24 = vadd.f32 %v10458_v4, %v19626_v20  ;;  %11142 = vmatprep.mubr.bf16.mxu0 %v12093_v36  ;;  %11255 = vmatprep.mubr.bf16.mxu1 %v12095_v37 }
 0x318   :  { %v10460_v1 = vpop.f32.mrf.mxu0  ;;  %v10573_v55 = vpop.f32.mrf.mxu1 }
 0x319   :  { %v19940_v52 = vadd.f32 %v10571_v32, %v10459_v24  ;;  %v10461_v17 = vadd.f32 %v10460_v1, %v19641_v28  ;;  %11317 = vmatpush1.bf16.msra.mxu0 %v14345_v31  ;;  %13119 = vmatpush1.bf16.msra.mxu1 %v14345_v31  ;;  %v21906_v31 = vld [vmem:[#allocation73_spill] sm:$0xff] }
 0x31a   :  { %v10462_v47 = vpop.f32.mrf.mxu0  ;;  %v10575_v20 = vpop.f32.mrf.mxu1  ;;  %11318 = vmatprep.subr.bf16.mxu0 %v14350_v39  ;;  %13104 = vmatprep.subr.bf16.mxu1 %v14350_v39  ;;  %v14354_v1 = vld [vmem:[%s21046_s1 + $0x18f0] ss:$8 sps:$4 sm:$0xff]  }
 0x31b   :  { %v19949_v16 = vadd.f32 %v10573_v55, %v10461_v17  ;;  %v10463_v45 = vadd.f32 %v10462_v47, %v19644_v19  ;;  %v14356_v19 = vld [vmem:[%s21046_s1 + $0x18f4] ss:$8 sps:$4 sm:$0xff]   ;;  %v21908_v47 = vld [vmem:[#allocation76_spill] sm:$0xff] }
 0x31c   :  { %v10466_v36 = vpop.f32.mrf.mxu0  ;;  %v10579_v28 = vpop.f32.mrf.mxu1  ;;  %11143 = vmatmul.mubr.bf16.gmra.mxu0 %v12092_v49  ;;  %11256 = vmatmul.mubr.bf16.gmra.mxu1 %v12094_v23 }
 0x31d   :  { %v19952_v56 = vadd.f32 %v10575_v20, %v10463_v45  ;;  %v10467_v37 = vadd.f32 %v10466_v36, %v19659_v12  ;;  %11319 = vmatpush1.bf16.msra.mxu0 %v14348_v13  ;;  %13120 = vmatpush1.bf16.msra.mxu1 %v14348_v13  ;;  %v21907_v12 = vld [vmem:[#allocation75_spill] sm:$0xff]  ;;  %v21909_v20 = vld [vmem:[#allocation77_spill] sm:$0xff] }
 0x31e   :  { %v10468_v59 = vpop.f32.mrf.mxu0  ;;  %v10581_v5 = vpop.f32.mrf.mxu1  ;;  %11320 = vmatprep.subr.bf16.mxu0 %v14353_v61  ;;  %13105 = vmatprep.subr.bf16.mxu1 %v14353_v61  ;;  %v1344_v61 = vshrl.u32 %v19700_v35, 16 }
 0x31f   :  { %v19961_v44 = vadd.f32 %v10579_v28, %v10467_v37  ;;  %v10469_v33 = vadd.f32 %v10468_v59, %v19664_v27  ;;  %11152 = vmatprep.mubr.bf16.mxu0 %v21906_v31  ;;  %11265 = vmatprep.mubr.bf16.mxu1 %v21907_v12  ;;  %v14359_v27 = vld [vmem:[%s21046_s1 + $0x18e4] ss:$8 sps:$4 sm:$0xff]   ;;  %v14357_v28 = vld [vmem:[%s21046_s1 + $0x18e0] ss:$8 sps:$4 sm:$0xff]  }
 0x320   :  { %v10470_v4 = vpop.f32.mrf.mxu0  ;;  %v10583_v32 = vpop.f32.mrf.mxu1  ;;  %v1346_v12 = vrot.slane %v1344_v61, 5  ;;  %v1310_v61 = vrot.slane %v19700_v35, 5 }
 0x321   :  { %v19966_v39 = vadd.f32 %v10581_v5, %v10469_v33  ;;  %v10471_v24 = vadd.f32 %v10470_v4, %v19679_v26  ;;  %11321 = vmatpush1.bf16.msra.mxu0 %v14351_v48  ;;  %13121 = vmatpush1.bf16.msra.mxu1 %v14351_v48  ;;  %v14362_v48 = vld [vmem:[%s21046_s1 + $0x18d4] ss:$8 sps:$4 sm:$0xff]   ;;  %v1347_v4 = vrot.slane %v1278_v41, 6 }
 0x322   :  { %v10472_v55 = vpop.f32.mrf.mxu0  ;;  %v10585_v49 = vpop.f32.mrf.mxu1  ;;  %11322 = vmatprep.subr.bf16.mxu0 %v14356_v19  ;;  %13106 = vmatprep.subr.bf16.mxu1 %v14356_v19  ;;  %v21910_v19 = vld [vmem:[#allocation82_spill] sm:$0xff] }
 0x323   :  { %v19975_v23 = vadd.f32 %v10583_v32, %v10471_v24  ;;  %v10473_v17 = vadd.f32 %v10472_v55, %v19688_v57 }
 0x324   :  { %v10476_v13 = vpop.f32.mrf.mxu0  ;;  %v10589_v26 = vpop.f32.mrf.mxu1  ;;  %11153 = vmatmul.mubr.bf16.gmra.mxu0 %v21908_v47  ;;  %11266 = vmatmul.mubr.bf16.gmra.mxu1 %v21909_v20  ;;  %v20014_v47 = vld [vmem:[%s21045_s0 + $0x170] sm:$0xff] }
 0x325   :  { %v19981_v45 = vadd.f32 %v10585_v49, %v10473_v17  ;;  %v10477_v36 = vadd.f32 %v10476_v13, %v19708_v60  ;;  %11323 = vmatpush2.bf16.msra.mxu0 %v14354_v1  ;;  %13122 = vmatpush2.bf16.msra.mxu1 %v14354_v1  ;;  %v21911_v60 = vld [vmem:[#allocation83_spill] sm:$0xff]  ;;  %v21912_v13 = vld [vmem:[#allocation86_spill] sm:$0xff]  ;;  %v11895_v20 = vrot.slane %v20014_v47, 9 }
 0x326   :  { %v10478_v37 = vpop.f32.mrf.mxu0  ;;  %v10591_v57 = vpop.f32.mrf.mxu1  ;;  %11324 = vmatprep.subr.bf16.mxu0 %v14359_v27  ;;  %13107 = vmatprep.subr.bf16.mxu1 %v14359_v27  ;;  %v14365_v49 = vld [vmem:[%s21046_s1 + $0x18c4] ss:$8 sps:$4 sm:$0xff]  }
 0x327   :  { %v19990_v59 = vadd.f32 %v10589_v26, %v10477_v36  ;;  %v10479_v5 = vadd.f32 %v10478_v37, %v19714_v18  ;;  %11162 = vmatprep.mubr.bf16.mxu0 %v21910_v19  ;;  %11275 = vmatprep.mubr.bf16.mxu1 %v21911_v60  ;;  %v14360_v18 = vld [vmem:[%s21046_s1 + $0x18d0] ss:$8 sps:$4 sm:$0xff]   ;;  %v21913_v26 = vld [vmem:[#allocation87_spill] sm:$0xff]  ;;  %v21914_v36 = vor.u32 %v19415_v29, %v19411_v8  ;;  %v14368_v8 = vld [vmem:[%s21046_s1 + $0x18b4] ss:$8 sps:$4 sm:$0xff]  }
 0x328   :  { %v10480_v33 = vpop.f32.mrf.mxu0  ;;  %v10593_v31 = vpop.f32.mrf.mxu1 }
 0x329   :  { %v19997_v32 = vadd.f32 %v10591_v57, %v10479_v5  ;;  %v10481_v24 = vadd.f32 %v10480_v33, %v19729_v11  ;;  %11325 = vmatpush2.bf16.msra.mxu0 %v14357_v28  ;;  %13123 = vmatpush2.bf16.msra.mxu1 %v14357_v28  ;;  %v1343_v28 = vrot.slane %v21914_v36, 4  ;;  %v21915_v33 = vld [vmem:[#allocation49_spill] sm:$0xff] }
 0x32a   :  { %v10482_v1 = vpop.f32.mrf.mxu0  ;;  %v10595_v55 = vpop.f32.mrf.mxu1  ;;  %11326 = vmatprep.subr.bf16.mxu0 %v14362_v48  ;;  %13108 = vmatprep.subr.bf16.mxu1 %v14362_v48  ;;  %v14363_v48 = vld [vmem:[%s21046_s1 + $0x18c0] ss:$8 sps:$4 sm:$0xff]  }
 0x32b   :  { %v20006_v27 = vadd.f32 %v10593_v31, %v10481_v24  ;;  %v10483_v41 = vadd.f32 %v10482_v1, %v19736_v53  ;;  %v1348_v53 = vor.u32 %v1347_v4, %v1346_v12  ;;  %v1311_v4 = vsel %vm15379_vm8, %v11895_v20, %v1310_v61  ;;  %v21918_v20 = vld [vmem:[#allocation53_spill] sm:$0xff]  ;;  %v21919_v61 = vld [vmem:[#allocation54_spill] sm:$0xff] }
 0x32c   :  { %v10486_v17 = vpop.f32.mrf.mxu0  ;;  %v10599_v11 = vpop.f32.mrf.mxu1  ;;  %11163 = vmatmul.mubr.bf16.gmra.mxu0 %v21912_v13  ;;  %11276 = vmatmul.mubr.bf16.gmra.mxu1 %v21913_v26 }
 0x32d   :  { %v20021_v37 = vadd.f32 %v10595_v55, %v10483_v41  ;;  %v10487_v57 = vadd.f32 %v10486_v17, %v19751_v14  ;;  %11327 = vmatpush2.bf16.msra.mxu0 %v14360_v18  ;;  %13124 = vmatpush2.bf16.msra.mxu1 %v14360_v18  ;;  %v21916_v14 = vld [vmem:[#allocation50_spill] sm:$0xff]  ;;  %v1349_v24 = vsel %vm15091_vm5, %v1343_v28, %v1348_v53 }
 0x32e   :  { %v10488_v5 = vpop.f32.mrf.mxu0  ;;  %v10601_v19 = vpop.f32.mrf.mxu1  ;;  %11328 = vmatprep.subr.bf16.mxu0 %v14365_v49  ;;  %13109 = vmatprep.subr.bf16.mxu1 %v14365_v49  ;;  %v21917_v17 = vld [vmem:[#allocation90_spill] sm:$0xff] }
 0x32f   :  { %v20030_v29 = vadd.f32 %v10599_v11, %v10487_v57  ;;  %v10489_v60 = vadd.f32 %v10488_v5, %v19758_v34  ;;  %11172 = vmatprep.mubr.bf16.mxu0 %v21915_v33  ;;  %11285 = vmatprep.mubr.bf16.mxu1 %v21916_v14  ;;  %v14366_v34 = vld [vmem:[%s21046_s1 + $0x18b0] ss:$8 sps:$4 sm:$0xff]   ;;  %v12295_v11 = vcombine.high %v19386_v0, %v1349_v24 }
 0x330   :  { %v10490_v31 = vpop.f32.mrf.mxu0  ;;  %v10603_v12 = vpop.f32.mrf.mxu1  ;;  %v12294_v33 = vcombine.low %v19386_v0, %v1349_v24 }
 0x331   :  { %v20039_v18 = vadd.f32 %v10601_v19, %v10489_v60  ;;  %v10491_v1 = vadd.f32 %v10490_v31, %v19773_v51  ;;  %11329 = vmatpush2.bf16.msra.mxu0 %v14363_v48  ;;  %13125 = vmatpush2.bf16.msra.mxu1 %v14363_v48  ;;  %v12293_v51 = vcombine.high %v21917_v17, %v1311_v4  ;;  %v14374_v48 = vld [vmem:[%s21046_s1 + $0x1894] ss:$8 sps:$4 sm:$0xff]  }
 0x332   :  { %v10492_v55 = vpop.f32.mrf.mxu0  ;;  %v10605_v49 = vpop.f32.mrf.mxu1  ;;  %11330 = vmatprep.subr.bf16.mxu0 %v14368_v8  ;;  %13110 = vmatprep.subr.bf16.mxu1 %v14368_v8  ;;  %v12292_v60 = vcombine.low %v21917_v17, %v1311_v4  ;;  %v14377_v4 = vld [vmem:[%s21046_s1 + $0x1884] ss:$8 sps:$4 sm:$0xff]  }
 0x333   :  { %v20048_v62 = vadd.f32 %v10603_v12, %v10491_v1  ;;  %v10493_v41 = vadd.f32 %v10492_v55, %v19781_v25  ;;  %v14369_v25 = vld [vmem:[%s21046_s1 + $0x18a0] ss:$8 sps:$4 sm:$0xff]   ;;  %v14372_v12 = vld [vmem:[%s21046_s1 + $0x1890] ss:$8 sps:$4 sm:$0xff]  }
 0x334   :  { %v10496_v13 = vpop.f32.mrf.mxu0  ;;  %v10609_v26 = vpop.f32.mrf.mxu1  ;;  %11173 = vmatmul.mubr.bf16.gmra.mxu0 %v21918_v20  ;;  %11286 = vmatmul.mubr.bf16.gmra.mxu1 %v21919_v61 }
 0x335   :  { %v20055_v36 = vadd.f32 %v10605_v49, %v10493_v41  ;;  %v10497_v28 = vadd.f32 %v10496_v13, %v19796_v7  ;;  %11331 = vmatpush2.bf16.msra.mxu0 %v14366_v34  ;;  %13126 = vmatpush2.bf16.msra.mxu1 %v14366_v34  ;;  %v21921_v13 = vld [vmem:[#allocation110_spill] sm:$0xff] }
 0x336   :  { %v10498_v53 = vpop.f32.mrf.mxu0  ;;  %v10611_v57 = vpop.f32.mrf.mxu1  ;;  %11332 = vmatprep.subr.bf16.mxu0 %v14371_v63  ;;  %13111 = vmatprep.subr.bf16.mxu1 %v14371_v63  ;;  %v14375_v63 = vld [vmem:[%s21046_s1 + $0x1880] ss:$8 sps:$4 sm:$0xff]  }
 0x337   :  { %v20064_v5 = vadd.f32 %v10609_v26, %v10497_v28  ;;  %v10499_v19 = vadd.f32 %v10498_v53, %v19802_v2  ;;  %11182 = vmatprep.mubr.bf16.mxu0 %v12293_v51  ;;  %11295 = vmatprep.mubr.bf16.mxu1 %v12295_v11  ;;  %v21920_v11 = vld [vmem:[#allocation94_spill] sm:$0xff] }
 0x338   :  { %v10500_v7 = vpop.f32.mrf.mxu0  ;;  %v10613_v8 = vpop.f32.mrf.mxu1 }
 0x339   :  { %v20069_v14 = vadd.f32 %v10611_v57, %v10499_v19  ;;  %v10501_v31 = vadd.f32 %v10500_v7, %v19817_v3  ;;  %11333 = vmatpush2.bf16.msra.mxu0 %v14369_v25  ;;  %13127 = vmatpush2.bf16.msra.mxu1 %v14369_v25  ;;  %v21922_v19 = vld [vmem:[#allocation97_spill] sm:$0xff] }
 0x33a   :  { %v10502_v1 = vpop.f32.mrf.mxu0  ;;  %v10615_v2 = vpop.f32.mrf.mxu1  ;;  %11334 = vmatprep.subr.bf16.mxu0 %v14374_v48  ;;  %13112 = vmatprep.subr.bf16.mxu1 %v14374_v48  ;;  %v21923_v7 = vld [vmem:[#allocation113_spill] sm:$0xff] }
 0x33b   :  { %v20078_v34 = vadd.f32 %v10613_v8, %v10501_v31  ;;  %v10503_v0 = vadd.f32 %v10502_v1, %v19820_v38 }
 0x33c   :  { %v10506_v24 = vpop.f32.mrf.mxu0  ;;  %v10619_v3 = vpop.f32.mrf.mxu1  ;;  %11183 = vmatmul.mubr.bf16.gmra.mxu0 %v12292_v60  ;;  %11296 = vmatmul.mubr.bf16.gmra.mxu1 %v12294_v33  ;;  %v21924_v33 = vld [vmem:[#allocation100_spill] sm:$0xff] }
 0x33d   :  { %v20081_v55 = vadd.f32 %v10615_v2, %v10503_v0  ;;  %v10507_v49 = vadd.f32 %v10506_v24, %v19832_v6  ;;  %11335 = vmatpush2.bf16.msra.mxu0 %v14372_v12  ;;  %13128 = vmatpush2.bf16.msra.mxu1 %v14372_v12 }
 0x33e   :  { %v10508_v41 = vpop.f32.mrf.mxu0  ;;  %v10621_v17 = vpop.f32.mrf.mxu1  ;;  %11336 = vmatprep.subr.bf16.mxu0 %v14377_v4  ;;  %13113 = vmatprep.subr.bf16.mxu1 %v14377_v4 }
 0x33f   :  { %v20087_v51 = vadd.f32 %v10619_v3, %v10507_v49  ;;  %v10509_v38 = vadd.f32 %v10508_v41, %v19837_v30  ;;  %11338 = vmatprep.mubr.bf16.mxu0 %v21920_v11  ;;  %11378 = vmatprep.mubr.bf16.mxu1 %v21921_v13 }
 0x340   :  { %v10510_v26 = vpop.f32.mrf.mxu0  ;;  %v10623_v6 = vpop.f32.mrf.mxu1 }
 0x341   :  { %v20092_v20 = vadd.f32 %v10621_v17, %v10509_v38  ;;  %v10511_v61 = vadd.f32 %v10510_v26, %v19846_v58  ;;  %11337 = vmatpush2.bf16.msra.mxu0 %v14375_v63  ;;  %13129 = vmatpush2.bf16.msra.mxu1 %v14375_v63  ;;  %v21925_v58 = vld [vmem:[#allocation117_spill] sm:$0xff]  ;;  %v14428_v63 = vld [vmem:[%s21045_s0 + $0xb8] sm:$0x33]  ;;  %v11897_v17 = vrot.slane %v20014_v47, 10  ;;  %v1374_v38 = vrot.slane %v19700_v35, 6 }
 0x342   :  { %v10512_v28 = vpop.f32.mrf.mxu0  ;;  %v10625_v25 = vpop.f32.mrf.mxu1  ;;  %v1370_v41 = vrot.slane %v14428_v63, 6  ;;  %v21933_v63 = vld [vmem:[#allocation64_spill] sm:$0xff] }
 0x343   :  { %v20095_v53 = vadd.f32 %v10623_v6, %v10511_v61  ;;  %v10513_v57 = vadd.f32 %v10512_v28, %v19852_v50  ;;  %v21927_v6 = vld [vmem:[#allocation121_spill] sm:$0xff]  ;;  %v21928_v28 = vld [vmem:[#allocation124_spill] sm:$0xff] }
 0x344   :  { %v10662_v48 = vpop.f32.mrf.mxu0  ;;  %v10775_v30 = vpop.f32.mrf.mxu1  ;;  %11339 = vmatmul.mubr.bf16.vlgmr.msra.gmra.mxu0 %v21922_v19  ;;  %11379 = vmatmul.mubr.bf16.vlgmr.msra.gmra.mxu1 %v21923_v7 }
 0x345   :  { %v20100_v8 = vadd.f32 %v10625_v25, %v10513_v57  ;;  %v10663_v60 = vadd.f32 %v10662_v48, %v19861_v54  ;;  %11348 = vmatprep.mubr.bf16.mxu0 %v21924_v33  ;;  %11388 = vmatprep.mubr.bf16.mxu1 %v21925_v58  ;;  %v11896_v54 = vrot.slane %v19885_v15, 10  ;;  %v21929_v25 = vld [vmem:[#allocation69_spill] sm:$0xff]  ;;  %v21931_v58 = vld [vmem:[#allocation95_spill] sm:$0xff] }
 0x346   :  { %v10664_v31 = vpop.f32.mrf.mxu0  ;;  %v10777_v12 = vpop.f32.mrf.mxu1 }
 0x347   :  { %v20105_v1 = vadd.f32 %v10775_v30, %v10663_v60  ;;  %v10665_v50 = vadd.f32 %v10664_v31, %v19868_v40  ;;  %v1371_v48 = vsel %vm15929_vm11, %v11896_v54, %v1370_v41 }
 0x348   :  { %v10666_v2 = vpop.f32.mrf.mxu0  ;;  %v10779_v4 = vpop.f32.mrf.mxu1  ;;  %v12097_v31 = vcombine.high %v21931_v58, %v1371_v48 }
 0x349   :  { %v20108_v0 = vadd.f32 %v10777_v12, %v10665_v50  ;;  %v10667_v24 = vadd.f32 %v10666_v2, %v19877_v42  ;;  %v21926_v42 = vld [vmem:[#allocation102_spill] sm:$0xff]  ;;  %v21932_v12 = vld [vmem:[#allocation123_spill] sm:$0xff] }
 0x34a   :  { %v10668_v3 = vpop.f32.mrf.mxu0  ;;  %v10781_v49 = vpop.f32.mrf.mxu1 }
 0x34b   :  { %v20117_v40 = vadd.f32 %v10779_v4, %v10667_v24  ;;  %v10669_v11 = vadd.f32 %v10668_v3, %v19892_v22  ;;  %v1375_v22 = vsel %vm15929_vm11, %v11897_v17, %v1374_v38 }
 0x34c   :  { %v10672_v13 = vpop.f32.mrf.mxu0  ;;  %v10785_v26 = vpop.f32.mrf.mxu1  ;;  %11349 = vmatmul.mubr.bf16.gmra.mxu0 %v21926_v42  ;;  %11389 = vmatmul.mubr.bf16.gmra.mxu1 %v21927_v6  ;;  %v12297_v50 = vcombine.high %v21932_v12, %v1375_v22  ;;  %v12096_v42 = vcombine.low %v21931_v58, %v1371_v48  ;;  %v12296_v6 = vcombine.low %v21932_v12, %v1375_v22 }
 0x34d   :  { %v20122_v15 = vadd.f32 %v10781_v49, %v10669_v11  ;;  %v10673_v61 = vadd.f32 %v10672_v13, %v19901_v9  ;;  %11358 = vmatprep.mubr.bf16.mxu0 %v21928_v28  ;;  %11398 = vmatprep.mubr.bf16.mxu1 %v21929_v25 }
 0x34e   :  { %v10674_v47 = vpop.f32.mrf.mxu0  ;;  %v10787_v35 = vpop.f32.mrf.mxu1 }
 0x34f   :  { %v20131_v30 = vadd.f32 %v10785_v26, %v10673_v61  ;;  %v10675_v19 = vadd.f32 %v10674_v47, %v19910_v43  ;;  %v21934_v43 = vld [vmem:[#allocation128_spill] sm:$0xff] }
 0x350   :  { %v10676_v7 = vpop.f32.mrf.mxu0  ;;  %v10789_v60 = vpop.f32.mrf.mxu1 }
 0x351   :  { %v20134_v33 = vadd.f32 %v10787_v35, %v10675_v19  ;;  %v10677_v9 = vadd.f32 %v10676_v7, %v19919_v21 }
 0x352   :  { %v10678_v2 = vpop.f32.mrf.mxu0  ;;  %v10791_v4 = vpop.f32.mrf.mxu1 }
 0x353   :  { %v20139_v24 = vadd.f32 %v10789_v60, %v10677_v9  ;;  %v10679_v3 = vadd.f32 %v10678_v2, %v19926_v10 }
 0x354   :  { %v10682_v49 = vpop.f32.mrf.mxu0  ;;  %v10795_v54 = vpop.f32.mrf.mxu1  ;;  %11359 = vmatmul.mubr.bf16.gmra.mxu0 %v21933_v63  ;;  %11399 = vmatmul.mubr.bf16.gmra.mxu1 %v21934_v43 }
 0x355   :  { %v20144_v41 = vadd.f32 %v10791_v4, %v10679_v3  ;;  %v10683_v21 = vadd.f32 %v10682_v49, %v19935_v46  ;;  %11368 = vmatprep.mubr.bf16.mxu0 %v12097_v31  ;;  %11408 = vmatprep.mubr.bf16.mxu1 %v12297_v50 }
 0x356   :  { %v10684_v17 = vpop.f32.mrf.mxu0  ;;  %v10797_v38 = vpop.f32.mrf.mxu1 }
 0x357   :  { %v20147_v11 = vadd.f32 %v10795_v54, %v10683_v21  ;;  %v10685_v13 = vadd.f32 %v10684_v17, %v19940_v52 }
 0x358   :  { %v10686_v26 = vpop.f32.mrf.mxu0  ;;  %v10799_v10 = vpop.f32.mrf.mxu1 }
 0x359   :  { %v20152_v61 = vadd.f32 %v10797_v38, %v10685_v13  ;;  %v10687_v28 = vadd.f32 %v10686_v26, %v19949_v16 }
 0x35a   :  { %v10688_v25 = vpop.f32.mrf.mxu0  ;;  %v10801_v46 = vpop.f32.mrf.mxu1 }
 0x35b   :  { %v20155_v47 = vadd.f32 %v10799_v10, %v10687_v28  ;;  %v10689_v35 = vadd.f32 %v10688_v25, %v19952_v56 }
 0x35c   :  { %v10692_v57 = vpop.f32.mrf.mxu0  ;;  %v10805_v19 = vpop.f32.mrf.mxu1  ;;  %11369 = vmatmul.mubr.bf16.gmra.mxu0 %v12096_v42  ;;  %11409 = vmatmul.mubr.bf16.gmra.mxu1 %v12296_v6 }
 0x35d   :  { %v20158_v52 = vadd.f32 %v10801_v46, %v10689_v35  ;;  %v10693_v48 = vadd.f32 %v10692_v57, %v19961_v44 }
 0x35e   :  { %v10694_v7 = vpop.f32.mrf.mxu0  ;;  %v10807_v22 = vpop.f32.mrf.mxu1 }
 0x35f   :  { %v20161_v60 = vadd.f32 %v10805_v19, %v10693_v48  ;;  %v10695_v16 = vadd.f32 %v10694_v7, %v19966_v39 }
 0x360   :  { %v10696_v9 = vpop.f32.mrf.mxu0  ;;  %v10809_v58 = vpop.f32.mrf.mxu1 }
 0x361   :  { %v20164_v31 = vadd.f32 %v10807_v22, %v10695_v16  ;;  %v10697_v56 = vadd.f32 %v10696_v9, %v19975_v23 }
 0x362   :  { %v10698_v12 = vpop.f32.mrf.mxu0  ;;  %v10811_v50 = vpop.f32.mrf.mxu1 }
 0x363   :  { %v20167_v2 = vadd.f32 %v10809_v58, %v10697_v56  ;;  %v10699_v4 = vadd.f32 %v10698_v12, %v19981_v45 }
 0x364   :  { %v10702_v3 = vpop.f32.mrf.mxu0  ;;  %v10815_v44 = vpop.f32.mrf.mxu1 }
 0x365   :  { %v20170_v49 = vadd.f32 %v10811_v50, %v10699_v4  ;;  %v10703_v54 = vadd.f32 %v10702_v3, %v19990_v59 }
 0x366   :  { %v10704_v63 = vpop.f32.mrf.mxu0  ;;  %v10817_v39 = vpop.f32.mrf.mxu1 }
 0x367   :  { %v20173_v43 = vadd.f32 %v10815_v44, %v10703_v54  ;;  %v10705_v21 = vadd.f32 %v10704_v63, %v19997_v32 }
 0x368   :  { %v10706_v17 = vpop.f32.mrf.mxu0  ;;  %v10819_v23 = vpop.f32.mrf.mxu1 }
 0x369   :  { %v20176_v38 = vadd.f32 %v10817_v39, %v10705_v21  ;;  %v10707_v13 = vadd.f32 %v10706_v17, %v20006_v27 }
 0x36a   :  { %v10708_v26 = vpop.f32.mrf.mxu0  ;;  %v10821_v45 = vpop.f32.mrf.mxu1 }
 0x36b   :  { %v20179_v10 = vadd.f32 %v10819_v23, %v10707_v13  ;;  %v10709_v42 = vadd.f32 %v10708_v26, %v20021_v37 }
 0x36c   :  { %v10712_v6 = vpop.f32.mrf.mxu0  ;;  %v10825_v59 = vpop.f32.mrf.mxu1 }
 0x36d   :  { %v20182_v28 = vadd.f32 %v10821_v45, %v10709_v42  ;;  %v10713_v25 = vadd.f32 %v10712_v6, %v20030_v29 }
 0x36e   :  { %v10714_v46 = vpop.f32.mrf.mxu0  ;;  %v10827_v32 = vpop.f32.mrf.mxu1 }
 0x36f   :  { %v20185_v35 = vadd.f32 %v10825_v59, %v10713_v25  ;;  %v10715_v57 = vadd.f32 %v10714_v46, %v20039_v18 }
 0x370   :  { %v10716_v19 = vpop.f32.mrf.mxu0  ;;  %v10829_v27 = vpop.f32.mrf.mxu1 }
 0x371   :  { %v20188_v48 = vadd.f32 %v10827_v32, %v10715_v57  ;;  %v10717_v7 = vadd.f32 %v10716_v19, %v20048_v62 }
 0x372   :  { %v10718_v22 = vpop.f32.mrf.mxu0  ;;  %v10831_v37 = vpop.f32.mrf.mxu1 }
 0x373   :  { %v20191_v16 = vadd.f32 %v10829_v27, %v10717_v7  ;;  %v10719_v9 = vadd.f32 %v10718_v22, %v20055_v36 }
 0x374   :  { %v10722_v58 = vpop.f32.mrf.mxu0  ;;  %v10835_v29 = vpop.f32.mrf.mxu1 }
 0x375   :  { %v20194_v56 = vadd.f32 %v10831_v37, %v10719_v9  ;;  %v10723_v12 = vadd.f32 %v10722_v58, %v20064_v5 }
 0x376   :  { %v10724_v50 = vpop.f32.mrf.mxu0  ;;  %v10837_v18 = vpop.f32.mrf.mxu1 }
 0x377   :  { %v20197_v4 = vadd.f32 %v10835_v29, %v10723_v12  ;;  %v10725_v3 = vadd.f32 %v10724_v50, %v20069_v14 }
 0x378   :  { %v10726_v44 = vpop.f32.mrf.mxu0  ;;  %v10839_v62 = vpop.f32.mrf.mxu1 }
 0x379   :  { %v20200_v54 = vadd.f32 %v10837_v18, %v10725_v3  ;;  %v10727_v63 = vadd.f32 %v10726_v44, %v20078_v34 }
 0x37a   :  { %v10728_v39 = vpop.f32.mrf.mxu0  ;;  %v10841_v36 = vpop.f32.mrf.mxu1 }
 0x37b   :  { %v20203_v21 = vadd.f32 %v10839_v62, %v10727_v63  ;;  %v10729_v17 = vadd.f32 %v10728_v39, %v20081_v55 }
 0x37c   :  { %v10732_v23 = vpop.f32.mrf.mxu0  ;;  %v10845_v5 = vpop.f32.mrf.mxu1 }
 0x37d   :  { %v20206_v13 = vadd.f32 %v10841_v36, %v10729_v17  ;;  %v10733_v26 = vadd.f32 %v10732_v23, %v20087_v51 }
 0x37e   :  { %v10734_v45 = vpop.f32.mrf.mxu0  ;;  %v10847_v14 = vpop.f32.mrf.mxu1 }
 0x37f   :  { %v20209_v42 = vadd.f32 %v10845_v5, %v10733_v26  ;;  %v10735_v6 = vadd.f32 %v10734_v45, %v20092_v20 }
 0x380   :  { %v10736_v59 = vpop.f32.mrf.mxu0  ;;  %v10849_v34 = vpop.f32.mrf.mxu1 }
 0x381   :  { %v20212_v25 = vadd.f32 %v10847_v14, %v10735_v6  ;;  %v10737_v46 = vadd.f32 %v10736_v59, %v20095_v53 }
 0x382   :  { %v10738_v32 = vpop.f32.mrf.mxu0  ;;  %v10851_v55 = vpop.f32.mrf.mxu1 }
 0x383   :  { %v20215_v57 = vadd.f32 %v10849_v34, %v10737_v46  ;;  %v10739_v19 = vadd.f32 %v10738_v32, %v20100_v8 }
 0x384   :  { %v10888_v27 = vpop.f32.mrf.mxu0  ;;  %v11001_v51 = vpop.f32.mrf.mxu1 }
 0x385   :  { %v20218_v7 = vadd.f32 %v10851_v55, %v10739_v19  ;;  %v10889_v22 = vadd.f32 %v10888_v27, %v20105_v1 }
 0x386   :  { %v10890_v37 = vpop.f32.mrf.mxu0  ;;  %v11003_v20 = vpop.f32.mrf.mxu1 }
 0x387   :  { %v20221_v9 = vadd.f32 %v11001_v51, %v10889_v22  ;;  %v10891_v58 = vadd.f32 %v10890_v37, %v20108_v0 }
 0x388   :  { %v10892_v29 = vpop.f32.mrf.mxu0  ;;  %v11005_v53 = vpop.f32.mrf.mxu1 }
 0x389   :  { %v20224_v12 = vadd.f32 %v11003_v20, %v10891_v58  ;;  %v10893_v50 = vadd.f32 %v10892_v29, %v20117_v40 }
 0x38a   :  { %v10894_v18 = vpop.f32.mrf.mxu0  ;;  %v11007_v8 = vpop.f32.mrf.mxu1 }
 0x38b   :  { %v20227_v3 = vadd.f32 %v11005_v53, %v10893_v50  ;;  %v10895_v44 = vadd.f32 %v10894_v18, %v20122_v15 }
 0x38c   :  { %v10898_v62 = vpop.f32.mrf.mxu0  ;;  %v11011_v1 = vpop.f32.mrf.mxu1 }
 0x38d   :  { %v20230_v63 = vadd.f32 %v11007_v8, %v10895_v44  ;;  %v10899_v39 = vadd.f32 %v10898_v62, %v20131_v30 }
 0x38e   :  { %v10900_v36 = vpop.f32.mrf.mxu0  ;;  %v11013_v0 = vpop.f32.mrf.mxu1 }
 0x38f   :  { %v20233_v17 = vadd.f32 %v11011_v1, %v10899_v39  ;;  %v10901_v23 = vadd.f32 %v10900_v36, %v20134_v33 }
 0x390   :  { %v10902_v5 = vpop.f32.mrf.mxu0  ;;  %v11015_v40 = vpop.f32.mrf.mxu1 }
 0x391   :  { %v20236_v26 = vadd.f32 %v11013_v0, %v10901_v23  ;;  %v10903_v45 = vadd.f32 %v10902_v5, %v20139_v24 }
 0x392   :  { %v10904_v14 = vpop.f32.mrf.mxu0  ;;  %v11017_v15 = vpop.f32.mrf.mxu1 }
 0x393   :  { %v20239_v6 = vadd.f32 %v11015_v40, %v10903_v45  ;;  %v10905_v59 = vadd.f32 %v10904_v14, %v20144_v41 }
 0x394   :  { %v10908_v34 = vpop.f32.mrf.mxu0  ;;  %v11021_v30 = vpop.f32.mrf.mxu1 }
 0x395   :  { %v20242_v46 = vadd.f32 %v11017_v15, %v10905_v59  ;;  %v10909_v32 = vadd.f32 %v10908_v34, %v20147_v11 }
 0x396   :  { %v10910_v55 = vpop.f32.mrf.mxu0  ;;  %v11023_v33 = vpop.f32.mrf.mxu1 }
 0x397   :  { %v20245_v19 = vadd.f32 %v11021_v30, %v10909_v32  ;;  %v10911_v27 = vadd.f32 %v10910_v55, %v20152_v61 }
 0x398   :  { %v10912_v51 = vpop.f32.mrf.mxu0  ;;  %v11025_v24 = vpop.f32.mrf.mxu1 }
 0x399   :  { %v20248_v22 = vadd.f32 %v11023_v33, %v10911_v27  ;;  %v10913_v37 = vadd.f32 %v10912_v51, %v20155_v47 }
 0x39a   :  { %v10914_v20 = vpop.f32.mrf.mxu0  ;;  %v11027_v41 = vpop.f32.mrf.mxu1 }
 0x39b   :  { %v20251_v58 = vadd.f32 %v11025_v24, %v10913_v37  ;;  %v10915_v29 = vadd.f32 %v10914_v20, %v20158_v52 }
 0x39c   :  { %v10918_v53 = vpop.f32.mrf.mxu0  ;;  %v11031_v11 = vpop.f32.mrf.mxu1 }
 0x39d   :  { %v20254_v50 = vadd.f32 %v11027_v41, %v10915_v29  ;;  %v10919_v18 = vadd.f32 %v10918_v53, %v20161_v60 }
 0x39e   :  { %v10920_v8 = vpop.f32.mrf.mxu0  ;;  %v11033_v61 = vpop.f32.mrf.mxu1 }
 0x39f   :  { %v20257_v44 = vadd.f32 %v11031_v11, %v10919_v18  ;;  %v10921_v62 = vadd.f32 %v10920_v8, %v20164_v31 }
 0x3a0   :  { %v10922_v1 = vpop.f32.mrf.mxu0  ;;  %v11035_v47 = vpop.f32.mrf.mxu1 }
 0x3a1   :  { %v20260_v39 = vadd.f32 %v11033_v61, %v10921_v62  ;;  %v10923_v36 = vadd.f32 %v10922_v1, %v20167_v2 }
 0x3a2   :  { %v10924_v0 = vpop.f32.mrf.mxu0  ;;  %v11037_v52 = vpop.f32.mrf.mxu1 }
 0x3a3   :  { %v20263_v23 = vadd.f32 %v11035_v47, %v10923_v36  ;;  %v10925_v5 = vadd.f32 %v10924_v0, %v20170_v49 }
 0x3a4   :  { %v10928_v40 = vpop.f32.mrf.mxu0  ;;  %v11041_v60 = vpop.f32.mrf.mxu1 }
 0x3a5   :  { %v20266_v45 = vadd.f32 %v11037_v52, %v10925_v5  ;;  %v10929_v14 = vadd.f32 %v10928_v40, %v20173_v43 }
 0x3a6   :  { %v10930_v15 = vpop.f32.mrf.mxu0  ;;  %v11043_v31 = vpop.f32.mrf.mxu1 }
 0x3a7   :  { %v20269_v59 = vadd.f32 %v11041_v60, %v10929_v14  ;;  %v10931_v34 = vadd.f32 %v10930_v15, %v20176_v38 }
 0x3a8   :  { %v10932_v30 = vpop.f32.mrf.mxu0  ;;  %v11045_v2 = vpop.f32.mrf.mxu1 }
 0x3a9   :  { %v20272_v32 = vadd.f32 %v11043_v31, %v10931_v34  ;;  %v10933_v55 = vadd.f32 %v10932_v30, %v20179_v10 }
 0x3aa   :  { %v10934_v33 = vpop.f32.mrf.mxu0  ;;  %v11047_v49 = vpop.f32.mrf.mxu1 }
 0x3ab   :  { %v20275_v27 = vadd.f32 %v11045_v2, %v10933_v55  ;;  %v10935_v51 = vadd.f32 %v10934_v33, %v20182_v28 }
 0x3ac   :  { %v10938_v24 = vpop.f32.mrf.mxu0  ;;  %v11051_v43 = vpop.f32.mrf.mxu1 }
 0x3ad   :  { %v20278_v37 = vadd.f32 %v11047_v49, %v10935_v51  ;;  %v10939_v20 = vadd.f32 %v10938_v24, %v20185_v35 }
 0x3ae   :  { %v10940_v41 = vpop.f32.mrf.mxu0  ;;  %v11053_v38 = vpop.f32.mrf.mxu1 }
 0x3af   :  { %v20281_v29 = vadd.f32 %v11051_v43, %v10939_v20  ;;  %v10941_v53 = vadd.f32 %v10940_v41, %v20188_v48 }
 0x3b0   :  { %v10942_v11 = vpop.f32.mrf.mxu0  ;;  %v11055_v10 = vpop.f32.mrf.mxu1 }
 0x3b1   :  { %v20284_v18 = vadd.f32 %v11053_v38, %v10941_v53  ;;  %v10943_v8 = vadd.f32 %v10942_v11, %v20191_v16 }
 0x3b2   :  { %v10944_v61 = vpop.f32.mrf.mxu0  ;;  %v11057_v28 = vpop.f32.mrf.mxu1 }
 0x3b3   :  { %21935 = vst [vmem:[#allocation96_spill] sm:$0xff] %v20284_v18  ;;  %v20287_v62 = vadd.f32 %v11055_v10, %v10943_v8  ;;  %v10945_v1 = vadd.f32 %v10944_v61, %v20194_v56 }
 0x3b4   :  { %v10948_v47 = vpop.f32.mrf.mxu0  ;;  %v11061_v35 = vpop.f32.mrf.mxu1 }
 0x3b5   :  { %21936 = vst [vmem:[#allocation101_spill] sm:$0xff] %v20287_v62  ;;  %v20290_v36 = vadd.f32 %v11057_v28, %v10945_v1  ;;  %v10949_v0 = vadd.f32 %v10948_v47, %v20197_v4 }
 0x3b6   :  { %v10950_v52 = vpop.f32.mrf.mxu0  ;;  %v11063_v48 = vpop.f32.mrf.mxu1 }
 0x3b7   :  { %21937 = vst [vmem:[#allocation136_spill] sm:$0xff] %v20290_v36  ;;  %v20293_v5 = vadd.f32 %v11061_v35, %v10949_v0  ;;  %v10951_v40 = vadd.f32 %v10950_v52, %v20200_v54 }
 0x3b8   :  { %v10952_v60 = vpop.f32.mrf.mxu0  ;;  %v11065_v16 = vpop.f32.mrf.mxu1 }
 0x3b9   :  { %21938 = vst [vmem:[#allocation103_spill] sm:$0xff] %v20293_v5  ;;  %v20296_v14 = vadd.f32 %v11063_v48, %v10951_v40  ;;  %v10953_v15 = vadd.f32 %v10952_v60, %v20203_v21 }
 0x3ba   :  { %v10954_v31 = vpop.f32.mrf.mxu0  ;;  %v11067_v56 = vpop.f32.mrf.mxu1 }
 0x3bb   :  { %21939 = vst [vmem:[#allocation104_spill] sm:$0xff] %v20296_v14  ;;  %v20299_v34 = vadd.f32 %v11065_v16, %v10953_v15  ;;  %v10955_v30 = vadd.f32 %v10954_v31, %v20206_v13 }
 0x3bc   :  { %v10958_v2 = vpop.f32.mrf.mxu0  ;;  %v11071_v4 = vpop.f32.mrf.mxu1 }
 0x3bd   :  { %21940 = vst [vmem:[#allocation105_spill] sm:$0xff] %v20299_v34  ;;  %v20302_v55 = vadd.f32 %v11067_v56, %v10955_v30  ;;  %v10959_v33 = vadd.f32 %v10958_v2, %v20209_v42 }
 0x3be   :  { %v10960_v49 = vpop.f32.mrf.mxu0  ;;  %v11073_v54 = vpop.f32.mrf.mxu1 }
 0x3bf   :  { %21941 = vst [vmem:[#allocation106_spill] sm:$0xff] %v20302_v55  ;;  %v20305_v51 = vadd.f32 %v11071_v4, %v10959_v33  ;;  %v10961_v24 = vadd.f32 %v10960_v49, %v20212_v25 }
 0x3c0   :  { %v10962_v43 = vpop.f32.mrf.mxu0  ;;  %v11075_v21 = vpop.f32.mrf.mxu1 }
 0x3c1   :  { %21942 = vst [vmem:[#allocation107_spill] sm:$0xff] %v20305_v51  ;;  %v20308_v20 = vadd.f32 %v11073_v54, %v10961_v24  ;;  %v10963_v41 = vadd.f32 %v10962_v43, %v20215_v57 }
 0x3c2   :  { %v10964_v38 = vpop.f32.mrf.mxu0  ;;  %v11077_v13 = vpop.f32.mrf.mxu1 }
 0x3c3   :  { %21943 = vst [vmem:[#allocation111_spill] sm:$0xff] %v20308_v20  ;;  %v20311_v53 = vadd.f32 %v11075_v21, %v10963_v41  ;;  %v10965_v11 = vadd.f32 %v10964_v38, %v20218_v7 }
 0x3c4   :  { %v11114_v10 = vpop.f32.mrf.mxu0  ;;  %v11227_v42 = vpop.f32.mrf.mxu1 }
 0x3c5   :  { %21944 = vst [vmem:[#allocation112_spill] sm:$0xff] %v20311_v53  ;;  %v20314_v8 = vadd.f32 %v11077_v13, %v10965_v11  ;;  %v11115_v61 = vadd.f32 %v11114_v10, %v20221_v9 }
 0x3c6   :  { %v11116_v28 = vpop.f32.mrf.mxu0  ;;  %v20317_v25 = vpop.f32.mrf.mxu1 }
 0x3c7   :  { %21945 = vst [vmem:[#allocation118_spill] sm:$0xff] %v20314_v8  ;;  %v20319_v1 = vadd.f32 %v11227_v42, %v11115_v61  ;;  %v20322_v47 = vadd.f32 %v11116_v28, %v20224_v12 }
 0x3c8   :  { %v11118_v57 = vpop.f32.mrf.mxu0  ;;  %v20324_v35 = vpop.f32.mrf.mxu1 }
 0x3c9   :  { %v20327_v0 = vadd.f32 %v11118_v57, %v20227_v3 }
 0x3ca   :  { %v11120_v7 = vpop.f32.mrf.mxu0  ;;  %v20329_v52 = vpop.f32.mrf.mxu1 }
 0x3cb   :  { %v20332_v48 = vadd.f32 %v11120_v7, %v20230_v63 }
 0x3cc   :  { %v11124_v9 = vpop.f32.mrf.mxu0  ;;  %v20334_v40 = vpop.f32.mrf.mxu1 }
 0x3cd   :  { %v20337_v60 = vadd.f32 %v11124_v9, %v20233_v17 }
 0x3ce   :  { %v11126_v12 = vpop.f32.mrf.mxu0  ;;  %v20339_v16 = vpop.f32.mrf.mxu1 }
 0x3cf   :  { %v20342_v15 = vadd.f32 %v11126_v12, %v20236_v26 }
 0x3d0   :  { %v11128_v3 = vpop.f32.mrf.mxu0  ;;  %v20344_v31 = vpop.f32.mrf.mxu1 }
 0x3d1   :  { %v20347_v56 = vadd.f32 %v11128_v3, %v20239_v6 }
 0x3d2   :  { %v11130_v63 = vpop.f32.mrf.mxu0  ;;  %v20349_v30 = vpop.f32.mrf.mxu1 }
 0x3d3   :  { %v20352_v2 = vadd.f32 %v11130_v63, %v20242_v46 }
 0x3d4   :  { %v11134_v17 = vpop.f32.mrf.mxu0  ;;  %v20354_v4 = vpop.f32.mrf.mxu1 }
 0x3d5   :  { %v20357_v33 = vadd.f32 %v11134_v17, %v20245_v19 }
 0x3d6   :  { %v11136_v26 = vpop.f32.mrf.mxu0  ;;  %v20359_v49 = vpop.f32.mrf.mxu1 }
 0x3d7   :  { %v20362_v54 = vadd.f32 %v11136_v26, %v20248_v22 }
 0x3d8   :  { %v11138_v6 = vpop.f32.mrf.mxu0  ;;  %v20364_v24 = vpop.f32.mrf.mxu1 }
 0x3d9   :  { %v20367_v43 = vadd.f32 %v11138_v6, %v20251_v58 }
 0x3da   :  { %v11140_v46 = vpop.f32.mrf.mxu0  ;;  %v20369_v21 = vpop.f32.mrf.mxu1 }
 0x3db   :  { %v20372_v41 = vadd.f32 %v11140_v46, %v20254_v50 }
 0x3dc   :  { %v11144_v19 = vpop.f32.mrf.mxu0  ;;  %v20374_v38 = vpop.f32.mrf.mxu1 }
 0x3dd   :  { %v20377_v13 = vadd.f32 %v11144_v19, %v20257_v44 }
 0x3de   :  { %v20379_v22 = vpop.f32.mrf.mxu0  ;;  %v20381_v11 = vpop.f32.mrf.mxu1 }
 0x3e0   :  { %v20383_v10 = vpop.f32.mrf.mxu0  ;;  %v20385_v58 = vpop.f32.mrf.mxu1 }
 0x3e2   :  { %v20387_v42 = vpop.f32.mrf.mxu0  ;;  %v20389_v61 = vpop.f32.mrf.mxu1 }
 0x3e4   :  { %v20391_v50 = vpop.f32.mrf.mxu0  ;;  %v20393_v28 = vpop.f32.mrf.mxu1 }
 0x3e6   :  { %v20395_v57 = vpop.f32.mrf.mxu0  ;;  %v20397_v44 = vpop.f32.mrf.mxu1 }
 0x3e8   :  { %v20399_v7 = vpop.f32.mrf.mxu0  ;;  %v20401_v9 = vpop.f32.mrf.mxu1 }
 0x3ea   :  { %v20403_v12 = vpop.f32.mrf.mxu0  ;;  %v20405_v3 = vpop.f32.mrf.mxu1 }
 0x3eb   :  { %21946 = vst [vmem:[#allocation70_spill] sm:$0xff] %v20405_v3 }
 0x3ec   :  { %v20407_v63 = vpop.f32.mrf.mxu0  ;;  %v20409_v17 = vpop.f32.mrf.mxu1 }
 0x3ed   :  { %21947 = vst [vmem:[#allocation122_spill] sm:$0xff] %v20409_v17 }
 0x3ee   :  { %v20411_v26 = vpop.f32.mrf.mxu0  ;;  %v20413_v6 = vpop.f32.mrf.mxu1 }
 0x3ef   :  { %21948 = vst [vmem:[#allocation13_spill] sm:$0xff] %v20411_v26  ;;  %21949 = vst [vmem:[#allocation68_spill] sm:$0xff] %v20413_v6 }
 0x3f0   :  { %v20415_v46 = vpop.f32.mrf.mxu0  ;;  %v20417_v19 = vpop.f32.mrf.mxu1 }
 0x3f1   :  { %21950 = vst [vmem:[#allocation8_spill] sm:$0xff] %v20415_v46  ;;  %21951 = vst [vmem:[#allocation71_spill] sm:$0xff] %v20417_v19 }
 0x3f2   :  { %v20419_v8 = vpop.f32.mrf.mxu0  ;;  %v20421_v53 = vpop.f32.mrf.mxu1 }
 0x3f3   :  { %21952 = vst [vmem:[#allocation19_spill] sm:$0xff] %v20419_v8  ;;  %21953 = vst [vmem:[#allocation72_spill] sm:$0xff] %v20421_v53 }
 0x3f4   :  { %v20423_v20 = vpop.f32.mrf.mxu0  ;;  %v20425_v51 = vpop.f32.mrf.mxu1 }
 0x3f5   :  { %21954 = vst [vmem:[#allocation14_spill] sm:$0xff] %v20423_v20  ;;  %21955 = vst [vmem:[#allocation74_spill] sm:$0xff] %v20425_v51 }
 0x3f6   :  { %v20427_v55 = vpop.f32.mrf.mxu0  ;;  %v20429_v34 = vpop.f32.mrf.mxu1 }
 0x3f7   :  { %21956 = vst [vmem:[#allocation20_spill] sm:$0xff] %v20427_v55  ;;  %21957 = vst [vmem:[#allocation125_spill] sm:$0xff] %v20429_v34 }
 0x3f8   :  { %v20431_v14 = vpop.f32.mrf.mxu0  ;;  %v20433_v5 = vpop.f32.mrf.mxu1 }
 0x3f9   :  { %21958 = vst [vmem:[#allocation7_spill] sm:$0xff] %v20431_v14  ;;  %21959 = vst [vmem:[#allocation47_spill] sm:$0xff] %v20433_v5 }
 0x3fa   :  { %v20435_v6 = vpop.f32.mrf.mxu0  ;;  %v20437_v36 = vpop.f32.mrf.mxu1 }
 0x3fb   :  { %21960 = vst [vmem:[#allocation126_spill] sm:$0xff] %v20435_v6  ;;  %21961 = vst [vmem:[#allocation127_spill] sm:$0xff] %v20437_v36 }
 0x3fc   :  { %v20439_v19 = vpop.f32.mrf.mxu0  ;;  %v20441_v8 = vpop.f32.mrf.mxu1 }
 0x3fd   :  { %21962 = vst [vmem:[#allocation27_spill] sm:$0xff] %v20439_v19  ;;  %21963 = vst [vmem:[#allocation80_spill] sm:$0xff] %v20441_v8 }
 0x3fe   :  { %v20443_v53 = vpop.f32.mrf.mxu0  ;;  %v20445_v20 = vpop.f32.mrf.mxu1 }
 0x3ff   :  { %21964 = vst [vmem:[#allocation26_spill] sm:$0xff] %v20443_v53  ;;  %21965 = vst [vmem:[#allocation81_spill] sm:$0xff] %v20445_v20 }
 0x400   :  { %v20447_v51 = vpop.f32.mrf.mxu0  ;;  %v20449_v55 = vpop.f32.mrf.mxu1 }
 0x401   :  { %21966 = vst [vmem:[#allocation28_spill] sm:$0xff] %v20447_v51  ;;  %21967 = vst [vmem:[#allocation84_spill] sm:$0xff] %v20449_v55 }
 0x402   :  { %v20451_v34 = vpop.f32.mrf.mxu0  ;;  %v20453_v14 = vpop.f32.mrf.mxu1 }
 0x403   :  { %21968 = vst [vmem:[#allocation40_spill] sm:$0xff] %v20451_v34  ;;  %21969 = vst [vmem:[#allocation85_spill] sm:$0xff] %v20453_v14 }
 0x404   :  { %v11340_v5 = vpop.f32.mrf.mxu0  ;;  %v20455_v6 = vpop.f32.mrf.mxu1 }
 0x405   :  { %21970 = vst [vmem:[#allocation41_spill] sm:$0xff] %v20455_v6  ;;  %v11232_v6 = vadd.f32 %v20324_v35, %v20327_v0  ;;  %v11242_v35 = vadd.f32 %v20344_v31, %v20347_v56  ;;  %v20488_v0 = vadd.f32 %v11340_v5, %v20319_v1  ;;  %v11254_v56 = vadd.f32 %v20369_v21, %v20372_v41 }
 0x406   :  { %v11342_v36 = vpop.f32.mrf.mxu0  ;;  %v20457_v17 = vpop.f32.mrf.mxu1 }
 0x407   :  { %21971 = vst [vmem:[#allocation129_spill] sm:$0xff] %v20457_v17 }
 0x408   :  { %v11344_v19 = vpop.f32.mrf.mxu0  ;;  %v20459_v8 = vpop.f32.mrf.mxu1 }
 0x409   :  { %21972 = vst [vmem:[#allocation11_spill] sm:$0xff] %v20459_v8  ;;  %v11234_v8 = vadd.f32 %v20329_v52, %v20332_v48  ;;  %v20477_v26 = vadd.f32 %v11344_v19, %v11232_v6  ;;  %v11161_v6 = vadd.f32 %v20403_v12, %v20278_v37  ;;  %v21979_v12 = vld [vmem:[#allocation101_spill] sm:$0xff] }
 0x40a   :  { %v11346_v53 = vpop.f32.mrf.mxu0  ;;  %v20461_v3 = vpop.f32.mrf.mxu1 }
 0x40b   :  { %21973 = vst [vmem:[#allocation130_spill] sm:$0xff] %v20461_v3  ;;  %v11238_v3 = vadd.f32 %v20334_v40, %v20337_v60  ;;  %v20490_v52 = vadd.f32 %v11346_v53, %v11234_v8  ;;  %v11244_v40 = vadd.f32 %v20349_v30, %v20352_v2  ;;  %v11252_v53 = vadd.f32 %v20364_v24, %v20367_v43 }
 0x40c   :  { %v11350_v20 = vpop.f32.mrf.mxu0  ;;  %v20463_v51 = vpop.f32.mrf.mxu1  ;;  %v11147_v8 = vadd.f32 %v20379_v22, %v20260_v39  ;;  %v11258_v30 = vadd.f32 %v20374_v38, %v20377_v13  ;;  %v11149_v39 = vadd.f32 %v20383_v10, %v20263_v23  ;;  %v11155_v24 = vadd.f32 %v20391_v50, %v20269_v59 }
 0x40d   :  { %21974 = vst [vmem:[#allocation131_spill] sm:$0xff] %v20463_v51  ;;  %v20492_v48 = vadd.f32 %v11350_v20, %v11238_v3  ;;  %v11250_v20 = vadd.f32 %v20359_v49, %v20362_v54  ;;  %v11151_v54 = vadd.f32 %v20387_v42, %v20266_v45  ;;  %v11157_v22 = vadd.f32 %v20395_v57, %v20272_v32 }
 0x40e   :  { %v11352_v55 = vpop.f32.mrf.mxu0  ;;  %v20465_v46 = vpop.f32.mrf.mxu1  ;;  %v11159_v45 = vadd.f32 %v20399_v7, %v20275_v27  ;;  %v11262_v59 = vadd.f32 %v20385_v58, %v11149_v39  ;;  %v11165_v32 = vadd.f32 %v20407_v63, %v20281_v29  ;;  %v11268_v27 = vadd.f32 %v20393_v28, %v11155_v24  ;;  %v21986_v39 = vld [vmem:[#allocation103_spill] sm:$0xff] }
 0x40f   :  { %21975 = vst [vmem:[#allocation51_spill] sm:$0xff] %v20465_v46  ;;  %v11230_v46 = vadd.f32 %v20317_v25, %v20322_v47  ;;  %v11248_v25 = vadd.f32 %v20354_v4, %v20357_v33  ;;  %v11264_v3 = vadd.f32 %v20389_v61, %v11151_v54 }
 0x410   :  { %v11354_v34 = vpop.f32.mrf.mxu0  ;;  %v20467_v14 = vpop.f32.mrf.mxu1  ;;  %v11272_v61 = vadd.f32 %v20401_v9, %v11159_v45  ;;  %v21989_v24 = vld [vmem:[#allocation11_spill] sm:$0xff] }
 0x411   :  { %21976 = vst [vmem:[#allocation92_spill] sm:$0xff] %v20467_v14  ;;  %v11240_v14 = vadd.f32 %v20339_v16, %v20342_v15  ;;  %v20498_v60 = vadd.f32 %v11342_v36, %v11230_v46  ;;  %v11419_v16 = vadd.f32 %v20477_v26, %v20488_v0  ;;  %v20504_v5 = vadd.f32 %v11354_v34, %v11242_v35 }
 0x412   :  { %v11356_v62 = vpop.f32.mrf.mxu0  ;;  %v20471_v17 = vpop.f32.mrf.mxu1  ;;  %v11270_v35 = vadd.f32 %v20397_v44, %v11157_v22  ;;  %v21990_v22 = vld [vmem:[#allocation68_spill] sm:$0xff] }
 0x413   :  { %v20502_v15 = vadd.f32 %v11352_v55, %v11240_v14  ;;  %v11440_v31 = vadd.f32 %v20490_v52, %v20498_v60  ;;  %v11420_v14 = vadd.f32 %v11419_v16, %v20492_v48  ;;  %v20517_v55 = vadd.f32 %v11356_v62, %v11244_v40  ;;  %v21977_v40 = vld [vmem:[#allocation96_spill] sm:$0xff]  ;;  %v21981_v16 = vld [vmem:[#allocation41_spill] sm:$0xff] }
 0x414   :  { %v11360_v51 = vpop.f32.mrf.mxu0  ;;  %v20483_v18 = vpop.f32.mrf.mxu1 }
 0x415   :  { %v20519_v34 = vadd.f32 %v11360_v51, %v11248_v25  ;;  %v11441_v4 = vadd.f32 %v11440_v31, %v20502_v15  ;;  %v11421_v33 = vadd.f32 %v11420_v14, %v20504_v5  ;;  %v11260_v51 = vadd.f32 %v20381_v11, %v11147_v8  ;;  %v21978_v25 = vld [vmem:[#allocation13_spill] sm:$0xff]  ;;  %v21983_v31 = vld [vmem:[#allocation122_spill] sm:$0xff]  ;;  %v21984_v14 = vld [vmem:[#allocation136_spill] sm:$0xff] }
 0x416   :  { %v11362_v47 = vpop.f32.mrf.mxu0  ;;  %v20512_v1 = vpop.f32.mrf.mxu1  ;;  %v11167_v37 = vadd.f32 %v21978_v25, %v21977_v40  ;;  %v11278_v9 = vadd.f32 %v21983_v31, %v11165_v32  ;;  %v21995_v32 = vld [vmem:[#allocation7_spill] sm:$0xff]  ;;  %v21998_v25 = vld [vmem:[#allocation72_spill] sm:$0xff] }
 0x417   :  { %v20529_v49 = vadd.f32 %v11362_v47, %v11250_v20  ;;  %v11442_v21 = vadd.f32 %v11441_v4, %v20517_v55  ;;  %v11422_v41 = vadd.f32 %v11421_v33, %v20519_v34  ;;  %v21980_v47 = vld [vmem:[#allocation8_spill] sm:$0xff]  ;;  %v20572_v20 = vadd.f32 %v21981_v16, %v11268_v27  ;;  %v21996_v27 = vld [vmem:[#allocation130_spill] sm:$0xff] }
 0x418   :  { %v11364_v36 = vpop.f32.mrf.mxu0  ;;  %v20538_v43 = vpop.f32.mrf.mxu1  ;;  %v11169_v29 = vadd.f32 %v21980_v47, %v21979_v12  ;;  %v11280_v45 = vadd.f32 %v21990_v22, %v11167_v37  ;;  %v21999_v12 = vld [vmem:[#allocation74_spill] sm:$0xff] }
 0x419   :  { %v20531_v62 = vadd.f32 %v11364_v36, %v11252_v53  ;;  %v11443_v10 = vadd.f32 %v11442_v21, %v20529_v49  ;;  %v21982_v36 = vld [vmem:[#allocation70_spill] sm:$0xff] }
 0x41a   :  { %v11366_v2 = vpop.f32.mrf.mxu0  ;;  %v11406_v57 = vpop.f32.mrf.mxu1  ;;  %v11274_v44 = vadd.f32 %v21982_v36, %v11161_v6  ;;  %v21994_v6 = vld [vmem:[#allocation105_spill] sm:$0xff] }
 0x41b   :  { %v20542_v38 = vadd.f32 %v11366_v2, %v11254_v56  ;;  %v11423_v42 = vadd.f32 %v11422_v41, %v20531_v62  ;;  %v21985_v56 = vld [vmem:[#allocation19_spill] sm:$0xff]  ;;  %v21987_v2 = vld [vmem:[#allocation14_spill] sm:$0xff] }
 0x41c   :  { %v11370_v23 = vpop.f32.mrf.mxu0  ;;  %v11175_v4 = vadd.f32 %v21987_v2, %v21986_v39  ;;  %v11410_v33 = vpop.f32.mrf.mxu1 }
 0x41d   :  { %v20544_v13 = vadd.f32 %v11370_v23, %v11258_v30  ;;  %v11444_v58 = vadd.f32 %v11443_v10, %v20542_v38  ;;  %v11171_v30 = vadd.f32 %v21985_v56, %v21984_v14  ;;  %v20588_v23 = vadd.f32 %v21989_v24, %v11272_v61  ;;  %v21992_v10 = vld [vmem:[#allocation104_spill] sm:$0xff] }
 0x41e   :  { %v11372_v11 = vpop.f32.mrf.mxu0  ;;  %v11288_v47 = vadd.f32 %v21999_v12, %v11175_v4  ;;  %v11412_v31 = vpop.f32.mrf.mxu1  ;;  %v22007_v4 = vld [vmem:[#allocation47_spill] sm:$0xff] }
 0x41f   :  { %v20553_v50 = vadd.f32 %v11372_v11, %v11260_v51  ;;  %v11424_v7 = vadd.f32 %v11423_v42, %v20544_v13  ;;  %v21988_v51 = vld [vmem:[#allocation129_spill] sm:$0xff]  ;;  %v21991_v11 = vld [vmem:[#allocation71_spill] sm:$0xff]  ;;  %v21993_v42 = vld [vmem:[#allocation20_spill] sm:$0xff]  ;;  %v11284_v37 = vadd.f32 %v21998_v25, %v11171_v30 }
 0x420   :  { %v11374_v46 = vpop.f32.mrf.mxu0  ;;  %v20585_v54 = vadd.f32 %v21988_v51, %v11270_v35  ;;  %v22006_v30 = vld [vmem:[#allocation125_spill] sm:$0xff]  ;;  %v11414_v12 = vpop.f32.mrf.mxu1 }
 0x421   :  { %v20563_v19 = vadd.f32 %v11374_v46, %v11262_v59  ;;  %v11445_v28 = vadd.f32 %v11444_v58, %v20553_v50  ;;  %v11282_v59 = vadd.f32 %v21991_v11, %v11169_v29  ;;  %v11179_v46 = vadd.f32 %v21995_v32, %v21994_v6  ;;  %v22000_v29 = vld [vmem:[#allocation106_spill] sm:$0xff]  ;;  %v22010_v11 = vld [vmem:[#allocation112_spill] sm:$0xff] }
 0x422   :  { %v11376_v63 = vpop.f32.mrf.mxu0  ;;  %v20599_v58 = vadd.f32 %v21996_v27, %v11274_v44  ;;  %v22004_v44 = vld [vmem:[#allocation51_spill] sm:$0xff] }
 0x423   :  { %v11425_v53 = vadd.f32 %v11424_v7, %v20563_v19  ;;  %v20576_v8 = vadd.f32 %v11376_v63, %v11264_v3  ;;  %v11177_v3 = vadd.f32 %v21993_v42, %v21992_v10  ;;  %v21997_v7 = vld [vmem:[#allocation131_spill] sm:$0xff]  ;;  %v22001_v63 = vld [vmem:[#allocation126_spill] sm:$0xff]  ;;  %v20613_v14 = vadd.f32 %v22004_v44, %v11280_v45  ;;  %v22011_v10 = vld [vmem:[#allocation28_spill] sm:$0xff] }
 0x424   :  { %v20602_v35 = vadd.f32 %v21997_v7, %v11278_v9  ;;  %v11181_v16 = vadd.f32 %v22001_v63, %v22000_v29  ;;  %v22005_v9 = vld [vmem:[#allocation92_spill] sm:$0xff]  ;;  %v11292_v24 = vadd.f32 %v22007_v4, %v11179_v46  ;;  %v11189_v42 = vadd.f32 %v22011_v10, %v22010_v11  ;;  %v22012_v27 = vld [vmem:[#allocation127_spill] sm:$0xff] }
 0x425   :  { %v11426_v21 = vadd.f32 %v11425_v53, %v20572_v20  ;;  %v11446_v41 = vadd.f32 %v11445_v28, %v20576_v8  ;;  %v22002_v28 = vld [vmem:[#allocation107_spill] sm:$0xff]  ;;  %v20616_v56 = vadd.f32 %v22005_v9, %v11282_v59  ;;  %v11290_v51 = vadd.f32 %v22006_v30, %v11177_v3  ;;  %v22013_v7 = vld [vmem:[#allocation80_spill] sm:$0xff]  ;;  %v22018_v9 = vld [vmem:[#allocation85_spill] sm:$0xff] }
 0x426   :  { %v22003_v53 = vld [vmem:[#allocation27_spill] sm:$0xff]  ;;  %v20627_v45 = vadd.f32 %v20471_v17, %v11284_v37  ;;  %v20630_v59 = vadd.f32 %v20483_v18, %v11288_v47  ;;  %v11294_v3 = vadd.f32 %v22012_v27, %v11181_v16  ;;  %v20642_v17 = vadd.f32 %v20538_v43, %v11292_v24  ;;  %v22016_v47 = vld [vmem:[#allocation81_spill] sm:$0xff]  ;;  %v11416_v43 = vpop.f32.mrf.mxu1 }
 0x427   :  { %v11427_v61 = vadd.f32 %v11426_v21, %v20588_v23  ;;  %v11447_v40 = vadd.f32 %v11446_v41, %v20585_v54  ;;  %v11185_v36 = vadd.f32 %v22003_v53, %v22002_v28  ;;  %v22008_v21 = vld [vmem:[#allocation111_spill] sm:$0xff]  ;;  %v22009_v41 = vld [vmem:[#allocation26_spill] sm:$0xff]  ;;  %v20639_v29 = vadd.f32 %v20512_v1, %v11290_v51  ;;  %v22017_v28 = vld [vmem:[#allocation84_spill] sm:$0xff] }
 0x428   :  { %v11187_v22 = vadd.f32 %v22009_v41, %v22008_v21  ;;  %v11302_v16 = vadd.f32 %v22017_v28, %v11189_v42  ;;  %v20648_v53 = vadd.f32 %v11406_v57, %v11294_v3 }
 0x429   :  { %v11428_v39 = vadd.f32 %v11427_v61, %v20602_v35  ;;  %v11448_v2 = vadd.f32 %v11447_v40, %v20599_v58  ;;  %v11298_v46 = vadd.f32 %v22013_v7, %v11185_v36  ;;  %v22014_v61 = vld [vmem:[#allocation118_spill] sm:$0xff]  ;;  %v22015_v40 = vld [vmem:[#allocation40_spill] sm:$0xff] }
 0x42a   :  { %v11191_v25 = vadd.f32 %v22015_v40, %v22014_v61  ;;  %v11300_v63 = vadd.f32 %v22016_v47, %v11187_v22  ;;  %v20657_v30 = vadd.f32 %v11414_v12, %v11302_v16 }
 0x42b   :  { %v11429_v6 = vadd.f32 %v11428_v39, %v20616_v56  ;;  %v11449_v32 = vadd.f32 %v11448_v2, %v20613_v14  ;;  %v20650_v36 = vadd.f32 %v11410_v33, %v11298_v46 }
 0x42c   :  { %v11304_v39 = vadd.f32 %v22018_v9, %v11191_v25  ;;  %v20655_v2 = vadd.f32 %v11412_v31, %v11300_v63 }
 0x42d   :  { %v11430_v18 = vadd.f32 %v11429_v6, %v20630_v59  ;;  %v11450_v37 = vadd.f32 %v11449_v32, %v20627_v45 }
 0x42e   :  { %v20662_v24 = vadd.f32 %v11416_v43, %v11304_v39 }
 0x42f   :  { %v11431_v44 = vadd.f32 %v11430_v18, %v20642_v17  ;;  %v11451_v1 = vadd.f32 %v11450_v37, %v20639_v29 }
 0x431   :  { %v11432_v51 = vadd.f32 %v11431_v44, %v20650_v36  ;;  %v11452_v4 = vadd.f32 %v11451_v1, %v20648_v53 }
 0x433   :  { %v11433_v57 = vadd.f32 %v11432_v51, %v20657_v30  ;;  %v11453_v33 = vadd.f32 %v11452_v4, %v20655_v2 }
 0x435   :  { %v11434_v21 = vrot.slane %v11433_v57, 4  ;;  %v11454_v41 = vadd.f32 %v11453_v33, %v20662_v24 }
 0x437   :  { %v11435_v22 = vadd.f32 %v11434_v21, %v11433_v57  ;;  %v11455_v11 = vrot.slane %v11454_v41, 4 }
 0x439   :  { %v11436_v10 = vrot.slane %v11435_v22, 2  ;;  %v11456_v31 = vadd.f32 %v11455_v11, %v11454_v41 }
 0x43b   :  { %v11437_v42 = vadd.f32 %v11436_v10, %v11435_v22  ;;  %v11457_v6 = vrot.slane %v11456_v31, 2 }
 0x43d   :  { %v11438_v32 = vrot.slane %v11437_v42, 1  ;;  %v11458_v3 = vadd.f32 %v11457_v6, %v11456_v31 }
 0x43f   :  { %v11439_v27 = vadd.f32 %v11438_v32, %v11437_v42  ;;  %v11459_v40 = vrot.slane %v11458_v3, 1 }
 0x441   :  { %v20666_v7 = vmul.f32 0.0078125, %v11439_v27  ;;  %v11460_v37 = vadd.f32 %v11459_v40, %v11458_v3 }
 0x443   :  { %v11464_v46 = vsub.f32 %v20488_v0, %v20666_v7  ;;  %v11466_v61 = vsub.f32 %v20477_v26, %v20666_v7  ;;  %v11468_v25 = vsub.f32 %v20492_v48, %v20666_v7  ;;  %v11470_v47 = vsub.f32 %v20504_v5, %v20666_v7 }
 0x444   :  { %v11472_v63 = vsub.f32 %v20519_v34, %v20666_v7  ;;  %v20678_v44 = vmul.f32 0.0078125, %v11460_v37  ;;  %v11474_v1 = vsub.f32 %v20531_v62, %v20666_v7  ;;  %v11476_v4 = vsub.f32 %v20544_v13, %v20666_v7 }
 0x445   :  { %v11496_v12 = vmul.f32 %v11464_v46, %v11464_v46  ;;  %v11498_v18 = vmul.f32 %v11466_v61, %v11466_v61  ;;  %v11500_v28 = vmul.f32 %v11468_v25, %v11468_v25  ;;  %v11502_v9 = vmul.f32 %v11470_v47, %v11470_v47 }
 0x446   :  { %v11465_v43 = vsub.f32 %v20498_v60, %v20678_v44  ;;  %v11467_v51 = vsub.f32 %v20490_v52, %v20678_v44  ;;  %v11504_v57 = vmul.f32 %v11472_v63, %v11472_v63  ;;  %v11478_v21 = vsub.f32 %v20563_v19, %v20666_v7 }
 0x447   :  { %v11528_v16 = vadd.f32 %v11498_v18, %v11496_v12  ;;  %v11506_v41 = vmul.f32 %v11474_v1, %v11474_v1  ;;  %v11469_v11 = vsub.f32 %v20502_v15, %v20678_v44  ;;  %v11480_v42 = vsub.f32 %v20572_v20, %v20666_v7 }
 0x448   :  { %v11497_v10 = vmul.f32 %v11465_v43, %v11465_v43  ;;  %v11499_v31 = vmul.f32 %v11467_v51, %v11467_v51  ;;  %v11508_v6 = vmul.f32 %v11476_v4, %v11476_v4  ;;  %v11471_v27 = vsub.f32 %v20517_v55, %v20678_v44 }
 0x449   :  { %v11529_v39 = vadd.f32 %v11528_v16, %v11500_v28  ;;  %v11482_v3 = vsub.f32 %v20588_v23, %v20666_v7  ;;  %v11510_v46 = vmul.f32 %v11478_v21, %v11478_v21  ;;  %v11473_v40 = vsub.f32 %v20529_v49, %v20678_v44 }
 0x44a   :  { %v11501_v25 = vmul.f32 %v11469_v11, %v11469_v11  ;;  %v11549_v12 = vadd.f32 %v11499_v31, %v11497_v10  ;;  %v11484_v18 = vsub.f32 %v20602_v35, %v20666_v7  ;;  %v11512_v37 = vmul.f32 %v11480_v42, %v11480_v42 }
 0x44b   :  { %v11530_v33 = vadd.f32 %v11529_v39, %v11502_v9  ;;  %v11475_v63 = vsub.f32 %v20542_v38, %v20678_v44  ;;  %v11503_v28 = vmul.f32 %v11471_v27, %v11471_v27  ;;  %v11486_v1 = vsub.f32 %v20616_v56, %v20666_v7 }
 0x44c   :  { %v11550_v16 = vadd.f32 %v11549_v12, %v11501_v25  ;;  %v11514_v9 = vmul.f32 %v11482_v3, %v11482_v3  ;;  %v11477_v43 = vsub.f32 %v20553_v50, %v20678_v44  ;;  %v11505_v51 = vmul.f32 %v11473_v40, %v11473_v40 }
 0x44d   :  { %v11531_v22 = vadd.f32 %v11530_v33, %v11504_v57  ;;  %v11488_v57 = vsub.f32 %v20630_v59, %v20666_v7  ;;  %v11516_v33 = vmul.f32 %v11484_v18, %v11484_v18  ;;  %v11490_v10 = vsub.f32 %v20642_v17, %v20666_v7 }
 0x44e   :  { %v11551_v4 = vadd.f32 %v11550_v16, %v11503_v28  ;;  %v11518_v31 = vmul.f32 %v11486_v1, %v11486_v1  ;;  %v11492_v3 = vsub.f32 %v20650_v36, %v20666_v7  ;;  %v11483_v40 = vsub.f32 %v20599_v58, %v20678_v44 }
 0x44f   :  { %v11532_v32 = vadd.f32 %v11531_v22, %v11506_v41  ;;  %v11479_v41 = vsub.f32 %v20576_v8, %v20678_v44  ;;  %v11507_v22 = vmul.f32 %v11475_v63, %v11475_v63  ;;  %v11494_v18 = vsub.f32 %v20657_v30, %v20666_v7 }
 0x450   :  { %v11552_v11 = vadd.f32 %v11551_v4, %v11505_v51  ;;  %v11485_v63 = vsub.f32 %v20613_v14, %v20678_v44  ;;  %v11524_v1 = vmul.f32 %v11492_v3, %v11492_v3 }
 0x451   :  { %v11533_v61 = vadd.f32 %v11532_v32, %v11508_v6  ;;  %v11481_v6 = vsub.f32 %v20585_v54, %v20678_v44  ;;  %v11509_v32 = vmul.f32 %v11477_v43, %v11477_v43  ;;  %v11511_v25 = vmul.f32 %v11479_v41, %v11479_v41 }
 0x452   :  { %v11553_v27 = vadd.f32 %v11552_v11, %v11507_v22  ;;  %v11515_v43 = vmul.f32 %v11483_v40, %v11483_v40  ;;  %v11526_v4 = vmul.f32 %v11494_v18, %v11494_v18  ;;  %v11491_v11 = vsub.f32 %v20648_v53, %v20678_v44 }
 0x453   :  { %v11534_v47 = vadd.f32 %v11533_v61, %v11510_v46  ;;  %v11520_v46 = vmul.f32 %v11488_v57, %v11488_v57  ;;  %v11513_v28 = vmul.f32 %v11481_v6, %v11481_v6  ;;  %v11493_v6 = vsub.f32 %v20655_v2, %v20678_v44 }
 0x454   :  { %v11554_v12 = vadd.f32 %v11553_v27, %v11509_v32 }
 0x455   :  { %v11535_v39 = vadd.f32 %v11534_v47, %v11512_v37  ;;  %v11522_v37 = vmul.f32 %v11490_v10, %v11490_v10 }
 0x456   :  { %v11555_v16 = vadd.f32 %v11554_v12, %v11511_v25  ;;  %v11525_v12 = vmul.f32 %v11493_v6, %v11493_v6 }
 0x457   :  { %v11536_v21 = vadd.f32 %v11535_v39, %v11514_v9  ;;  %v11487_v39 = vsub.f32 %v20627_v45, %v20678_v44 }
 0x458   :  { %v11556_v51 = vadd.f32 %v11555_v16, %v11513_v28 }
 0x459   :  { %v11537_v42 = vadd.f32 %v11536_v21, %v11516_v33  ;;  %v11489_v33 = vsub.f32 %v20639_v29, %v20678_v44  ;;  %v11517_v21 = vmul.f32 %v11485_v63, %v11485_v63  ;;  %v11519_v10 = vmul.f32 %v11487_v39, %v11487_v39 }
 0x45a   :  { %v11557_v41 = vadd.f32 %v11556_v51, %v11515_v43 }
 0x45b   :  { %v11538_v61 = vadd.f32 %v11537_v42, %v11518_v31  ;;  %v11521_v32 = vmul.f32 %v11489_v33, %v11489_v33 }
 0x45c   :  { %v11558_v31 = vadd.f32 %v11557_v41, %v11517_v21 }
 0x45d   :  { %v11539_v47 = vadd.f32 %v11538_v61, %v11520_v46  ;;  %v11495_v46 = vsub.f32 %v20662_v24, %v20678_v44  ;;  %v11523_v61 = vmul.f32 %v11491_v11, %v11491_v11  ;;  %v14451_v11 = vmov 1966171168  }
 0x45e   :  { %v11559_v27 = vadd.f32 %v11558_v31, %v11519_v10  ;;  %v11581_v10 = vunpack.c.l.s4 %v14451_v11  ;;  %v11583_v31 = vlaneseq }
 0x45f   :  { %v11540_v9 = vadd.f32 %v11539_v47, %v11522_v37  ;;  %v11527_v47 = vmul.f32 %v11495_v46, %v11495_v46 }
 0x460   :  { %v11560_v40 = vadd.f32 %v11559_v27, %v11521_v32  ;;  %v11584_v6 = vshrl.u32 %v11583_v31, 7 }
 0x461   :  { %v11541_v57 = vadd.f32 %v11540_v9, %v11524_v1 }
 0x462   :  { %v11561_v18 = vadd.f32 %v11560_v40, %v11523_v61  ;;  %v11572_v40 = vld [vmem:[%s21047_s2] sm:$0x3] }
 0x463   :  { %v11542_v22 = vadd.f32 %v11541_v57, %v11526_v4 }
 0x464   :  { %v11562_v63 = vadd.f32 %v11561_v18, %v11525_v12  ;;  %v11600_v12 = vsub.s32 0, %v11584_v6  ;;  %v11604_v18 = vsub.s32 1, %v11584_v6 }
 0x465   :  { %v11543_v42 = vrot.slane %v11542_v22, 4 }
 0x466   :  { %v11563_v28 = vadd.f32 %v11562_v63, %v11527_v47 }
 0x467   :  { %v11544_v3 = vadd.f32 %v11543_v42, %v11542_v22  ;;  %v11582_v42 = vunpack.c.0.s8 %v11581_v10 }
 0x468   :  { %v11564_v1 = vrot.slane %v11563_v28, 4 }
 0x469   :  { %v11545_v25 = vrot.slane %v11544_v3, 2  ;;  %v11585_v27 = vsub.s32 %v11582_v42, %v11584_v6 }
 0x46a   :  { %v11565_v9 = vadd.f32 %v11564_v1, %v11563_v28 }
 0x46b   :  { %v11546_v37 = vadd.f32 %v11545_v25, %v11544_v3 }
 0x46c   :  { %v11566_v43 = vrot.slane %v11565_v9, 2 }
 0x46d   :  { %v11547_v16 = vrot.slane %v11546_v37, 1 }
 0x46e   :  { %v11567_v51 = vadd.f32 %v11566_v43, %v11565_v9 }
 0x46f   :  { %v11548_v39 = vadd.f32 %v11547_v16, %v11546_v37 }
 0x470   :  { %v11568_v57 = vrot.slane %v11567_v51, 1 }
 0x471   :  { %v11570_v4 = vmul.f32 0.0078125, %v11548_v39  ;;  %v11596_v39 = vld [vmem:[%s21048_s3] sm:$0x3]  ;;  %s14452_s3 = smov [#allocation4]  }
 0x472   :  { %v11569_v33 = vadd.f32 %v11568_v57, %v11567_v51 }
 0x473   :  { %v11573_v21 = vadd.f32 1e-05, %v11570_v4 }
 0x474   :  { %v11571_v41 = vmul.f32 0.0078125, %v11569_v33  ;;  %v20748_v33 = vstv %s21049_s4  ;;  %s11839_s4 = sshll.u32 %s14452_s3, 4  ;;  %s21011_s4 = int_to_ptr.vmem [resolvable:$true] %s11839_s4 }
 0x475   :  { %14378 = vrsqrt.f32 %v11573_v21  ;;  %s14429_s11 = scalar_lea.vmem %s21011_s4, 4096  ;;  %p14434_p1 = scmp.lt.s32.totalorder %s21011_s4, %s21011_s4 }
 0x476   :  { %v11574_v22 = vadd.f32 1e-05, %v11571_v41  ;;  %p14430_p0 = scmp.ne.s32.totalorder %s21011_s4, %s14429_s11  ;;  %p14435_p2 = scmp.lt.s32.totalorder %s14429_s11, %s14429_s11 }
 0x478   :  { %14380 = vrsqrt.f32 %v11574_v22  ;;  %p14436_p3 = por %p14435_p2, %p14434_p1 }
 0x47a   :  { %p14437_p4 = pnand %p14436_p3, %p14430_p0 }
 0x482   :  { %v14379_v32 = vpop.eup %14378 }
 0x485   :  { %v14381_v3 = vpop.eup %14380 }
 0x486   :  { %v11579_v46 = vcombine.low %v14379_v32, %v14381_v3 }
 0x488   :  { %v11586_v61 = vrot.slane %v11579_v46, %v11585_v27 }
 0x48a   :  { %v11593_v25 = vrot.slane %v11586_v61, %v11585_v27 }
 0x48c   :  { %v11595_v37 = vmul.f32 %v11593_v25, %v11572_v40 }
 0x48e   :  { %v11601_v47 = vrot.slane %v11595_v37, %v11600_v12  ;;  %v11605_v63 = vrot.slane %v11595_v37, %v11604_v18 }
 0x490   :  { %v11608_v28 = vmul.f32 %v11601_v47, %v20666_v7  ;;  %v11609_v16 = vmul.f32 %v11605_v63, %v20678_v44  ;;  %v11629_v51 = vmul.f32 %v11601_v47, %v20488_v0  ;;  %v11630_v4 = vmul.f32 %v11605_v63, %v20498_v60 }
 0x491   :  { %v11631_v57 = vmul.f32 %v11601_v47, %v20477_v26  ;;  %v11632_v44 = vmul.f32 %v11605_v63, %v20490_v52  ;;  %v11633_v21 = vmul.f32 %v11601_v47, %v20492_v48  ;;  %v11634_v41 = vmul.f32 %v11605_v63, %v20502_v15 }
 0x492   :  { %v11612_v1 = vcombine.low %v11608_v28, %v11609_v16  ;;  %v11635_v22 = vmul.f32 %v11601_v47, %v20504_v5  ;;  %v11636_v0 = vmul.f32 %v11605_v63, %v20517_v55  ;;  %v11637_v60 = vmul.f32 %v11601_v47, %v20519_v34 }
 0x493   :  { %v11638_v26 = vmul.f32 %v11605_v63, %v20529_v49  ;;  %v11639_v11 = vmul.f32 %v11601_v47, %v20531_v62  ;;  %v11640_v10 = vmul.f32 %v11605_v63, %v20542_v38  ;;  %v11641_v31 = vmul.f32 %v11601_v47, %v20544_v13 }
 0x494   :  { %v11619_v9 = vrot.slane %v11612_v1, %v11585_v27  ;;  %v11642_v52 = vmul.f32 %v11605_v63, %v20553_v50  ;;  %v11643_v48 = vmul.f32 %v11601_v47, %v20563_v19  ;;  %v11644_v15 = vmul.f32 %v11605_v63, %v20576_v8 }
 0x495   :  { %v11645_v5 = vmul.f32 %v11601_v47, %v20572_v20  ;;  %v11646_v55 = vmul.f32 %v11605_v63, %v20585_v54  ;;  %v11647_v34 = vmul.f32 %v11601_v47, %v20588_v23  ;;  %v11648_v49 = vmul.f32 %v11605_v63, %v20599_v58 }
 0x496   :  { %v11626_v43 = vrot.slane %v11619_v9, %v11585_v27  ;;  %v11649_v38 = vmul.f32 %v11601_v47, %v20602_v35  ;;  %v11650_v13 = vmul.f32 %v11605_v63, %v20613_v14  ;;  %v11651_v50 = vmul.f32 %v11601_v47, %v20616_v56 }
 0x497   :  { %v11652_v19 = vmul.f32 %v11605_v63, %v20627_v45  ;;  %v11653_v8 = vmul.f32 %v11601_v47, %v20630_v59  ;;  %v11654_v20 = vmul.f32 %v11605_v63, %v20639_v29  ;;  %v11655_v54 = vmul.f32 %v11601_v47, %v20642_v17 }
 0x498   :  { %v11628_v7 = vsub.f32 %v11596_v39, %v11626_v43  ;;  %v11656_v23 = vmul.f32 %v11605_v63, %v20648_v53  ;;  %v11657_v58 = vmul.f32 %v11601_v47, %v20650_v36  ;;  %v11658_v6 = vmul.f32 %v11605_v63, %v20655_v2 }
 0x499   :  { %v11659_v35 = vmul.f32 %v11601_v47, %v20657_v30  ;;  %v11660_v14 = vmul.f32 %v11605_v63, %v20662_v24 }
 0x49a   :  { %v11665_v42 = vrot.slane %v11628_v7, %v11600_v12  ;;  %v11669_v62 = vrot.slane %v11628_v7, %v11604_v18 }
 0x49c   :  { %v20779_v32 = vadd.f32 %v11665_v42, %v11629_v51  ;;  %v20781_v56 = vadd.f32 %v11669_v62, %v11630_v4  ;;  %v20783_v45 = vadd.f32 %v11665_v42, %v11631_v57  ;;  %v20785_v59 = vadd.f32 %v11669_v62, %v11632_v44 }
 0x49d   :  { %v20787_v29 = vadd.f32 %v11665_v42, %v11633_v21  ;;  %v20789_v17 = vadd.f32 %v11669_v62, %v11634_v41  ;;  %v20791_v53 = vadd.f32 %v11665_v42, %v11635_v22  ;;  %v20793_v36 = vadd.f32 %v11669_v62, %v11636_v0 }
 0x49e   :  { %v20795_v2 = vadd.f32 %v11665_v42, %v11637_v60  ;;  %v20797_v30 = vadd.f32 %v11669_v62, %v11638_v26  ;;  %v20799_v24 = vadd.f32 %v11665_v42, %v11639_v11  ;;  %v20801_v27 = vadd.f32 %v11669_v62, %v11640_v10 }
 0x49f   :  { %v20803_v3 = vadd.f32 %v11665_v42, %v11641_v31  ;;  %v20805_v46 = vadd.f32 %v11669_v62, %v11642_v52  ;;  %v20807_v61 = vadd.f32 %v11665_v42, %v11643_v48  ;;  %v20809_v40 = vadd.f32 %v11669_v62, %v11644_v15 }
 0x4a0   :  { %v20811_v25 = vadd.f32 %v11665_v42, %v11645_v5  ;;  %v20813_v12 = vadd.f32 %v11669_v62, %v11646_v55  ;;  %v20815_v18 = vadd.f32 %v11665_v42, %v11647_v34  ;;  %v20817_v37 = vadd.f32 %v11669_v62, %v11648_v49 }
 0x4a1   :  { %v20819_v47 = vadd.f32 %v11665_v42, %v11649_v38  ;;  %v20821_v63 = vadd.f32 %v11669_v62, %v11650_v13  ;;  %v20823_v28 = vadd.f32 %v11665_v42, %v11651_v50  ;;  %v20825_v16 = vadd.f32 %v11669_v62, %v11652_v19 }
 0x4a2   :  { %v20827_v1 = vadd.f32 %v11665_v42, %v11653_v8  ;;  %v20829_v9 = vadd.f32 %v11669_v62, %v11654_v20  ;;  %v20831_v39 = vadd.f32 %v11665_v42, %v11655_v54  ;;  %v20833_v43 = vadd.f32 %v11669_v62, %v11656_v23 }
 0x4a3   :  { %v20835_v51 = vadd.f32 %v11665_v42, %v11657_v58  ;;  %v20837_v4 = vadd.f32 %v11669_v62, %v11658_v6  ;;  %v20839_v57 = vadd.f32 %v11665_v42, %v11659_v35  ;;  %v20841_v7 = vadd.f32 %v11669_v62, %v11660_v14 }
 0x4a4   :  { %22019 = vst [vmem:[#allocation133_spill] sm:$0xff] %v20827_v1  ;;  %22020 = vst [vmem:[#allocation93_spill] sm:$0xff] %v20829_v9  ;;  %vm11705_vm12 = vcmp.ge.f32.partialorder %v20779_v32, 0.0  ;;  %vm11706_vm13 = vcmp.ge.f32.partialorder %v20781_v56, 0.0  ;;  %vm11707_vm14 = vcmp.ge.f32.partialorder %v20783_v45, 0.0  ;;  %vm11708_vm15 = vcmp.ge.f32.partialorder %v20785_v59, 0.0 }
 0x4a5   :  { %22021 = vst [vmem:[#allocation52_spill] sm:$0xff] %v20833_v43  ;;  %22022 = vst [vmem:[#allocation98_spill] sm:$0xff] %v20835_v51  ;;  %vm11709_vm0 = vcmp.ge.f32.partialorder %v20787_v29, 0.0  ;;  %vm11710_vm1 = vcmp.ge.f32.partialorder %v20789_v17, 0.0  ;;  %vm11711_vm2 = vcmp.ge.f32.partialorder %v20791_v53, 0.0  ;;  %vm11712_vm3 = vcmp.ge.f32.partialorder %v20793_v36, 0.0 }
 0x4a6   :  { %22023 = vst [vmem:[#allocation137_spill] sm:$0xff] %v20837_v4  ;;  %vm11713_vm4 = vcmp.ge.f32.partialorder %v20795_v2, 0.0  ;;  %vm11714_vm5 = vcmp.ge.f32.partialorder %v20797_v30, 0.0  ;;  %vm11715_vm6 = vcmp.ge.f32.partialorder %v20799_v24, 0.0  ;;  %vm11716_vm7 = vcmp.ge.f32.partialorder %v20801_v27, 0.0 }
 0x4a7   :  { %v11738_v44 = vmul.f32 %v20748_v33, %v20779_v32  ;;  %v11739_v21 = vmul.f32 %v20748_v33, %v20781_v56  ;;  %v11740_v41 = vmul.f32 %v20748_v33, %v20783_v45  ;;  %v11741_v22 = vmul.f32 %v20748_v33, %v20785_v59 }
 0x4a8   :  { %v11742_v0 = vmul.f32 %v20748_v33, %v20787_v29  ;;  %v11743_v60 = vmul.f32 %v20748_v33, %v20789_v17  ;;  %v11744_v26 = vmul.f32 %v20748_v33, %v20791_v53  ;;  %v11745_v11 = vmul.f32 %v20748_v33, %v20793_v36 }
 0x4a9   :  { %v11746_v10 = vmul.f32 %v20748_v33, %v20795_v2  ;;  %v11747_v31 = vmul.f32 %v20748_v33, %v20797_v30  ;;  %v11748_v52 = vmul.f32 %v20748_v33, %v20799_v24  ;;  %v11749_v48 = vmul.f32 %v20748_v33, %v20801_v27 }
 0x4aa   :  { %v11750_v15 = vmul.f32 %v20748_v33, %v20803_v3  ;;  %v11751_v5 = vmul.f32 %v20748_v33, %v20805_v46  ;;  %v11752_v55 = vmul.f32 %v20748_v33, %v20807_v61  ;;  %v11753_v34 = vmul.f32 %v20748_v33, %v20809_v40 }
 0x4ab   :  { %vm11733_vm8 = vcmp.ge.f32.partialorder %v20835_v51, 0.0  ;;  %vm11734_vm9 = vcmp.ge.f32.partialorder %v20837_v4, 0.0  ;;  %vm11735_vm10 = vcmp.ge.f32.partialorder %v20839_v57, 0.0  ;;  %vm11736_vm11 = vcmp.ge.f32.partialorder %v20841_v7, 0.0 }
 0x4ac   :  { %v11754_v49 = vmul.f32 %v20748_v33, %v20811_v25  ;;  %v11755_v42 = vmul.f32 %v20748_v33, %v20813_v12  ;;  %v11756_v62 = vmul.f32 %v20748_v33, %v20815_v18  ;;  %v11757_v38 = vmul.f32 %v20748_v33, %v20817_v37 }
 0x4ad   :  { %v11758_v13 = vmul.f32 %v20748_v33, %v20819_v47  ;;  %v11759_v50 = vmul.f32 %v20748_v33, %v20821_v63  ;;  %v11760_v19 = vmul.f32 %v20748_v33, %v20823_v28  ;;  %v11761_v8 = vmul.f32 %v20748_v33, %v20825_v16 }
 0x4ae   :  { %v11762_v20 = vmul.f32 %v20748_v33, %v20827_v1  ;;  %v11763_v54 = vmul.f32 %v20748_v33, %v20829_v9  ;;  %v11764_v23 = vmul.f32 %v20748_v33, %v20831_v39  ;;  %v11765_v58 = vmul.f32 %v20748_v33, %v20833_v43 }
 0x4af   :  { %v11766_v6 = vmul.f32 %v20748_v33, %v20835_v51  ;;  %v11767_v35 = vmul.f32 %v20748_v33, %v20837_v4  ;;  %v11768_v14 = vmul.f32 %v20748_v33, %v20839_v57  ;;  %v11769_v1 = vmul.f32 %v20748_v33, %v20841_v7 }
 0x4b0   :  { %v11770_v9 = vsel %vm11705_vm12, %v20779_v32, %v11738_v44  ;;  %v11771_v43 = vsel %vm11706_vm13, %v20781_v56, %v11739_v21  ;;  %v11772_v51 = vsel %vm11707_vm14, %v20783_v45, %v11740_v41  ;;  %v11773_v4 = vsel %vm11708_vm15, %v20785_v59, %v11741_v22  ;;  %v22044_v44 = vld [vmem:[#allocation137_spill] sm:$0xff] }
 0x4b1   :  { %v11774_v33 = vsel %vm11709_vm0, %v20787_v29, %v11742_v0  ;;  %v11775_v32 = vsel %vm11710_vm1, %v20789_v17, %v11743_v60  ;;  %v11776_v56 = vsel %vm11711_vm2, %v20791_v53, %v11744_v26  ;;  %v11777_v45 = vsel %vm11712_vm3, %v20793_v36, %v11745_v11  ;;  %11802 = vst [vmem:[#allocation4] sm:$0xff] %v11770_v9  ;;  %v22038_v9 = vld [vmem:[#allocation93_spill] sm:$0xff] }
 0x4b2   :  { %11803 = vst [vmem:[#allocation4 + $0x8] sm:$0xff] %v11771_v43  ;;  %11804 = vst [vmem:[#allocation4 + $0x10] sm:$0xff] %v11772_v51  ;;  %v11778_v59 = vsel %vm11713_vm4, %v20795_v2, %v11746_v10  ;;  %v11779_v29 = vsel %vm11714_vm5, %v20797_v30, %v11747_v31  ;;  %v11780_v17 = vsel %vm11715_vm6, %v20799_v24, %v11748_v52  ;;  %vm22024_vm12 = vcmp.ge.f32.partialorder %v20803_v3, 0.0  ;;  %v22041_v43 = vld [vmem:[#allocation52_spill] sm:$0xff]  ;;  %v22043_v51 = vld [vmem:[#allocation98_spill] sm:$0xff] }
 0x4b3   :  { %11805 = vst [vmem:[#allocation4 + $0x18] sm:$0xff] %v11773_v4  ;;  %v11781_v53 = vsel %vm11716_vm7, %v20801_v27, %v11749_v48  ;;  %11806 = vst [vmem:[#allocation4 + $0x20] sm:$0xff] %v11774_v33  ;;  %v11782_v36 = vsel %vm22024_vm12, %v20803_v3, %v11750_v15  ;;  %vm22025_vm13 = vcmp.ge.f32.partialorder %v20805_v46, 0.0  ;;  %vm22026_vm14 = vcmp.ge.f32.partialorder %v20807_v61, 0.0 }
 0x4b4   :  { %11807 = vst [vmem:[#allocation4 + $0x28] sm:$0xff] %v11775_v32  ;;  %11808 = vst [vmem:[#allocation4 + $0x30] sm:$0xff] %v11776_v56  ;;  %v11783_v2 = vsel %vm22025_vm13, %v20805_v46, %v11751_v5  ;;  %v11784_v30 = vsel %vm22026_vm14, %v20807_v61, %v11752_v55  ;;  %vm22027_vm15 = vcmp.ge.f32.partialorder %v20809_v40, 0.0  ;;  %vm22028_vm0 = vcmp.ge.f32.partialorder %v20811_v25, 0.0 }
 0x4b5   :  { %11809 = vst [vmem:[#allocation4 + $0x38] sm:$0xff] %v11777_v45  ;;  %v11785_v24 = vsel %vm22027_vm15, %v20809_v40, %v11753_v34  ;;  %11810 = vst [vmem:[#allocation4 + $0x40] sm:$0xff] %v11778_v59  ;;  %v11786_v27 = vsel %vm22028_vm0, %v20811_v25, %v11754_v49  ;;  %vm22029_vm1 = vcmp.ge.f32.partialorder %v20813_v12, 0.0  ;;  %vm22030_vm2 = vcmp.ge.f32.partialorder %v20815_v18, 0.0 }
 0x4b6   :  { %11811 = vst [vmem:[#allocation4 + $0x48] sm:$0xff] %v11779_v29  ;;  %11812 = vst [vmem:[#allocation4 + $0x50] sm:$0xff] %v11780_v17  ;;  %v11787_v3 = vsel %vm22029_vm1, %v20813_v12, %v11755_v42  ;;  %v11788_v46 = vsel %vm22030_vm2, %v20815_v18, %v11756_v62  ;;  %vm22031_vm3 = vcmp.ge.f32.partialorder %v20817_v37, 0.0  ;;  %vm22032_vm4 = vcmp.ge.f32.partialorder %v20819_v47, 0.0 }
 0x4b7   :  { %11813 = vst [vmem:[#allocation4 + $0x58] sm:$0xff] %v11781_v53  ;;  %v11789_v61 = vsel %vm22031_vm3, %v20817_v37, %v11757_v38  ;;  %11814 = vst [vmem:[#allocation4 + $0x60] sm:$0xff] %v11782_v36  ;;  %v11790_v40 = vsel %vm22032_vm4, %v20819_v47, %v11758_v13  ;;  %vm22033_vm5 = vcmp.ge.f32.partialorder %v20821_v63, 0.0  ;;  %vm22034_vm6 = vcmp.ge.f32.partialorder %v20823_v28, 0.0  ;;  %v22036_v37 = vld [vmem:[#allocation133_spill] sm:$0xff] }
 0x4b8   :  { %11815 = vst [vmem:[#allocation4 + $0x68] sm:$0xff] %v11783_v2  ;;  %11816 = vst [vmem:[#allocation4 + $0x70] sm:$0xff] %v11784_v30  ;;  %v11791_v25 = vsel %vm22033_vm5, %v20821_v63, %v11759_v50  ;;  %v11792_v12 = vsel %vm22034_vm6, %v20823_v28, %v11760_v19  ;;  %vm22035_vm7 = vcmp.ge.f32.partialorder %v20825_v16, 0.0  ;;  %vm22037_vm12 = vcmp.ge.f32.partialorder %v22036_v37, 0.0 }
 0x4b9   :  { %11817 = vst [vmem:[#allocation4 + $0x78] sm:$0xff] %v11785_v24  ;;  %v11793_v18 = vsel %vm22035_vm7, %v20825_v16, %v11761_v8  ;;  %11818 = vst [vmem:[#allocation4 + $0x80] sm:$0xff] %v11786_v27  ;;  %v11794_v47 = vsel %vm22037_vm12, %v22036_v37, %v11762_v20  ;;  %vm22039_vm13 = vcmp.ge.f32.partialorder %v22038_v9, 0.0  ;;  %vm22040_vm14 = vcmp.ge.f32.partialorder %v20831_v39, 0.0 }
 0x4ba   :  { %11819 = vst [vmem:[#allocation4 + $0x88] sm:$0xff] %v11787_v3  ;;  %11820 = vst [vmem:[#allocation4 + $0x90] sm:$0xff] %v11788_v46  ;;  %v11795_v63 = vsel %vm22039_vm13, %v22038_v9, %v11763_v54  ;;  %v11796_v28 = vsel %vm22040_vm14, %v20831_v39, %v11764_v23  ;;  %vm22042_vm15 = vcmp.ge.f32.partialorder %v22041_v43, 0.0  ;;  %v11798_v4 = vsel %vm11733_vm8, %v22043_v51, %v11766_v6 }
 0x4bb   :  { %11821 = vst [vmem:[#allocation4 + $0x98] sm:$0xff] %v11789_v61  ;;  %v11797_v16 = vsel %vm22042_vm15, %v22041_v43, %v11765_v58  ;;  %11822 = vst [vmem:[#allocation4 + $0xa0] sm:$0xff] %v11790_v40  ;;  %v11799_v21 = vsel %vm11734_vm9, %v22044_v44, %v11767_v35  ;;  %v11800_v39 = vsel %vm11735_vm10, %v20839_v57, %v11768_v14 }
 0x4bc   :  { %11823 = vst [vmem:[#allocation4 + $0xa8] sm:$0xff] %v11791_v25  ;;  %11824 = vst [vmem:[#allocation4 + $0xb0] sm:$0xff] %v11792_v12  ;;  %v11801_v41 = vsel %vm11736_vm11, %v20841_v7, %v11769_v1 }
 0x4bd   :  { %11825 = vst [vmem:[#allocation4 + $0xb8] sm:$0xff] %v11793_v18  ;;  %11826 = vst [vmem:[#allocation4 + $0xc0] sm:$0xff] %v11794_v47 }
 0x4be   :  { %11827 = vst [vmem:[#allocation4 + $0xc8] sm:$0xff] %v11795_v63  ;;  %11828 = vst [vmem:[#allocation4 + $0xd0] sm:$0xff] %v11796_v28 }
 0x4bf   :  { %11829 = vst [vmem:[#allocation4 + $0xd8] sm:$0xff] %v11797_v16  ;;  %11830 = vst [vmem:[#allocation4 + $0xe0] sm:$0xff] %v11798_v4 }
 0x4c0   :  { %11831 = vst [vmem:[#allocation4 + $0xe8] sm:$0xff] %v11799_v21  ;;  %11832 = vst [vmem:[#allocation4 + $0xf0] sm:$0xff] %v11800_v39 }
 0x4c1   :  { %11833 = vst [vmem:[#allocation4 + $0xf8] sm:$0xff] %v11801_v41 }
 0x4c2   :  { %14440 = shalt.err (!%p14437_p4)
}
 0x4c3   :  { %s14453_s12 = smov 256   ;;  %s14454_s13 = smov 16  }
 0x4c4   :  { %11845 = dma.vmem_to_hbm [thread:$0]  %s21011_s4, 4096, %s21050_s5, [#allocation5], %s14453_s12, %s14453_s12, %s14454_s13  }
 0x4c5   :  { %14449 = dma.done.wait [#allocation5], 4096  }
 0x4c6   :  { %14450 = vsyncadd [#allocation5], 4294963200 }
 0x4c7   :  { %11849 = vsyncpa [#allocation5], 1 }

</bundles_post_ra>
